<compile_context>
chip_gen: v6e
topology: v6e:2x2x1
jax: 0.10.0
libtpu: 0.0.40
codegen_flags: <defaults>
</compile_context>

<pallas_src>
import functools
import math

import jax
import jax.numpy as jnp
from jax.experimental import pallas as pl
from jax.experimental.pallas import tpu as pltpu


def _round_up(x, m):
    return (x + m - 1) // m * m


def hgt_kernel(dst_ref, src_ref,
               wk_ref, bk_ref, wq_ref, bq_ref, wv_ref, bv_ref,
               wa_ref, ba_ref, alpha_ref,
               out_ref,
               q_scratch, m_scratch, l_scratch, acc_scratch,
               *, n_heads, d_k, n_src, tile_src, needs_mask):
    j = pl.program_id(1)
    n_src_tiles = pl.num_programs(1)

    # ---- first src tile of each dst tile: Q projection + online-softmax init ----
    @pl.when(j == 0)
    def _init():
        # wq already carries relation_pri / sqrt(d_k) per head (folded in wrapper).
        q = jnp.dot(dst_ref[...].astype(jnp.bfloat16), wq_ref[...],
                    preferred_element_type=jnp.float32) + bq_ref[...]
        q_scratch[...] = q
        m_scratch[...] = jnp.full_like(m_scratch, -jnp.inf)
        l_scratch[...] = jnp.zeros_like(l_scratch)
        acc_scratch[...] = jnp.zeros_like(acc_scratch)

    # K / V projections for the current src tile.  relation_att / relation_msg are
    # folded into wk/wv, so k and v are already the per-head "key"/"val" of the reference.
    src = src_ref[...]                                                 # bf16
    k = jnp.dot(src, wk_ref[...], preferred_element_type=jnp.float32) + bk_ref[...]
    v = jnp.dot(src, wv_ref[...], preferred_element_type=jnp.float32) + bv_ref[...]

    if needs_mask:
        col = jax.lax.broadcasted_iota(jnp.int32, (1, tile_src), 1) + j * tile_src
        mask_bias = jnp.where(col < n_src, 0.0, -1e30).astype(jnp.float32)

    for h in range(n_heads):                       # static unrolled loop over heads
        lo = h * d_k
        q_h = q_scratch[:, lo:lo + d_k].astype(jnp.bfloat16)           # (tile_dst, d_k)
        k_h = k[:, lo:lo + d_k].astype(jnp.bfloat16)                   # (tile_src, d_k)
        v_h = v[:, lo:lo + d_k].astype(jnp.bfloat16)                   # (tile_src, d_k)

        # (tile_dst, tile_src) logits; scaling already inside q_h.
        logits = jax.lax.dot_general(q_h, k_h, (((1,), (1,)), ((), ())),
                                     preferred_element_type=jnp.float32)
        if needs_mask:
            logits = logits + mask_bias

        m_prev = m_scratch[h]                                          # (tile_dst, 1)
        m_new = jnp.maximum(m_prev, jnp.max(logits, axis=-1, keepdims=True))
        a = jnp.exp(m_prev - m_new)
        p = jnp.exp(logits - m_new)
        l_scratch[h] = a * l_scratch[h] + jnp.sum(p, axis=-1, keepdims=True)
        acc_scratch[h] = a * acc_scratch[h] + jnp.dot(
            p.astype(jnp.bfloat16), v_h, preferred_element_type=jnp.float32)
        m_scratch[h] = m_new

    # ---- last src tile: normalize, project with a_linear (per-head row block), gate ----
    @pl.when(j == n_src_tiles - 1)
    def _finalize():
        proj = None
        for h in range(n_heads):
            inv_l = pl.reciprocal(l_scratch[h], approx=True)           # (tile_dst, 1)
            t_h = acc_scratch[h] * inv_l                               # (tile_dst, d_k)
            d = jnp.dot(t_h, wa_ref[h * d_k:(h + 1) * d_k, :],
                        preferred_element_type=jnp.float32)            # (tile_dst, out_pad)
            proj = d if proj is None else proj + d
        alpha = alpha_ref[0, 0]
        # TODO(synk): nn.Dropout (eval-mode identity) and LayerNorm (use_norm=False) skipped.
        out_ref[...] = (proj + ba_ref[...]) * alpha + dst_ref[...] * (1.0 - alpha)


def hgt_forward(src_h, dst_h, params, *, n_heads, tile_dst=128, tile_src=128):
    n_src, in_dim = src_h.shape
    n_dst, in_dim_d = dst_h.shape
    out_dim = params["wk"].shape[1]
    assert in_dim == in_dim_d
    assert out_dim % n_heads == 0, "out_dim must be divisible by n_heads"
    assert in_dim == out_dim, "HGT gated skip requires in_dim == out_dim"
    d_k = out_dim // n_heads
    sqrt_dk = math.sqrt(d_k)

    # ---- wrapper-side algebra: fold relation matrices / priors into projections ----
    ratt, rmsg, rpri = params["ratt"], params["rmsg"], params["rpri"]
    wk3 = params["wk"].reshape(in_dim, n_heads, d_k)
    wv3 = params["wv"].reshape(in_dim, n_heads, d_k)
    wq3 = params["wq"].reshape(in_dim, n_heads, d_k)
    bk3 = params["bk"].reshape(n_heads, d_k)
    bv3 = params["bv"].reshape(n_heads, d_k)
    bq3 = params["bq"].reshape(n_heads, d_k)

    wk_eff = jnp.einsum("ihd,hde->ihe", wk3, ratt).reshape(in_dim, out_dim)
    wv_eff = jnp.einsum("ihd,hde->ihe", wv3, rmsg).reshape(in_dim, out_dim)
    bk_eff = jnp.einsum("hd,hde->he", bk3, ratt).reshape(1, out_dim)
    bv_eff = jnp.einsum("hd,hde->he", bv3, rmsg).reshape(1, out_dim)
    scale = (rpri / sqrt_dk)[None, :, None]
    wq_eff = (wq3 * scale).reshape(in_dim, out_dim)
    bq_eff = (bq3 * scale[0]).reshape(1, out_dim)
    alpha = jax.nn.sigmoid(params["skip"]).reshape(1, 1).astype(jnp.float32)

    # ---- padding: lane-dense features/output, tile-multiple node counts ----
    feat_pad = _round_up(in_dim, 128)
    out_pad = _round_up(out_dim, 128)
    n_dst_pad = _round_up(n_dst, tile_dst)
    n_src_pad = _round_up(n_src, tile_src)

    def pad2(x, r, c):
        return jnp.pad(x, ((0, r - x.shape[0]), (0, c - x.shape[1])))

    src_p = pad2(src_h, n_src_pad, feat_pad).astype(jnp.bfloat16)
    dst_p = pad2(dst_h, n_dst_pad, feat_pad).astype(jnp.float32)   # kept f32 (exact skip)
    wk_p = pad2(wk_eff, feat_pad, out_dim).astype(jnp.bfloat16)
    wq_p = pad2(wq_eff, feat_pad, out_dim).astype(jnp.bfloat16)
    wv_p = pad2(wv_eff, feat_pad, out_dim).astype(jnp.bfloat16)
    wa_p = pad2(params["wa"], out_dim, out_pad).astype(jnp.float32)
    bk_p = bk_eff.astype(jnp.float32)
    bq_p = bq_eff.astype(jnp.float32)
    bv_p = bv_eff.astype(jnp.float32)
    ba_p = pad2(params["ba"], 1, out_pad).astype(jnp.float32)

    grid = (n_dst_pad // tile_dst, n_src_pad // tile_src)
    needs_mask = (n_src_pad != n_src)

    kernel = functools.partial(hgt_kernel, n_heads=n_heads, d_k=d_k,
                               n_src=n_src, tile_src=tile_src, needs_mask=needs_mask)

    def const(i, j):
        return (0, 0)

    grid_spec = pltpu.PrefetchScalarGridSpec(
        num_scalar_prefetch=0,
        grid=grid,
        in_specs=[
            pl.BlockSpec((tile_dst, feat_pad), lambda i, j: (i, 0)),   # dst_h
            pl.BlockSpec((tile_src, feat_pad), lambda i, j: (j, 0)),   # src_h
            pl.BlockSpec((feat_pad, out_dim), const),                  # wk (ratt folded)
            pl.BlockSpec((1, out_dim), const),                         # bk
            pl.BlockSpec((feat_pad, out_dim), const),                  # wq (pri folded)
            pl.BlockSpec((1, out_dim), const),                         # bq
            pl.BlockSpec((feat_pad, out_dim), const),                  # wv (rmsg folded)
            pl.BlockSpec((1, out_dim), const),                         # bv
            pl.BlockSpec((out_dim, out_pad), const),                   # wa
            pl.BlockSpec((1, out_pad), const),                         # ba
            pl.BlockSpec((1, 1), const, memory_space=pltpu.MemorySpace.SMEM),  # alpha
        ],
        out_specs=pl.BlockSpec((tile_dst, out_pad), lambda i, j: (i, 0)),
        scratch_shapes=[
            pltpu.VMEM((tile_dst, out_dim), jnp.float32),              # q (resident per dst tile)
            pltpu.VMEM((n_heads, tile_dst, 1), jnp.float32),           # m (running max)
            pltpu.VMEM((n_heads, tile_dst, 1), jnp.float32),           # l (running denom)
            pltpu.VMEM((n_heads, tile_dst, d_k), jnp.float32),         # acc (per-head)
        ],
    )

    flops = (2 * n_src_pad * feat_pad * out_dim * 2        # k, v projections
             + 2 * n_dst_pad * feat_pad * out_dim          # q projection
             + 4 * n_dst_pad * n_src_pad * out_dim         # qk + pv over all heads
             + 2 * n_dst_pad * out_dim * out_pad)          # a_linear
    cost = pl.CostEstimate(
        flops=flops,
        transcendentals=n_dst_pad * n_src_pad * n_heads,
        bytes_accessed=(src_p.size * 2 + dst_p.size * 4
                        + (wk_p.size + wq_p.size + wv_p.size) * 2
                        + wa_p.size * 4 + n_dst_pad * out_pad * 4))

    out = pl.pallas_call(
        kernel,
        out_shape=jax.ShapeDtypeStruct((n_dst_pad, out_pad), jnp.float32),
        grid_spec=grid_spec,
        compiler_params=pltpu.CompilerParams(
            dimension_semantics=("parallel", "arbitrary"),
            vmem_limit_bytes=32 * 1024 * 1024),
        cost_estimate=cost,
    )(dst_p, src_p, wk_p, bk_p, wq_p, bq_p, wv_p, bv_p, wa_p, ba_p, alpha)

    return out[:n_dst, :out_dim]


def hgt_reference(src_h, dst_h, params, *, n_heads):
    """Pure-JAX f32 reference mirroring the PyTorch HGTLayer forward."""
    out_dim = params["wk"].shape[1]
    d_k = out_dim // n_heads
    sqrt_dk = math.sqrt(d_k)
    n_src, n_dst = src_h.shape[0], dst_h.shape[0]

    k = (src_h @ params["wk"] + params["bk"]).reshape(n_src, n_heads, d_k)
    v = (src_h @ params["wv"] + params["bv"]).reshape(n_src, n_heads, d_k)
    q = (dst_h @ params["wq"] + params["bq"]).reshape(n_dst, n_heads, d_k)

    key = jnp.einsum("shd,hde->she", k, params["ratt"])
    val = jnp.einsum("shd,hde->she", v, params["rmsg"])
    att = jnp.einsum("qhd,shd->qsh", q, key) * params["rpri"] / sqrt_dk
    att = jax.nn.softmax(att, axis=1)                    # over incoming edges (src)
    t = jnp.einsum("qsh,shd->qhd", att, val).reshape(n_dst, out_dim)

    trans = t @ params["wa"] + params["ba"]
    alpha = jax.nn.sigmoid(params["skip"][0, 0])
    return trans * alpha + dst_h * (1.0 - alpha)


def init_params(key, in_dim, out_dim, n_heads):
    d_k = out_dim // n_heads
    ks = jax.random.split(key, 8)

    def xavier(k, shape, fan_in, fan_out):
        bound = math.sqrt(6.0 / (fan_in + fan_out))
        return jax.random.uniform(k, shape, jnp.float32, -bound, bound)

    return {
        # Linear weights pre-transposed: (in, out)
        "wk": xavier(ks[0], (in_dim, out_dim), in_dim, out_dim),
        "wq": xavier(ks[1], (in_dim, out_dim), in_dim, out_dim),
        "wv": xavier(ks[2], (in_dim, out_dim), in_dim, out_dim),
        "wa": xavier(ks[3], (out_dim, out_dim), out_dim, out_dim),
        "bk": jnp.zeros((1, out_dim), jnp.float32),
        "bq": jnp.full((1, out_dim), 0.01, jnp.float32),
        "bv": jnp.full((1, out_dim), -0.01, jnp.float32),
        "ba": jnp.zeros((1, out_dim), jnp.float32),
        # relation params for the single etype (etype index 0 already selected)
        "ratt": xavier(ks[4], (n_heads, d_k, d_k), d_k, d_k),
        "rmsg": xavier(ks[5], (n_heads, d_k, d_k), d_k, d_k),
        "rpri": jnp.ones((n_heads,), jnp.float32),
        "skip": jnp.ones((1, 1), jnp.float32),
    }


if __name__ == "__main__":
    in_dim = 64
    out_dim = 64
    n_heads = 4
    n_src = 320      # not a tile multiple -> exercises padded-src masking
    n_dst = 200      # not a tile multiple -> exercises dst padding / 2 dst tiles

    key = jax.random.PRNGKey(0)
    k_src, k_dst, k_par = jax.random.split(key, 3)
    src_h = jax.random.normal(k_src, (n_src, in_dim), jnp.float32)
    dst_h = jax.random.normal(k_dst, (n_dst, in_dim), jnp.float32)
    params = init_params(k_par, in_dim, out_dim, n_heads)

    out = jax.block_until_ready(hgt_forward(src_h, dst_h, params, n_heads=n_heads))
    ref = jax.block_until_ready(hgt_reference(src_h, dst_h, params, n_heads=n_heads))

    assert out.shape == (n_dst, out_dim)
    err = jnp.max(jnp.abs(out - ref))
    # bf16 MXU operands with f32 accumulation vs pure-f32 reference.
    assert jnp.allclose(out, ref, atol=5e-2, rtol=5e-2), f"max abs err {err}"
    print("KERNEL_OK")
</pallas_src>

<mosaic_0001>
module attributes {stable_mosaic.version = 11 : i64} {
  func.func @hgt_kernel(%arg0: i32, %arg1: i32, %arg2: memref<128x128xf32, #tpu.memory_space<vmem>>, %arg3: memref<128x128xbf16, #tpu.memory_space<vmem>>, %arg4: memref<128x64xbf16, #tpu.memory_space<vmem>>, %arg5: memref<1x64xf32, #tpu.memory_space<vmem>>, %arg6: memref<128x64xbf16, #tpu.memory_space<vmem>>, %arg7: memref<1x64xf32, #tpu.memory_space<vmem>>, %arg8: memref<128x64xbf16, #tpu.memory_space<vmem>>, %arg9: memref<1x64xf32, #tpu.memory_space<vmem>>, %arg10: memref<64x128xf32, #tpu.memory_space<vmem>>, %arg11: memref<1x128xf32, #tpu.memory_space<vmem>>, %arg12: memref<1x1xf32, #tpu.memory_space<smem>>, %arg13: memref<128x128xf32, #tpu.memory_space<vmem>>, %arg14: memref<128x64xf32, #tpu.memory_space<vmem>>, %arg15: memref<4x128x1xf32, #tpu.memory_space<vmem>>, %arg16: memref<4x128x1xf32, #tpu.memory_space<vmem>>, %arg17: memref<4x128x16xf32, #tpu.memory_space<vmem>>) attributes {dimension_semantics = [#tpu.dimension_semantics<parallel>, #tpu.dimension_semantics<arbitrary>], iteration_bounds = array<i64: 2, 3>, scalar_prefetch = 0 : i64, scratch_operands = 4 : i64, tpu.core_type = #tpu.core_type<tc>, window_params = [{transform_indices = @transform_0, window_bounds = array<i64: 128, 128>}, {transform_indices = @transform_1, window_bounds = array<i64: 128, 128>}, {pipeline_mode = #tpu.pipeline_mode<synchronous>, transform_indices = @transform_2, window_bounds = array<i64: 128, 64>}, {pipeline_mode = #tpu.pipeline_mode<synchronous>, transform_indices = @transform_3, window_bounds = array<i64: 1, 64>}, {pipeline_mode = #tpu.pipeline_mode<synchronous>, transform_indices = @transform_4, window_bounds = array<i64: 128, 64>}, {pipeline_mode = #tpu.pipeline_mode<synchronous>, transform_indices = @transform_5, window_bounds = array<i64: 1, 64>}, {pipeline_mode = #tpu.pipeline_mode<synchronous>, transform_indices = @transform_6, window_bounds = array<i64: 128, 64>}, {pipeline_mode = #tpu.pipeline_mode<synchronous>, transform_indices = @transform_7, window_bounds = array<i64: 1, 64>}, {pipeline_mode = #tpu.pipeline_mode<synchronous>, transform_indices = @transform_8, window_bounds = array<i64: 64, 128>}, {pipeline_mode = #tpu.pipeline_mode<synchronous>, transform_indices = @transform_9, window_bounds = array<i64: 1, 128>}, {transform_indices = @transform_10, window_bounds = array<i64: 1, 1>}, {transform_indices = @transform_11, window_bounds = array<i64: 128, 128>}]} {
    %c0_i32 = arith.constant 0 : i32
    %0 = arith.cmpi eq, %arg1, %c0_i32 : i32
    %1 = arith.extui %0 : i1 to i32
    %c0_i32_0 = arith.constant 0 : i32
    %2 = arith.cmpi ne, %1, %c0_i32_0 : i32
    scf.if %2 {
      %c0_104 = arith.constant 0 : index
      %c0_105 = arith.constant 0 : index
      %190 = vector.load %arg2[%c0_104, %c0_105] : memref<128x128xf32, #tpu.memory_space<vmem>>, vector<128x128xf32>
      %191 = arith.truncf %190 : vector<128x128xf32> to vector<128x128xbf16>
      %c0_106 = arith.constant 0 : index
      %c0_107 = arith.constant 0 : index
      %192 = vector.load %arg6[%c0_106, %c0_107] : memref<128x64xbf16, #tpu.memory_space<vmem>>, vector<128x64xbf16>
      %cst_108 = arith.constant dense<0.000000e+00> : vector<128x64xf32>
      %193 = tpu.matmul %191, %192, %cst_108 {dimension_numbers = #tpu.dot_dimension_numbers<[1], [0], [0], [1], [0, 0, 1, 1], [], []>} : vector<128x128xbf16>, vector<128x64xbf16>, vector<128x64xf32> -> vector<128x64xf32>
      %c0_109 = arith.constant 0 : index
      %c0_110 = arith.constant 0 : index
      %194 = vector.load %arg7[%c0_109, %c0_110] : memref<1x64xf32, #tpu.memory_space<vmem>>, vector<1x64xf32>
      %195 = vector.broadcast %194 : vector<1x64xf32> to vector<128x64xf32>
      %196 = arith.addf %193, %195 : vector<128x64xf32>
      %c0_111 = arith.constant 0 : index
      %c0_112 = arith.constant 0 : index
      %197 = vector.load %arg14[%c0_111, %c0_112] : memref<128x64xf32, #tpu.memory_space<vmem>>, vector<128x64xf32>
      tpu.vector_store %arg14[%c0_111, %c0_112], %196 {strides = array<i32>} : memref<128x64xf32, #tpu.memory_space<vmem>>, vector<128x64xf32>,
      %cst_113 = arith.constant 0xFF800000 : f32
      %198 = vector.broadcast %cst_113 : f32 to vector<4x128x1xf32>
      %c0_114 = arith.constant 0 : index
      %c0_115 = arith.constant 0 : index
      %c0_116 = arith.constant 0 : index
      %199 = vector.load %arg15[%c0_114, %c0_115, %c0_116] : memref<4x128x1xf32, #tpu.memory_space<vmem>>, vector<4x128x1xf32>
      tpu.vector_store %arg15[%c0_114, %c0_115, %c0_116], %198 {strides = array<i32>} : memref<4x128x1xf32, #tpu.memory_space<vmem>>, vector<4x128x1xf32>,
      %cst_117 = arith.constant 0.000000e+00 : f32
      %200 = vector.broadcast %cst_117 : f32 to vector<4x128x1xf32>
      %c0_118 = arith.constant 0 : index
      %c0_119 = arith.constant 0 : index
      %c0_120 = arith.constant 0 : index
      %201 = vector.load %arg16[%c0_118, %c0_119, %c0_120] : memref<4x128x1xf32, #tpu.memory_space<vmem>>, vector<4x128x1xf32>
      tpu.vector_store %arg16[%c0_118, %c0_119, %c0_120], %200 {strides = array<i32>} : memref<4x128x1xf32, #tpu.memory_space<vmem>>, vector<4x128x1xf32>,
      %cst_121 = arith.constant 0.000000e+00 : f32
      %202 = vector.broadcast %cst_121 : f32 to vector<4x128x16xf32>
      %c0_122 = arith.constant 0 : index
      %c0_123 = arith.constant 0 : index
      %c0_124 = arith.constant 0 : index
      %203 = vector.load %arg17[%c0_122, %c0_123, %c0_124] : memref<4x128x16xf32, #tpu.memory_space<vmem>>, vector<4x128x16xf32>
      tpu.vector_store %arg17[%c0_122, %c0_123, %c0_124], %202 {strides = array<i32>} : memref<4x128x16xf32, #tpu.memory_space<vmem>>, vector<4x128x16xf32>,
    } else {
    }
    %c0 = arith.constant 0 : index
    %c0_1 = arith.constant 0 : index
    %3 = vector.load %arg3[%c0, %c0_1] : memref<128x128xbf16, #tpu.memory_space<vmem>>, vector<128x128xbf16>
    %c0_2 = arith.constant 0 : index
    %c0_3 = arith.constant 0 : index
    %4 = vector.load %arg4[%c0_2, %c0_3] : memref<128x64xbf16, #tpu.memory_space<vmem>>, vector<128x64xbf16>
    %cst = arith.constant dense<0.000000e+00> : vector<128x64xf32>
    %5 = tpu.matmul %3, %4, %cst {dimension_numbers = #tpu.dot_dimension_numbers<[1], [0], [0], [1], [0, 0, 1, 1], [], []>} : vector<128x128xbf16>, vector<128x64xbf16>, vector<128x64xf32> -> vector<128x64xf32>
    %c0_4 = arith.constant 0 : index
    %c0_5 = arith.constant 0 : index
    %6 = vector.load %arg5[%c0_4, %c0_5] : memref<1x64xf32, #tpu.memory_space<vmem>>, vector<1x64xf32>
    %7 = vector.broadcast %6 : vector<1x64xf32> to vector<128x64xf32>
    %8 = arith.addf %5, %7 : vector<128x64xf32>
    %c0_6 = arith.constant 0 : index
    %c0_7 = arith.constant 0 : index
    %9 = vector.load %arg8[%c0_6, %c0_7] : memref<128x64xbf16, #tpu.memory_space<vmem>>, vector<128x64xbf16>
    %cst_8 = arith.constant dense<0.000000e+00> : vector<128x64xf32>
    %10 = tpu.matmul %3, %9, %cst_8 {dimension_numbers = #tpu.dot_dimension_numbers<[1], [0], [0], [1], [0, 0, 1, 1], [], []>} : vector<128x128xbf16>, vector<128x64xbf16>, vector<128x64xf32> -> vector<128x64xf32>
    %c0_9 = arith.constant 0 : index
    %c0_10 = arith.constant 0 : index
    %11 = vector.load %arg9[%c0_9, %c0_10] : memref<1x64xf32, #tpu.memory_space<vmem>>, vector<1x64xf32>
    %12 = vector.broadcast %11 : vector<1x64xf32> to vector<128x64xf32>
    %13 = arith.addf %10, %12 : vector<128x64xf32>
    %14 = tpu.iota {dimensions = array<i32: 1>} : vector<1x128xi32>
    %c128_i32 = arith.constant 128 : i32
    %15 = arith.muli %arg1, %c128_i32 : i32
    %16 = vector.broadcast %15 : i32 to vector<1x128xi32>
    %17 = arith.addi %14, %16 : vector<1x128xi32>
    %c320_i32 = arith.constant 320 : i32
    %18 = vector.broadcast %c320_i32 : i32 to vector<1x128xi32>
    %19 = arith.cmpi slt, %17, %18 : vector<1x128xi32>
    %cst_11 = arith.constant 0.000000e+00 : f32
    %cst_12 = arith.constant -1.000000e+30 : f32
    %20 = vector.broadcast %cst_11 : f32 to vector<1x128xf32>
    %21 = vector.broadcast %cst_12 : f32 to vector<1x128xf32>
    %22 = arith.select %19, %20, %21 : vector<1x128xi1>, vector<1x128xf32>
    %c0_13 = arith.constant 0 : index
    %c0_14 = arith.constant 0 : index
    %23 = vector.load %arg14[%c0_13, %c0_14] : memref<128x64xf32, #tpu.memory_space<vmem>>, vector<128x16xf32>
    %24 = arith.truncf %23 : vector<128x16xf32> to vector<128x16xbf16>
    %25 = vector.extract_strided_slice %8 {offsets = [0, 0], sizes = [128, 16], strides = [1, 1]} : vector<128x64xf32> to vector<128x16xf32>
    %26 = arith.truncf %25 : vector<128x16xf32> to vector<128x16xbf16>
    %27 = vector.extract_strided_slice %13 {offsets = [0, 0], sizes = [128, 16], strides = [1, 1]} : vector<128x64xf32> to vector<128x16xf32>
    %28 = arith.truncf %27 : vector<128x16xf32> to vector<128x16xbf16>
    %cst_15 = arith.constant dense<0.000000e+00> : vector<128x128xf32>
    %29 = tpu.matmul %24, %26, %cst_15 {dimension_numbers = #tpu.dot_dimension_numbers<[1], [1], [0], [0], [0, 0, 1, 0], [], []>} : vector<128x16xbf16>, vector<128x16xbf16>, vector<128x128xf32> -> vector<128x128xf32>
    %30 = vector.broadcast %22 : vector<1x128xf32> to vector<128x128xf32>
    %31 = arith.addf %29, %30 : vector<128x128xf32>
    %c0_16 = arith.constant 0 : index
    %c0_17 = arith.constant 0 : index
    %c0_18 = arith.constant 0 : index
    %32 = vector.load %arg15[%c0_16, %c0_17, %c0_18] : memref<4x128x1xf32, #tpu.memory_space<vmem>>, vector<1x128x1xf32>
    %33 = vector.shape_cast %32 : vector<1x128x1xf32> to vector<128x1xf32>
    %cst_19 = arith.constant dense<0xFF800000> : vector<128xf32>
    %34 = vector.multi_reduction <maximumf>, %31, %cst_19 [1] : vector<128x128xf32> to vector<128xf32>
    %35 = vector.shape_cast %34 : vector<128xf32> to vector<128x1xf32>
    %36 = arith.maximumf %33, %35 : vector<128x1xf32>
    %37 = arith.subf %33, %36 : vector<128x1xf32>
    %38 = math.exp %37 : vector<128x1xf32>
    %39 = vector.broadcast %36 : vector<128x1xf32> to vector<128x128xf32>
    %40 = arith.subf %31, %39 : vector<128x128xf32>
    %41 = math.exp %40 : vector<128x128xf32>
    %c0_20 = arith.constant 0 : index
    %c0_21 = arith.constant 0 : index
    %c0_22 = arith.constant 0 : index
    %42 = vector.load %arg16[%c0_20, %c0_21, %c0_22] : memref<4x128x1xf32, #tpu.memory_space<vmem>>, vector<1x128x1xf32>
    %43 = vector.shape_cast %42 : vector<1x128x1xf32> to vector<128x1xf32>
    %44 = arith.mulf %38, %43 : vector<128x1xf32>
    %cst_23 = arith.constant dense<0.000000e+00> : vector<128xf32>
    %45 = vector.multi_reduction <add>, %41, %cst_23 [1] : vector<128x128xf32> to vector<128xf32>
    %46 = vector.shape_cast %45 : vector<128xf32> to vector<128x1xf32>
    %47 = arith.addf %44, %46 : vector<128x1xf32>
    %c0_24 = arith.constant 0 : index
    %c0_25 = arith.constant 0 : index
    %c0_26 = arith.constant 0 : index
    %48 = vector.load %arg16[%c0_24, %c0_25, %c0_26] : memref<4x128x1xf32, #tpu.memory_space<vmem>>, vector<1x128x1xf32>
    %49 = vector.shape_cast %48 : vector<1x128x1xf32> to vector<128x1xf32>
    %50 = vector.shape_cast %47 : vector<128x1xf32> to vector<1x128x1xf32>
    tpu.vector_store %arg16[%c0_24, %c0_25, %c0_26], %50 {strides = array<i32>} : memref<4x128x1xf32, #tpu.memory_space<vmem>>, vector<1x128x1xf32>,
    %c0_27 = arith.constant 0 : index
    %c0_28 = arith.constant 0 : index
    %c0_29 = arith.constant 0 : index
    %51 = vector.load %arg17[%c0_27, %c0_28, %c0_29] : memref<4x128x16xf32, #tpu.memory_space<vmem>>, vector<1x128x16xf32>
    %52 = vector.shape_cast %51 : vector<1x128x16xf32> to vector<128x16xf32>
    %53 = vector.broadcast %38 : vector<128x1xf32> to vector<128x16xf32>
    %54 = arith.mulf %53, %52 : vector<128x16xf32>
    %55 = arith.truncf %41 : vector<128x128xf32> to vector<128x128xbf16>
    %cst_30 = arith.constant dense<0.000000e+00> : vector<128x16xf32>
    %56 = tpu.matmul %55, %28, %cst_30 {dimension_numbers = #tpu.dot_dimension_numbers<[1], [0], [0], [1], [0, 0, 1, 1], [], []>} : vector<128x128xbf16>, vector<128x16xbf16>, vector<128x16xf32> -> vector<128x16xf32>
    %57 = arith.addf %54, %56 : vector<128x16xf32>
    %c0_31 = arith.constant 0 : index
    %c0_32 = arith.constant 0 : index
    %c0_33 = arith.constant 0 : index
    %58 = vector.load %arg17[%c0_31, %c0_32, %c0_33] : memref<4x128x16xf32, #tpu.memory_space<vmem>>, vector<1x128x16xf32>
    %59 = vector.shape_cast %58 : vector<1x128x16xf32> to vector<128x16xf32>
    %60 = vector.shape_cast %57 : vector<128x16xf32> to vector<1x128x16xf32>
    tpu.vector_store %arg17[%c0_31, %c0_32, %c0_33], %60 {strides = array<i32>} : memref<4x128x16xf32, #tpu.memory_space<vmem>>, vector<1x128x16xf32>,
    %c0_34 = arith.constant 0 : index
    %c0_35 = arith.constant 0 : index
    %c0_36 = arith.constant 0 : index
    %61 = vector.load %arg15[%c0_34, %c0_35, %c0_36] : memref<4x128x1xf32, #tpu.memory_space<vmem>>, vector<1x128x1xf32>
    %62 = vector.shape_cast %61 : vector<1x128x1xf32> to vector<128x1xf32>
    %63 = vector.shape_cast %36 : vector<128x1xf32> to vector<1x128x1xf32>
    tpu.vector_store %arg15[%c0_34, %c0_35, %c0_36], %63 {strides = array<i32>} : memref<4x128x1xf32, #tpu.memory_space<vmem>>, vector<1x128x1xf32>,
    %c0_37 = arith.constant 0 : index
    %c16 = arith.constant 16 : index
    %64 = vector.load %arg14[%c0_37, %c16] : memref<128x64xf32, #tpu.memory_space<vmem>>, vector<128x16xf32>
    %65 = arith.truncf %64 : vector<128x16xf32> to vector<128x16xbf16>
    %66 = vector.extract_strided_slice %8 {offsets = [0, 16], sizes = [128, 16], strides = [1, 1]} : vector<128x64xf32> to vector<128x16xf32>
    %67 = arith.truncf %66 : vector<128x16xf32> to vector<128x16xbf16>
    %68 = vector.extract_strided_slice %13 {offsets = [0, 16], sizes = [128, 16], strides = [1, 1]} : vector<128x64xf32> to vector<128x16xf32>
    %69 = arith.truncf %68 : vector<128x16xf32> to vector<128x16xbf16>
    %cst_38 = arith.constant dense<0.000000e+00> : vector<128x128xf32>
    %70 = tpu.matmul %65, %67, %cst_38 {dimension_numbers = #tpu.dot_dimension_numbers<[1], [1], [0], [0], [0, 0, 1, 0], [], []>} : vector<128x16xbf16>, vector<128x16xbf16>, vector<128x128xf32> -> vector<128x128xf32>
    %71 = vector.broadcast %22 : vector<1x128xf32> to vector<128x128xf32>
    %72 = arith.addf %70, %71 : vector<128x128xf32>
    %c1 = arith.constant 1 : index
    %c0_39 = arith.constant 0 : index
    %c0_40 = arith.constant 0 : index
    %73 = vector.load %arg15[%c1, %c0_39, %c0_40] : memref<4x128x1xf32, #tpu.memory_space<vmem>>, vector<1x128x1xf32>
    %74 = vector.shape_cast %73 : vector<1x128x1xf32> to vector<128x1xf32>
    %cst_41 = arith.constant dense<0xFF800000> : vector<128xf32>
    %75 = vector.multi_reduction <maximumf>, %72, %cst_41 [1] : vector<128x128xf32> to vector<128xf32>
    %76 = vector.shape_cast %75 : vector<128xf32> to vector<128x1xf32>
    %77 = arith.maximumf %74, %76 : vector<128x1xf32>
    %78 = arith.subf %74, %77 : vector<128x1xf32>
    %79 = math.exp %78 : vector<128x1xf32>
    %80 = vector.broadcast %77 : vector<128x1xf32> to vector<128x128xf32>
    %81 = arith.subf %72, %80 : vector<128x128xf32>
    %82 = math.exp %81 : vector<128x128xf32>
    %c1_42 = arith.constant 1 : index
    %c0_43 = arith.constant 0 : index
    %c0_44 = arith.constant 0 : index
    %83 = vector.load %arg16[%c1_42, %c0_43, %c0_44] : memref<4x128x1xf32, #tpu.memory_space<vmem>>, vector<1x128x1xf32>
    %84 = vector.shape_cast %83 : vector<1x128x1xf32> to vector<128x1xf32>
    %85 = arith.mulf %79, %84 : vector<128x1xf32>
    %cst_45 = arith.constant dense<0.000000e+00> : vector<128xf32>
    %86 = vector.multi_reduction <add>, %82, %cst_45 [1] : vector<128x128xf32> to vector<128xf32>
    %87 = vector.shape_cast %86 : vector<128xf32> to vector<128x1xf32>
    %88 = arith.addf %85, %87 : vector<128x1xf32>
    %c1_46 = arith.constant 1 : index
    %c0_47 = arith.constant 0 : index
    %c0_48 = arith.constant 0 : index
    %89 = vector.load %arg16[%c1_46, %c0_47, %c0_48] : memref<4x128x1xf32, #tpu.memory_space<vmem>>, vector<1x128x1xf32>
    %90 = vector.shape_cast %89 : vector<1x128x1xf32> to vector<128x1xf32>
    %91 = vector.shape_cast %88 : vector<128x1xf32> to vector<1x128x1xf32>
    tpu.vector_store %arg16[%c1_46, %c0_47, %c0_48], %91 {strides = array<i32>} : memref<4x128x1xf32, #tpu.memory_space<vmem>>, vector<1x128x1xf32>,
    %c1_49 = arith.constant 1 : index
    %c0_50 = arith.constant 0 : index
    %c0_51 = arith.constant 0 : index
    %92 = vector.load %arg17[%c1_49, %c0_50, %c0_51] : memref<4x128x16xf32, #tpu.memory_space<vmem>>, vector<1x128x16xf32>
    %93 = vector.shape_cast %92 : vector<1x128x16xf32> to vector<128x16xf32>
    %94 = vector.broadcast %79 : vector<128x1xf32> to vector<128x16xf32>
    %95 = arith.mulf %94, %93 : vector<128x16xf32>
    %96 = arith.truncf %82 : vector<128x128xf32> to vector<128x128xbf16>
    %cst_52 = arith.constant dense<0.000000e+00> : vector<128x16xf32>
    %97 = tpu.matmul %96, %69, %cst_52 {dimension_numbers = #tpu.dot_dimension_numbers<[1], [0], [0], [1], [0, 0, 1, 1], [], []>} : vector<128x128xbf16>, vector<128x16xbf16>, vector<128x16xf32> -> vector<128x16xf32>
    %98 = arith.addf %95, %97 : vector<128x16xf32>
    %c1_53 = arith.constant 1 : index
    %c0_54 = arith.constant 0 : index
    %c0_55 = arith.constant 0 : index
    %99 = vector.load %arg17[%c1_53, %c0_54, %c0_55] : memref<4x128x16xf32, #tpu.memory_space<vmem>>, vector<1x128x16xf32>
    %100 = vector.shape_cast %99 : vector<1x128x16xf32> to vector<128x16xf32>
    %101 = vector.shape_cast %98 : vector<128x16xf32> to vector<1x128x16xf32>
    tpu.vector_store %arg17[%c1_53, %c0_54, %c0_55], %101 {strides = array<i32>} : memref<4x128x16xf32, #tpu.memory_space<vmem>>, vector<1x128x16xf32>,
    %c1_56 = arith.constant 1 : index
    %c0_57 = arith.constant 0 : index
    %c0_58 = arith.constant 0 : index
    %102 = vector.load %arg15[%c1_56, %c0_57, %c0_58] : memref<4x128x1xf32, #tpu.memory_space<vmem>>, vector<1x128x1xf32>
    %103 = vector.shape_cast %102 : vector<1x128x1xf32> to vector<128x1xf32>
    %104 = vector.shape_cast %77 : vector<128x1xf32> to vector<1x128x1xf32>
    tpu.vector_store %arg15[%c1_56, %c0_57, %c0_58], %104 {strides = array<i32>} : memref<4x128x1xf32, #tpu.memory_space<vmem>>, vector<1x128x1xf32>,
    %c0_59 = arith.constant 0 : index
    %c32 = arith.constant 32 : index
    %105 = vector.load %arg14[%c0_59, %c32] : memref<128x64xf32, #tpu.memory_space<vmem>>, vector<128x16xf32>
    %106 = arith.truncf %105 : vector<128x16xf32> to vector<128x16xbf16>
    %107 = vector.extract_strided_slice %8 {offsets = [0, 32], sizes = [128, 16], strides = [1, 1]} : vector<128x64xf32> to vector<128x16xf32>
    %108 = arith.truncf %107 : vector<128x16xf32> to vector<128x16xbf16>
    %109 = vector.extract_strided_slice %13 {offsets = [0, 32], sizes = [128, 16], strides = [1, 1]} : vector<128x64xf32> to vector<128x16xf32>
    %110 = arith.truncf %109 : vector<128x16xf32> to vector<128x16xbf16>
    %cst_60 = arith.constant dense<0.000000e+00> : vector<128x128xf32>
    %111 = tpu.matmul %106, %108, %cst_60 {dimension_numbers = #tpu.dot_dimension_numbers<[1], [1], [0], [0], [0, 0, 1, 0], [], []>} : vector<128x16xbf16>, vector<128x16xbf16>, vector<128x128xf32> -> vector<128x128xf32>
    %112 = vector.broadcast %22 : vector<1x128xf32> to vector<128x128xf32>
    %113 = arith.addf %111, %112 : vector<128x128xf32>
    %c2 = arith.constant 2 : index
    %c0_61 = arith.constant 0 : index
    %c0_62 = arith.constant 0 : index
    %114 = vector.load %arg15[%c2, %c0_61, %c0_62] : memref<4x128x1xf32, #tpu.memory_space<vmem>>, vector<1x128x1xf32>
    %115 = vector.shape_cast %114 : vector<1x128x1xf32> to vector<128x1xf32>
    %cst_63 = arith.constant dense<0xFF800000> : vector<128xf32>
    %116 = vector.multi_reduction <maximumf>, %113, %cst_63 [1] : vector<128x128xf32> to vector<128xf32>
    %117 = vector.shape_cast %116 : vector<128xf32> to vector<128x1xf32>
    %118 = arith.maximumf %115, %117 : vector<128x1xf32>
    %119 = arith.subf %115, %118 : vector<128x1xf32>
    %120 = math.exp %119 : vector<128x1xf32>
    %121 = vector.broadcast %118 : vector<128x1xf32> to vector<128x128xf32>
    %122 = arith.subf %113, %121 : vector<128x128xf32>
    %123 = math.exp %122 : vector<128x128xf32>
    %c2_64 = arith.constant 2 : index
    %c0_65 = arith.constant 0 : index
    %c0_66 = arith.constant 0 : index
    %124 = vector.load %arg16[%c2_64, %c0_65, %c0_66] : memref<4x128x1xf32, #tpu.memory_space<vmem>>, vector<1x128x1xf32>
    %125 = vector.shape_cast %124 : vector<1x128x1xf32> to vector<128x1xf32>
    %126 = arith.mulf %120, %125 : vector<128x1xf32>
    %cst_67 = arith.constant dense<0.000000e+00> : vector<128xf32>
    %127 = vector.multi_reduction <add>, %123, %cst_67 [1] : vector<128x128xf32> to vector<128xf32>
    %128 = vector.shape_cast %127 : vector<128xf32> to vector<128x1xf32>
    %129 = arith.addf %126, %128 : vector<128x1xf32>
    %c2_68 = arith.constant 2 : index
    %c0_69 = arith.constant 0 : index
    %c0_70 = arith.constant 0 : index
    %130 = vector.load %arg16[%c2_68, %c0_69, %c0_70] : memref<4x128x1xf32, #tpu.memory_space<vmem>>, vector<1x128x1xf32>
    %131 = vector.shape_cast %130 : vector<1x128x1xf32> to vector<128x1xf32>
    %132 = vector.shape_cast %129 : vector<128x1xf32> to vector<1x128x1xf32>
    tpu.vector_store %arg16[%c2_68, %c0_69, %c0_70], %132 {strides = array<i32>} : memref<4x128x1xf32, #tpu.memory_space<vmem>>, vector<1x128x1xf32>,
    %c2_71 = arith.constant 2 : index
    %c0_72 = arith.constant 0 : index
    %c0_73 = arith.constant 0 : index
    %133 = vector.load %arg17[%c2_71, %c0_72, %c0_73] : memref<4x128x16xf32, #tpu.memory_space<vmem>>, vector<1x128x16xf32>
    %134 = vector.shape_cast %133 : vector<1x128x16xf32> to vector<128x16xf32>
    %135 = vector.broadcast %120 : vector<128x1xf32> to vector<128x16xf32>
    %136 = arith.mulf %135, %134 : vector<128x16xf32>
    %137 = arith.truncf %123 : vector<128x128xf32> to vector<128x128xbf16>
    %cst_74 = arith.constant dense<0.000000e+00> : vector<128x16xf32>
    %138 = tpu.matmul %137, %110, %cst_74 {dimension_numbers = #tpu.dot_dimension_numbers<[1], [0], [0], [1], [0, 0, 1, 1], [], []>} : vector<128x128xbf16>, vector<128x16xbf16>, vector<128x16xf32> -> vector<128x16xf32>
    %139 = arith.addf %136, %138 : vector<128x16xf32>
    %c2_75 = arith.constant 2 : index
    %c0_76 = arith.constant 0 : index
    %c0_77 = arith.constant 0 : index
    %140 = vector.load %arg17[%c2_75, %c0_76, %c0_77] : memref<4x128x16xf32, #tpu.memory_space<vmem>>, vector<1x128x16xf32>
    %141 = vector.shape_cast %140 : vector<1x128x16xf32> to vector<128x16xf32>
    %142 = vector.shape_cast %139 : vector<128x16xf32> to vector<1x128x16xf32>
    tpu.vector_store %arg17[%c2_75, %c0_76, %c0_77], %142 {strides = array<i32>} : memref<4x128x16xf32, #tpu.memory_space<vmem>>, vector<1x128x16xf32>,
    %c2_78 = arith.constant 2 : index
    %c0_79 = arith.constant 0 : index
    %c0_80 = arith.constant 0 : index
    %143 = vector.load %arg15[%c2_78, %c0_79, %c0_80] : memref<4x128x1xf32, #tpu.memory_space<vmem>>, vector<1x128x1xf32>
    %144 = vector.shape_cast %143 : vector<1x128x1xf32> to vector<128x1xf32>
    %145 = vector.shape_cast %118 : vector<128x1xf32> to vector<1x128x1xf32>
    tpu.vector_store %arg15[%c2_78, %c0_79, %c0_80], %145 {strides = array<i32>} : memref<4x128x1xf32, #tpu.memory_space<vmem>>, vector<1x128x1xf32>,
    %c0_81 = arith.constant 0 : index
    %c48 = arith.constant 48 : index
    %146 = vector.load %arg14[%c0_81, %c48] : memref<128x64xf32, #tpu.memory_space<vmem>>, vector<128x16xf32>
    %147 = arith.truncf %146 : vector<128x16xf32> to vector<128x16xbf16>
    %148 = vector.extract_strided_slice %8 {offsets = [0, 48], sizes = [128, 16], strides = [1, 1]} : vector<128x64xf32> to vector<128x16xf32>
    %149 = arith.truncf %148 : vector<128x16xf32> to vector<128x16xbf16>
    %150 = vector.extract_strided_slice %13 {offsets = [0, 48], sizes = [128, 16], strides = [1, 1]} : vector<128x64xf32> to vector<128x16xf32>
    %151 = arith.truncf %150 : vector<128x16xf32> to vector<128x16xbf16>
    %cst_82 = arith.constant dense<0.000000e+00> : vector<128x128xf32>
    %152 = tpu.matmul %147, %149, %cst_82 {dimension_numbers = #tpu.dot_dimension_numbers<[1], [1], [0], [0], [0, 0, 1, 0], [], []>} : vector<128x16xbf16>, vector<128x16xbf16>, vector<128x128xf32> -> vector<128x128xf32>
    %153 = vector.broadcast %22 : vector<1x128xf32> to vector<128x128xf32>
    %154 = arith.addf %152, %153 : vector<128x128xf32>
    %c3 = arith.constant 3 : index
    %c0_83 = arith.constant 0 : index
    %c0_84 = arith.constant 0 : index
    %155 = vector.load %arg15[%c3, %c0_83, %c0_84] : memref<4x128x1xf32, #tpu.memory_space<vmem>>, vector<1x128x1xf32>
    %156 = vector.shape_cast %155 : vector<1x128x1xf32> to vector<128x1xf32>
    %cst_85 = arith.constant dense<0xFF800000> : vector<128xf32>
    %157 = vector.multi_reduction <maximumf>, %154, %cst_85 [1] : vector<128x128xf32> to vector<128xf32>
    %158 = vector.shape_cast %157 : vector<128xf32> to vector<128x1xf32>
    %159 = arith.maximumf %156, %158 : vector<128x1xf32>
    %160 = arith.subf %156, %159 : vector<128x1xf32>
    %161 = math.exp %160 : vector<128x1xf32>
    %162 = vector.broadcast %159 : vector<128x1xf32> to vector<128x128xf32>
    %163 = arith.subf %154, %162 : vector<128x128xf32>
    %164 = math.exp %163 : vector<128x128xf32>
    %c3_86 = arith.constant 3 : index
    %c0_87 = arith.constant 0 : index
    %c0_88 = arith.constant 0 : index
    %165 = vector.load %arg16[%c3_86, %c0_87, %c0_88] : memref<4x128x1xf32, #tpu.memory_space<vmem>>, vector<1x128x1xf32>
    %166 = vector.shape_cast %165 : vector<1x128x1xf32> to vector<128x1xf32>
    %167 = arith.mulf %161, %166 : vector<128x1xf32>
    %cst_89 = arith.constant dense<0.000000e+00> : vector<128xf32>
    %168 = vector.multi_reduction <add>, %164, %cst_89 [1] : vector<128x128xf32> to vector<128xf32>
    %169 = vector.shape_cast %168 : vector<128xf32> to vector<128x1xf32>
    %170 = arith.addf %167, %169 : vector<128x1xf32>
    %c3_90 = arith.constant 3 : index
    %c0_91 = arith.constant 0 : index
    %c0_92 = arith.constant 0 : index
    %171 = vector.load %arg16[%c3_90, %c0_91, %c0_92] : memref<4x128x1xf32, #tpu.memory_space<vmem>>, vector<1x128x1xf32>
    %172 = vector.shape_cast %171 : vector<1x128x1xf32> to vector<128x1xf32>
    %173 = vector.shape_cast %170 : vector<128x1xf32> to vector<1x128x1xf32>
    tpu.vector_store %arg16[%c3_90, %c0_91, %c0_92], %173 {strides = array<i32>} : memref<4x128x1xf32, #tpu.memory_space<vmem>>, vector<1x128x1xf32>,
    %c3_93 = arith.constant 3 : index
    %c0_94 = arith.constant 0 : index
    %c0_95 = arith.constant 0 : index
    %174 = vector.load %arg17[%c3_93, %c0_94, %c0_95] : memref<4x128x16xf32, #tpu.memory_space<vmem>>, vector<1x128x16xf32>
    %175 = vector.shape_cast %174 : vector<1x128x16xf32> to vector<128x16xf32>
    %176 = vector.broadcast %161 : vector<128x1xf32> to vector<128x16xf32>
    %177 = arith.mulf %176, %175 : vector<128x16xf32>
    %178 = arith.truncf %164 : vector<128x128xf32> to vector<128x128xbf16>
    %cst_96 = arith.constant dense<0.000000e+00> : vector<128x16xf32>
    %179 = tpu.matmul %178, %151, %cst_96 {dimension_numbers = #tpu.dot_dimension_numbers<[1], [0], [0], [1], [0, 0, 1, 1], [], []>} : vector<128x128xbf16>, vector<128x16xbf16>, vector<128x16xf32> -> vector<128x16xf32>
    %180 = arith.addf %177, %179 : vector<128x16xf32>
    %c3_97 = arith.constant 3 : index
    %c0_98 = arith.constant 0 : index
    %c0_99 = arith.constant 0 : index
    %181 = vector.load %arg17[%c3_97, %c0_98, %c0_99] : memref<4x128x16xf32, #tpu.memory_space<vmem>>, vector<1x128x16xf32>
    %182 = vector.shape_cast %181 : vector<1x128x16xf32> to vector<128x16xf32>
    %183 = vector.shape_cast %180 : vector<128x16xf32> to vector<1x128x16xf32>
    tpu.vector_store %arg17[%c3_97, %c0_98, %c0_99], %183 {strides = array<i32>} : memref<4x128x16xf32, #tpu.memory_space<vmem>>, vector<1x128x16xf32>,
    %c3_100 = arith.constant 3 : index
    %c0_101 = arith.constant 0 : index
    %c0_102 = arith.constant 0 : index
    %184 = vector.load %arg15[%c3_100, %c0_101, %c0_102] : memref<4x128x1xf32, #tpu.memory_space<vmem>>, vector<1x128x1xf32>
    %185 = vector.shape_cast %184 : vector<1x128x1xf32> to vector<128x1xf32>
    %186 = vector.shape_cast %159 : vector<128x1xf32> to vector<1x128x1xf32>
    tpu.vector_store %arg15[%c3_100, %c0_101, %c0_102], %186 {strides = array<i32>} : memref<4x128x1xf32, #tpu.memory_space<vmem>>, vector<1x128x1xf32>,
    %c2_i32 = arith.constant 2 : i32
    %187 = arith.cmpi eq, %arg1, %c2_i32 : i32
    %188 = arith.extui %187 : i1 to i32
    %c0_i32_103 = arith.constant 0 : i32
    %189 = arith.cmpi ne, %188, %c0_i32_103 : i32
    scf.if %189 {
      %c0_104 = arith.constant 0 : index
      %c0_105 = arith.constant 0 : index
      %c0_106 = arith.constant 0 : index
      %190 = vector.load %arg16[%c0_104, %c0_105, %c0_106] : memref<4x128x1xf32, #tpu.memory_space<vmem>>, vector<1x128x1xf32>
      %191 = vector.shape_cast %190 : vector<1x128x1xf32> to vector<128x1xf32>
      %192 = tpu.reciprocal %191 {approx = true} : vector<128x1xf32> -> vector<128x1xf32>
      %c0_107 = arith.constant 0 : index
      %c0_108 = arith.constant 0 : index
      %c0_109 = arith.constant 0 : index
      %193 = vector.load %arg17[%c0_107, %c0_108, %c0_109] : memref<4x128x16xf32, #tpu.memory_space<vmem>>, vector<1x128x16xf32>
      %194 = vector.shape_cast %193 : vector<1x128x16xf32> to vector<128x16xf32>
      %195 = vector.broadcast %192 : vector<128x1xf32> to vector<128x16xf32>
      %196 = arith.mulf %194, %195 : vector<128x16xf32>
      %c0_110 = arith.constant 0 : index
      %c0_111 = arith.constant 0 : index
      %197 = vector.load %arg10[%c0_110, %c0_111] : memref<64x128xf32, #tpu.memory_space<vmem>>, vector<16x128xf32>
      %cst_112 = arith.constant dense<0.000000e+00> : vector<128x128xf32>
      %198 = tpu.matmul %196, %197, %cst_112 {dimension_numbers = #tpu.dot_dimension_numbers<[1], [0], [0], [1], [0, 0, 1, 1], [], []>} : vector<128x16xf32>, vector<16x128xf32>, vector<128x128xf32> -> vector<128x128xf32>
      %c1_113 = arith.constant 1 : index
      %c0_114 = arith.constant 0 : index
      %c0_115 = arith.constant 0 : index
      %199 = vector.load %arg16[%c1_113, %c0_114, %c0_115] : memref<4x128x1xf32, #tpu.memory_space<vmem>>, vector<1x128x1xf32>
      %200 = vector.shape_cast %199 : vector<1x128x1xf32> to vector<128x1xf32>
      %201 = tpu.reciprocal %200 {approx = true} : vector<128x1xf32> -> vector<128x1xf32>
      %c1_116 = arith.constant 1 : index
      %c0_117 = arith.constant 0 : index
      %c0_118 = arith.constant 0 : index
      %202 = vector.load %arg17[%c1_116, %c0_117, %c0_118] : memref<4x128x16xf32, #tpu.memory_space<vmem>>, vector<1x128x16xf32>
      %203 = vector.shape_cast %202 : vector<1x128x16xf32> to vector<128x16xf32>
      %204 = vector.broadcast %201 : vector<128x1xf32> to vector<128x16xf32>
      %205 = arith.mulf %203, %204 : vector<128x16xf32>
      %c16_119 = arith.constant 16 : index
      %c0_120 = arith.constant 0 : index
      %206 = vector.load %arg10[%c16_119, %c0_120] : memref<64x128xf32, #tpu.memory_space<vmem>>, vector<16x128xf32>
      %cst_121 = arith.constant dense<0.000000e+00> : vector<128x128xf32>
      %207 = tpu.matmul %205, %206, %cst_121 {dimension_numbers = #tpu.dot_dimension_numbers<[1], [0], [0], [1], [0, 0, 1, 1], [], []>} : vector<128x16xf32>, vector<16x128xf32>, vector<128x128xf32> -> vector<128x128xf32>
      %208 = arith.addf %198, %207 : vector<128x128xf32>
      %c2_122 = arith.constant 2 : index
      %c0_123 = arith.constant 0 : index
      %c0_124 = arith.constant 0 : index
      %209 = vector.load %arg16[%c2_122, %c0_123, %c0_124] : memref<4x128x1xf32, #tpu.memory_space<vmem>>, vector<1x128x1xf32>
      %210 = vector.shape_cast %209 : vector<1x128x1xf32> to vector<128x1xf32>
      %211 = tpu.reciprocal %210 {approx = true} : vector<128x1xf32> -> vector<128x1xf32>
      %c2_125 = arith.constant 2 : index
      %c0_126 = arith.constant 0 : index
      %c0_127 = arith.constant 0 : index
      %212 = vector.load %arg17[%c2_125, %c0_126, %c0_127] : memref<4x128x16xf32, #tpu.memory_space<vmem>>, vector<1x128x16xf32>
      %213 = vector.shape_cast %212 : vector<1x128x16xf32> to vector<128x16xf32>
      %214 = vector.broadcast %211 : vector<128x1xf32> to vector<128x16xf32>
      %215 = arith.mulf %213, %214 : vector<128x16xf32>
      %c32_128 = arith.constant 32 : index
      %c0_129 = arith.constant 0 : index
      %216 = vector.load %arg10[%c32_128, %c0_129] : memref<64x128xf32, #tpu.memory_space<vmem>>, vector<16x128xf32>
      %cst_130 = arith.constant dense<0.000000e+00> : vector<128x128xf32>
      %217 = tpu.matmul %215, %216, %cst_130 {dimension_numbers = #tpu.dot_dimension_numbers<[1], [0], [0], [1], [0, 0, 1, 1], [], []>} : vector<128x16xf32>, vector<16x128xf32>, vector<128x128xf32> -> vector<128x128xf32>
      %218 = arith.addf %208, %217 : vector<128x128xf32>
      %c3_131 = arith.constant 3 : index
      %c0_132 = arith.constant 0 : index
      %c0_133 = arith.constant 0 : index
      %219 = vector.load %arg16[%c3_131, %c0_132, %c0_133] : memref<4x128x1xf32, #tpu.memory_space<vmem>>, vector<1x128x1xf32>
      %220 = vector.shape_cast %219 : vector<1x128x1xf32> to vector<128x1xf32>
      %221 = tpu.reciprocal %220 {approx = true} : vector<128x1xf32> -> vector<128x1xf32>
      %c3_134 = arith.constant 3 : index
      %c0_135 = arith.constant 0 : index
      %c0_136 = arith.constant 0 : index
      %222 = vector.load %arg17[%c3_134, %c0_135, %c0_136] : memref<4x128x16xf32, #tpu.memory_space<vmem>>, vector<1x128x16xf32>
      %223 = vector.shape_cast %222 : vector<1x128x16xf32> to vector<128x16xf32>
      %224 = vector.broadcast %221 : vector<128x1xf32> to vector<128x16xf32>
      %225 = arith.mulf %223, %224 : vector<128x16xf32>
      %c48_137 = arith.constant 48 : index
      %c0_138 = arith.constant 0 : index
      %226 = vector.load %arg10[%c48_137, %c0_138] : memref<64x128xf32, #tpu.memory_space<vmem>>, vector<16x128xf32>
      %cst_139 = arith.constant dense<0.000000e+00> : vector<128x128xf32>
      %227 = tpu.matmul %225, %226, %cst_139 {dimension_numbers = #tpu.dot_dimension_numbers<[1], [0], [0], [1], [0, 0, 1, 1], [], []>} : vector<128x16xf32>, vector<16x128xf32>, vector<128x128xf32> -> vector<128x128xf32>
      %228 = arith.addf %218, %227 : vector<128x128xf32>
      %c0_140 = arith.constant 0 : index
      %c0_141 = arith.constant 0 : index
      %229 = memref.load %arg12[%c0_140, %c0_141] : memref<1x1xf32, #tpu.memory_space<smem>>
      %c0_142 = arith.constant 0 : index
      %c0_143 = arith.constant 0 : index
      %230 = vector.load %arg11[%c0_142, %c0_143] : memref<1x128xf32, #tpu.memory_space<vmem>>, vector<1x128xf32>
      %231 = vector.broadcast %230 : vector<1x128xf32> to vector<128x128xf32>
      %232 = arith.addf %228, %231 : vector<128x128xf32>
      %233 = vector.broadcast %229 : f32 to vector<128x128xf32>
      %234 = arith.mulf %232, %233 : vector<128x128xf32>
      %c0_144 = arith.constant 0 : index
      %c0_145 = arith.constant 0 : index
      %235 = vector.load %arg2[%c0_144, %c0_145] : memref<128x128xf32, #tpu.memory_space<vmem>>, vector<128x128xf32>
      %cst_146 = arith.constant 1.000000e+00 : f32
      %236 = arith.subf %cst_146, %229 : f32
      %237 = vector.broadcast %236 : f32 to vector<128x128xf32>
      %238 = arith.mulf %235, %237 : vector<128x128xf32>
      %239 = arith.addf %234, %238 : vector<128x128xf32>
      %c0_147 = arith.constant 0 : index
      %c0_148 = arith.constant 0 : index
      %240 = vector.load %arg13[%c0_147, %c0_148] : memref<128x128xf32, #tpu.memory_space<vmem>>, vector<128x128xf32>
      tpu.vector_store %arg13[%c0_147, %c0_148], %239 {strides = array<i32>} : memref<128x128xf32, #tpu.memory_space<vmem>>, vector<128x128xf32>,
    } else {
    }
    return
  }
  func.func @transform_0(%arg0: i32, %arg1: i32) -> (i32, i32) {
    %c0_i32 = arith.constant 0 : i32
    %c0_i32_0 = arith.constant 0 : i32
    return %arg0, %c0_i32 : i32, i32
  }
  func.func @transform_1(%arg0: i32, %arg1: i32) -> (i32, i32) {
    %c0_i32 = arith.constant 0 : i32
    %c0_i32_0 = arith.constant 0 : i32
    return %arg1, %c0_i32 : i32, i32
  }
  func.func @transform_2(%arg0: i32, %arg1: i32) -> (i32, i32) {
    %c0_i32 = arith.constant 0 : i32
    %c0_i32_0 = arith.constant 0 : i32
    %c0_i32_1 = arith.constant 0 : i32
    return %c0_i32, %c0_i32_0 : i32, i32
  }
  func.func @transform_3(%arg0: i32, %arg1: i32) -> (i32, i32) {
    %c0_i32 = arith.constant 0 : i32
    %c0_i32_0 = arith.constant 0 : i32
    %c0_i32_1 = arith.constant 0 : i32
    return %c0_i32, %c0_i32_0 : i32, i32
  }
  func.func @transform_4(%arg0: i32, %arg1: i32) -> (i32, i32) {
    %c0_i32 = arith.constant 0 : i32
    %c0_i32_0 = arith.constant 0 : i32
    %c0_i32_1 = arith.constant 0 : i32
    return %c0_i32, %c0_i32_0 : i32, i32
  }
  func.func @transform_5(%arg0: i32, %arg1: i32) -> (i32, i32) {
    %c0_i32 = arith.constant 0 : i32
    %c0_i32_0 = arith.constant 0 : i32
    %c0_i32_1 = arith.constant 0 : i32
    return %c0_i32, %c0_i32_0 : i32, i32
  }
  func.func @transform_6(%arg0: i32, %arg1: i32) -> (i32, i32) {
    %c0_i32 = arith.constant 0 : i32
    %c0_i32_0 = arith.constant 0 : i32
    %c0_i32_1 = arith.constant 0 : i32
    return %c0_i32, %c0_i32_0 : i32, i32
  }
  func.func @transform_7(%arg0: i32, %arg1: i32) -> (i32, i32) {
    %c0_i32 = arith.constant 0 : i32
    %c0_i32_0 = arith.constant 0 : i32
    %c0_i32_1 = arith.constant 0 : i32
    return %c0_i32, %c0_i32_0 : i32, i32
  }
  func.func @transform_8(%arg0: i32, %arg1: i32) -> (i32, i32) {
    %c0_i32 = arith.constant 0 : i32
    %c0_i32_0 = arith.constant 0 : i32
    %c0_i32_1 = arith.constant 0 : i32
    return %c0_i32, %c0_i32_0 : i32, i32
  }
  func.func @transform_9(%arg0: i32, %arg1: i32) -> (i32, i32) {
    %c0_i32 = arith.constant 0 : i32
    %c0_i32_0 = arith.constant 0 : i32
    %c0_i32_1 = arith.constant 0 : i32
    return %c0_i32, %c0_i32_0 : i32, i32
  }
  func.func @transform_10(%arg0: i32, %arg1: i32) -> (i32, i32) {
    %c0_i32 = arith.constant 0 : i32
    %c0_i32_0 = arith.constant 0 : i32
    %c0_i32_1 = arith.constant 0 : i32
    return %c0_i32, %c0_i32_0 : i32, i32
  }
  func.func @transform_11(%arg0: i32, %arg1: i32) -> (i32, i32) {
    %c0_i32 = arith.constant 0 : i32
    %c0_i32_0 = arith.constant 0 : i32
    return %arg0, %c0_i32 : i32, i32
  }
}

</mosaic_0001>

<bundles_post_ra>
// kernel: tpu_custom_call.1
= control target key start
LH: loop header
LB: loop body
LE: loop exit
PB: predicated region body
PF: predicated region fallthrough
CT: control target
= control target key end

     0   :  { %s11164_s0 = inlined_call_operand.vmem [shape: f32[256,128], index: 0, kind: input, shape index: {}]   ;;  %s11165_s1 = inlined_call_operand.hbm [shape: bf16[384,128], index: 1, kind: input, shape index: {}]   ;;  %s11166_s2 = inlined_call_operand.vmem [shape: bf16[128,64], index: 2, kind: input, shape index: {}]   ;;  %s11167_s3 = inlined_call_operand.vmem [shape: f32[1,64], index: 3, kind: input, shape index: {}]   ;;  %s11168_s4 = inlined_call_operand.vmem [shape: bf16[128,64], index: 4, kind: input, shape index: {}]   ;;  %s11169_s5 = inlined_call_operand.vmem [shape: f32[1,64], index: 5, kind: input, shape index: {}]   ;;  %s11170_s6 = inlined_call_operand.vmem [shape: bf16[128,64], index: 6, kind: input, shape index: {}]   ;;  %s11171_s7 = inlined_call_operand.vmem [shape: f32[1,64], index: 7, kind: input, shape index: {}]   ;;  %s11172_s8 = inlined_call_operand.hbm [shape: f32[64,128], index: 8, kind: input, shape index: {}]   ;;  %s11173_s9 = inlined_call_operand.vmem [shape: f32[1,128], index: 9, kind: input, shape index: {}]   ;;  %s11174_s10 = inlined_call_operand.<no memory space> [shape: f32[1,1], index: 10, kind: input, shape index: {}]   ;;  %s11175_s11 = inlined_call_operand.hbm [shape: f32[256,128], index: 11, kind: output, shape index: {}]  }
   0x1   :  { %11300 = sst [smem:[#allocation131_spill]] %s11166_s2 }
   0x2   :  { %11301 = sst [smem:[#allocation132_spill]] %s11167_s3 }
   0x3   :  { %11302 = sst [smem:[#allocation133_spill]] %s11170_s6 }
   0x4   :  { %11303 = sst [smem:[#allocation134_spill]] %s11171_s7 }
   0x5   :  { %11304 = sst [smem:[#allocation135_spill]] %s11172_s8 }
   0x6   :  { %11305 = sst [smem:[#allocation136_spill]] %s11173_s9 }
   0x7   :  { %11306 = sst [smem:[#allocation137_spill]] %s11175_s11 }
   0x8   :  { %16 = sst [smem:[#allocation6]] %s11174_s10 }
   0x9   :  { %17 = vsyncpa [#allocation8], 0 }
   0xa   :  { %19 = vsyncpa [#allocation8 + $0x1], 0 }
   0xb   :  { %20 = vsyncpa [#allocation11], 0 }
   0xc   :  { %21 = vsyncpa [#allocation9], 0 }
   0xd   :  { %23 = vsyncpa [#allocation9 + $0x1], 0  ;;  %s7929_s19 = smov 0   ;;  %s7931_s20 = smov 0  }
   0xe   :  { %s7933_s21 = smov 0   ;;  %s7935_s22 = smov 0  }
   0xf   :  { %s7937_s23 = smov 0   ;;  %s7939_s24 = smov 0  }
  0x10   :  { %s7941_s25 = smov 0   ;;  %s7943_s10 = smov 0  }
  0x11   :  { %s7945_s26 = smov 0   ;;  %s7947_s27 = smov 0  }
  0x12   :  { %s7949_s28 = smov 0  }
  0x13 LB: > { %11307 = sst [smem:[#allocation16_spill]] %s7807_s19  ;;  %s6206_s29 = sadd.s32 4294967295, %s7847_s28   ;;  %s7847_s28 = sphi %s7949_s28, %s29_s28   ;;  %s7843_s27 = sphi %s7947_s27, %s11705_s27   ;;  %s7839_s26 = sphi %s7945_s26, %s11704_s26   ;;  %s7835_s10 = sphi %s7943_s10, %s11703_s10   ;;  %s7831_s25 = sphi %s7941_s25, %s11702_s25   ;;  %s7827_s24 = sphi %s7939_s24, %s11701_s24   ;;  %s7823_s23 = sphi %s7937_s23, %s11700_s23   ;;  %s7819_s22 = sphi %s7935_s22, %s11699_s22   ;;  %s7815_s21 = sphi %s7933_s21, %s11698_s21   ;;  %s7811_s20 = sphi %s7931_s20, %s11697_s20   ;;  %s7807_s19 = sphi %s7929_s19, %s11696_s19  }
  0x14   : > { %11308 = sst [smem:[#allocation17_spill]] %s7847_s28  ;;  %s6207_s30 = sadd.s32 4294967294, %s7847_s28  }
  0x15   : > { %p87_p0 = scmp.ne.s32.totalorder %s7823_s23, %s7819_s22  ;;  %p7985_p1 = scmp.eq.s32.totalorder %s6206_s29, 0 }
  0x16   : > { %p299_p2 = scmp.ne.s32.totalorder %s7815_s21, %s7811_s20  ;;  %p300_p4 = scmp.eq.s32.totalorder %s6206_s29, 5 }
  0x17   : > { %p7994_p3 = por %p7985_p1, %p87_p0  ;;  %p305_p5 = scmp.ne.s32.totalorder %s7811_s20, %s7807_s19 }
  0x18   : > { %p306_p6 = scmp.eq.s32.totalorder %s6207_s30, 5  ;;  %p8000_p7 = por %p300_p4, %p299_p2 }
  0x19   : > { %p6208_p8 = scmp.ge.s32.totalorder %s7847_s28, 1  ;;  %p313_p10 = scmp.lt.s32.totalorder %s7847_s28, 7 }
  0x1a   : > { %s11311_s15 = scalar_select %p8000_p7, 1, 0 }
  0x1b   : > { %p8005_p9 = por %p306_p6, %p305_p5  ;;  %p8010_p11 = pnand %p6208_p8, %p313_p10 }
  0x1c   : > { %11312 = sst [smem:[#allocation18_spill]] %s11311_s15  ;;  %s7849_s18 = smov [#allocation10]  }
  0x1d   : > { %s11313_s16 = scalar_select %p8005_p9, 1, 0 }
  0x1e   : > { %s343_s22 = sshll.u32 %s7849_s18, 4  ;;  %p7130_p12 = pneg %p8010_p11  ;;  %s344_s22 = int_to_ptr.vmem [resolvable:$true] %s343_s22 }
  0x1f   : > { %11314 = sst [smem:[#allocation19_spill]] %s11313_s16  ;;  %s7680_s29 = scalar_lea.vmem %s344_s22, 1024 }
  0x20   : > { %p7131_p13 = pnand %p7130_p12, %p7985_p1  ;;  %p7681_p2 = scmp.ne.s32.totalorder %s344_s22, %s7680_s29 }
  0x21   : > { %p7688_p6 = scmp.lt.s32.totalorder %s344_s22, %s344_s22  ;;  %p7689_p9 = scmp.lt.s32.totalorder %s7680_s29, %s7680_s29 }
  0x22   : > { %p7671_p0 = pneg %p7131_p13 }
  0x23   : > { %p7690_p7 = por %p7689_p9, %p7688_p6 }
  0x24   : > { %p7683_p4 = pnand %p7681_p2, %p7671_p0 }
  0x26   : > { %p7684_p5 = pneg %p7683_p4 }
  0x28   : > { %p7691_p8 = pnand %p7690_p7, %p7684_p5 }
  0x2a   : > { %7694 = shalt.err (!%p7691_p8)
}
  0x2b   : > { %s7850_s30 = smov 128   ;;  %s7851_s18 = smov 8  }
  0x2c   : > { %s11316_s8 = sld [smem:[#allocation135_spill]]  ;;  %s38_s29 = sadd.s32 1, %s7839_s26 }
  0x2d   : > { %p39_p7 = scmp.ge.s32.totalorder %s38_s29, 3  ;;  %s41_s19 = sadd.s32 1, %s7843_s27 }
  0x2e   : > { %s74_s11 = sadd.s32 1, %s7827_s24  ;;  %p81_p9 = scmp.ne.s32.totalorder %s7827_s24, %s7823_s23 }
  0x2f   : > { %s11707_s29 = smov (%p39_p7, %s38_s29), 0  ;;  %s11709_s19 = smov (!%p39_p7, %s41_s19), %s7843_s27 }
  0x30   : > { %11317 = sst [smem:[#allocation20_spill]] %s11707_s29  ;;  %s71_s15 = ssub.s32 %s7839_s26, %s11707_s29 }
  0x31   : > { %p82_p10 = scmp.eq.s32.totalorder %s7847_s28, 0  ;;  %p43_p12 = scmp.ge.s32.totalorder %s11709_s19, 2 }
  0x32   : > { %7133 = dma.hbm_to_vmem [thread:$0]  (!%p7131_p13), %s11316_s8, 1024, %s344_s22, [#allocation11], %s7850_s30, %s7850_s30, %s7851_s18  }
  0x33   : > { %p72_p0 = scmp.eq.s32.totalorder %s71_s15, 0  ;;  %p8032_p2 = por %p82_p10, %p81_p9 }
  0x34   : > { %p7143_p13 = scmp.lt.s32.totalorder %s7847_s28, 6  ;;  %s11711_s19 = smov (%p43_p12, %s11709_s19), 0 }
  0x35   : > { %11319 = sst [smem:[#allocation21_spill]] %s11711_s19  ;;  %s286_s22 = ssub.s32 %s7843_s27, %s11711_s19 }
  0x36   : > { %s8040_s16 = scalar_select %p72_p0, %s7827_s24, %s74_s11  }
  0x37   : > { %s372_s30 = sand.u32 1, %s7827_s24   ;;  %p287_p4 = scmp.eq.s32.totalorder %s286_s22, 0 }
  0x38   : > { %s6211_s18 = sshll.u32 %s372_s30, 6  ;;  %s6360_s8 = sshll.u32 %s7839_s26, 10 }
  0x39   : > { %s11320_s29 = sadd.s32 1, %s7815_s21  ;;  %s382_s3 = scalar_lea.hbm %s11165_s1, %s6360_s8 }
  0x3a   : > { %s8049_s9 = scalar_select %p287_p4, %s7815_s21, %s11320_s29  }
  0x3b   : > { %s376_s6 = scalar_lea.vmem [#allocation7], %s6211_s18  ;;  %p8056_p5 = pnand %p7143_p13, %p8032_p2 }
  0x3c   : > { %s383_s2 = sshll.u32 %s376_s6, 4  ;;  %s373_s11 = scalar_lea.sflag [#allocation8], %s372_s30  ;;  %s384_s2 = int_to_ptr.vmem [resolvable:$true] %s383_s2 }
  0x3d   : > { %p7697_p6 = pneg %p8056_p5  ;;  %s7708_s22 = scalar_lea.vmem %s384_s2, 1024 }
  0x3e   : > { %p7709_p8 = scmp.ne.s32.totalorder %s384_s2, %s7708_s22  ;;  %s7852_s29 = smov [#allocation7]  }
  0x3f   : > { %s7713_s19 = sshll.u32 %s7852_s29, 4  ;;  %s7714_s19 = int_to_ptr.vmem [resolvable:$false] %s7713_s19 }
  0x40   : > { %p7711_p7 = pnand %p7709_p8, %p7697_p6  ;;  %s7715_s7 = scalar_lea.vmem %s7714_s19, 2048 }
  0x41   : > { %p7716_p10 = scmp.lt.s32.totalorder %s384_s2, %s7714_s19  ;;  %p7717_p12 = scmp.lt.s32.totalorder %s7715_s7, %s7708_s22 }
  0x42   : > { %p7712_p9 = pneg %p7711_p7 }
  0x43   : > { %p7718_p0 = por %p7717_p12, %p7716_p10 }
  0x45   : > { %p7719_p2 = pnand %p7718_p0, %p7712_p9 }
  0x47   : > { %7722 = shalt.err (!%p7719_p2)
}
  0x48   : > { %s7853_s6 = smov 64   ;;  %s7854_s8 = smov 4  }
  0x49   : > { %7137 = dma.hbm_to_vmem [thread:$0]  (!%p8056_p5), %s382_s3, 1024, %s384_s2, %s373_s11, %s7853_s6, %s7853_s6, %s7854_s8  }
  0x4a   : > { %395 = sbr.rel (%p8010_p11) target bundleno = 3633 (0xe31), region = 64 }
  0x4f   : > { %s397_s13 = sand.u32 1, %s7823_s23  }
  0x50   : > { %s6215_s30 = sshll.u32 %s397_s13, 6  ;;  %s398_s18 = scalar_lea.sflag [#allocation8], %s397_s13 }
  0x51   : > { %s8067_s15 = scalar_lea.vmem [#allocation7], %s6215_s30 }
  0x52   : > { %7794 = dma.done.wait (%p7994_p3), %s398_s18, 1024  }
  0x53   : > { %7796 = vsyncadd (%p7994_p3), %s398_s18, 4294966272 }
  0x54   : > { %7798 = dma.done.wait (%p7985_p1), [#allocation11], 1024  }
  0x55   : > { %7800 = vsyncadd (%p7985_p1), [#allocation11], 4294966272  ;;  %s446_s2 = sand.u32 1, %s7811_s20   ;;  %s6218_s3 = sshll.u32 %s7835_s10, 4 }
  0x56   : > { %s6217_s19 = sshll.u32 %s446_s2, 7  ;;  %p450_p11 = scmp.lt.s32.totalorder %s6218_s3, 31 }
  0x57   : > { %s8086_s22 = scalar_lea.vmem [#allocation12], %s6217_s19  ;;  %p6220_p3 = scmp.ne.s32.totalorder %s7831_s25, 0 }
  0x58   : > { %s11713_s3 = smov (!%p450_p11, %s6218_s3), 31 }
  0x59   : > { %s6219_s28 = sshll.u32 %s11713_s3, 3  ;;  %461 = sbr.rel (%p6220_p3) target bundleno = 337 (0x151), region = 76 }
  0x5a   : > { %s8084_s14 = scalar_lea.vmem %s11164_s0, %s6219_s28 }
  0x5e   : > { %v7249_v0 = vld [vmem:[%s11168_s4 + $0x38] sm:$0xff]   ;;  %v7250_v1 = vld [vmem:[%s11168_s4 + $0x30] sm:$0xff]   ;;  %v7251_v2 = vld [vmem:[%s11168_s4 + $0x28] sm:$0xff]   ;;  %vm671_vm0 = vcmask 7168   ;;  %vm800_vm1 = vcmask 130048   ;;  %v7855_v32 = vmov -inf  }
  0x5f   : > { %6610 = vmatprep.subr.bf16.mxu0 %v7249_v0  ;;  %7074 = vmatprep.subr.bf16.mxu1 %v7249_v0  ;;  %v7252_v3 = vld [vmem:[%s11168_s4 + $0x20] sm:$0xff]   ;;  %v463_v5 = vld [vmem:[%s8084_s14 + $0x8] sm:$0xff]  ;;  %v7253_v10 = vld [vmem:[%s11168_s4 + $0x18] sm:$0xff]   ;;  %672 = vst.msk [vmem:[#allocation3] sm:$0xff] %vm671_vm0, %v7855_v32  ;;  %v7856_v33 = vmov 0.0   ;;  %vm654_vm2 = vcmask 523264  }
  0x60   : > { %6611 = vmatpush3.bf16.msra.mxu0 %v7249_v0  ;;  %7082 = vmatpush3.bf16.msra.mxu1 %v7249_v0  ;;  %v462_v4 = vld [vmem:[%s8084_s14] sm:$0xff]  ;;  %v471_v8 = vld [vmem:[%s8084_s14 + $0x48] sm:$0xff]  ;;  %v7254_v11 = vld [vmem:[%s11168_s4 + $0x10] sm:$0xff]   ;;  %673 = vst.msk [vmem:[#allocation3 + $0x8] sm:$0xff] %vm671_vm0, %v7855_v32 }
  0x61   : > { %6612 = vmatprep.subr.bf16.mxu0 %v7250_v1  ;;  %7075 = vmatprep.subr.bf16.mxu1 %v7250_v1  ;;  %v470_v6 = vld [vmem:[%s8084_s14 + $0x40] sm:$0xff]  ;;  %v478_v7 = vpack.c.bf16 %v463_v5, %v462_v4  ;;  %v7255_v12 = vld [vmem:[%s11168_s4 + $0x8] sm:$0xff]   ;;  %v464_v14 = vld [vmem:[%s8084_s14 + $0x10] sm:$0xff]  ;;  %674 = vst.msk [vmem:[#allocation3 + $0x10] sm:$0xff] %vm671_vm0, %v7855_v32 }
  0x62   : > { %v482_v9 = vpack.c.bf16 %v471_v8, %v470_v6  ;;  %v7256_v13 = vld [vmem:[%s11168_s4] sm:$0xff]   ;;  %v465_v15 = vld [vmem:[%s8084_s14 + $0x18] sm:$0xff]  ;;  %v472_v16 = vld [vmem:[%s8084_s14 + $0x50] sm:$0xff]  ;;  %675 = vst.msk [vmem:[#allocation3 + $0x18] sm:$0xff] %vm671_vm0, %v7855_v32 }
  0x63   : > { %6626 = vmatprep.mubr.bf16.mxu0 %v478_v7  ;;  %v473_v17 = vld [vmem:[%s8084_s14 + $0x58] sm:$0xff]  ;;  %v466_v18 = vld [vmem:[%s8084_s14 + $0x20] sm:$0xff]  ;;  %v467_v19 = vld [vmem:[%s8084_s14 + $0x28] sm:$0xff]  ;;  %v479_v22 = vpack.c.bf16 %v465_v15, %v464_v14  ;;  %676 = vst.msk [vmem:[#allocation3 + $0x20] sm:$0xff] %vm671_vm0, %v7855_v32 }
  0x64   : > { %6613 = vmatpush3.bf16.msra.mxu0 %v7250_v1  ;;  %7083 = vmatpush3.bf16.msra.mxu1 %v7250_v1  ;;  %v474_v20 = vld [vmem:[%s8084_s14 + $0x60] sm:$0xff]  ;;  %v475_v21 = vld [vmem:[%s8084_s14 + $0x68] sm:$0xff]  ;;  %v483_v23 = vpack.c.bf16 %v473_v17, %v472_v16  ;;  %v480_v24 = vpack.c.bf16 %v467_v19, %v466_v18  ;;  %v468_v26 = vld [vmem:[%s8084_s14 + $0x30] sm:$0xff]  ;;  %677 = vst.msk [vmem:[#allocation3 + $0x28] sm:$0xff] %vm671_vm0, %v7855_v32 }
  0x65   : > { %6614 = vmatprep.subr.bf16.mxu0 %v7251_v2  ;;  %7076 = vmatprep.subr.bf16.mxu1 %v7251_v2  ;;  %v484_v25 = vpack.c.bf16 %v475_v21, %v474_v20  ;;  %v469_v27 = vld [vmem:[%s8084_s14 + $0x38] sm:$0xff]  ;;  %v476_v28 = vld [vmem:[%s8084_s14 + $0x70] sm:$0xff]  ;;  %678 = vst.msk [vmem:[#allocation3 + $0x30] sm:$0xff] %vm671_vm0, %v7855_v32  ;;  %679 = vst.msk [vmem:[#allocation3 + $0x38] sm:$0xff] %vm671_vm0, %v7855_v32 }
  0x66   : > { %6634 = vmatprep.mubr.bf16.mxu1 %v482_v9  ;;  %v477_v29 = vld [vmem:[%s8084_s14 + $0x78] sm:$0xff]  ;;  %v481_v30 = vpack.c.bf16 %v469_v27, %v468_v26  ;;  %680 = vst.msk [vmem:[#allocation3 + $0x40] sm:$0xff] %vm671_vm0, %v7855_v32  ;;  %681 = vst.msk [vmem:[#allocation3 + $0x48] sm:$0xff] %vm671_vm0, %v7855_v32  ;;  %v6221_v34 = vld [vmem:[%s11169_s5] ss:$0 sm:$0xff] }
  0x67   : > { %v485_v31 = vpack.c.bf16 %v477_v29, %v476_v28  ;;  %682 = vst.msk [vmem:[#allocation3 + $0x50] sm:$0xff] %vm671_vm0, %v7855_v32  ;;  %683 = vst.msk [vmem:[#allocation3 + $0x58] sm:$0xff] %vm671_vm0, %v7855_v32 }
  0x68   : > { %6615 = vmatpush3.bf16.msra.mxu0 %v7251_v2  ;;  %7084 = vmatpush3.bf16.msra.mxu1 %v7251_v2  ;;  %684 = vst.msk [vmem:[#allocation3 + $0x60] sm:$0xff] %vm671_vm0, %v7855_v32  ;;  %685 = vst.msk [vmem:[#allocation3 + $0x68] sm:$0xff] %vm671_vm0, %v7855_v32 }
  0x69   : > { %6616 = vmatprep.subr.bf16.mxu0 %v7252_v3  ;;  %7077 = vmatprep.subr.bf16.mxu1 %v7252_v3  ;;  %686 = vst.msk [vmem:[#allocation3 + $0x70] sm:$0xff] %vm671_vm0, %v7855_v32  ;;  %687 = vst.msk [vmem:[#allocation3 + $0x78] sm:$0xff] %vm671_vm0, %v7855_v32 }
  0x6a   : > { %688 = vst.msk [vmem:[#allocation3 + $0x80] sm:$0xff] %vm671_vm0, %v7855_v32  ;;  %689 = vst.msk [vmem:[#allocation3 + $0x88] sm:$0xff] %vm671_vm0, %v7855_v32 }
  0x6b   : > { %690 = vst.msk [vmem:[#allocation3 + $0x90] sm:$0xff] %vm671_vm0, %v7855_v32  ;;  %691 = vst.msk [vmem:[#allocation3 + $0x98] sm:$0xff] %vm671_vm0, %v7855_v32 }
  0x6c   : > { %6617 = vmatpush3.bf16.msra.mxu0 %v7252_v3  ;;  %7085 = vmatpush3.bf16.msra.mxu1 %v7252_v3  ;;  %692 = vst.msk [vmem:[#allocation3 + $0xa0] sm:$0xff] %vm671_vm0, %v7855_v32  ;;  %693 = vst.msk [vmem:[#allocation3 + $0xa8] sm:$0xff] %vm671_vm0, %v7855_v32 }
  0x6d   : > { %6618 = vmatprep.subr.bf16.mxu0 %v7253_v10  ;;  %7078 = vmatprep.subr.bf16.mxu1 %v7253_v10  ;;  %694 = vst.msk [vmem:[#allocation3 + $0xb0] sm:$0xff] %vm671_vm0, %v7855_v32  ;;  %695 = vst.msk [vmem:[#allocation3 + $0xb8] sm:$0xff] %vm671_vm0, %v7855_v32 }
  0x6e   : > { %696 = vst.msk [vmem:[#allocation3 + $0xc0] sm:$0xff] %vm671_vm0, %v7855_v32  ;;  %697 = vst.msk [vmem:[#allocation3 + $0xc8] sm:$0xff] %vm671_vm0, %v7855_v32 }
  0x6f   : > { %698 = vst.msk [vmem:[#allocation3 + $0xd0] sm:$0xff] %vm671_vm0, %v7855_v32  ;;  %699 = vst.msk [vmem:[#allocation3 + $0xd8] sm:$0xff] %vm671_vm0, %v7855_v32 }
  0x70   : > { %6619 = vmatpush3.bf16.msra.mxu0 %v7253_v10  ;;  %7086 = vmatpush3.bf16.msra.mxu1 %v7253_v10  ;;  %700 = vst.msk [vmem:[#allocation3 + $0xe0] sm:$0xff] %vm671_vm0, %v7855_v32  ;;  %701 = vst.msk [vmem:[#allocation3 + $0xe8] sm:$0xff] %vm671_vm0, %v7855_v32 }
  0x71   : > { %6620 = vmatprep.subr.bf16.mxu0 %v7254_v11  ;;  %7079 = vmatprep.subr.bf16.mxu1 %v7254_v11  ;;  %702 = vst.msk [vmem:[#allocation3 + $0xf0] sm:$0xff] %vm671_vm0, %v7855_v32  ;;  %703 = vst.msk [vmem:[#allocation3 + $0xf8] sm:$0xff] %vm671_vm0, %v7855_v32 }
  0x72   : > { %704 = vst.msk [vmem:[#allocation3 + $0x100] sm:$0xff] %vm671_vm0, %v7855_v32  ;;  %705 = vst.msk [vmem:[#allocation3 + $0x108] sm:$0xff] %vm671_vm0, %v7855_v32 }
  0x73   : > { %706 = vst.msk [vmem:[#allocation3 + $0x110] sm:$0xff] %vm671_vm0, %v7855_v32  ;;  %707 = vst.msk [vmem:[#allocation3 + $0x118] sm:$0xff] %vm671_vm0, %v7855_v32 }
  0x74   : > { %6621 = vmatpush3.bf16.msra.mxu0 %v7254_v11  ;;  %7087 = vmatpush3.bf16.msra.mxu1 %v7254_v11  ;;  %708 = vst.msk [vmem:[#allocation3 + $0x120] sm:$0xff] %vm671_vm0, %v7855_v32  ;;  %709 = vst.msk [vmem:[#allocation3 + $0x128] sm:$0xff] %vm671_vm0, %v7855_v32 }
  0x75   : > { %6622 = vmatprep.subr.bf16.mxu0 %v7255_v12  ;;  %7080 = vmatprep.subr.bf16.mxu1 %v7255_v12  ;;  %710 = vst.msk [vmem:[#allocation3 + $0x130] sm:$0xff] %vm671_vm0, %v7855_v32  ;;  %711 = vst.msk [vmem:[#allocation3 + $0x138] sm:$0xff] %vm671_vm0, %v7855_v32 }
  0x76   : > { %712 = vst.msk [vmem:[#allocation3 + $0x140] sm:$0xff] %vm671_vm0, %v7855_v32  ;;  %713 = vst.msk [vmem:[#allocation3 + $0x148] sm:$0xff] %vm671_vm0, %v7855_v32 }
  0x77   : > { %714 = vst.msk [vmem:[#allocation3 + $0x150] sm:$0xff] %vm671_vm0, %v7855_v32  ;;  %715 = vst.msk [vmem:[#allocation3 + $0x158] sm:$0xff] %vm671_vm0, %v7855_v32 }
  0x78   : > { %6623 = vmatpush3.bf16.msra.mxu0 %v7255_v12  ;;  %7088 = vmatpush3.bf16.msra.mxu1 %v7255_v12  ;;  %716 = vst.msk [vmem:[#allocation3 + $0x160] sm:$0xff] %vm671_vm0, %v7855_v32  ;;  %717 = vst.msk [vmem:[#allocation3 + $0x168] sm:$0xff] %vm671_vm0, %v7855_v32 }
  0x79   : > { %6624 = vmatprep.subr.bf16.mxu0 %v7256_v13  ;;  %7081 = vmatprep.subr.bf16.mxu1 %v7256_v13  ;;  %718 = vst.msk [vmem:[#allocation3 + $0x170] sm:$0xff] %vm671_vm0, %v7855_v32  ;;  %719 = vst.msk [vmem:[#allocation3 + $0x178] sm:$0xff] %vm671_vm0, %v7855_v32 }
  0x7a   : > { %720 = vst.msk [vmem:[#allocation3 + $0x180] sm:$0xff] %vm671_vm0, %v7855_v32  ;;  %721 = vst.msk [vmem:[#allocation3 + $0x188] sm:$0xff] %vm671_vm0, %v7855_v32 }
  0x7b   : > { %722 = vst.msk [vmem:[#allocation3 + $0x190] sm:$0xff] %vm671_vm0, %v7855_v32  ;;  %723 = vst.msk [vmem:[#allocation3 + $0x198] sm:$0xff] %vm671_vm0, %v7855_v32 }
  0x7c   : > { %6625 = vmatpush3.bf16.msra.mxu0 %v7256_v13  ;;  %7089 = vmatpush3.bf16.msra.mxu1 %v7256_v13  ;;  %724 = vst.msk [vmem:[#allocation3 + $0x1a0] sm:$0xff] %vm671_vm0, %v7855_v32  ;;  %725 = vst.msk [vmem:[#allocation3 + $0x1a8] sm:$0xff] %vm671_vm0, %v7855_v32 }
  0x7d   : > { %726 = vst.msk [vmem:[#allocation3 + $0x1b0] sm:$0xff] %vm671_vm0, %v7855_v32  ;;  %727 = vst.msk [vmem:[#allocation3 + $0x1b8] sm:$0xff] %vm671_vm0, %v7855_v32 }
  0x7e   : > { %728 = vst.msk [vmem:[#allocation3 + $0x1c0] sm:$0xff] %vm671_vm0, %v7855_v32  ;;  %729 = vst.msk [vmem:[#allocation3 + $0x1c8] sm:$0xff] %vm671_vm0, %v7855_v32 }
  0x7f   : > { %6627 = vmatmul.mubr.bf16.vlgmr.msra.gmra.mxu0 %v479_v22  ;;  %6635 = vmatmul.mubr.bf16.vlgmr.msra.gmra.mxu1 %v483_v23  ;;  %730 = vst.msk [vmem:[#allocation3 + $0x1d0] sm:$0xff] %vm671_vm0, %v7855_v32  ;;  %731 = vst.msk [vmem:[#allocation3 + $0x1d8] sm:$0xff] %vm671_vm0, %v7855_v32 }
  0x80   : > { %6630 = vmatprep.mubr.bf16.mxu0 %v480_v24  ;;  %6638 = vmatprep.mubr.bf16.mxu1 %v484_v25  ;;  %732 = vst.msk [vmem:[#allocation3 + $0x1e0] sm:$0xff] %vm671_vm0, %v7855_v32  ;;  %733 = vst.msk [vmem:[#allocation3 + $0x1e8] sm:$0xff] %vm671_vm0, %v7855_v32 }
  0x81   : > { %734 = vst.msk [vmem:[#allocation3 + $0x1f0] sm:$0xff] %vm671_vm0, %v7855_v32  ;;  %735 = vst.msk [vmem:[#allocation3 + $0x1f8] sm:$0xff] %vm671_vm0, %v7855_v32 }
  0x82   : > { %736 = vst.msk [vmem:[#allocation4] sm:$0xff] %vm671_vm0, %v7856_v33  ;;  %737 = vst.msk [vmem:[#allocation4 + $0x8] sm:$0xff] %vm671_vm0, %v7856_v33 }
  0x83   : > { %738 = vst.msk [vmem:[#allocation4 + $0x10] sm:$0xff] %vm671_vm0, %v7856_v33  ;;  %739 = vst.msk [vmem:[#allocation4 + $0x18] sm:$0xff] %vm671_vm0, %v7856_v33 }
  0x84   : > { %740 = vst.msk [vmem:[#allocation4 + $0x20] sm:$0xff] %vm671_vm0, %v7856_v33  ;;  %741 = vst.msk [vmem:[#allocation4 + $0x28] sm:$0xff] %vm671_vm0, %v7856_v33 }
  0x85   : > { %742 = vst.msk [vmem:[#allocation4 + $0x30] sm:$0xff] %vm671_vm0, %v7856_v33  ;;  %743 = vst.msk [vmem:[#allocation4 + $0x38] sm:$0xff] %vm671_vm0, %v7856_v33 }
  0x86   : > { %744 = vst.msk [vmem:[#allocation4 + $0x40] sm:$0xff] %vm671_vm0, %v7856_v33  ;;  %745 = vst.msk [vmem:[#allocation4 + $0x48] sm:$0xff] %vm671_vm0, %v7856_v33 }
  0x87   : > { %6631 = vmatmul.mubr.bf16.gmra.mxu0 %v481_v30  ;;  %6639 = vmatmul.mubr.bf16.gmra.mxu1 %v485_v31  ;;  %746 = vst.msk [vmem:[#allocation4 + $0x50] sm:$0xff] %vm671_vm0, %v7856_v33  ;;  %747 = vst.msk [vmem:[#allocation4 + $0x58] sm:$0xff] %vm671_vm0, %v7856_v33 }
  0x88   : > { %748 = vst.msk [vmem:[#allocation4 + $0x60] sm:$0xff] %vm671_vm0, %v7856_v33  ;;  %749 = vst.msk [vmem:[#allocation4 + $0x68] sm:$0xff] %vm671_vm0, %v7856_v33 }
  0x89   : > { %750 = vst.msk [vmem:[#allocation4 + $0x70] sm:$0xff] %vm671_vm0, %v7856_v33  ;;  %751 = vst.msk [vmem:[#allocation4 + $0x78] sm:$0xff] %vm671_vm0, %v7856_v33 }
  0x8a   : > { %752 = vst.msk [vmem:[#allocation4 + $0x80] sm:$0xff] %vm671_vm0, %v7856_v33  ;;  %753 = vst.msk [vmem:[#allocation4 + $0x88] sm:$0xff] %vm671_vm0, %v7856_v33 }
  0x8b   : > { %754 = vst.msk [vmem:[#allocation4 + $0x90] sm:$0xff] %vm671_vm0, %v7856_v33  ;;  %755 = vst.msk [vmem:[#allocation4 + $0x98] sm:$0xff] %vm671_vm0, %v7856_v33 }
  0x8c   : > { %756 = vst.msk [vmem:[#allocation4 + $0xa0] sm:$0xff] %vm671_vm0, %v7856_v33  ;;  %757 = vst.msk [vmem:[#allocation4 + $0xa8] sm:$0xff] %vm671_vm0, %v7856_v33 }
  0x8d   : > { %758 = vst.msk [vmem:[#allocation4 + $0xb0] sm:$0xff] %vm671_vm0, %v7856_v33  ;;  %759 = vst.msk [vmem:[#allocation4 + $0xb8] sm:$0xff] %vm671_vm0, %v7856_v33 }
  0x8e   : > { %760 = vst.msk [vmem:[#allocation4 + $0xc0] sm:$0xff] %vm671_vm0, %v7856_v33  ;;  %761 = vst.msk [vmem:[#allocation4 + $0xc8] sm:$0xff] %vm671_vm0, %v7856_v33 }
  0x8f   : > { %762 = vst.msk [vmem:[#allocation4 + $0xd0] sm:$0xff] %vm671_vm0, %v7856_v33  ;;  %763 = vst.msk [vmem:[#allocation4 + $0xd8] sm:$0xff] %vm671_vm0, %v7856_v33 }
  0x90   : > { %764 = vst.msk [vmem:[#allocation4 + $0xe0] sm:$0xff] %vm671_vm0, %v7856_v33  ;;  %765 = vst.msk [vmem:[#allocation4 + $0xe8] sm:$0xff] %vm671_vm0, %v7856_v33 }
  0x91   : > { %766 = vst.msk [vmem:[#allocation4 + $0xf0] sm:$0xff] %vm671_vm0, %v7856_v33  ;;  %767 = vst.msk [vmem:[#allocation4 + $0xf8] sm:$0xff] %vm671_vm0, %v7856_v33 }
  0x92   : > { %768 = vst.msk [vmem:[#allocation4 + $0x100] sm:$0xff] %vm671_vm0, %v7856_v33  ;;  %769 = vst.msk [vmem:[#allocation4 + $0x108] sm:$0xff] %vm671_vm0, %v7856_v33 }
  0x93   : > { %770 = vst.msk [vmem:[#allocation4 + $0x110] sm:$0xff] %vm671_vm0, %v7856_v33  ;;  %771 = vst.msk [vmem:[#allocation4 + $0x118] sm:$0xff] %vm671_vm0, %v7856_v33 }
  0x94   : > { %772 = vst.msk [vmem:[#allocation4 + $0x120] sm:$0xff] %vm671_vm0, %v7856_v33  ;;  %773 = vst.msk [vmem:[#allocation4 + $0x128] sm:$0xff] %vm671_vm0, %v7856_v33 }
  0x95   : > { %774 = vst.msk [vmem:[#allocation4 + $0x130] sm:$0xff] %vm671_vm0, %v7856_v33  ;;  %775 = vst.msk [vmem:[#allocation4 + $0x138] sm:$0xff] %vm671_vm0, %v7856_v33 }
  0x96   : > { %776 = vst.msk [vmem:[#allocation4 + $0x140] sm:$0xff] %vm671_vm0, %v7856_v33  ;;  %777 = vst.msk [vmem:[#allocation4 + $0x148] sm:$0xff] %vm671_vm0, %v7856_v33 }
  0x97   : > { %778 = vst.msk [vmem:[#allocation4 + $0x150] sm:$0xff] %vm671_vm0, %v7856_v33  ;;  %779 = vst.msk [vmem:[#allocation4 + $0x158] sm:$0xff] %vm671_vm0, %v7856_v33 }
  0x98   : > { %780 = vst.msk [vmem:[#allocation4 + $0x160] sm:$0xff] %vm671_vm0, %v7856_v33  ;;  %781 = vst.msk [vmem:[#allocation4 + $0x168] sm:$0xff] %vm671_vm0, %v7856_v33 }
  0x99   : > { %782 = vst.msk [vmem:[#allocation4 + $0x170] sm:$0xff] %vm671_vm0, %v7856_v33  ;;  %783 = vst.msk [vmem:[#allocation4 + $0x178] sm:$0xff] %vm671_vm0, %v7856_v33 }
  0x9a   : > { %784 = vst.msk [vmem:[#allocation4 + $0x180] sm:$0xff] %vm671_vm0, %v7856_v33  ;;  %785 = vst.msk [vmem:[#allocation4 + $0x188] sm:$0xff] %vm671_vm0, %v7856_v33 }
  0x9b   : > { %786 = vst.msk [vmem:[#allocation4 + $0x190] sm:$0xff] %vm671_vm0, %v7856_v33  ;;  %787 = vst.msk [vmem:[#allocation4 + $0x198] sm:$0xff] %vm671_vm0, %v7856_v33 }
  0x9c   : > { %788 = vst.msk [vmem:[#allocation4 + $0x1a0] sm:$0xff] %vm671_vm0, %v7856_v33  ;;  %789 = vst.msk [vmem:[#allocation4 + $0x1a8] sm:$0xff] %vm671_vm0, %v7856_v33 }
  0x9d   : > { %790 = vst.msk [vmem:[#allocation4 + $0x1b0] sm:$0xff] %vm671_vm0, %v7856_v33  ;;  %791 = vst.msk [vmem:[#allocation4 + $0x1b8] sm:$0xff] %vm671_vm0, %v7856_v33 }
  0x9e   : > { %792 = vst.msk [vmem:[#allocation4 + $0x1c0] sm:$0xff] %vm671_vm0, %v7856_v33  ;;  %793 = vst.msk [vmem:[#allocation4 + $0x1c8] sm:$0xff] %vm671_vm0, %v7856_v33 }
  0x9f   : > { %794 = vst.msk [vmem:[#allocation4 + $0x1d0] sm:$0xff] %vm671_vm0, %v7856_v33  ;;  %795 = vst.msk [vmem:[#allocation4 + $0x1d8] sm:$0xff] %vm671_vm0, %v7856_v33 }
  0xa0   : > { %796 = vst.msk [vmem:[#allocation4 + $0x1e0] sm:$0xff] %vm671_vm0, %v7856_v33  ;;  %797 = vst.msk [vmem:[#allocation4 + $0x1e8] sm:$0xff] %vm671_vm0, %v7856_v33 }
  0xa1   : > { %798 = vst.msk [vmem:[#allocation4 + $0x1f0] sm:$0xff] %vm671_vm0, %v7856_v33  ;;  %799 = vst.msk [vmem:[#allocation4 + $0x1f8] sm:$0xff] %vm671_vm0, %v7856_v33 }
  0xa2   : > { %801 = vst.msk [vmem:[#allocation5] sm:$0xff] %vm800_vm1, %v7856_v33  ;;  %802 = vst.msk [vmem:[#allocation5 + $0x8] sm:$0xff] %vm800_vm1, %v7856_v33 }
  0xa3   : > { %803 = vst.msk [vmem:[#allocation5 + $0x10] sm:$0xff] %vm800_vm1, %v7856_v33  ;;  %804 = vst.msk [vmem:[#allocation5 + $0x18] sm:$0xff] %vm800_vm1, %v7856_v33 }
  0xa4   : > { %805 = vst.msk [vmem:[#allocation5 + $0x20] sm:$0xff] %vm800_vm1, %v7856_v33  ;;  %806 = vst.msk [vmem:[#allocation5 + $0x28] sm:$0xff] %vm800_vm1, %v7856_v33 }
  0xa5   : > { %807 = vst.msk [vmem:[#allocation5 + $0x30] sm:$0xff] %vm800_vm1, %v7856_v33  ;;  %808 = vst.msk [vmem:[#allocation5 + $0x38] sm:$0xff] %vm800_vm1, %v7856_v33 }
  0xa6   : > { %809 = vst.msk [vmem:[#allocation5 + $0x40] sm:$0xff] %vm800_vm1, %v7856_v33  ;;  %810 = vst.msk [vmem:[#allocation5 + $0x48] sm:$0xff] %vm800_vm1, %v7856_v33 }
  0xa7   : > { %811 = vst.msk [vmem:[#allocation5 + $0x50] sm:$0xff] %vm800_vm1, %v7856_v33  ;;  %812 = vst.msk [vmem:[#allocation5 + $0x58] sm:$0xff] %vm800_vm1, %v7856_v33 }
  0xa8   : > { %813 = vst.msk [vmem:[#allocation5 + $0x60] sm:$0xff] %vm800_vm1, %v7856_v33  ;;  %814 = vst.msk [vmem:[#allocation5 + $0x68] sm:$0xff] %vm800_vm1, %v7856_v33 }
  0xa9   : > { %815 = vst.msk [vmem:[#allocation5 + $0x70] sm:$0xff] %vm800_vm1, %v7856_v33  ;;  %816 = vst.msk [vmem:[#allocation5 + $0x78] sm:$0xff] %vm800_vm1, %v7856_v33 }
  0xaa   : > { %817 = vst.msk [vmem:[#allocation5 + $0x80] sm:$0xff] %vm800_vm1, %v7856_v33  ;;  %818 = vst.msk [vmem:[#allocation5 + $0x88] sm:$0xff] %vm800_vm1, %v7856_v33 }
  0xab   : > { %819 = vst.msk [vmem:[#allocation5 + $0x90] sm:$0xff] %vm800_vm1, %v7856_v33  ;;  %820 = vst.msk [vmem:[#allocation5 + $0x98] sm:$0xff] %vm800_vm1, %v7856_v33 }
  0xac   : > { %821 = vst.msk [vmem:[#allocation5 + $0xa0] sm:$0xff] %vm800_vm1, %v7856_v33  ;;  %822 = vst.msk [vmem:[#allocation5 + $0xa8] sm:$0xff] %vm800_vm1, %v7856_v33 }
  0xad   : > { %823 = vst.msk [vmem:[#allocation5 + $0xb0] sm:$0xff] %vm800_vm1, %v7856_v33  ;;  %824 = vst.msk [vmem:[#allocation5 + $0xb8] sm:$0xff] %vm800_vm1, %v7856_v33 }
  0xae   : > { %825 = vst.msk [vmem:[#allocation5 + $0xc0] sm:$0xff] %vm800_vm1, %v7856_v33  ;;  %826 = vst.msk [vmem:[#allocation5 + $0xc8] sm:$0xff] %vm800_vm1, %v7856_v33 }
  0xaf   : > { %827 = vst.msk [vmem:[#allocation5 + $0xd0] sm:$0xff] %vm800_vm1, %v7856_v33  ;;  %828 = vst.msk [vmem:[#allocation5 + $0xd8] sm:$0xff] %vm800_vm1, %v7856_v33 }
  0xb0   : > { %829 = vst.msk [vmem:[#allocation5 + $0xe0] sm:$0xff] %vm800_vm1, %v7856_v33  ;;  %830 = vst.msk [vmem:[#allocation5 + $0xe8] sm:$0xff] %vm800_vm1, %v7856_v33 }
  0xb1   : > { %831 = vst.msk [vmem:[#allocation5 + $0xf0] sm:$0xff] %vm800_vm1, %v7856_v33  ;;  %832 = vst.msk [vmem:[#allocation5 + $0xf8] sm:$0xff] %vm800_vm1, %v7856_v33 }
  0xb2   : > { %833 = vst.msk [vmem:[#allocation5 + $0x100] sm:$0xff] %vm800_vm1, %v7856_v33  ;;  %834 = vst.msk [vmem:[#allocation5 + $0x108] sm:$0xff] %vm800_vm1, %v7856_v33 }
  0xb3   : > { %835 = vst.msk [vmem:[#allocation5 + $0x110] sm:$0xff] %vm800_vm1, %v7856_v33  ;;  %836 = vst.msk [vmem:[#allocation5 + $0x118] sm:$0xff] %vm800_vm1, %v7856_v33 }
  0xb4   : > { %837 = vst.msk [vmem:[#allocation5 + $0x120] sm:$0xff] %vm800_vm1, %v7856_v33  ;;  %838 = vst.msk [vmem:[#allocation5 + $0x128] sm:$0xff] %vm800_vm1, %v7856_v33 }
  0xb5   : > { %839 = vst.msk [vmem:[#allocation5 + $0x130] sm:$0xff] %vm800_vm1, %v7856_v33  ;;  %840 = vst.msk [vmem:[#allocation5 + $0x138] sm:$0xff] %vm800_vm1, %v7856_v33 }
  0xb6   : > { %841 = vst.msk [vmem:[#allocation5 + $0x140] sm:$0xff] %vm800_vm1, %v7856_v33  ;;  %842 = vst.msk [vmem:[#allocation5 + $0x148] sm:$0xff] %vm800_vm1, %v7856_v33 }
  0xb7   : > { %843 = vst.msk [vmem:[#allocation5 + $0x150] sm:$0xff] %vm800_vm1, %v7856_v33  ;;  %844 = vst.msk [vmem:[#allocation5 + $0x158] sm:$0xff] %vm800_vm1, %v7856_v33 }
  0xb8   : > { %845 = vst.msk [vmem:[#allocation5 + $0x160] sm:$0xff] %vm800_vm1, %v7856_v33  ;;  %846 = vst.msk [vmem:[#allocation5 + $0x168] sm:$0xff] %vm800_vm1, %v7856_v33 }
  0xb9   : > { %847 = vst.msk [vmem:[#allocation5 + $0x170] sm:$0xff] %vm800_vm1, %v7856_v33  ;;  %848 = vst.msk [vmem:[#allocation5 + $0x178] sm:$0xff] %vm800_vm1, %v7856_v33 }
  0xba   : > { %849 = vst.msk [vmem:[#allocation5 + $0x180] sm:$0xff] %vm800_vm1, %v7856_v33  ;;  %850 = vst.msk [vmem:[#allocation5 + $0x188] sm:$0xff] %vm800_vm1, %v7856_v33 }
  0xbb   : > { %851 = vst.msk [vmem:[#allocation5 + $0x190] sm:$0xff] %vm800_vm1, %v7856_v33  ;;  %852 = vst.msk [vmem:[#allocation5 + $0x198] sm:$0xff] %vm800_vm1, %v7856_v33 }
  0xbc   : > { %853 = vst.msk [vmem:[#allocation5 + $0x1a0] sm:$0xff] %vm800_vm1, %v7856_v33  ;;  %854 = vst.msk [vmem:[#allocation5 + $0x1a8] sm:$0xff] %vm800_vm1, %v7856_v33 }
  0xbd   : > { %855 = vst.msk [vmem:[#allocation5 + $0x1b0] sm:$0xff] %vm800_vm1, %v7856_v33  ;;  %856 = vst.msk [vmem:[#allocation5 + $0x1b8] sm:$0xff] %vm800_vm1, %v7856_v33 }
  0xbe   : > { %857 = vst.msk [vmem:[#allocation5 + $0x1c0] sm:$0xff] %vm800_vm1, %v7856_v33  ;;  %858 = vst.msk [vmem:[#allocation5 + $0x1c8] sm:$0xff] %vm800_vm1, %v7856_v33 }
  0xbf   : > { %859 = vst.msk [vmem:[#allocation5 + $0x1d0] sm:$0xff] %vm800_vm1, %v7856_v33  ;;  %860 = vst.msk [vmem:[#allocation5 + $0x1d8] sm:$0xff] %vm800_vm1, %v7856_v33 }
  0xc0   : > { %861 = vst.msk [vmem:[#allocation5 + $0x1e0] sm:$0xff] %vm800_vm1, %v7856_v33  ;;  %862 = vst.msk [vmem:[#allocation5 + $0x1e8] sm:$0xff] %vm800_vm1, %v7856_v33 }
  0xc1   : > { %863 = vst.msk [vmem:[#allocation5 + $0x1f0] sm:$0xff] %vm800_vm1, %v7856_v33  ;;  %864 = vst.msk [vmem:[#allocation5 + $0x1f8] sm:$0xff] %vm800_vm1, %v7856_v33 }
 0x13f   : > { %v6628_v35 = vpop.f32.mrf.mxu0  ;;  %v6636_v36 = vpop.f32.mrf.mxu1 }
 0x140   : > { %v600_v37 = vadd.f32 %v6628_v35, %v6221_v34  ;;  %v632_v38 = vadd.f32 %v6636_v36, %v6221_v34 }
 0x141   : > { %v591_v39 = vpop.f32.mrf.mxu0  ;;  %v623_v40 = vpop.f32.mrf.mxu1 }
 0x142   : > { %657 = vst.msk [vmem:[#allocation2 + $0x10] sm:$0xff] %vm654_vm2, %v600_v37  ;;  %665 = vst.msk [vmem:[#allocation2 + $0x50] sm:$0xff] %vm654_vm2, %v632_v38  ;;  %v592_v41 = vadd.f32 %v6221_v34, %v591_v39  ;;  %v624_v42 = vadd.f32 %v6221_v34, %v623_v40 }
 0x143   : > { %v6629_v43 = vpop.f32.mrf.mxu0  ;;  %v6637_v44 = vpop.f32.mrf.mxu1 }
 0x144   : > { %655 = vst.msk [vmem:[#allocation2] sm:$0xff] %vm654_vm2, %v592_v41  ;;  %663 = vst.msk [vmem:[#allocation2 + $0x40] sm:$0xff] %vm654_vm2, %v624_v42  ;;  %v603_v45 = vadd.f32 %v6629_v43, %v6221_v34  ;;  %v635_v46 = vadd.f32 %v6637_v44, %v6221_v34 }
 0x145   : > { %v594_v47 = vpop.f32.mrf.mxu0  ;;  %v626_v48 = vpop.f32.mrf.mxu1 }
 0x146   : > { %658 = vst.msk [vmem:[#allocation2 + $0x18] sm:$0xff] %vm654_vm2, %v603_v45  ;;  %666 = vst.msk [vmem:[#allocation2 + $0x58] sm:$0xff] %vm654_vm2, %v635_v46  ;;  %v595_v49 = vadd.f32 %v6221_v34, %v594_v47  ;;  %v627_v50 = vadd.f32 %v6221_v34, %v626_v48 }
 0x147   : > { %v6632_v51 = vpop.f32.mrf.mxu0  ;;  %v6640_v52 = vpop.f32.mrf.mxu1 }
 0x148   : > { %656 = vst.msk [vmem:[#allocation2 + $0x8] sm:$0xff] %vm654_vm2, %v595_v49  ;;  %664 = vst.msk [vmem:[#allocation2 + $0x48] sm:$0xff] %vm654_vm2, %v627_v50  ;;  %v616_v53 = vadd.f32 %v6632_v51, %v6221_v34  ;;  %v648_v54 = vadd.f32 %v6640_v52, %v6221_v34 }
 0x149   : > { %v607_v55 = vpop.f32.mrf.mxu0  ;;  %v639_v56 = vpop.f32.mrf.mxu1 }
 0x14a   : > { %661 = vst.msk [vmem:[#allocation2 + $0x30] sm:$0xff] %vm654_vm2, %v616_v53  ;;  %669 = vst.msk [vmem:[#allocation2 + $0x70] sm:$0xff] %vm654_vm2, %v648_v54  ;;  %v608_v57 = vadd.f32 %v6221_v34, %v607_v55  ;;  %v640_v58 = vadd.f32 %v6221_v34, %v639_v56 }
 0x14b   : > { %v6633_v59 = vpop.f32.mrf.mxu0  ;;  %v6641_v60 = vpop.f32.mrf.mxu1 }
 0x14c   : > { %659 = vst.msk [vmem:[#allocation2 + $0x20] sm:$0xff] %vm654_vm2, %v608_v57  ;;  %667 = vst.msk [vmem:[#allocation2 + $0x60] sm:$0xff] %vm654_vm2, %v640_v58  ;;  %v619_v61 = vadd.f32 %v6633_v59, %v6221_v34  ;;  %v651_v62 = vadd.f32 %v6641_v60, %v6221_v34 }
 0x14d   : > { %v610_v63 = vpop.f32.mrf.mxu0  ;;  %v642_v0 = vpop.f32.mrf.mxu1 }
 0x14e   : > { %662 = vst.msk [vmem:[#allocation2 + $0x38] sm:$0xff] %vm654_vm2, %v619_v61  ;;  %670 = vst.msk [vmem:[#allocation2 + $0x78] sm:$0xff] %vm654_vm2, %v651_v62  ;;  %v611_v1 = vadd.f32 %v6221_v34, %v610_v63  ;;  %v643_v2 = vadd.f32 %v6221_v34, %v642_v0 }
 0x150   : > { %660 = vst.msk [vmem:[#allocation2 + $0x28] sm:$0xff] %vm654_vm2, %v611_v1  ;;  %668 = vst.msk [vmem:[#allocation2 + $0x68] sm:$0xff] %vm654_vm2, %v643_v2 }
 0x151 PF: > { %s11322_s18 = sld [smem:[#allocation131_spill]]  ;;  %v7267_v7 = vld [vmem:[%s8067_s15] sm:$0xff]   ;;  %v8558_v12 = vld [vmem:[%s8067_s15 + $0x8] sm:$0xff]   ;;  %v8561_v13 = vld [vmem:[%s8067_s15 + $0x10] sm:$0xff]   ;;  %vm1312_vm3 = vcmask 130048   ;;  %s6256_s8 = sshll.u32 %s7831_s25, 7 }
 0x152   : > { %6658 = vmatprep.mubr.bf16.mxu0 %v7267_v7  ;;  %6690 = vmatprep.mubr.bf16.mxu1 %v7267_v7  ;;  %v8566_v14 = vld [vmem:[%s8067_s15 + $0x18] sm:$0xff]   ;;  %v8569_v15 = vld [vmem:[%s8067_s15 + $0x20] sm:$0xff]   ;;  %v8574_v16 = vld [vmem:[%s8067_s15 + $0x28] sm:$0xff]   ;;  %s11323_s11 = sld [smem:[#allocation133_spill]]  ;;  %vm1778_vm5 = vcmask 7168   ;;  %s7859_s19 = smov 112  }
 0x153   : > { %v8577_v17 = vld [vmem:[%s8067_s15 + $0x30] sm:$0xff]   ;;  %v8582_v18 = vld [vmem:[%s8067_s15 + $0x38] sm:$0xff]   ;;  %v1272_v19 = vld [vmem:[#allocation2] sm:$0xff]  ;;  %s11324_s3 = sld [smem:[#allocation132_spill]]  ;;  %s7860_s28 = smov 96  }
 0x154   : > { %v1273_v20 = vld [vmem:[#allocation2 + $0x8] sm:$0xff]  ;;  %s7861_s17 = smov 80   ;;  %p6289_p1 = scmp.ne.s32.totalorder %s7831_s25, 2 }
 0x155   : > { %v8585_v21 = vpack.c.bf16 %v1273_v20, %v1272_v19  ;;  %s5979_s25 = sld [smem:[#allocation6]] (!%p6289_p1) }
 0x156   : > { %s11686_s7 = sld [smem:[#allocation136_spill]] (!%p6289_p1) }
 0x157   : > { %v7259_v3 = vld [vmem:[%s11322_s18 + $0x38] sm:$0xff]   ;;  %v7260_v4 = vld [vmem:[%s11322_s18 + $0x30] sm:$0xff]   ;;  %v7261_v5 = vld [vmem:[%s11322_s18 + $0x28] sm:$0xff]  }
 0x158   : > { %6642 = vmatprep.subr.bf16.mxu0 %v7259_v3  ;;  %v7262_v6 = vld [vmem:[%s11322_s18 + $0x20] sm:$0xff]   ;;  %v7263_v8 = vld [vmem:[%s11322_s18 + $0x18] sm:$0xff]   ;;  %v7264_v9 = vld [vmem:[%s11322_s18 + $0x10] sm:$0xff]  }
 0x159   : > { %6643 = vmatpush3.bf16.msra.mxu0 %v7259_v3  ;;  %v7265_v10 = vld [vmem:[%s11322_s18 + $0x8] sm:$0xff]   ;;  %v7266_v11 = vld [vmem:[%s11322_s18] sm:$0xff]   ;;  %v7275_v22 = vld [vmem:[%s11323_s11 + $0x38] sm:$0xff]  }
 0x15a   : > { %6644 = vmatprep.subr.bf16.mxu0 %v7260_v4  ;;  %v7276_v23 = vld [vmem:[%s11323_s11 + $0x30] sm:$0xff]   ;;  %6674 = vmatprep.subr.bf16.mxu1 %v7275_v22  ;;  %v7277_v24 = vld [vmem:[%s11323_s11 + $0x28] sm:$0xff]   ;;  %v7278_v26 = vld [vmem:[%s11323_s11 + $0x20] sm:$0xff]  }
 0x15b   : > { %6675 = vmatpush3.bf16.msra.mxu1 %v7275_v22  ;;  %v8604_v27 = vld [vmem:[%s11324_s3] ss:$0 sm:$0xff]  ;;  %v7279_v32 = vld [vmem:[%s11323_s11 + $0x18] sm:$0xff]   ;;  %v7280_v39 = vld [vmem:[%s11323_s11 + $0x10] sm:$0xff]   ;;  %s11329_s3 = sld [smem:[#allocation134_spill]] }
 0x15c   : > { %6676 = vmatprep.subr.bf16.mxu1 %v7276_v23  ;;  %v7281_v42 = vld [vmem:[%s11323_s11 + $0x8] sm:$0xff]   ;;  %v7282_v45 = vld [vmem:[%s11323_s11] sm:$0xff]   ;;  %v1278_v22 = vld [vmem:[#allocation2 + $0x30] sm:$0xff]  ;;  %s6036_s12 = ssub.f32 (!%p6289_p1), 1.0, %s5979_s25 }
 0x15d   : > { %6645 = vmatpush3.bf16.msra.mxu0 %v7260_v4 }
 0x15e   : > { %6646 = vmatprep.subr.bf16.mxu0 %v7261_v5 }
 0x15f   : > { %6677 = vmatpush3.bf16.msra.mxu1 %v7276_v23  ;;  %v1279_v23 = vld [vmem:[#allocation2 + $0x38] sm:$0xff] }
 0x160   : > { %6678 = vmatprep.subr.bf16.mxu1 %v7277_v24 }
 0x161   : > { %6647 = vmatpush3.bf16.msra.mxu0 %v7261_v5 }
 0x162   : > { %6648 = vmatprep.subr.bf16.mxu0 %v7262_v6 }
 0x163   : > { %6679 = vmatpush3.bf16.msra.mxu1 %v7277_v24  ;;  %v1280_v24 = vld [vmem:[#allocation2 + $0x40] sm:$0xff] }
 0x164   : > { %6680 = vmatprep.subr.bf16.mxu1 %v7278_v26 }
 0x165   : > { %6649 = vmatpush3.bf16.msra.mxu0 %v7262_v6 }
 0x166   : > { %6650 = vmatprep.subr.bf16.mxu0 %v7263_v8 }
 0x167   : > { %6681 = vmatpush3.bf16.msra.mxu1 %v7278_v26  ;;  %v8697_v26 = vpack.c.bf16 %v1279_v23, %v1278_v22 }
 0x168   : > { %6682 = vmatprep.subr.bf16.mxu1 %v7279_v32 }
 0x169   : > { %6651 = vmatpush3.bf16.msra.mxu0 %v7263_v8 }
 0x16a   : > { %6652 = vmatprep.subr.bf16.mxu0 %v7264_v9 }
 0x16b   : > { %6683 = vmatpush3.bf16.msra.mxu1 %v7279_v32 }
 0x16c   : > { %6684 = vmatprep.subr.bf16.mxu1 %v7280_v39 }
 0x16d   : > { %6653 = vmatpush3.bf16.msra.mxu0 %v7264_v9 }
 0x16e   : > { %6654 = vmatprep.subr.bf16.mxu0 %v7265_v10 }
 0x16f   : > { %6685 = vmatpush3.bf16.msra.mxu1 %v7280_v39  ;;  %v1265_v39 = vlaneseq }
 0x170   : > { %6686 = vmatprep.subr.bf16.mxu1 %v7281_v42 }
 0x171   : > { %6655 = vmatpush3.bf16.msra.mxu0 %v7265_v10 }
 0x172   : > { %6656 = vmatprep.subr.bf16.mxu0 %v7266_v11 }
 0x173   : > { %6687 = vmatpush3.bf16.msra.mxu1 %v7281_v42 }
 0x174   : > { %6688 = vmatprep.subr.bf16.mxu1 %v7282_v45 }
 0x175   : > { %6657 = vmatpush3.bf16.msra.mxu0 %v7266_v11 }
 0x177   : > { %6689 = vmatpush3.bf16.msra.mxu1 %v7282_v45 }
 0x178   : > { %6659 = vmatmul.mubr.bf16.vlgmr.msra.gmra.mxu0 %v8558_v12 }
 0x179   : > { %6662 = vmatprep.mubr.bf16.mxu0 %v8561_v13 }
 0x17a   : > { %6691 = vmatmul.mubr.bf16.vlgmr.msra.gmra.mxu1 %v8558_v12 }
 0x17b   : > { %6694 = vmatprep.mubr.bf16.mxu1 %v8561_v13 }
 0x180   : > { %6663 = vmatmul.mubr.bf16.gmra.mxu0 %v8566_v14 }
 0x181   : > { %6666 = vmatprep.mubr.bf16.mxu0 %v8569_v15 }
 0x182   : > { %6695 = vmatmul.mubr.bf16.gmra.mxu1 %v8566_v14 }
 0x183   : > { %6698 = vmatprep.mubr.bf16.mxu1 %v8569_v15  ;;  %v1274_v15 = vld [vmem:[#allocation2 + $0x10] sm:$0xff] }
 0x188   : > { %6667 = vmatmul.mubr.bf16.gmra.mxu0 %v8574_v16 }
 0x189   : > { %6670 = vmatprep.mubr.bf16.mxu0 %v8577_v17 }
 0x18a   : > { %6699 = vmatmul.mubr.bf16.gmra.mxu1 %v8574_v16  ;;  %v1275_v16 = vld [vmem:[#allocation2 + $0x18] sm:$0xff] }
 0x18b   : > { %6702 = vmatprep.mubr.bf16.mxu1 %v8577_v17  ;;  %v1276_v17 = vld [vmem:[#allocation2 + $0x20] sm:$0xff]  ;;  %v8689_v19 = vpack.c.bf16 %v1275_v16, %v1274_v15 }
 0x190   : > { %6671 = vmatmul.mubr.bf16.gmra.mxu0 %v8582_v18 }
 0x191   : > { %6722 = vmatprep.mubr.msk.bf16.mxu0 %vm1312_vm3, %v8585_v21 }
 0x192   : > { %6703 = vmatmul.mubr.bf16.gmra.mxu1 %v8582_v18  ;;  %v1277_v18 = vld [vmem:[#allocation2 + $0x28] sm:$0xff] }
 0x193   : > { %v8691_v20 = vpack.c.bf16 %v1277_v18, %v1276_v17 }
 0x238   : > { %v6660_v25 = vpop.f32.mrf.mxu0 }
 0x239   : > { %v1043_v30 = vadd.f32 %v6660_v25, %v8604_v27  ;;  %v1281_v25 = vld [vmem:[#allocation2 + $0x48] sm:$0xff] }
 0x23a   : > { %v1034_v28 = vpop.f32.mrf.mxu0  ;;  %v6692_v23 = vpop.f32.mrf.mxu1 }
 0x23b   : > { %v1035_v34 = vadd.f32 %v8604_v27, %v1034_v28  ;;  %v1282_v28 = vld [vmem:[#allocation2 + $0x50] sm:$0xff] }
 0x23c   : > { %v6661_v29 = vpop.f32.mrf.mxu0 }
 0x23d   : > { %v1046_v31 = vadd.f32 %v6661_v29, %v8604_v27  ;;  %v1283_v29 = vld [vmem:[#allocation2 + $0x58] sm:$0xff] }
 0x23e   : > { %v1037_v33 = vpop.f32.mrf.mxu0  ;;  %v8705_v32 = vpack.c.bf16 %v1283_v29, %v1282_v28 }
 0x23f   : > { %v8612_v35 = vpack.c.bf16 %v1046_v31, %v1043_v30  ;;  %v1038_v36 = vadd.f32 %v8604_v27, %v1037_v33  ;;  %v1284_v30 = vld [vmem:[#allocation2 + $0x60] sm:$0xff]  ;;  %v1285_v31 = vld [vmem:[#allocation2 + $0x68] sm:$0xff] }
 0x240   : > { %v6664_v37 = vpop.f32.mrf.mxu0  ;;  %v8707_v33 = vpack.c.bf16 %v1285_v31, %v1284_v30 }
 0x241   : > { %11325 = vst [vmem:[#allocation22_spill] sm:$0xff] %v8612_v35  ;;  %v8615_v38 = vpack.c.bf16 %v1038_v36, %v1035_v34  ;;  %v1059_v5 = vadd.f32 %v6664_v37, %v8604_v27  ;;  %v1341_v13 = vsel %vm1312_vm3, %v8612_v35, 0  ;;  %v1286_v34 = vld [vmem:[#allocation2 + $0x70] sm:$0xff]  ;;  %v1287_v36 = vld [vmem:[#allocation2 + $0x78] sm:$0xff] }
 0x242   : > { %v1050_v40 = vpop.f32.mrf.mxu0  ;;  %v8713_v37 = vpack.c.bf16 %v1287_v36, %v1286_v34 }
 0x243   : > { %11326 = vst [vmem:[#allocation23_spill] sm:$0xff] %v8615_v38  ;;  %v1051_v9 = vadd.f32 %v8604_v27, %v1050_v40  ;;  %v1338_v14 = vsel %vm1312_vm3, %v8615_v38, 0  ;;  %v1266_v40 = vand.u32 127, %v1265_v39 }
 0x244   : > { %v6665_v41 = vpop.f32.mrf.mxu0 }
 0x245   : > { %v1062_v4 = vadd.f32 %v6665_v41, %v8604_v27  ;;  %v1268_v41 = vstv %s6256_s8 }
 0x246   : > { %v1053_v43 = vpop.f32.mrf.mxu0  ;;  %v1269_v42 = vadd.s32 %v1268_v41, %v1266_v40 }
 0x247   : > { %v8665_v6 = vpack.c.bf16 %v1062_v4, %v1059_v5  ;;  %v1054_v8 = vadd.f32 %v8604_v27, %v1053_v43  ;;  %v7857_v43 = vmov -1e+30  }
 0x248   : > { %v6668_v44 = vpop.f32.mrf.mxu0  ;;  %vm1270_vm4 = vcmp.lt.s32.totalorder %v1269_v42, 320  ;;  %v6247_v42 = vld [vmem:[%s11329_s3] ss:$0 sm:$0xff] }
 0x249   : > { %v1075_v61 = vadd.f32 %v6668_v44, %v8604_v27  ;;  %v8673_v10 = vpack.c.bf16 %v1054_v8, %v1051_v9  ;;  %v1347_v11 = vsel %vm1312_vm3, %v8665_v6, 0  ;;  %v8718_v44 = vsel %vm1270_vm4, 0.0, %v7857_v43 }
 0x24a   : > { %v1066_v46 = vpop.f32.mrf.mxu0  ;;  %11328 = vst [vmem:[#allocation25_spill] sm:$0xff] %v8718_v44 }
 0x24b   : > { %v1067_v1 = vadd.f32 %v8604_v27, %v1066_v46  ;;  %v1344_v12 = vsel %vm1312_vm3, %v8673_v10, 0 }
 0x24c   : > { %v6669_v47 = vpop.f32.mrf.mxu0 }
 0x24d   : > { %v1078_v60 = vadd.f32 %v6669_v47, %v8604_v27 }
 0x24e   : > { %v1069_v48 = vpop.f32.mrf.mxu0 }
 0x24f   : > { %v8646_v62 = vpack.c.bf16 %v1078_v60, %v1075_v61  ;;  %v1070_v0 = vadd.f32 %v8604_v27, %v1069_v48 }
 0x250   : > { %v6672_v49 = vpop.f32.mrf.mxu0 }
 0x251   : > { %v1091_v52 = vadd.f32 %v6672_v49, %v8604_v27  ;;  %v8656_v2 = vpack.c.bf16 %v1070_v0, %v1067_v1  ;;  %v1353_v3 = vsel %vm1312_vm3, %v8646_v62, 0 }
 0x252   : > { %v1082_v50 = vpop.f32.mrf.mxu0 }
 0x253   : > { %v1083_v55 = vadd.f32 %v8604_v27, %v1082_v50  ;;  %v1350_v7 = vsel %vm1312_vm3, %v8656_v2, 0 }
 0x254   : > { %v6673_v51 = vpop.f32.mrf.mxu0 }
 0x255   : > { %v1094_v53 = vadd.f32 %v6673_v51, %v8604_v27 }
 0x256   : > { %v1085_v54 = vpop.f32.mrf.mxu0 }
 0x257   : > { %v8631_v56 = vpack.c.bf16 %v1094_v53, %v1091_v52  ;;  %v1086_v57 = vadd.f32 %v8604_v27, %v1085_v54  ;;  %v8699_v27 = vpack.c.bf16 %v1281_v25, %v1280_v24  ;;  %v1202_v24 = vpop.f32.mrf.mxu1 }
 0x259   : > { %v8634_v58 = vpack.c.bf16 %v1086_v57, %v1083_v55  ;;  %7090 = vmatprep.subr.msk.bf16.mxu0 %vm1312_vm3, %v8631_v56  ;;  %v1359_v59 = vsel %vm1312_vm3, %v8631_v56, 0  ;;  %v6693_v25 = vpop.f32.mrf.mxu1 }
 0x25a   : > { %6707 = vmatpush3.bf16.xpose.msra.mxu0 %v1359_v59 }
 0x25b   : > { %11327 = vst [vmem:[#allocation24_spill] sm:$0xff] %v8634_v58  ;;  %7091 = vmatprep.subr.msk.bf16.mxu0 %vm1312_vm3, %v8634_v58  ;;  %v1356_v63 = vsel %vm1312_vm3, %v8634_v58, 0  ;;  %v1205_v28 = vpop.f32.mrf.mxu1 }
 0x25d   : > { %v6696_v29 = vpop.f32.mrf.mxu1 }
 0x25f   : > { %v1218_v30 = vpop.f32.mrf.mxu1 }
 0x261   : > { %v6697_v31 = vpop.f32.mrf.mxu1 }
 0x262   : > { %6709 = vmatpush3.bf16.xpose.msra.mxu0 %v1356_v63  ;;  %v7858_v63 = vmov 0  }
 0x263   : > { %7092 = vmatprep.subr.msk.bf16.mxu0 %vm1312_vm3, %v8646_v62  ;;  %7258 = vset.pattern.permute.xlu1 %v7858_v63  ;;  %v1221_v34 = vpop.f32.mrf.mxu1 }
 0x264   : > { %7257 = vset.pattern.permute.xlu0 %v7858_v63 }
 0x265   : > { %v6700_v36 = vpop.f32.mrf.mxu1 }
 0x267   : > { %v1234_v39 = vpop.f32.mrf.mxu1 }
 0x269   : > { %v6701_v40 = vpop.f32.mrf.mxu1 }
 0x26a   : > { %6711 = vmatpush3.bf16.xpose.msra.mxu0 %v1353_v3 }
 0x26b   : > { %7093 = vmatprep.subr.msk.bf16.mxu0 %vm1312_vm3, %v8656_v2  ;;  %v1237_v41 = vpop.f32.mrf.mxu1 }
 0x26d   : > { %v6704_v43 = vpop.f32.mrf.mxu1 }
 0x272   : > { %6713 = vmatpush3.bf16.xpose.msra.mxu0 %v1350_v7 }
 0x273   : > { %7094 = vmatprep.subr.msk.bf16.mxu0 %vm1312_vm3, %v8665_v6 }
 0x27a   : > { %6715 = vmatpush3.bf16.xpose.msra.mxu0 %v1347_v11 }
 0x27b   : > { %7095 = vmatprep.subr.msk.bf16.mxu0 %vm1312_vm3, %v8673_v10 }
 0x282   : > { %6717 = vmatpush3.bf16.xpose.msra.mxu0 %v1344_v12 }
 0x283   : > { %7096 = vmatprep.subr.msk.bf16.mxu0 %vm1312_vm3, %v8612_v35 }
 0x28a   : > { %6719 = vmatpush3.bf16.xpose.msra.mxu0 %v1341_v13 }
 0x28b   : > { %7097 = vmatprep.subr.msk.bf16.mxu0 %vm1312_vm3, %v8615_v38 }
 0x292   : > { %6721 = vmatpush3.bf16.xpose.msra.mxu0 %v1338_v14 }
 0x299   : > { %6723 = vmatmul.mubr.msk.bf16.vlgmr.msra.gmra.mxu0 %vm1312_vm3, %v8689_v19 }
 0x29a   : > { %6726 = vmatprep.mubr.msk.bf16.mxu0 %vm1312_vm3, %v8691_v20 }
 0x2a1   : > { %6727 = vmatmul.mubr.msk.bf16.gmra.mxu0 %vm1312_vm3, %v8697_v26 }
 0x2a2   : > { %6730 = vmatprep.mubr.msk.bf16.mxu0 %vm1312_vm3, %v8699_v27 }
 0x2a9   : > { %6731 = vmatmul.mubr.msk.bf16.gmra.mxu0 %vm1312_vm3, %v8705_v32 }
 0x2aa   : > { %6734 = vmatprep.mubr.msk.bf16.mxu0 %vm1312_vm3, %v8707_v33 }
 0x2b1   : > { %6735 = vmatmul.mubr.msk.bf16.gmra.mxu0 %vm1312_vm3, %v8713_v37 }
 0x359   : > { %v6724_v45 = vpop.f32.mrf.mxu0 }
 0x35a   : > { %v8721_v46 = vadd.f32 %v6724_v45, %v8718_v44  ;;  %v1250_v45 = vpop.f32.mrf.mxu1 }
 0x35b   : > { %v1395_v47 = vpop.f32.mrf.mxu0 }
 0x35c   : > { %v8724_v48 = vadd.f32 %v1395_v47, %v8718_v44  ;;  %1478 = vmax.xlane.f32.xlu1 %v8721_v46  ;;  %v1259_v47 = vadd.f32 %v6704_v43, %v6247_v42  ;;  %v1222_v43 = vadd.f32 %v6247_v42, %v1221_v34 }
 0x35d   : > { %v6725_v49 = vpop.f32.mrf.mxu0 }
 0x35e   : > { %v8728_v50 = vadd.f32 %v6725_v49, %v8718_v44  ;;  %1474 = vmax.xlane.f32.xlu0 %v8724_v48  ;;  %v6705_v49 = vpop.f32.mrf.mxu1 }
 0x35f   : > { %v1398_v51 = vpop.f32.mrf.mxu0 }
 0x360   : > { %v8732_v52 = vadd.f32 %v1398_v51, %v8718_v44  ;;  %1480 = vmax.xlane.f32.xlu1 %v8728_v50  ;;  %v1251_v51 = vadd.f32 %v6247_v42, %v1250_v45 }
 0x361   : > { %v6728_v53 = vpop.f32.mrf.mxu0 }
 0x362   : > { %v8736_v54 = vadd.f32 %v6728_v53, %v8718_v44  ;;  %1476 = vmax.xlane.f32.xlu0 %v8732_v52  ;;  %v1262_v53 = vadd.f32 %v6705_v49, %v6247_v42 }
 0x363   : > { %v1411_v55 = vpop.f32.mrf.mxu0 }
 0x364   : > { %v8740_v59 = vadd.f32 %v1411_v55, %v8718_v44  ;;  %v1253_v55 = vpop.f32.mrf.mxu1  ;;  %v8787_v63 = vpack.c.bf16 %v1262_v53, %v1259_v47  ;;  %v1206_v47 = vadd.f32 %v6247_v42, %v1205_v28 }
 0x365   : > { %v6729_v57 = vpop.f32.mrf.mxu0 }
 0x366   : > { %v8743_v60 = vadd.f32 %v6729_v57, %v8718_v44  ;;  %1486 = vmax.xlane.f32.xlu0 %v8736_v54  ;;  %v1243_v57 = vadd.f32 %v6700_v36, %v6247_v42  ;;  %11330 = vst [vmem:[#allocation26_spill] sm:$0xff] %v8787_v63  ;;  %6738 = vmatprep.subr.bf16.mxu1 %v8787_v63 }
 0x367   : > { %v1414_v61 = vpop.f32.mrf.mxu0  ;;  %6739 = vmatpush3.bf16.msra.mxu1 %v8787_v63  ;;  %v1219_v36 = vadd.f32 %v6247_v42, %v1218_v30 }
 0x368   : > { %v8747_v0 = vadd.f32 %v1414_v61, %v8718_v44  ;;  %1488 = vmax.xlane.f32.xlu1 %v8743_v60  ;;  %v1246_v61 = vadd.f32 %v6701_v40, %v6247_v42 }
 0x369   : > { %v6732_v1 = vpop.f32.mrf.mxu0  ;;  %v8805_v45 = vpack.c.bf16 %v1222_v43, %v1219_v36  ;;  %v8860_v43 = vld [vmem:[#allocation3 + $0x38] sm:$0xff] }
 0x36a   : > { %v8751_v3 = vadd.f32 %v6732_v1, %v8718_v44  ;;  %1482 = vmax.xlane.f32.xlu0 %v8740_v59  ;;  %v1254_v1 = vadd.f32 %v6247_v42, %v1253_v55  ;;  %v8836_v55 = vld [vmem:[#allocation3 + $0x8] sm:$0xff]  ;;  %11340 = vst [vmem:[#allocation36_spill] sm:$0xff] %v8860_v43 }
 0x36b   : > { %v1427_v4 = vpop.f32.mrf.mxu0  ;;  %11335 = vst [vmem:[#allocation31_spill] sm:$0xff] %v8805_v45 }
 0x36c   : > { %1484 = vmax.xlane.f32.xlu1 %v8747_v0  ;;  %v8756_v7 = vadd.f32 %v1427_v4, %v8718_v44  ;;  %v8789_v4 = vpack.c.bf16 %v1254_v1, %v1251_v51 }
 0x36d   : > { %v6733_v5 = vpop.f32.mrf.mxu0 }
 0x36e   : > { %v8759_v8 = vadd.f32 %v6733_v5, %v8718_v44  ;;  %1494 = vmax.xlane.f32.xlu0 %v8751_v3  ;;  %11331 = vst [vmem:[#allocation27_spill] sm:$0xff] %v8789_v4  ;;  %v1235_v5 = vadd.f32 %v6247_v42, %v1234_v39  ;;  %6740 = vmatprep.subr.bf16.mxu1 %v8789_v4 }
 0x36f   : > { %v1430_v9 = vpop.f32.mrf.mxu0  ;;  %6741 = vmatpush3.bf16.msra.mxu1 %v8789_v4  ;;  %v1211_v39 = vadd.f32 %v6692_v23, %v6247_v42  ;;  %v8819_v23 = vld [vmem:[#allocation3 + $0x10] sm:$0xff] }
 0x370   : > { %v8763_v11 = vadd.f32 %v1430_v9, %v8718_v44  ;;  %1496 = vmax.xlane.f32.xlu1 %v8759_v8  ;;  %v8793_v9 = vpack.c.bf16 %v1246_v61, %v1243_v57 }
 0x371   : > { %v6736_v12 = vpop.f32.mrf.mxu0 }
 0x372   : > { %v8767_v13 = vadd.f32 %v6736_v12, %v8718_v44  ;;  %1490 = vmax.xlane.f32.xlu0 %v8756_v7  ;;  %11332 = vst [vmem:[#allocation28_spill] sm:$0xff] %v8793_v9  ;;  %v1238_v12 = vadd.f32 %v6247_v42, %v1237_v41  ;;  %6742 = vmatprep.subr.bf16.mxu1 %v8793_v9 }
 0x373   : > { %v1443_v14 = vpop.f32.mrf.mxu0  ;;  %6743 = vmatpush3.bf16.msra.mxu1 %v8793_v9  ;;  %v1214_v41 = vadd.f32 %v6693_v25, %v6247_v42  ;;  %v8821_v25 = vld [vmem:[#allocation3] sm:$0xff] }
 0x374   : > { %1492 = vmax.xlane.f32.xlu1 %v8763_v11  ;;  %v8772_v16 = vadd.f32 %v1443_v14, %v8718_v44  ;;  %v1227_v14 = vadd.f32 %v6696_v29, %v6247_v42  ;;  %v1203_v29 = vadd.f32 %v6247_v42, %v1202_v24 }
 0x375   : > { %v6737_v15 = vpop.f32.mrf.mxu0 }
 0x376   : > { %v8775_v17 = vadd.f32 %v6737_v15, %v8718_v44  ;;  %1502 = vmax.xlane.f32.xlu0 %v8767_v13  ;;  %v1230_v15 = vadd.f32 %v6697_v31, %v6247_v42  ;;  %v8809_v31 = vpack.c.bf16 %v1214_v41, %v1211_v39  ;;  %v8813_v30 = vpack.c.bf16 %v1206_v47, %v1203_v29  ;;  %v8826_v42 = vld [vmem:[#allocation3 + $0x18] sm:$0xff]  ;;  %v8865_v29 = vld [vmem:[#allocation3 + $0x20] sm:$0xff] }
 0x377   : > { %v1446_v18 = vpop.f32.mrf.mxu0  ;;  %11342 = vst [vmem:[#allocation38_spill] sm:$0xff] %v8865_v29 }
 0x378   : > { %1504 = vmax.xlane.f32.xlu1 %v8775_v17  ;;  %v8780_v22 = vadd.f32 %v1446_v18, %v8718_v44  ;;  %v8797_v18 = vpack.c.bf16 %v1238_v12, %v1235_v5  ;;  %v8801_v40 = vpack.c.bf16 %v1230_v15, %v1227_v14  ;;  %11336 = vst [vmem:[#allocation32_spill] sm:$0xff] %v8809_v31  ;;  %11337 = vst [vmem:[#allocation33_spill] sm:$0xff] %v8813_v30  ;;  %v8853_v14 = vld [vmem:[#allocation3 + $0x30] sm:$0xff] }
 0x379   : > { %11339 = vst [vmem:[#allocation35_spill] sm:$0xff] %v8853_v14  ;;  %v8885_v5 = vld [vmem:[#allocation3 + $0x50] sm:$0xff] }
 0x37a   : > { %1498 = vmax.xlane.f32.xlu0 %v8772_v16  ;;  %11333 = vst [vmem:[#allocation29_spill] sm:$0xff] %v8797_v18  ;;  %11334 = vst [vmem:[#allocation30_spill] sm:$0xff] %v8801_v40  ;;  %6744 = vmatprep.subr.bf16.mxu1 %v8797_v18 }
 0x37b   : > { %6745 = vmatpush3.bf16.msra.mxu1 %v8797_v18  ;;  %11345 = vst [vmem:[#allocation41_spill] sm:$0xff] %v8885_v5 }
 0x37c   : > { %1500 = vmax.xlane.f32.xlu1 %v8780_v22  ;;  %6746 = vmatprep.subr.bf16.mxu1 %v8801_v40 }
 0x37f   : > { %6747 = vmatpush3.bf16.msra.mxu1 %v8801_v40 }
 0x380   : > { %6748 = vmatprep.subr.bf16.mxu1 %v8805_v45 }
 0x383   : > { %6749 = vmatpush3.bf16.msra.mxu1 %v8805_v45 }
 0x384   : > { %6750 = vmatprep.subr.bf16.mxu1 %v8809_v31 }
 0x387   : > { %6751 = vmatpush3.bf16.msra.mxu1 %v8809_v31 }
 0x388   : > { %6752 = vmatprep.subr.bf16.mxu1 %v8813_v30 }
 0x38b   : > { %6753 = vmatpush3.bf16.msra.mxu1 %v8813_v30 }
 0x3e5   : > { %v1479_v24 = vpop.xlane.xlu1 %1478 }
 0x3e6   : > { %v8824_v28 = vmax.f32 %v8819_v23, %v1479_v24 }
 0x3e7   : > { %v1475_v34 = vpop.xlane.xlu0 %1474 }
 0x3e8   : > { %2046 = vst.msk [vmem:[#allocation3 + $0x10] sm:$0xff] %vm1778_vm5, %v8824_v28  ;;  %v8833_v51 = vmax.f32 %v8821_v25, %v1475_v34  ;;  %1582 = vperm.xlu1 %7258, %v8824_v28  }
 0x3e9   : > { %v1481_v53 = vpop.xlane.xlu1 %1480 }
 0x3ea   : > { %2044 = vst.msk [vmem:[#allocation3] sm:$0xff] %vm1778_vm5, %v8833_v51  ;;  %v8843_v61 = vmax.f32 %v8826_v42, %v1481_v53  ;;  %1572 = vperm.xlu0 %7257, %v8833_v51   ;;  %v8875_v53 = vld [vmem:[#allocation3 + $0x28] sm:$0xff] }
 0x3eb   : > { %v1477_v1 = vpop.xlane.xlu0 %1476  ;;  %11344 = vst [vmem:[#allocation40_spill] sm:$0xff] %v8875_v53 }
 0x3ec   : > { %11338 = vst [vmem:[#allocation34_spill] sm:$0xff] %v8843_v61  ;;  %2047 = vst.msk [vmem:[#allocation3 + $0x18] sm:$0xff] %vm1778_vm5, %v8843_v61  ;;  %v8851_v12 = vmax.f32 %v8836_v55, %v1477_v1  ;;  %v8896_v1 = vld [vmem:[#allocation3 + $0x58] sm:$0xff] }
 0x3ed   : > { %11347 = vst [vmem:[#allocation43_spill] sm:$0xff] %v8896_v1 }
 0x3ee   : > { %2045 = vst.msk [vmem:[#allocation3 + $0x8] sm:$0xff] %vm1778_vm5, %v8851_v12  ;;  %1577 = vperm.xlu1 %7258, %v8851_v12  }
 0x3ef   : > { %v1487_v36 = vpop.xlane.xlu0 %1486 }
 0x3f0   : > { %v8863_v39 = vmax.f32 %v8853_v14, %v1487_v36  ;;  %v8938_v14 = vld [vmem:[#allocation3 + $0x78] sm:$0xff] }
 0x3f1   : > { %v1489_v41 = vpop.xlane.xlu1 %1488  ;;  %11355 = vst [vmem:[#allocation51_spill] sm:$0xff] %v8938_v14 }
 0x3f2   : > { %11341 = vst [vmem:[#allocation37_spill] sm:$0xff] %v8863_v39  ;;  %2050 = vst.msk [vmem:[#allocation3 + $0x30] sm:$0xff] %vm1778_vm5, %v8863_v39  ;;  %v8872_v24 = vmax.f32 %v8860_v43, %v1489_v41  ;;  %1587 = vperm.xlu1 %7258, %v8843_v61  }
 0x3f3   : > { %v1483_v34 = vpop.xlane.xlu0 %1482 }
 0x3f4   : > { %11343 = vst [vmem:[#allocation39_spill] sm:$0xff] %v8872_v24  ;;  %2051 = vst.msk [vmem:[#allocation3 + $0x38] sm:$0xff] %vm1778_vm5, %v8872_v24  ;;  %v8882_v36 = vmax.f32 %v8865_v29, %v1483_v34  ;;  %1607 = vperm.xlu0 %7257, %v8872_v24   ;;  %v8905_v24 = vld [vmem:[#allocation3 + $0x40] sm:$0xff] }
 0x3f5   : > { %v1485_v47 = vpop.xlane.xlu1 %1484  ;;  %11349 = vst [vmem:[#allocation45_spill] sm:$0xff] %v8905_v24 }
 0x3f6   : > { %2048 = vst.msk [vmem:[#allocation3 + $0x20] sm:$0xff] %vm1778_vm5, %v8882_v36  ;;  %v8892_v49 = vmax.f32 %v8875_v53, %v1485_v47  ;;  %2130 = vrot.lane.b32.xlu1 %v8631_v56, %s7859_s19 }
 0x3f7   : > { %v1495_v34 = vpop.xlane.xlu0 %1494 }
 0x3f8   : > { %11346 = vst [vmem:[#allocation42_spill] sm:$0xff] %v8892_v49  ;;  %2049 = vst.msk [vmem:[#allocation3 + $0x28] sm:$0xff] %vm1778_vm5, %v8892_v49  ;;  %v8903_v41 = vmax.f32 %v8885_v5, %v1495_v34  ;;  %v8917_v34 = vld [vmem:[#allocation3 + $0x48] sm:$0xff] }
 0x3f9   : > { %v1497_v15 = vpop.xlane.xlu1 %1496  ;;  %11351 = vst [vmem:[#allocation47_spill] sm:$0xff] %v8917_v34 }
 0x3fa   : > { %11348 = vst [vmem:[#allocation44_spill] sm:$0xff] %v8903_v41  ;;  %2054 = vst.msk [vmem:[#allocation3 + $0x50] sm:$0xff] %vm1778_vm5, %v8903_v41  ;;  %v8912_v43 = vmax.f32 %v8896_v1, %v1497_v15  ;;  %2128 = vrot.lane.b32.xlu1 %v8634_v58, %s7859_s19  ;;  %1622 = vperm.xlu0 %7257, %v8903_v41   ;;  %v8926_v15 = vld [vmem:[#allocation3 + $0x70] sm:$0xff] }
 0x3fb   : > { %v1491_v57 = vpop.xlane.xlu0 %1490  ;;  %11353 = vst [vmem:[#allocation49_spill] sm:$0xff] %v8926_v15 }
 0x3fc   : > { %11350 = vst [vmem:[#allocation46_spill] sm:$0xff] %v8912_v43  ;;  %2055 = vst.msk [vmem:[#allocation3 + $0x58] sm:$0xff] %vm1778_vm5, %v8912_v43  ;;  %v8924_v47 = vmax.f32 %v8905_v24, %v1491_v57 }
 0x3fd   : > { %v1493_v5 = vpop.xlane.xlu1 %1492 }
 0x3fe   : > { %11352 = vst [vmem:[#allocation48_spill] sm:$0xff] %v8924_v47  ;;  %2052 = vst.msk [vmem:[#allocation3 + $0x40] sm:$0xff] %vm1778_vm5, %v8924_v47  ;;  %v8933_v41 = vmax.f32 %v8917_v34, %v1493_v5  ;;  %2126 = vrot.lane.b32.xlu1 %v8646_v62, %s7859_s19  ;;  %1612 = vperm.xlu0 %7257, %v8924_v47   ;;  %v8947_v5 = vld [vmem:[#allocation3 + $0x60] sm:$0xff]  ;;  %v8959_v34 = vld [vmem:[#allocation3 + $0x68] sm:$0xff] }
 0x3ff   : > { %v1503_v57 = vpop.xlane.xlu0 %1502  ;;  %11357 = vst [vmem:[#allocation53_spill] sm:$0xff] %v8947_v5  ;;  %11359 = vst [vmem:[#allocation55_spill] sm:$0xff] %v8959_v34 }
 0x400   : > { %11354 = vst [vmem:[#allocation50_spill] sm:$0xff] %v8933_v41  ;;  %2053 = vst.msk [vmem:[#allocation3 + $0x48] sm:$0xff] %vm1778_vm5, %v8933_v41  ;;  %v8945_v53 = vmax.f32 %v8926_v15, %v1503_v57 }
 0x401   : > { %v1505_v24 = vpop.xlane.xlu1 %1504 }
 0x402   : > { %11356 = vst [vmem:[#allocation52_spill] sm:$0xff] %v8945_v53  ;;  %v8950_v29 = vmax.f32 %v8938_v14, %v1505_v24  ;;  %1602 = vperm.xlu1 %7258, %v8863_v39   ;;  %2124 = vrot.lane.b32.xlu0 %v8656_v2, %s7859_s19  ;;  %2058 = vst.msk [vmem:[#allocation3 + $0x70] sm:$0xff] %vm1778_vm5, %v8945_v53 }
 0x403   : > { %v1499_v57 = vpop.xlane.xlu0 %1498 }
 0x404   : > { %11358 = vst [vmem:[#allocation54_spill] sm:$0xff] %v8950_v29  ;;  %2059 = vst.msk [vmem:[#allocation3 + $0x78] sm:$0xff] %vm1778_vm5, %v8950_v29  ;;  %v8966_v24 = vmax.f32 %v8947_v5, %v1499_v57 }
 0x405   : > { %v1501_v39 = vpop.xlane.xlu1 %1500 }
 0x406   : > { %11360 = vst [vmem:[#allocation56_spill] sm:$0xff] %v8966_v24  ;;  %v8969_v61 = vmax.f32 %v8959_v34, %v1501_v39  ;;  %1592 = vperm.xlu1 %7258, %v8882_v36   ;;  %2056 = vst.msk [vmem:[#allocation3 + $0x60] sm:$0xff] %vm1778_vm5, %v8966_v24 }
 0x408   : > { %11361 = vst [vmem:[#allocation57_spill] sm:$0xff] %v8969_v61  ;;  %2057 = vst.msk [vmem:[#allocation3 + $0x68] sm:$0xff] %vm1778_vm5, %v8969_v61  ;;  %1637 = vperm.xlu0 %7257, %v8969_v61  }
 0x40a   : > { %1597 = vperm.xlu1 %7258, %v8892_v49  }
 0x40c   : > { %1647 = vperm.xlu0 %7257, %v8950_v29  }
 0x40e   : > { %1627 = vperm.xlu1 %7258, %v8912_v43  }
 0x410   : > { %2120 = vrot.lane.b32.xlu0 %v8673_v10, %s7859_s19 }
 0x412   : > { %1617 = vperm.xlu1 %7258, %v8933_v41   ;;  %v9216_v41 = vld [vmem:[#allocation3 + $0x88] sm:$0xff] }
 0x413   : > { %11383 = vst [vmem:[#allocation79_spill] sm:$0xff] %v9216_v41 }
 0x414   : > { %2116 = vrot.lane.b32.xlu0 %v8615_v38, %s7859_s19 }
 0x416   : > { %1642 = vperm.xlu1 %7258, %v8945_v53  }
 0x418   : > { %2094 = vrot.lane.b32.xlu0 %v8689_v19, %s7859_s19 }
 0x41a   : > { %1632 = vperm.xlu1 %7258, %v8966_v24  }
 0x41c   : > { %2098 = vrot.lane.b32.xlu0 %v8697_v26, %s7859_s19 }
 0x41e   : > { %2122 = vrot.lane.b32.xlu1 %v8665_v6, %s7859_s19 }
 0x420   : > { %2102 = vrot.lane.b32.xlu0 %v8705_v32, %s7859_s19 }
 0x422   : > { %2118 = vrot.lane.b32.xlu1 %v8612_v35, %s7859_s19 }
 0x424   : > { %2106 = vrot.lane.b32.xlu0 %v8713_v37, %s7859_s19 }
 0x426   : > { %2092 = vrot.lane.b32.xlu1 %v8585_v21, %s7859_s19 }
 0x42a   : > { %2096 = vrot.lane.b32.xlu1 %v8691_v20, %s7859_s19 }
 0x42e   : > { %2100 = vrot.lane.b32.xlu1 %v8699_v27, %s7859_s19 }
 0x432   : > { %2104 = vrot.lane.b32.xlu1 %v8707_v33, %s7859_s19 }
 0x463   : > { %v1583_v19 = vpop.permute.xlu1 %1582 }
 0x464   : > { %v1652_v39 = vsub.f32 %v8721_v46, %v1583_v19 }
 0x465   : > { %v1573_v26 = vpop.permute.xlu0 %1572 }
 0x466   : > { %v1650_v32 = vsub.f32 %v8724_v48, %v1573_v26  ;;  %v1670_v1 = vmul.f32 1.442695, %v1652_v39 }
 0x468   : > { %v1666_v57 = vmul.f32 1.442695, %v1650_v32 }
 0x469   : > { %v1578_v37 = vpop.permute.xlu1 %1577 }
 0x46a   : > { %v1651_v47 = vsub.f32 %v8732_v52, %v1578_v37  ;;  %7283 = vpow2.f32 %v1666_v57 }
 0x46c   : > { %v1668_v21 = vmul.f32 1.442695, %v1651_v47 }
 0x46d   : > { %v1588_v20 = vpop.permute.xlu1 %1587 }
 0x46e   : > { %7285 = vpow2.f32 %v1668_v21  ;;  %v1653_v27 = vsub.f32 %v8728_v50, %v1588_v20 }
 0x46f   : > { %7287 = vpow2.f32 %v1670_v1  ;;  %v1608_v26 = vpop.permute.xlu0 %1607 }
 0x470   : > { %v1672_v29 = vmul.f32 1.442695, %v1653_v27  ;;  %v1657_v14 = vsub.f32 %v8743_v60, %v1608_v26 }
 0x471   : > { %v2131_v33 = vpop.permute.xlu1 %2130 }
 0x472   : > { %7289 = vpow2.f32 %v1672_v29  ;;  %7098 = vmatprep.subr.msk.bf16.mxu1 %vm1312_vm3, %v2131_v33  ;;  %v2178_v27 = vsel %vm1312_vm3, %v2131_v33, 0  ;;  %v1680_v61 = vmul.f32 1.442695, %v1657_v14 }
 0x475   : > { %v2129_v48 = vpop.permute.xlu1 %2128  ;;  %v1623_v52 = vpop.permute.xlu0 %1622 }
 0x476   : > { %v2175_v60 = vsel %vm1312_vm3, %v2129_v48, 0 }
 0x477   : > { %v9016_v19 = vpop.eup %7283 }
 0x479   : > { %v2127_v46 = vpop.permute.xlu1 %2126  ;;  %v1613_v37 = vpop.permute.xlu0 %1612 }
 0x47a   : > { %v1658_v34 = vsub.f32 %v8756_v7, %v1613_v37 }
 0x47b   : > { %v9018_v32 = vpop.eup %7285 }
 0x47c   : > { %v1907_v47 = vpack.c.bf16 %v9018_v32, %v9016_v19  ;;  %v9022_v57 = vpop.eup %7287 }
 0x47d   : > { %v1603_v39 = vpop.permute.xlu1 %1602 }
 0x47e   : > { %6754 = vmatprep.mubr.bf16.mxu1 %v1907_v47  ;;  %v1656_v29 = vsub.f32 %v8736_v54, %v1603_v39  ;;  %v2125_v39 = vpop.permute.xlu0 %2124 }
 0x47f   : > { %v9024_v50 = vpop.eup %7289 }
 0x480   : > { %v1908_v1 = vpack.c.bf16 %v9024_v50, %v9022_v57  ;;  %v1678_v53 = vmul.f32 1.442695, %v1656_v29  ;;  %v1660_v29 = vsub.f32 %v8751_v3, %v1623_v52  ;;  %v2172_v3 = vsel %vm1312_vm3, %v2127_v46, 0 }
 0x481   : > { %v1593_v21 = vpop.permute.xlu1 %1592 }
 0x482   : > { %v1654_v20 = vsub.f32 %v8740_v59, %v1593_v21  ;;  %6755 = vmatmul.mubr.bf16.vlgmr.msra.gmra.mxu1 %v1908_v1  ;;  %7291 = vpow2.f32 %v1678_v53  ;;  %v1682_v1 = vmul.f32 1.442695, %v1658_v34  ;;  %v1686_v53 = vmul.f32 1.442695, %v1660_v29 }
 0x483   : > { %6771 = vmatpush3.bf16.xpose.msra.mxu1 %v2178_v27  ;;  %v1638_v26 = vpop.permute.xlu0 %1637 }
 0x484   : > { %7099 = vmatprep.subr.msk.bf16.mxu1 %vm1312_vm3, %v2129_v48  ;;  %v1674_v47 = vmul.f32 1.442695, %v1654_v20 }
 0x485   : > { %v1598_v15 = vpop.permute.xlu1 %1597 }
 0x486   : > { %v1655_v54 = vsub.f32 %v8747_v0, %v1598_v15  ;;  %7293 = vpow2.f32 %v1674_v47  ;;  %v1663_v15 = vsub.f32 %v8780_v22, %v1638_v26 }
 0x488   : > { %v1676_v24 = vmul.f32 1.442695, %v1655_v54  ;;  %v1692_v34 = vmul.f32 1.442695, %v1663_v15 }
 0x489   : > { %v1628_v59 = vpop.permute.xlu1 %1627 }
 0x48a   : > { %7295 = vpow2.f32 %v1676_v24  ;;  %v1661_v33 = vsub.f32 %v8759_v8, %v1628_v59  ;;  %v1648_v8 = vpop.permute.xlu0 %1647  ;;  %v2169_v59 = vsel %vm1312_vm3, %v2125_v39, 0 }
 0x48b   : > { %6773 = vmatpush3.bf16.xpose.msra.mxu1 %v2175_v60  ;;  %7297 = vpow2.f32 %v1680_v61  ;;  %v1665_v52 = vsub.f32 %v8775_v17, %v1648_v8 }
 0x48c   : > { %7100 = vmatprep.subr.msk.bf16.mxu1 %vm1312_vm3, %v2127_v46  ;;  %v1688_v0 = vmul.f32 1.442695, %v1661_v33  ;;  %7299 = vpow2.f32 %v1682_v1 }
 0x48d   : > { %v1618_v14 = vpop.permute.xlu1 %1617 }
 0x48e   : > { %v1659_v7 = vsub.f32 %v8763_v11, %v1618_v14  ;;  %7301 = vpow2.f32 %v1688_v0  ;;  %v2121_v14 = vpop.permute.xlu0 %2120 }
 0x48f   : > { %v9045_v11 = vpop.eup %7291 }
 0x490   : > { %v1684_v24 = vmul.f32 1.442695, %v1659_v7 }
 0x491   : > { %v1643_v48 = vpop.permute.xlu1 %1642 }
 0x492   : > { %7303 = vpow2.f32 %v1684_v24  ;;  %v1664_v61 = vsub.f32 %v8767_v13, %v1643_v48  ;;  %v1696_v13 = vmul.f32 1.442695, %v1665_v52 }
 0x493   : > { %6775 = vmatpush3.bf16.xpose.msra.mxu1 %v2172_v3  ;;  %7305 = vpow2.f32 %v1686_v53  ;;  %v9047_v21 = vpop.eup %7293 }
 0x494   : > { %7101 = vmatprep.subr.msk.bf16.mxu1 %vm1312_vm3, %v2125_v39  ;;  %v1694_v37 = vmul.f32 1.442695, %v1664_v61  ;;  %7307 = vpow2.f32 %v1692_v34  ;;  %v2163_v61 = vsel %vm1312_vm3, %v2121_v14, 0 }
 0x495   : > { %v1633_v22 = vpop.permute.xlu1 %1632 }
 0x496   : > { %v1662_v20 = vsub.f32 %v8772_v16, %v1633_v22  ;;  %7309 = vpow2.f32 %v1694_v37  ;;  %v2117_v37 = vpop.permute.xlu0 %2116 }
 0x497   : > { %v9050_v27 = vpop.eup %7295  ;;  %v2157_v22 = vsel %vm1312_vm3, %v2117_v37, 0 }
 0x498   : > { %v1690_v46 = vmul.f32 1.442695, %v1662_v20  ;;  %v1909_v47 = vpack.c.bf16 %v9050_v27, %v9047_v21  ;;  %v9054_v54 = vpop.eup %7297 }
 0x499   : > { %v2123_v17 = vpop.permute.xlu1 %2122  ;;  %v1910_v33 = vpack.c.bf16 %v9054_v54, %v9045_v11  ;;  %v9060_v16 = vpop.eup %7299 }
 0x49a   : > { %7311 = vpow2.f32 %v1690_v46  ;;  %6758 = vmatprep.mubr.bf16.mxu1 %v1909_v47  ;;  %v2166_v39 = vsel %vm1312_vm3, %v2123_v17, 0  ;;  %v2095_v20 = vpop.permute.xlu0 %2094 }
 0x49b   : > { %6777 = vmatpush3.bf16.xpose.msra.mxu1 %v2169_v59  ;;  %7313 = vpow2.f32 %v1696_v13  ;;  %v9062_v60 = vpop.eup %7301 }
 0x49c   : > { %6759 = vmatmul.mubr.bf16.gmra.mxu1 %v1910_v33  ;;  %7102 = vmatprep.subr.msk.bf16.mxu1 %vm1312_vm3, %v2123_v17 }
 0x49d   : > { %v2119_v15 = vpop.permute.xlu1 %2118 }
 0x49e   : > { %v2160_v52 = vsel %vm1312_vm3, %v2119_v15, 0  ;;  %v2099_v46 = vpop.permute.xlu0 %2098 }
 0x49f   : > { %v9064_v26 = vpop.eup %7303 }
 0x4a0   : > { %v1911_v29 = vpack.c.bf16 %v9064_v26, %v9060_v16  ;;  %v9068_v1 = vpop.eup %7305 }
 0x4a1   : > { %v1912_v0 = vpack.c.bf16 %v9062_v60, %v9068_v1  ;;  %v9074_v7 = vpop.eup %7307  ;;  %v2093_v34 = vpop.permute.xlu1 %2092 }
 0x4a2   : > { %6762 = vmatprep.mubr.bf16.mxu1 %v1911_v29  ;;  %v2103_v17 = vpop.permute.xlu0 %2102 }
 0x4a3   : > { %6779 = vmatpush3.bf16.xpose.msra.mxu1 %v2166_v39  ;;  %v9076_v53 = vpop.eup %7309 }
 0x4a4   : > { %6763 = vmatmul.mubr.bf16.gmra.mxu1 %v1912_v0  ;;  %7103 = vmatprep.subr.msk.bf16.mxu1 %vm1312_vm3, %v2121_v14 }
 0x4a5   : > { %v2097_v13 = vpop.permute.xlu1 %2096 }
 0x4a6   : > { %v2107_v33 = vpop.permute.xlu0 %2106 }
 0x4a7   : > { %v9078_v24 = vpop.eup %7311 }
 0x4a8   : > { %v1913_v8 = vpack.c.bf16 %v9074_v7, %v9078_v24  ;;  %v9082_v48 = vpop.eup %7313 }
 0x4a9   : > { %v1914_v3 = vpack.c.bf16 %v9082_v48, %v9076_v53  ;;  %v2101_v47 = vpop.permute.xlu1 %2100 }
 0x4aa   : > { %6766 = vmatprep.mubr.bf16.mxu1 %v1913_v8 }
 0x4ab   : > { %6781 = vmatpush3.bf16.xpose.msra.mxu1 %v2163_v61 }
 0x4ac   : > { %6767 = vmatmul.mubr.bf16.gmra.mxu1 %v1914_v3  ;;  %7104 = vmatprep.subr.msk.bf16.mxu1 %vm1312_vm3, %v2119_v15 }
 0x4ad   : > { %6786 = vmatprep.mubr.msk.bf16.mxu1 %vm1312_vm3, %v2093_v34  ;;  %v2105_v59 = vpop.permute.xlu1 %2104 }
 0x4b3   : > { %6783 = vmatpush3.bf16.xpose.msra.mxu1 %v2160_v52 }
 0x4b4   : > { %7105 = vmatprep.subr.msk.bf16.mxu1 %vm1312_vm3, %v2117_v37 }
 0x4bb   : > { %6785 = vmatpush3.bf16.xpose.msra.mxu1 %v2157_v22 }
 0x4c2   : > { %6787 = vmatmul.mubr.msk.bf16.vlgmr.msra.gmra.mxu1 %vm1312_vm3, %v2095_v20 }
 0x4c3   : > { %6790 = vmatprep.mubr.msk.bf16.mxu1 %vm1312_vm3, %v2097_v13 }
 0x4ca   : > { %6791 = vmatmul.mubr.msk.bf16.gmra.mxu1 %vm1312_vm3, %v2099_v46 }
 0x4cb   : > { %6794 = vmatprep.mubr.msk.bf16.mxu1 %vm1312_vm3, %v2101_v47 }
 0x4d2   : > { %6795 = vmatmul.mubr.msk.bf16.gmra.mxu1 %vm1312_vm3, %v2103_v17 }
 0x4d3   : > { %6798 = vmatprep.mubr.msk.bf16.mxu1 %vm1312_vm3, %v2105_v59 }
 0x4da   : > { %6799 = vmatmul.mubr.msk.bf16.gmra.mxu1 %vm1312_vm3, %v2107_v33 }
 0x542   : > { %v9099_v29 = vpop.f32.mrf.mxu1 }
 0x543   : > { %11362 = vst [vmem:[#allocation58_spill] sm:$0xff] %v9099_v29 }
 0x544   : > { %v9101_v39 = vpop.f32.mrf.mxu1 }
 0x545   : > { %11363 = vst [vmem:[#allocation59_spill] sm:$0xff] %v9101_v39 }
 0x546   : > { %v9103_v0 = vpop.f32.mrf.mxu1 }
 0x547   : > { %11364 = vst [vmem:[#allocation60_spill] sm:$0xff] %v9103_v0 }
 0x548   : > { %v9105_v14 = vpop.f32.mrf.mxu1 }
 0x549   : > { %11365 = vst [vmem:[#allocation61_spill] sm:$0xff] %v9105_v14  ;;  %v9201_v14 = vld [vmem:[#allocation3 + $0x80] sm:$0xff] }
 0x54a   : > { %11379 = vst [vmem:[#allocation75_spill] sm:$0xff] %v9201_v14 }
 0x55c   : > { %v9107_v15 = vpop.f32.mrf.mxu1 }
 0x55d   : > { %11366 = vst [vmem:[#allocation62_spill] sm:$0xff] %v9107_v15 }
 0x55e   : > { %v9109_v8 = vpop.f32.mrf.mxu1 }
 0x55f   : > { %11367 = vst [vmem:[#allocation63_spill] sm:$0xff] %v9109_v8 }
 0x560   : > { %v9111_v61 = vpop.f32.mrf.mxu1 }
 0x561   : > { %11368 = vst [vmem:[#allocation64_spill] sm:$0xff] %v9111_v61 }
 0x562   : > { %v9113_v3 = vpop.f32.mrf.mxu1 }
 0x563   : > { %11369 = vst [vmem:[#allocation65_spill] sm:$0xff] %v9113_v3 }
 0x564   : > { %v9115_v34 = vpop.f32.mrf.mxu1 }
 0x565   : > { %11370 = vst [vmem:[#allocation66_spill] sm:$0xff] %v9115_v34 }
 0x566   : > { %v9117_v52 = vpop.f32.mrf.mxu1 }
 0x567   : > { %11371 = vst [vmem:[#allocation67_spill] sm:$0xff] %v9117_v52 }
 0x568   : > { %v9119_v37 = vpop.f32.mrf.mxu1 }
 0x569   : > { %11372 = vst [vmem:[#allocation68_spill] sm:$0xff] %v9119_v37 }
 0x56a   : > { %v9121_v22 = vpop.f32.mrf.mxu1 }
 0x56b   : > { %11373 = vst [vmem:[#allocation69_spill] sm:$0xff] %v9121_v22 }
 0x56c   : > { %v9123_v20 = vpop.f32.mrf.mxu1 }
 0x56d   : > { %11374 = vst [vmem:[#allocation70_spill] sm:$0xff] %v9123_v20 }
 0x56e   : > { %v9125_v13 = vpop.f32.mrf.mxu1 }
 0x56f   : > { %11375 = vst [vmem:[#allocation71_spill] sm:$0xff] %v9125_v13 }
 0x570   : > { %v9127_v46 = vpop.f32.mrf.mxu1 }
 0x571   : > { %11376 = vst [vmem:[#allocation72_spill] sm:$0xff] %v9127_v46 }
 0x572   : > { %v9129_v47 = vpop.f32.mrf.mxu1 }
 0x573   : > { %11377 = vst [vmem:[#allocation73_spill] sm:$0xff] %v9129_v47 }
 0x582   : > { %v6788_v17 = vpop.f32.mrf.mxu1 }
 0x583   : > { %v9132_v59 = vadd.f32 %v6788_v17, %v8718_v44 }
 0x584   : > { %v2214_v33 = vpop.f32.mrf.mxu1 }
 0x585   : > { %v9135_v34 = vadd.f32 %v2214_v33, %v8718_v44  ;;  %2298 = vmax.xlane.f32.xlu0 %v9132_v59 }
 0x586   : > { %v6789_v37 = vpop.f32.mrf.mxu1 }
 0x587   : > { %2294 = vmax.xlane.f32.xlu1 %v9135_v34  ;;  %v9140_v13 = vadd.f32 %v6789_v37, %v8718_v44 }
 0x588   : > { %v2217_v20 = vpop.f32.mrf.mxu1 }
 0x589   : > { %v9143_v46 = vadd.f32 %v2217_v20, %v8718_v44 }
 0x58a   : > { %v6792_v17 = vpop.f32.mrf.mxu1 }
 0x58b   : > { %2296 = vmax.xlane.f32.xlu0 %v9143_v46  ;;  %2300 = vmax.xlane.f32.xlu1 %v9140_v13  ;;  %v9152_v20 = vadd.f32 %v6792_v17, %v8718_v44 }
 0x58c   : > { %v2230_v33 = vpop.f32.mrf.mxu1 }
 0x58d   : > { %v9160_v8 = vadd.f32 %v2230_v33, %v8718_v44 }
 0x58e   : > { %v6793_v47 = vpop.f32.mrf.mxu1 }
 0x58f   : > { %v9155_v15 = vadd.f32 %v6793_v47, %v8718_v44 }
 0x590   : > { %v2233_v22 = vpop.f32.mrf.mxu1 }
 0x591   : > { %v9163_v0 = vadd.f32 %v2233_v22, %v8718_v44 }
 0x592   : > { %v6796_v52 = vpop.f32.mrf.mxu1 }
 0x593   : > { %v9168_v17 = vadd.f32 %v6796_v52, %v8718_v44 }
 0x594   : > { %v2246_v37 = vpop.f32.mrf.mxu1 }
 0x595   : > { %v9176_v33 = vadd.f32 %v2246_v37, %v8718_v44 }
 0x596   : > { %v6797_v61 = vpop.f32.mrf.mxu1 }
 0x597   : > { %v9171_v47 = vadd.f32 %v6797_v61, %v8718_v44 }
 0x598   : > { %v2249_v3 = vpop.f32.mrf.mxu1 }
 0x599   : > { %v9179_v22 = vadd.f32 %v2249_v3, %v8718_v44 }
 0x59a   : > { %v6800_v29 = vpop.f32.mrf.mxu1 }
 0x59b   : > { %v9182_v39 = vadd.f32 %v6800_v29, %v8718_v44 }
 0x59c   : > { %2756 = vrot.lane.b32.xlu1 %v8789_v4, %s7859_s19 }
 0x5a1   : > { %2758 = vrot.lane.b32.xlu0 %v8787_v63, %s7859_s19  ;;  %v2262_v63 = vpop.f32.mrf.mxu1 }
 0x5a2   : > { %v9192_v37 = vadd.f32 %v2262_v63, %v8718_v44 }
 0x5a3   : > { %v6801_v4 = vpop.f32.mrf.mxu1 }
 0x5a4   : > { %v9185_v52 = vadd.f32 %v6801_v4, %v8718_v44  ;;  %v9199_v4 = vld [vmem:[#allocation3 + $0x90] sm:$0xff] }
 0x5a5   : > { %v2265_v61 = vpop.f32.mrf.mxu1  ;;  %11378 = vst [vmem:[#allocation74_spill] sm:$0xff] %v9199_v4 }
 0x5a6   : > { %v9195_v3 = vadd.f32 %v2265_v61, %v8718_v44  ;;  %v9214_v44 = vld [vmem:[#allocation3 + $0x98] sm:$0xff] }
 0x5a7   : > { %11382 = vst [vmem:[#allocation78_spill] sm:$0xff] %v9214_v44 }
 0x5c0   : > { %2306 = vmax.xlane.f32.xlu0 %v9152_v20  ;;  %2308 = vmax.xlane.f32.xlu1 %v9155_v15 }
 0x5c4   : > { %2304 = vmax.xlane.f32.xlu1 %v9163_v0  ;;  %2302 = vmax.xlane.f32.xlu0 %v9160_v8 }
 0x5c8   : > { %2314 = vmax.xlane.f32.xlu0 %v9168_v17  ;;  %2316 = vmax.xlane.f32.xlu1 %v9171_v47 }
 0x5cc   : > { %2312 = vmax.xlane.f32.xlu1 %v9179_v22  ;;  %2310 = vmax.xlane.f32.xlu0 %v9176_v33 }
 0x5d0   : > { %2322 = vmax.xlane.f32.xlu0 %v9182_v39  ;;  %2324 = vmax.xlane.f32.xlu1 %v9185_v52 }
 0x5d4   : > { %2320 = vmax.xlane.f32.xlu1 %v9195_v3  ;;  %2318 = vmax.xlane.f32.xlu0 %v9192_v37 }
 0x60e   : > { %v2299_v29 = vpop.xlane.xlu0 %2298 }
 0x60f   : > { %v9204_v5 = vmax.f32 %v9199_v4, %v2299_v29 }
 0x610   : > { %v2295_v43 = vpop.xlane.xlu1 %2294 }
 0x611   : > { %11380 = vst [vmem:[#allocation76_spill] sm:$0xff] %v9204_v5  ;;  %2899 = vst.msk [vmem:[#allocation3 + $0x90] sm:$0xff] %vm1778_vm5, %v9204_v5  ;;  %v9211_v61 = vmax.f32 %v9201_v14, %v2295_v43  ;;  %2402 = vperm.xlu1 %7258, %v9204_v5   ;;  %v9269_v14 = vld [vmem:[#allocation3 + $0xa0] sm:$0xff] }
 0x612   : > { %11391 = vst [vmem:[#allocation87_spill] sm:$0xff] %v9269_v14 }
 0x613   : > { %11381 = vst [vmem:[#allocation77_spill] sm:$0xff] %v9211_v61  ;;  %2897 = vst.msk [vmem:[#allocation3 + $0x80] sm:$0xff] %vm1778_vm5, %v9211_v61 }
 0x614   : > { %v2301_v49 = vpop.xlane.xlu1 %2300  ;;  %v2297_v63 = vpop.xlane.xlu0 %2296 }
 0x615   : > { %v9223_v4 = vmax.f32 %v9214_v44, %v2301_v49  ;;  %v9226_v43 = vmax.f32 %v9216_v41, %v2297_v63  ;;  %2392 = vperm.xlu1 %7258, %v9211_v61   ;;  %v9267_v61 = vld [vmem:[#allocation3 + $0xa8] sm:$0xff] }
 0x616   : > { %11390 = vst [vmem:[#allocation86_spill] sm:$0xff] %v9267_v61 }
 0x617   : > { %11384 = vst [vmem:[#allocation80_spill] sm:$0xff] %v9223_v4  ;;  %11385 = vst [vmem:[#allocation81_spill] sm:$0xff] %v9226_v43  ;;  %2397 = vperm.xlu0 %7257, %v9226_v43  }
 0x618   : > { %2900 = vst.msk [vmem:[#allocation3 + $0x98] sm:$0xff] %vm1778_vm5, %v9223_v4  ;;  %2898 = vst.msk [vmem:[#allocation3 + $0x88] sm:$0xff] %vm1778_vm5, %v9226_v43  ;;  %v2759_v49 = vpop.permute.xlu0 %2758  ;;  %v2757_v63 = vpop.permute.xlu1 %2756 }
 0x619   : > { %2754 = vrot.lane.b32.xlu1 %v8793_v9, %s7859_s19  ;;  %6802 = vmatprep.subr.bf16.mxu0 %v2759_v49 }
 0x61a   : > { %6803 = vmatpush3.bf16.msra.mxu0 %v2759_v49  ;;  %v9257_v49 = vld [vmem:[#allocation3 + $0xb8] sm:$0xff] }
 0x61b   : > { %2407 = vperm.xlu0 %7257, %v9223_v4   ;;  %6804 = vmatprep.subr.bf16.mxu0 %v2757_v63  ;;  %11386 = vst [vmem:[#allocation82_spill] sm:$0xff] %v9257_v49 }
 0x61d   : > { %2750 = vrot.lane.b32.xlu1 %v8801_v40, %s7859_s19 }
 0x61e   : > { %6805 = vmatpush3.bf16.msra.mxu0 %v2757_v63  ;;  %v9259_v63 = vld [vmem:[#allocation3 + $0xb0] sm:$0xff] }
 0x61f   : > { %2752 = vrot.lane.b32.xlu0 %v8797_v18, %s7859_s19  ;;  %11387 = vst [vmem:[#allocation83_spill] sm:$0xff] %v9259_v63 }
 0x621   : > { %2746 = vrot.lane.b32.xlu1 %v8809_v31, %s7859_s19 }
 0x623   : > { %2748 = vrot.lane.b32.xlu0 %v8805_v45, %s7859_s19 }
 0x625   : > { %2975 = vrot.lane.b32.xlu1 %v8631_v56, %s7860_s28 }
 0x627   : > { %2744 = vrot.lane.b32.xlu0 %v8813_v30, %s7859_s19  ;;  %v9289_v30 = vld [vmem:[#allocation3 + $0xd0] sm:$0xff] }
 0x628   : > { %11395 = vst [vmem:[#allocation91_spill] sm:$0xff] %v9289_v30 }
 0x629   : > { %2971 = vrot.lane.b32.xlu1 %v8646_v62, %s7860_s28 }
 0x62b   : > { %2973 = vrot.lane.b32.xlu0 %v8634_v58, %s7860_s28 }
 0x649   : > { %v2309_v5 = vpop.xlane.xlu1 %2308  ;;  %v2307_v29 = vpop.xlane.xlu0 %2306 }
 0x64a   : > { %v9262_v4 = vmax.f32 %v9257_v49, %v2309_v5  ;;  %v9265_v44 = vmax.f32 %v9259_v63, %v2307_v29  ;;  %v9287_v49 = vld [vmem:[#allocation3 + $0xd8] sm:$0xff]  ;;  %v9309_v63 = vld [vmem:[#allocation3 + $0xc0] sm:$0xff] }
 0x64b   : > { %11394 = vst [vmem:[#allocation90_spill] sm:$0xff] %v9287_v49  ;;  %11399 = vst [vmem:[#allocation95_spill] sm:$0xff] %v9309_v63 }
 0x64c   : > { %11388 = vst [vmem:[#allocation84_spill] sm:$0xff] %v9262_v4  ;;  %11389 = vst [vmem:[#allocation85_spill] sm:$0xff] %v9265_v44  ;;  %2427 = vperm.xlu0 %7257, %v9262_v4   ;;  %2422 = vperm.xlu1 %7258, %v9265_v44  }
 0x64d   : > { %2904 = vst.msk [vmem:[#allocation3 + $0xb8] sm:$0xff] %vm1778_vm5, %v9262_v4  ;;  %2903 = vst.msk [vmem:[#allocation3 + $0xb0] sm:$0xff] %vm1778_vm5, %v9265_v44  ;;  %v2305_v5 = vpop.xlane.xlu1 %2304  ;;  %v2303_v29 = vpop.xlane.xlu0 %2302 }
 0x64e   : > { %v9282_v58 = vmax.f32 %v9267_v61, %v2305_v5  ;;  %v9285_v43 = vmax.f32 %v9269_v14, %v2303_v29  ;;  %v9307_v61 = vld [vmem:[#allocation3 + $0xc8] sm:$0xff]  ;;  %v9329_v14 = vld [vmem:[#allocation3 + $0xf0] sm:$0xff] }
 0x64f   : > { %11398 = vst [vmem:[#allocation94_spill] sm:$0xff] %v9307_v61  ;;  %11403 = vst [vmem:[#allocation99_spill] sm:$0xff] %v9329_v14 }
 0x650   : > { %11392 = vst [vmem:[#allocation88_spill] sm:$0xff] %v9282_v58  ;;  %11393 = vst [vmem:[#allocation89_spill] sm:$0xff] %v9285_v43  ;;  %2417 = vperm.xlu0 %7257, %v9282_v58   ;;  %2412 = vperm.xlu1 %7258, %v9285_v43  }
 0x651   : > { %2902 = vst.msk [vmem:[#allocation3 + $0xa8] sm:$0xff] %vm1778_vm5, %v9282_v58  ;;  %2901 = vst.msk [vmem:[#allocation3 + $0xa0] sm:$0xff] %vm1778_vm5, %v9285_v43  ;;  %v2317_v5 = vpop.xlane.xlu1 %2316  ;;  %v2315_v29 = vpop.xlane.xlu0 %2314 }
 0x652   : > { %v9302_v44 = vmax.f32 %v9287_v49, %v2317_v5  ;;  %v9305_v41 = vmax.f32 %v9289_v30, %v2315_v29  ;;  %v9327_v49 = vld [vmem:[#allocation3 + $0xf8] sm:$0xff]  ;;  %v9347_v30 = vld [vmem:[#allocation3 + $0xe8] sm:$0xff] }
 0x653   : > { %11402 = vst [vmem:[#allocation98_spill] sm:$0xff] %v9327_v49  ;;  %11406 = vst [vmem:[#allocation102_spill] sm:$0xff] %v9347_v30 }
 0x654   : > { %11396 = vst [vmem:[#allocation92_spill] sm:$0xff] %v9302_v44  ;;  %11397 = vst [vmem:[#allocation93_spill] sm:$0xff] %v9305_v41  ;;  %2447 = vperm.xlu1 %7258, %v9302_v44   ;;  %2442 = vperm.xlu0 %7257, %v9305_v41  }
 0x655   : > { %2908 = vst.msk [vmem:[#allocation3 + $0xd8] sm:$0xff] %vm1778_vm5, %v9302_v44  ;;  %2907 = vst.msk [vmem:[#allocation3 + $0xd0] sm:$0xff] %vm1778_vm5, %v9305_v41  ;;  %v2313_v5 = vpop.xlane.xlu1 %2312  ;;  %v2311_v29 = vpop.xlane.xlu0 %2310 }
 0x656   : > { %v9322_v43 = vmax.f32 %v9307_v61, %v2313_v5  ;;  %v9325_v4 = vmax.f32 %v9309_v63, %v2311_v29  ;;  %v9349_v61 = vld [vmem:[#allocation3 + $0xe0] sm:$0xff] }
 0x657   : > { %11407 = vst [vmem:[#allocation103_spill] sm:$0xff] %v9349_v61  ;;  %v2921_v63 = vld [vmem:[#allocation2 + $0x40] sm:$0xff] }
 0x658   : > { %11400 = vst [vmem:[#allocation96_spill] sm:$0xff] %v9322_v43  ;;  %11401 = vst [vmem:[#allocation97_spill] sm:$0xff] %v9325_v4  ;;  %2437 = vperm.xlu1 %7258, %v9322_v43   ;;  %2432 = vperm.xlu0 %7257, %v9325_v4  }
 0x659   : > { %2906 = vst.msk [vmem:[#allocation3 + $0xc8] sm:$0xff] %vm1778_vm5, %v9322_v43  ;;  %2905 = vst.msk [vmem:[#allocation3 + $0xc0] sm:$0xff] %vm1778_vm5, %v9325_v4  ;;  %v2325_v5 = vpop.xlane.xlu1 %2324  ;;  %v2323_v29 = vpop.xlane.xlu0 %2322  ;;  %v2915_v43 = vld [vmem:[#allocation2 + $0x10] sm:$0xff] }
 0x65a   : > { %v9342_v41 = vmax.f32 %v9327_v49, %v2325_v5  ;;  %v9345_v58 = vmax.f32 %v9329_v14, %v2323_v29  ;;  %v2917_v14 = vld [vmem:[#allocation2 + $0x20] sm:$0xff] }
 0x65c   : > { %11404 = vst [vmem:[#allocation100_spill] sm:$0xff] %v9342_v41  ;;  %11405 = vst [vmem:[#allocation101_spill] sm:$0xff] %v9345_v58  ;;  %2969 = vrot.lane.b32.xlu0 %v8656_v2, %s7860_s28  ;;  %2462 = vperm.xlu1 %7258, %v9345_v58  }
 0x65d   : > { %2912 = vst.msk [vmem:[#allocation3 + $0xf8] sm:$0xff] %vm1778_vm5, %v9342_v41  ;;  %2911 = vst.msk [vmem:[#allocation3 + $0xf0] sm:$0xff] %vm1778_vm5, %v9345_v58  ;;  %v2321_v5 = vpop.xlane.xlu1 %2320  ;;  %v2319_v29 = vpop.xlane.xlu0 %2318  ;;  %v2916_v58 = vld [vmem:[#allocation2 + $0x18] sm:$0xff] }
 0x65e   : > { %v9363_v4 = vmax.f32 %v9347_v30, %v2321_v5  ;;  %v9366_v44 = vmax.f32 %v9349_v61, %v2319_v29  ;;  %v2913_v5 = vld [vmem:[#allocation2] sm:$0xff]  ;;  %v2914_v29 = vld [vmem:[#allocation2 + $0x8] sm:$0xff]  ;;  %v2920_v61 = vld [vmem:[#allocation2 + $0x38] sm:$0xff] }
 0x65f   : > { %v9385_v49 = vpack.c.bf16 %v2914_v29, %v2913_v5 }
 0x660   : > { %11408 = vst [vmem:[#allocation104_spill] sm:$0xff] %v9363_v4  ;;  %11409 = vst [vmem:[#allocation105_spill] sm:$0xff] %v9366_v44  ;;  %2457 = vperm.xlu0 %7257, %v9363_v4   ;;  %2452 = vperm.xlu1 %7258, %v9366_v44  }
 0x661   : > { %2910 = vst.msk [vmem:[#allocation3 + $0xe8] sm:$0xff] %vm1778_vm5, %v9363_v4  ;;  %2909 = vst.msk [vmem:[#allocation3 + $0xe0] sm:$0xff] %vm1778_vm5, %v9366_v44  ;;  %v2918_v4 = vld [vmem:[#allocation2 + $0x28] sm:$0xff]  ;;  %v2919_v44 = vld [vmem:[#allocation2 + $0x30] sm:$0xff] }
 0x662   : > { %11410 = vst [vmem:[#allocation106_spill] sm:$0xff] %v9385_v49  ;;  %v9393_v30 = vpack.c.bf16 %v2918_v4, %v2917_v14  ;;  %v9399_v5 = vpack.c.bf16 %v2920_v61, %v2919_v44 }
 0x664   : > { %2467 = vperm.xlu0 %7257, %v9342_v41   ;;  %2967 = vrot.lane.b32.xlu1 %v8665_v6, %s7860_s28  ;;  %v9391_v41 = vpack.c.bf16 %v2916_v58, %v2915_v43  ;;  %11412 = vst [vmem:[#allocation108_spill] sm:$0xff] %v9393_v30  ;;  %11413 = vst [vmem:[#allocation109_spill] sm:$0xff] %v9399_v5  ;;  %v2925_v58 = vld [vmem:[#allocation2 + $0x60] sm:$0xff]  ;;  %v2926_v43 = vld [vmem:[#allocation2 + $0x68] sm:$0xff] }
 0x665   : > { %v9409_v4 = vpack.c.bf16 %v2926_v43, %v2925_v58 }
 0x666   : > { %11411 = vst [vmem:[#allocation107_spill] sm:$0xff] %v9391_v41 }
 0x667   : > { %11416 = vst [vmem:[#allocation112_spill] sm:$0xff] %v9409_v4 }
 0x668   : > { %2965 = vrot.lane.b32.xlu0 %v8673_v10, %s7860_s28  ;;  %2963 = vrot.lane.b32.xlu1 %v8612_v35, %s7860_s28  ;;  %v2922_v35 = vld [vmem:[#allocation2 + $0x48] sm:$0xff] }
 0x669   : > { %v9401_v29 = vpack.c.bf16 %v2922_v35, %v2921_v63 }
 0x66b   : > { %11414 = vst [vmem:[#allocation110_spill] sm:$0xff] %v9401_v29 }
 0x66c   : > { %2961 = vrot.lane.b32.xlu0 %v8615_v38, %s7860_s28  ;;  %2945 = vrot.lane.b32.xlu1 %v9385_v49, %s7860_s28  ;;  %v2923_v38 = vld [vmem:[#allocation2 + $0x50] sm:$0xff]  ;;  %v2924_v49 = vld [vmem:[#allocation2 + $0x58] sm:$0xff] }
 0x66d   : > { %v9407_v14 = vpack.c.bf16 %v2924_v49, %v2923_v38 }
 0x66f   : > { %11415 = vst [vmem:[#allocation111_spill] sm:$0xff] %v9407_v14 }
 0x670   : > { %2947 = vrot.lane.b32.xlu0 %v9391_v41, %s7860_s28  ;;  %2949 = vrot.lane.b32.xlu1 %v9393_v30, %s7860_s28  ;;  %v2927_v41 = vld [vmem:[#allocation2 + $0x70] sm:$0xff]  ;;  %v2928_v30 = vld [vmem:[#allocation2 + $0x78] sm:$0xff] }
 0x671   : > { %v9415_v35 = vpack.c.bf16 %v2928_v30, %v2927_v41 }
 0x673   : > { %11417 = vst [vmem:[#allocation113_spill] sm:$0xff] %v9415_v35 }
 0x674   : > { %2951 = vrot.lane.b32.xlu0 %v9399_v5, %s7860_s28  ;;  %2953 = vrot.lane.b32.xlu1 %v9401_v29, %s7860_s28 }
 0x678   : > { %2955 = vrot.lane.b32.xlu0 %v9407_v14, %s7860_s28  ;;  %2957 = vrot.lane.b32.xlu1 %v9409_v4, %s7860_s28 }
 0x67c   : > { %2959 = vrot.lane.b32.xlu0 %v9415_v35, %s7860_s28 }
 0x68c   : > { %v2403_v44 = vpop.permute.xlu1 %2402 }
 0x68d   : > { %v2472_v30 = vsub.f32 %v9132_v59, %v2403_v44 }
 0x68f   : > { %v2490_v5 = vmul.f32 1.442695, %v2472_v30 }
 0x690   : > { %v2393_v61 = vpop.permute.xlu1 %2392 }
 0x691   : > { %v2470_v38 = vsub.f32 %v9135_v34, %v2393_v61 }
 0x692   : > { %v2398_v49 = vpop.permute.xlu0 %2397 }
 0x693   : > { %v2486_v63 = vmul.f32 1.442695, %v2470_v38  ;;  %v2471_v58 = vsub.f32 %v9143_v46, %v2398_v49 }
 0x694   : > { %v2755_v43 = vpop.permute.xlu1 %2754 }
 0x695   : > { %v2488_v29 = vmul.f32 1.442695, %v2471_v58  ;;  %6806 = vmatprep.subr.bf16.mxu0 %v2755_v43  ;;  %7315 = vpow2.f32 %v2486_v63 }
 0x696   : > { %6807 = vmatpush3.bf16.msra.mxu0 %v2755_v43  ;;  %v2408_v14 = vpop.permute.xlu0 %2407 }
 0x697   : > { %7317 = vpow2.f32 %v2488_v29  ;;  %v2473_v41 = vsub.f32 %v9140_v13, %v2408_v14 }
 0x698   : > { %v2751_v34 = vpop.permute.xlu1 %2750 }
 0x699   : > { %v2492_v35 = vmul.f32 1.442695, %v2473_v41 }
 0x69a   : > { %v2753_v4 = vpop.permute.xlu0 %2752 }
 0x69b   : > { %1732 = vadd.xlane.f32.xlu0 %v9018_v32  ;;  %6808 = vmatprep.subr.bf16.mxu0 %v2753_v4  ;;  %7319 = vpow2.f32 %v2492_v35 }
 0x69c   : > { %1730 = vadd.xlane.f32.xlu1 %v9016_v19  ;;  %6809 = vmatpush3.bf16.msra.mxu0 %v2753_v4  ;;  %7321 = vpow2.f32 %v2490_v5  ;;  %v2747_v59 = vpop.permute.xlu1 %2746 }
 0x69d   : > { %6810 = vmatprep.subr.bf16.mxu0 %v2751_v34 }
 0x69e   : > { %v2749_v46 = vpop.permute.xlu0 %2748 }
 0x69f   : > { %1734 = vadd.xlane.f32.xlu0 %v9022_v57 }
 0x6a0   : > { %1736 = vadd.xlane.f32.xlu1 %v9024_v50  ;;  %6811 = vmatpush3.bf16.msra.mxu0 %v2751_v34 }
 0x6a1   : > { %6812 = vmatprep.subr.bf16.mxu0 %v2749_v46 }
 0x6a2   : > { %v9427_v13 = vpop.eup %7315  ;;  %v2745_v57 = vpop.permute.xlu0 %2744 }
 0x6a3   : > { %1738 = vadd.xlane.f32.xlu0 %v9047_v21 }
 0x6a4   : > { %v9430_v32 = vpop.eup %7317  ;;  %1740 = vadd.xlane.f32.xlu1 %v9050_v27  ;;  %6813 = vmatpush3.bf16.msra.mxu0 %v2749_v46  ;;  %v2976_v27 = vpop.permute.xlu1 %2975 }
 0x6a5   : > { %6814 = vmatprep.subr.bf16.mxu0 %v2747_v59  ;;  %v2728_v19 = vpack.c.bf16 %v9430_v32, %v9427_v13 }
 0x6a6   : > { %v2974_v5 = vpop.permute.xlu0 %2973 }
 0x6a7   : > { %1742 = vadd.xlane.f32.xlu0 %v9045_v11  ;;  %6818 = vmatprep.mubr.bf16.mxu0 %v2728_v19 }
 0x6a8   : > { %1744 = vadd.xlane.f32.xlu1 %v9054_v54  ;;  %6815 = vmatpush3.bf16.msra.mxu0 %v2747_v59  ;;  %v9437_v50 = vpop.eup %7319  ;;  %v3023_v54 = vsel %vm1312_vm3, %v2976_v27, 0  ;;  %v2972_v29 = vpop.permute.xlu1 %2971 }
 0x6a9   : > { %6816 = vmatprep.subr.bf16.mxu0 %v2745_v57  ;;  %v9440_v21 = vpop.eup %7321 }
 0x6aa   : > { %v2729_v11 = vpack.c.bf16 %v9437_v50, %v9440_v21 }
 0x6ab   : > { %1746 = vadd.xlane.f32.xlu0 %v9060_v16  ;;  %v11418_v16 = vsub.f32 %v8836_v55, %v8851_v12 }
 0x6ac   : > { %1748 = vadd.xlane.f32.xlu1 %v9064_v26  ;;  %6817 = vmatpush3.bf16.msra.mxu0 %v2745_v57 }
 0x6ad   : > { %7106 = vmatprep.subr.msk.bf16.mxu0 %vm1312_vm3, %v2976_v27  ;;  %v1540_v26 = vmul.f32 1.442695, %v11418_v16 }
 0x6af   : > { %1750 = vadd.xlane.f32.xlu0 %v9068_v1  ;;  %6819 = vmatmul.mubr.bf16.vlgmr.msra.gmra.mxu0 %v2729_v11  ;;  %v3020_v1 = vsel %vm1312_vm3, %v2974_v5, 0  ;;  %7323 = vpow2.f32 %v1540_v26 }
 0x6b0   : > { %1752 = vadd.xlane.f32.xlu1 %v9062_v60  ;;  %6835 = vmatpush3.bf16.xpose.msra.mxu0 %v3023_v54  ;;  %v11419_v60 = vsub.f32 %v8821_v25, %v8833_v51 }
 0x6b1   : > { %7107 = vmatprep.subr.msk.bf16.mxu0 %vm1312_vm3, %v2974_v5 }
 0x6b3   : > { %1754 = vadd.xlane.f32.xlu0 %v9078_v24  ;;  %v1538_v24 = vmul.f32 1.442695, %v11419_v60 }
 0x6b4   : > { %1756 = vadd.xlane.f32.xlu1 %v9074_v7  ;;  %v3017_v7 = vsel %vm1312_vm3, %v2972_v29, 0 }
 0x6b5   : > { %7325 = vpow2.f32 %v1538_v24 }
 0x6b7   : > { %1758 = vadd.xlane.f32.xlu0 %v9076_v53 }
 0x6b8   : > { %1760 = vadd.xlane.f32.xlu1 %v9082_v48  ;;  %6837 = vmatpush3.bf16.xpose.msra.mxu0 %v3020_v1 }
 0x6b9   : > { %7108 = vmatprep.subr.msk.bf16.mxu0 %vm1312_vm3, %v2972_v29 }
 0x6bc   : > { %v9463_v53 = vpop.eup %7323 }
 0x6c0   : > { %6839 = vmatpush3.bf16.xpose.msra.mxu0 %v3017_v7 }
 0x6c2   : > { %v9468_v51 = vpop.eup %7325 }
 0x6c7   : > { %v2423_v55 = vpop.permute.xlu1 %2422  ;;  %v2428_v12 = vpop.permute.xlu0 %2427 }
 0x6c8   : > { %v2476_v14 = vsub.f32 %v9152_v20, %v2423_v55  ;;  %v2477_v48 = vsub.f32 %v9155_v15, %v2428_v12 }
 0x6c9   : > { %1818 = vperm.xlu1 %7258, %v9463_v53  }
 0x6ca   : > { %v2498_v4 = vmul.f32 1.442695, %v2476_v14  ;;  %v2500_v35 = vmul.f32 1.442695, %v2477_v48 }
 0x6cb   : > { %v2413_v44 = vpop.permute.xlu1 %2412  ;;  %v2418_v25 = vpop.permute.xlu0 %2417 }
 0x6cc   : > { %v2474_v61 = vsub.f32 %v9160_v8, %v2413_v44  ;;  %v2475_v38 = vsub.f32 %v9163_v0, %v2418_v25  ;;  %7327 = vpow2.f32 %v2498_v4 }
 0x6cd   : > { %1813 = vperm.xlu0 %7257, %v9468_v51   ;;  %7329 = vpow2.f32 %v2500_v35 }
 0x6ce   : > { %v2494_v49 = vmul.f32 1.442695, %v2474_v61  ;;  %v2496_v63 = vmul.f32 1.442695, %v2475_v38 }
 0x6cf   : > { %v2448_v20 = vpop.permute.xlu1 %2447  ;;  %v2443_v15 = vpop.permute.xlu0 %2442 }
 0x6d0   : > { %7331 = vpow2.f32 %v2494_v49  ;;  %v2481_v58 = vsub.f32 %v9171_v47, %v2448_v20  ;;  %v2480_v43 = vsub.f32 %v9168_v17, %v2443_v15 }
 0x6d1   : > { %7333 = vpow2.f32 %v2496_v63 }
 0x6d2   : > { %v2508_v30 = vmul.f32 1.442695, %v2481_v58  ;;  %v2506_v41 = vmul.f32 1.442695, %v2480_v43 }
 0x6d3   : > { %v2438_v34 = vpop.permute.xlu1 %2437  ;;  %v2433_v8 = vpop.permute.xlu0 %2432 }
 0x6d4   : > { %v2479_v0 = vsub.f32 %v9179_v22, %v2438_v34  ;;  %v2478_v46 = vsub.f32 %v9176_v33, %v2433_v8  ;;  %7335 = vpow2.f32 %v2508_v30 }
 0x6d5   : > { %7337 = vpow2.f32 %v2506_v41 }
 0x6d6   : > { %v2504_v59 = vmul.f32 1.442695, %v2479_v0  ;;  %v2502_v19 = vmul.f32 1.442695, %v2478_v46 }
 0x6d7   : > { %v2463_v57 = vpop.permute.xlu1 %2462  ;;  %v2970_v27 = vpop.permute.xlu0 %2969 }
 0x6d8   : > { %7339 = vpow2.f32 %v2504_v59  ;;  %7109 = vmatprep.subr.msk.bf16.mxu0 %vm1312_vm3, %v2970_v27  ;;  %v3014_v17 = vsel %vm1312_vm3, %v2970_v27, 0  ;;  %v2484_v11 = vsub.f32 %v9182_v39, %v2463_v57 }
 0x6d9   : > { %7341 = vpow2.f32 %v2502_v19  ;;  %6841 = vmatpush3.bf16.xpose.msra.mxu0 %v3014_v17  ;;  %v9479_v47 = vpop.eup %7327 }
 0x6da   : > { %v9482_v33 = vpop.eup %7329  ;;  %v2514_v24 = vmul.f32 1.442695, %v2484_v11  ;;  %v11420_v11 = vsub.f32 %v8819_v23, %v8824_v28  ;;  %v11429_v23 = vld [vmem:[#allocation37_spill] sm:$0xff] }
 0x6db   : > { %v2453_v22 = vpop.permute.xlu1 %2452  ;;  %v2458_v54 = vpop.permute.xlu0 %2457 }
 0x6dc   : > { %v2482_v5 = vsub.f32 %v9192_v37, %v2453_v22  ;;  %v2483_v16 = vsub.f32 %v9195_v3, %v2458_v54  ;;  %v2731_v37 = vpack.c.bf16 %v9482_v33, %v9479_v47  ;;  %v1542_v22 = vmul.f32 1.442695, %v11420_v11  ;;  %v11421_v54 = vld [vmem:[#allocation34_spill] sm:$0xff] }
 0x6dd   : > { %v9486_v26 = vpop.eup %7331 }
 0x6de   : > { %v9488_v1 = vpop.eup %7333  ;;  %v2510_v29 = vmul.f32 1.442695, %v2482_v5  ;;  %v2512_v60 = vmul.f32 1.442695, %v2483_v16  ;;  %v11422_v5 = vsub.f32 %v8826_v42, %v11421_v54  ;;  %v11431_v42 = vld [vmem:[#allocation36_spill] sm:$0xff]  ;;  %v11444_v54 = vld [vmem:[#allocation46_spill] sm:$0xff] }
 0x6df   : > { %v2968_v7 = vpop.permute.xlu1 %2967  ;;  %v2468_v55 = vpop.permute.xlu0 %2467  ;;  %v2730_v39 = vpack.c.bf16 %v9488_v1, %v9486_v26 }
 0x6e0   : > { %7343 = vpow2.f32 %v2510_v29  ;;  %v2485_v12 = vsub.f32 %v9185_v52, %v2468_v55  ;;  %7110 = vmatprep.subr.msk.bf16.mxu0 %vm1312_vm3, %v2968_v7  ;;  %v3011_v3 = vsel %vm1312_vm3, %v2968_v7, 0  ;;  %v1544_v16 = vmul.f32 1.442695, %v11422_v5  ;;  %v11423_v29 = vld [vmem:[#allocation38_spill] sm:$0xff]  ;;  %v11425_v55 = vld [vmem:[#allocation40_spill] sm:$0xff] }
 0x6e1   : > { %7345 = vpow2.f32 %v2512_v60  ;;  %6822 = vmatprep.mubr.bf16.mxu0 %v2730_v39  ;;  %6843 = vmatpush3.bf16.xpose.msra.mxu0 %v3011_v3  ;;  %v9497_v48 = vpop.eup %7335  ;;  %v11424_v60 = vsub.f32 %v11423_v29, %v8882_v36  ;;  %v11426_v39 = vld [vmem:[#allocation42_spill] sm:$0xff]  ;;  %v11428_v3 = vld [vmem:[#allocation35_spill] sm:$0xff]  ;;  %v11434_v36 = vld [vmem:[#allocation45_spill] sm:$0xff] }
 0x6e2   : > { %v2516_v14 = vmul.f32 1.442695, %v2485_v12  ;;  %6823 = vmatmul.mubr.bf16.gmra.mxu0 %v2731_v37  ;;  %7347 = vpow2.f32 %v2514_v24  ;;  %v9499_v35 = vpop.eup %7337  ;;  %v11427_v12 = vsub.f32 %v11425_v55, %v11426_v39  ;;  %v11430_v28 = vsub.f32 %v11428_v3, %v11429_v23  ;;  %v11446_v3 = vld [vmem:[#allocation53_spill] sm:$0xff] }
 0x6e3   : > { %v2966_v4 = vpop.permute.xlu0 %2965  ;;  %v2733_v61 = vpack.c.bf16 %v9497_v48, %v9499_v35  ;;  %v2964_v49 = vpop.permute.xlu1 %2963  ;;  %v1546_v24 = vmul.f32 1.442695, %v11424_v60 }
 0x6e4   : > { %7349 = vpow2.f32 %v2516_v14  ;;  %7111 = vmatprep.subr.msk.bf16.mxu0 %vm1312_vm3, %v2966_v4  ;;  %v3008_v38 = vsel %vm1312_vm3, %v2966_v4, 0  ;;  %v3005_v43 = vsel %vm1312_vm3, %v2964_v49, 0  ;;  %v1548_v37 = vmul.f32 1.442695, %v11427_v12  ;;  %v11432_v4 = vld [vmem:[#allocation39_spill] sm:$0xff]  ;;  %v1701_v12 = vld [vmem:[#allocation4 + $0x18] sm:$0xff] }
 0x6e5   : > { %v9502_v52 = vpop.eup %7339  ;;  %7351 = vpow2.f32 %v1542_v22  ;;  %v1550_v14 = vmul.f32 1.442695, %v11430_v28  ;;  %v11443_v22 = vld [vmem:[#allocation43_spill] sm:$0xff] }
 0x6e6   : > { %v9504_v44 = vpop.eup %7341  ;;  %7353 = vpow2.f32 %v1544_v16  ;;  %v11445_v5 = vsub.f32 %v11443_v22, %v11444_v54  ;;  %v11456_v22 = vld [vmem:[#allocation54_spill] sm:$0xff] }
 0x6e7   : > { %v2732_v25 = vpack.c.bf16 %v9502_v52, %v9504_v44  ;;  %v2962_v41 = vpop.permute.xlu0 %2961  ;;  %v2946_v8 = vpop.permute.xlu1 %2945  ;;  %7355 = vpow2.f32 %v1546_v24  ;;  %v1700_v24 = vld [vmem:[#allocation4 + $0x10] sm:$0xff] }
 0x6e8   : > { %v3002_v0 = vsel %vm1312_vm3, %v2962_v41, 0  ;;  %7357 = vpow2.f32 %v1548_v37  ;;  %v1560_v16 = vmul.f32 1.442695, %v11445_v5 }
 0x6e9   : > { %6826 = vmatprep.mubr.bf16.mxu0 %v2732_v25  ;;  %6845 = vmatpush3.bf16.xpose.msra.mxu0 %v3008_v38  ;;  %v11433_v25 = vsub.f32 %v11431_v42, %v11432_v4  ;;  %7359 = vpow2.f32 %v1550_v14  ;;  %v11435_v38 = vld [vmem:[#allocation48_spill] sm:$0xff]  ;;  %v11450_v4 = vld [vmem:[#allocation57_spill] sm:$0xff] }
 0x6ea   : > { %6827 = vmatmul.mubr.bf16.gmra.mxu0 %v2733_v61  ;;  %7112 = vmatprep.subr.msk.bf16.mxu0 %vm1312_vm3, %v2964_v49  ;;  %v11436_v49 = vsub.f32 %v11434_v36, %v11435_v38 }
 0x6eb   : > { %v2948_v46 = vpop.permute.xlu0 %2947  ;;  %v2950_v59 = vpop.permute.xlu1 %2949  ;;  %v1552_v61 = vmul.f32 1.442695, %v11433_v25 }
 0x6ed   : > { %v9512_v63 = vpop.eup %7343  ;;  %7361 = vpow2.f32 %v1552_v61 }
 0x6ee   : > { %v9514_v20 = vpop.eup %7345 }
 0x6ef   : > { %v2734_v15 = vpack.c.bf16 %v9514_v20, %v9512_v63  ;;  %v9518_v58 = vpop.eup %7347  ;;  %v2952_v19 = vpop.permute.xlu0 %2951 }
 0x6f0   : > { %v2954_v57 = vpop.permute.xlu1 %2953 }
 0x6f1   : > { %v9521_v30 = vpop.eup %7349  ;;  %6830 = vmatprep.mubr.bf16.mxu0 %v2734_v15  ;;  %6847 = vmatpush3.bf16.xpose.msra.mxu0 %v3005_v43  ;;  %v1554_v15 = vmul.f32 1.442695, %v11436_v49  ;;  %v11437_v43 = vld [vmem:[#allocation47_spill] sm:$0xff]  ;;  %v1702_v49 = vld [vmem:[#allocation4 + $0x20] sm:$0xff] }
 0x6f2   : > { %7113 = vmatprep.subr.msk.bf16.mxu0 %vm1312_vm3, %v2962_v41  ;;  %v2735_v34 = vpack.c.bf16 %v9521_v30, %v9518_v58  ;;  %v11438_v41 = vld [vmem:[#allocation50_spill] sm:$0xff]  ;;  %v9563_v11 = vpop.eup %7351 }
 0x6f3   : > { %v2956_v27 = vpop.permute.xlu0 %2955  ;;  %7363 = vpow2.f32 %v1554_v15  ;;  %v1716_v14 = vmul.f32 %v9563_v11, %v1700_v24 }
 0x6f4   : > { %6831 = vmatmul.mubr.bf16.gmra.mxu0 %v2735_v34  ;;  %v2958_v17 = vpop.permute.xlu1 %2957  ;;  %v11439_v34 = vsub.f32 %v11437_v43, %v11438_v41 }
 0x6f5   : > { %6850 = vmatprep.mubr.msk.bf16.mxu0 %vm1312_vm3, %v2946_v8 }
 0x6f6   : > { %v1556_v8 = vmul.f32 1.442695, %v11439_v34  ;;  %v1703_v34 = vld [vmem:[#allocation4 + $0x28] sm:$0xff] }
 0x6f7   : > { %v2960_v7 = vpop.permute.xlu0 %2959 }
 0x6f8   : > { %7365 = vpow2.f32 %v1556_v8 }
 0x6f9   : > { %6849 = vmatpush3.bf16.xpose.msra.mxu0 %v3002_v0  ;;  %v1699_v0 = vld [vmem:[#allocation4 + $0x8] sm:$0xff] }
 0x700   : > { %6851 = vmatmul.mubr.msk.bf16.vlgmr.msra.gmra.mxu0 %vm1312_vm3, %v2948_v46  ;;  %v1698_v46 = vld [vmem:[#allocation4] sm:$0xff] }
 0x701   : > { %6854 = vmatprep.mubr.msk.bf16.mxu0 %vm1312_vm3, %v2950_v59  ;;  %v11440_v59 = vld [vmem:[#allocation41_spill] sm:$0xff]  ;;  %v1714_v60 = vmul.f32 %v9468_v51, %v1698_v46  ;;  %v11449_v51 = vld [vmem:[#allocation55_spill] sm:$0xff]  ;;  %v11453_v46 = vld [vmem:[#allocation52_spill] sm:$0xff] }
 0x702   : > { %v11451_v25 = vsub.f32 %v11449_v51, %v11450_v4 }
 0x704   : > { %v1564_v61 = vmul.f32 1.442695, %v11451_v25 }
 0x708   : > { %6855 = vmatmul.mubr.msk.bf16.gmra.mxu0 %vm1312_vm3, %v2952_v19  ;;  %v11441_v19 = vld [vmem:[#allocation44_spill] sm:$0xff] }
 0x709   : > { %6858 = vmatprep.mubr.msk.bf16.mxu0 %vm1312_vm3, %v2954_v57  ;;  %v11442_v57 = vsub.f32 %v11440_v59, %v11441_v19 }
 0x710   : > { %6859 = vmatmul.mubr.msk.bf16.gmra.mxu0 %vm1312_vm3, %v2956_v27  ;;  %v1558_v27 = vmul.f32 1.442695, %v11442_v57 }
 0x711   : > { %6862 = vmatprep.mubr.msk.bf16.mxu0 %vm1312_vm3, %v2958_v17  ;;  %v1715_v17 = vmul.f32 %v9463_v53, %v1699_v0  ;;  %v11447_v53 = vld [vmem:[#allocation56_spill] sm:$0xff]  ;;  %v11452_v0 = vld [vmem:[#allocation49_spill] sm:$0xff] }
 0x712   : > { %7367 = vpow2.f32 %v1558_v27  ;;  %v11448_v23 = vsub.f32 %v11446_v3, %v11447_v53  ;;  %v11454_v59 = vsub.f32 %v11452_v0, %v11453_v46 }
 0x713   : > { %7369 = vpow2.f32 %v1560_v16 }
 0x714   : > { %v1562_v28 = vmul.f32 1.442695, %v11448_v23  ;;  %v1566_v19 = vmul.f32 1.442695, %v11454_v59  ;;  %v1709_v59 = vld [vmem:[#allocation4 + $0x58] sm:$0xff] }
 0x716   : > { %7371 = vpow2.f32 %v1562_v28 }
 0x717   : > { %7373 = vpow2.f32 %v1564_v61  ;;  %v1707_v61 = vld [vmem:[#allocation4 + $0x48] sm:$0xff] }
 0x718   : > { %6863 = vmatmul.mubr.msk.bf16.gmra.mxu0 %vm1312_vm3, %v2960_v7  ;;  %v9569_v7 = vpop.eup %7353  ;;  %7375 = vpow2.f32 %v1566_v19 }
 0x719   : > { %v9576_v42 = vpop.eup %7355  ;;  %v1717_v38 = vmul.f32 %v9569_v7, %v1701_v12  ;;  %v1705_v12 = vld [vmem:[#allocation4 + $0x38] sm:$0xff] }
 0x71a   : > { %v9583_v15 = vpop.eup %7357  ;;  %v1718_v57 = vmul.f32 %v9576_v42, %v1702_v49 }
 0x71b   : > { %v9590_v27 = vpop.eup %7359 }
 0x71c   : > { %v9597_v24 = vpop.eup %7361 }
 0x71d   : > { %v9601_v53 = vpop.eup %7363  ;;  %v1721_v28 = vmul.f32 %v9597_v24, %v1705_v12 }
 0x71e   : > { %v9605_v51 = vpop.eup %7365 }
 0x71f   : > { %v9609_v49 = vpop.eup %7367 }
 0x724   : > { %v1733_v29 = vpop.xlane.xlu0 %1732 }
 0x725   : > { %v1763_v55 = vadd.f32 %v1733_v29, %v1715_v17  ;;  %v1731_v39 = vpop.xlane.xlu1 %1730  ;;  %v11455_v17 = vld [vmem:[#allocation51_spill] sm:$0xff]  ;;  %v1719_v29 = vmul.f32 %v9583_v15, %v1703_v34  ;;  %v1708_v34 = vld [vmem:[#allocation4 + $0x50] sm:$0xff] }
 0x726   : > { %v1762_v37 = vadd.f32 %v1731_v39, %v1714_v60  ;;  %v11457_v54 = vsub.f32 %v11455_v17, %v11456_v22  ;;  %v1704_v60 = vld [vmem:[#allocation4 + $0x30] sm:$0xff] }
 0x727   : > { %1780 = vst.msk [vmem:[#allocation4 + $0x8] sm:$0xff] %vm1778_vm5, %v1763_v55  ;;  %v1720_v3 = vmul.f32 %v9590_v27, %v1704_v60 }
 0x728   : > { %1779 = vst.msk [vmem:[#allocation4] sm:$0xff] %vm1778_vm5, %v1762_v37  ;;  %v1735_v36 = vpop.xlane.xlu0 %1734  ;;  %v1568_v5 = vmul.f32 1.442695, %v11457_v54 }
 0x729   : > { %v1764_v43 = vadd.f32 %v1735_v36, %v1716_v14  ;;  %v1737_v41 = vpop.xlane.xlu1 %1736  ;;  %v1706_v14 = vld [vmem:[#allocation4 + $0x40] sm:$0xff] }
 0x72a   : > { %v1765_v8 = vadd.f32 %v1737_v41, %v1717_v38  ;;  %7377 = vpow2.f32 %v1568_v5  ;;  %v1722_v38 = vmul.f32 %v9601_v53, %v1706_v14  ;;  %v1723_v41 = vmul.f32 %v9605_v51, %v1707_v61  ;;  %v1710_v5 = vld [vmem:[#allocation4 + $0x60] sm:$0xff]  ;;  %v1713_v61 = vld [vmem:[#allocation4 + $0x78] sm:$0xff] }
 0x72b   : > { %1781 = vst.msk [vmem:[#allocation4 + $0x10] sm:$0xff] %vm1778_vm5, %v1764_v43 }
 0x72c   : > { %1782 = vst.msk [vmem:[#allocation4 + $0x18] sm:$0xff] %vm1778_vm5, %v1765_v8  ;;  %v1739_v16 = vpop.xlane.xlu0 %1738  ;;  %v9613_v8 = vpop.eup %7369 }
 0x72d   : > { %v1766_v55 = vadd.f32 %v1739_v16, %v1718_v57  ;;  %v1741_v39 = vpop.xlane.xlu1 %1740  ;;  %v1724_v57 = vmul.f32 %v9609_v49, %v1708_v34  ;;  %v9617_v17 = vpop.eup %7371  ;;  %v1725_v54 = vmul.f32 %v9613_v8, %v1709_v59  ;;  %v1796_v59 = vld [vmem:[#allocation5 + $0x8] sm:$0xff] }
 0x72e   : > { %v1767_v37 = vadd.f32 %v1741_v39, %v1719_v29  ;;  %v9621_v16 = vpop.eup %7373  ;;  %v1726_v12 = vmul.f32 %v9617_v17, %v1710_v5 }
 0x72f   : > { %1783 = vst.msk [vmem:[#allocation4 + $0x20] sm:$0xff] %vm1778_vm5, %v1766_v55  ;;  %11458 = vst [vmem:[#allocation34_spill] sm:$0xff] %v9621_v16  ;;  %v1711_v55 = vld [vmem:[#allocation4 + $0x68] sm:$0xff] }
 0x730   : > { %1784 = vst.msk [vmem:[#allocation4 + $0x28] sm:$0xff] %vm1778_vm5, %v1767_v37  ;;  %v1743_v23 = vpop.xlane.xlu0 %1742  ;;  %v9625_v37 = vpop.eup %7375 }
 0x731   : > { %v1768_v4 = vadd.f32 %v1743_v23, %v1720_v3  ;;  %v1745_v25 = vpop.xlane.xlu1 %1744  ;;  %11459 = vst [vmem:[#allocation38_spill] sm:$0xff] %v9625_v37  ;;  %v1727_v23 = vmul.f32 %v9621_v16, %v1711_v55  ;;  %v11462_v55 = vld [vmem:[#allocation59_spill] sm:$0xff] }
 0x732   : > { %v1769_v36 = vadd.f32 %v1745_v25, %v1721_v28  ;;  %v1712_v28 = vld [vmem:[#allocation4 + $0x70] sm:$0xff] }
 0x733   : > { %1785 = vst.msk [vmem:[#allocation4 + $0x30] sm:$0xff] %vm1778_vm5, %v1768_v4 }
 0x734   : > { %1786 = vst.msk [vmem:[#allocation4 + $0x38] sm:$0xff] %vm1778_vm5, %v1769_v36  ;;  %v1747_v43 = vpop.xlane.xlu0 %1746 }
 0x735   : > { %v1770_v0 = vadd.f32 %v1747_v43, %v1722_v38  ;;  %v1749_v46 = vpop.xlane.xlu1 %1748  ;;  %v1728_v38 = vmul.f32 %v9625_v37, %v1712_v28  ;;  %v9761_v37 = vld [vmem:[#allocation3 + $0x108] sm:$0xff] }
 0x736   : > { %v1771_v19 = vadd.f32 %v1749_v46, %v1723_v41 }
 0x737   : > { %1787 = vst.msk [vmem:[#allocation4 + $0x40] sm:$0xff] %vm1778_vm5, %v1770_v0  ;;  %v9629_v14 = vpop.eup %7377 }
 0x738   : > { %1788 = vst.msk [vmem:[#allocation4 + $0x48] sm:$0xff] %vm1778_vm5, %v1771_v19  ;;  %v1751_v22 = vpop.xlane.xlu0 %1750  ;;  %11460 = vst [vmem:[#allocation40_spill] sm:$0xff] %v9629_v14  ;;  %v1729_v41 = vmul.f32 %v9629_v14, %v1713_v61 }
 0x739   : > { %v1772_v29 = vadd.f32 %v1751_v22, %v1724_v57  ;;  %v1753_v60 = vpop.xlane.xlu1 %1752  ;;  %v1795_v22 = vld [vmem:[#allocation5] sm:$0xff] }
 0x73a   : > { %v1773_v39 = vadd.f32 %v1753_v60, %v1725_v54  ;;  %v11461_v54 = vld [vmem:[#allocation61_spill] sm:$0xff] }
 0x73b   : > { %1789 = vst.msk [vmem:[#allocation4 + $0x50] sm:$0xff] %vm1778_vm5, %v1772_v29 }
 0x73c   : > { %1790 = vst.msk [vmem:[#allocation4 + $0x58] sm:$0xff] %vm1778_vm5, %v1773_v39  ;;  %v1755_v3 = vpop.xlane.xlu0 %1754 }
 0x73d   : > { %v1774_v4 = vadd.f32 %v1755_v3, %v1726_v12  ;;  %v1757_v25 = vpop.xlane.xlu1 %1756 }
 0x73e   : > { %v1775_v36 = vadd.f32 %v1757_v25, %v1727_v23 }
 0x73f   : > { %1791 = vst.msk [vmem:[#allocation4 + $0x60] sm:$0xff] %vm1778_vm5, %v1774_v4 }
 0x740   : > { %1792 = vst.msk [vmem:[#allocation4 + $0x68] sm:$0xff] %vm1778_vm5, %v1775_v36  ;;  %v1759_v43 = vpop.xlane.xlu0 %1758 }
 0x741   : > { %v1776_v34 = vadd.f32 %v1759_v43, %v1728_v38  ;;  %v1761_v0 = vpop.xlane.xlu1 %1760 }
 0x742   : > { %v1777_v46 = vadd.f32 %v1761_v0, %v1729_v41 }
 0x743   : > { %1793 = vst.msk [vmem:[#allocation4 + $0x70] sm:$0xff] %vm1778_vm5, %v1776_v34 }
 0x744   : > { %1794 = vst.msk [vmem:[#allocation4 + $0x78] sm:$0xff] %vm1778_vm5, %v1777_v46 }
 0x745   : > { %v1819_v19 = vpop.permute.xlu1 %1818 }
 0x746   : > { %v1892_v57 = vmul.f32 %v1819_v19, %v1796_v59 }
 0x748   : > { %v2013_v5 = vadd.f32 %v11461_v54, %v1892_v57  ;;  %v1814_v29 = vpop.permute.xlu0 %1813 }
 0x749   : > { %v1891_v60 = vmul.f32 %v1814_v29, %v1795_v22  ;;  %v11479_v22 = vld [vmem:[#allocation25_spill] sm:$0xff] }
 0x74a   : > { %2029 = vst.msk [vmem:[#allocation5 + $0x8] sm:$0xff] %vm1312_vm3, %v2013_v5 }
 0x74b   : > { %v2012_v39 = vadd.f32 %v11462_v55, %v1891_v60 }
 0x74d   : > { %2028 = vst.msk [vmem:[#allocation5] sm:$0xff] %vm1312_vm3, %v2012_v39 }
 0x76f   : > { %v9641_v12 = vpop.f32.mrf.mxu0 }
 0x770   : > { %11463 = vst [vmem:[#allocation42_spill] sm:$0xff] %v9641_v12 }
 0x771   : > { %v9643_v3 = vpop.f32.mrf.mxu0 }
 0x772   : > { %11464 = vst [vmem:[#allocation35_spill] sm:$0xff] %v9643_v3 }
 0x773   : > { %v9645_v23 = vpop.f32.mrf.mxu0 }
 0x774   : > { %11465 = vst [vmem:[#allocation37_spill] sm:$0xff] %v9645_v23 }
 0x775   : > { %v9647_v28 = vpop.f32.mrf.mxu0 }
 0x776   : > { %11466 = vst [vmem:[#allocation36_spill] sm:$0xff] %v9647_v28  ;;  %v9746_v28 = vld [vmem:[#allocation3 + $0x100] sm:$0xff] }
 0x7a2   : > { %v9649_v4 = vpop.f32.mrf.mxu0 }
 0x7a3   : > { %11467 = vst [vmem:[#allocation39_spill] sm:$0xff] %v9649_v4 }
 0x7a4   : > { %v9651_v25 = vpop.f32.mrf.mxu0 }
 0x7a5   : > { %11468 = vst [vmem:[#allocation45_spill] sm:$0xff] %v9651_v25 }
 0x7a6   : > { %v9653_v61 = vpop.f32.mrf.mxu0 }
 0x7a7   : > { %11469 = vst [vmem:[#allocation48_spill] sm:$0xff] %v9653_v61 }
 0x7a8   : > { %v9655_v36 = vpop.f32.mrf.mxu0 }
 0x7a9   : > { %11470 = vst [vmem:[#allocation47_spill] sm:$0xff] %v9655_v36 }
 0x7aa   : > { %v9657_v38 = vpop.f32.mrf.mxu0 }
 0x7ab   : > { %11471 = vst [vmem:[#allocation50_spill] sm:$0xff] %v9657_v38 }
 0x7ac   : > { %v9659_v43 = vpop.f32.mrf.mxu0 }
 0x7ad   : > { %11472 = vst [vmem:[#allocation41_spill] sm:$0xff] %v9659_v43 }
 0x7ae   : > { %v9661_v41 = vpop.f32.mrf.mxu0 }
 0x7af   : > { %11473 = vst [vmem:[#allocation44_spill] sm:$0xff] %v9661_v41 }
 0x7b0   : > { %v9663_v34 = vpop.f32.mrf.mxu0 }
 0x7b1   : > { %11474 = vst [vmem:[#allocation43_spill] sm:$0xff] %v9663_v34 }
 0x7b4   : > { %v9665_v0 = vpop.f32.mrf.mxu0 }
 0x7b5   : > { %11475 = vst [vmem:[#allocation46_spill] sm:$0xff] %v9665_v0  ;;  %v11481_v0 = vld [vmem:[#allocation26_spill] sm:$0xff] }
 0x7b6   : > { %v9667_v46 = vpop.f32.mrf.mxu0 }
 0x7b7   : > { %11476 = vst [vmem:[#allocation53_spill] sm:$0xff] %v9667_v46 }
 0x7b8   : > { %v9669_v59 = vpop.f32.mrf.mxu0 }
 0x7b9   : > { %11477 = vst [vmem:[#allocation56_spill] sm:$0xff] %v9669_v59 }
 0x7ba   : > { %v9671_v19 = vpop.f32.mrf.mxu0 }
 0x7bb   : > { %11478 = vst [vmem:[#allocation55_spill] sm:$0xff] %v9671_v19 }
 0x7c0   : > { %v6852_v57 = vpop.f32.mrf.mxu0 }
 0x7c1   : > { %v9674_v54 = vadd.f32 %v6852_v57, %v11479_v22  ;;  %v11480_v57 = vld [vmem:[#allocation27_spill] sm:$0xff] }
 0x7c2   : > { %v3059_v5 = vpop.f32.mrf.mxu0 }
 0x7c3   : > { %3143 = vmax.xlane.f32.xlu1 %v9674_v54  ;;  %v9678_v60 = vadd.f32 %v3059_v5, %v11479_v22 }
 0x7c4   : > { %v6853_v29 = vpop.f32.mrf.mxu0 }
 0x7c5   : > { %v9681_v55 = vadd.f32 %v6853_v29, %v11479_v22 }
 0x7c6   : > { %v3062_v39 = vpop.f32.mrf.mxu0 }
 0x7c7   : > { %3145 = vmax.xlane.f32.xlu0 %v9681_v55  ;;  %3139 = vmax.xlane.f32.xlu1 %v9678_v60  ;;  %v9686_v59 = vadd.f32 %v3062_v39, %v11479_v22 }
 0x7c8   : > { %v6856_v5 = vpop.f32.mrf.mxu0 }
 0x7c9   : > { %v9698_v4 = vadd.f32 %v6856_v5, %v11479_v22 }
 0x7ca   : > { %v3075_v19 = vpop.f32.mrf.mxu0 }
 0x7cb   : > { %3141 = vmax.xlane.f32.xlu0 %v9686_v59  ;;  %v9694_v43 = vadd.f32 %v3075_v19, %v11479_v22 }
 0x7cc   : > { %v6857_v29 = vpop.f32.mrf.mxu0 }
 0x7ce   : > { %v3078_v46 = vpop.f32.mrf.mxu0 }
 0x7cf   : > { %v9709_v19 = vadd.f32 %v3078_v46, %v11479_v22 }
 0x7d0   : > { %v6860_v41 = vpop.f32.mrf.mxu0 }
 0x7d1   : > { %v9714_v23 = vadd.f32 %v6860_v41, %v11479_v22 }
 0x7d2   : > { %v3091_v38 = vpop.f32.mrf.mxu0 }
 0x7d3   : > { %v9725_v12 = vadd.f32 %v3091_v38, %v11479_v22  ;;  %v9741_v38 = vld [vmem:[#allocation3 + $0x110] sm:$0xff] }
 0x7d4   : > { %v6861_v34 = vpop.f32.mrf.mxu0 }
 0x7d5   : > { %v9704_v36 = vadd.f32 %v6861_v34, %v11479_v22 }
 0x7d6   : > { %v3094_v39 = vpop.f32.mrf.mxu0 }
 0x7d8   : > { %3593 = vrot.lane.b32.xlu1 %v11480_v57, %s7860_s28  ;;  %v6864_v61 = vpop.f32.mrf.mxu0  ;;  %v9701_v57 = vadd.f32 %v6857_v29, %v11479_v22  ;;  %v9717_v29 = vadd.f32 %v3094_v39, %v11479_v22 }
 0x7d9   : > { %v9728_v3 = vadd.f32 %v6864_v61, %v11479_v22 }
 0x7da   : > { %v3107_v25 = vpop.f32.mrf.mxu0 }
 0x7db   : > { %v9738_v39 = vadd.f32 %v3107_v25, %v11479_v22 }
 0x7dc   : > { %v6865_v5 = vpop.f32.mrf.mxu0 }
 0x7dd   : > { %v9722_v34 = vadd.f32 %v6865_v5, %v11479_v22 }
 0x7de   : > { %v3110_v46 = vpop.f32.mrf.mxu0 }
 0x7df   : > { %v9733_v41 = vadd.f32 %v3110_v46, %v11479_v22 }
 0x7e1   : > { %3595 = vrot.lane.b32.xlu0 %v11481_v0, %s7860_s28  ;;  %v9748_v0 = vld [vmem:[#allocation3 + $0x118] sm:$0xff] }
 0x7e2   : > { %11483 = vst [vmem:[#allocation49_spill] sm:$0xff] %v9748_v0 }
 0x7fc   : > { %3147 = vmax.xlane.f32.xlu1 %v9694_v43 }
 0x800   : > { %3151 = vmax.xlane.f32.xlu0 %v9698_v4  ;;  %3153 = vmax.xlane.f32.xlu1 %v9701_v57 }
 0x804   : > { %3149 = vmax.xlane.f32.xlu0 %v9709_v19  ;;  %3161 = vmax.xlane.f32.xlu1 %v9704_v36 }
 0x808   : > { %3159 = vmax.xlane.f32.xlu0 %v9714_v23  ;;  %3157 = vmax.xlane.f32.xlu1 %v9717_v29 }
 0x80c   : > { %3155 = vmax.xlane.f32.xlu0 %v9725_v12  ;;  %3169 = vmax.xlane.f32.xlu1 %v9722_v34 }
 0x810   : > { %3167 = vmax.xlane.f32.xlu0 %v9728_v3  ;;  %3165 = vmax.xlane.f32.xlu1 %v9733_v41 }
 0x814   : > { %3163 = vmax.xlane.f32.xlu0 %v9738_v39 }
 0x84c   : > { %v3144_v61 = vpop.xlane.xlu1 %3143 }
 0x84d   : > { %v9744_v5 = vmax.f32 %v9741_v38, %v3144_v61 }
 0x84f   : > { %11482 = vst [vmem:[#allocation57_spill] sm:$0xff] %v9744_v5  ;;  %3736 = vst.msk [vmem:[#allocation3 + $0x110] sm:$0xff] %vm1778_vm5, %v9744_v5  ;;  %3247 = vperm.xlu1 %7258, %v9744_v5  }
 0x850   : > { %v3140_v25 = vpop.xlane.xlu1 %3139  ;;  %v3146_v22 = vpop.xlane.xlu0 %3145 }
 0x851   : > { %v9756_v14 = vmax.f32 %v9746_v28, %v3140_v25  ;;  %v9759_v61 = vmax.f32 %v9748_v0, %v3146_v22  ;;  %v9840_v0 = vld [vmem:[#allocation3 + $0x150] sm:$0xff] }
 0x853   : > { %11484 = vst [vmem:[#allocation52_spill] sm:$0xff] %v9759_v61  ;;  %3734 = vst.msk [vmem:[#allocation3 + $0x100] sm:$0xff] %vm1778_vm5, %v9756_v14  ;;  %3237 = vperm.xlu1 %7258, %v9756_v14  }
 0x854   : > { %3737 = vst.msk [vmem:[#allocation3 + $0x118] sm:$0xff] %vm1778_vm5, %v9759_v61  ;;  %v3142_v25 = vpop.xlane.xlu0 %3141  ;;  %v3594_v16 = vpop.permute.xlu1 %3593 }
 0x855   : > { %v9773_v22 = vmax.f32 %v9761_v37, %v3142_v25  ;;  %v9799_v25 = vld [vmem:[#allocation3 + $0x120] sm:$0xff] }
 0x856   : > { %11487 = vst [vmem:[#allocation51_spill] sm:$0xff] %v9799_v25 }
 0x857   : > { %3735 = vst.msk [vmem:[#allocation3 + $0x108] sm:$0xff] %vm1778_vm5, %v9773_v22  ;;  %3591 = vrot.lane.b32.xlu1 %v8793_v9, %s7860_s28  ;;  %3242 = vperm.xlu0 %7257, %v9773_v22   ;;  %v9820_v9 = vld [vmem:[#allocation3 + $0x128] sm:$0xff] }
 0x858   : > { %v3596_v46 = vpop.permute.xlu0 %3595  ;;  %11494 = vst [vmem:[#allocation116_spill] sm:$0xff] %v9820_v9 }
 0x859   : > { %6866 = vmatprep.subr.bf16.mxu1 %v3596_v46 }
 0x85a   : > { %6867 = vmatpush3.bf16.msra.mxu1 %v3596_v46  ;;  %v11485_v46 = vld [vmem:[#allocation33_spill] sm:$0xff] }
 0x85b   : > { %3587 = vrot.lane.b32.xlu1 %v8801_v40, %s7860_s28  ;;  %3252 = vperm.xlu0 %7257, %v9759_v61  }
 0x85c   : > { %6868 = vmatprep.subr.bf16.mxu1 %v3594_v16 }
 0x85e   : > { %6869 = vmatpush3.bf16.msra.mxu1 %v3594_v16  ;;  %v11486_v16 = vld [vmem:[#allocation24_spill] sm:$0xff] }
 0x85f   : > { %3583 = vrot.lane.b32.xlu1 %v8809_v31, %s7860_s28  ;;  %3589 = vrot.lane.b32.xlu0 %v8797_v18, %s7860_s28  ;;  %v9804_v18 = vld [vmem:[#allocation3 + $0x138] sm:$0xff] }
 0x860   : > { %11489 = vst [vmem:[#allocation61_spill] sm:$0xff] %v9804_v18 }
 0x863   : > { %3812 = vrot.lane.b32.xlu1 %v8631_v56, %s7861_s17  ;;  %3585 = vrot.lane.b32.xlu0 %v8805_v45, %s7860_s28  ;;  %v9806_v56 = vld [vmem:[#allocation3 + $0x130] sm:$0xff] }
 0x864   : > { %11490 = vst [vmem:[#allocation59_spill] sm:$0xff] %v9806_v56 }
 0x867   : > { %3808 = vrot.lane.b32.xlu1 %v8646_v62, %s7861_s17  ;;  %3581 = vrot.lane.b32.xlu0 %v11485_v46, %s7860_s28 }
 0x86b   : > { %3810 = vrot.lane.b32.xlu0 %v11486_v16, %s7861_s17 }
 0x885   : > { %v3148_v5 = vpop.xlane.xlu1 %3147 }
 0x886   : > { %v9802_v31 = vmax.f32 %v9799_v25, %v3148_v5  ;;  %v9818_v5 = vld [vmem:[#allocation3 + $0x158] sm:$0xff] }
 0x887   : > { %11493 = vst [vmem:[#allocation115_spill] sm:$0xff] %v9818_v5 }
 0x888   : > { %11488 = vst [vmem:[#allocation54_spill] sm:$0xff] %v9802_v31  ;;  %3738 = vst.msk [vmem:[#allocation3 + $0x120] sm:$0xff] %vm1778_vm5, %v9802_v31 }
 0x889   : > { %v3154_v62 = vpop.xlane.xlu1 %3153  ;;  %v3152_v46 = vpop.xlane.xlu0 %3151 }
 0x88a   : > { %v9813_v16 = vmax.f32 %v9804_v18, %v3154_v62  ;;  %v9816_v40 = vmax.f32 %v9806_v56, %v3152_v46  ;;  %v9838_v18 = vld [vmem:[#allocation3 + $0x148] sm:$0xff]  ;;  %v9860_v56 = vld [vmem:[#allocation3 + $0x140] sm:$0xff] }
 0x88b   : > { %11497 = vst [vmem:[#allocation119_spill] sm:$0xff] %v9838_v18 }
 0x88c   : > { %11491 = vst [vmem:[#allocation24_spill] sm:$0xff] %v9813_v16  ;;  %11492 = vst [vmem:[#allocation114_spill] sm:$0xff] %v9816_v40  ;;  %3272 = vperm.xlu0 %7257, %v9813_v16   ;;  %3267 = vperm.xlu1 %7258, %v9816_v40  }
 0x88d   : > { %3741 = vst.msk [vmem:[#allocation3 + $0x138] sm:$0xff] %vm1778_vm5, %v9813_v16  ;;  %3740 = vst.msk [vmem:[#allocation3 + $0x130] sm:$0xff] %vm1778_vm5, %v9816_v40  ;;  %v3162_v46 = vpop.xlane.xlu1 %3161  ;;  %v3150_v62 = vpop.xlane.xlu0 %3149 }
 0x88e   : > { %v9833_v25 = vmax.f32 %v9818_v5, %v3162_v46  ;;  %v9836_v61 = vmax.f32 %v9820_v9, %v3150_v62  ;;  %v9858_v5 = vld [vmem:[#allocation3 + $0x178] sm:$0xff] }
 0x88f   : > { %11500 = vst [vmem:[#allocation122_spill] sm:$0xff] %v9858_v5 }
 0x890   : > { %11495 = vst [vmem:[#allocation117_spill] sm:$0xff] %v9833_v25  ;;  %11496 = vst [vmem:[#allocation118_spill] sm:$0xff] %v9836_v61  ;;  %3257 = vperm.xlu1 %7258, %v9802_v31   ;;  %3262 = vperm.xlu0 %7257, %v9836_v61   ;;  %v9880_v31 = vld [vmem:[#allocation3 + $0x170] sm:$0xff] }
 0x891   : > { %3745 = vst.msk [vmem:[#allocation3 + $0x158] sm:$0xff] %vm1778_vm5, %v9833_v25  ;;  %3739 = vst.msk [vmem:[#allocation3 + $0x128] sm:$0xff] %vm1778_vm5, %v9836_v61  ;;  %v3158_v46 = vpop.xlane.xlu1 %3157  ;;  %v3160_v62 = vpop.xlane.xlu0 %3159 }
 0x892   : > { %v9853_v40 = vmax.f32 %v9838_v18, %v3158_v46  ;;  %v9856_v45 = vmax.f32 %v9840_v0, %v3160_v62  ;;  %v9878_v18 = vld [vmem:[#allocation3 + $0x168] sm:$0xff]  ;;  %11504 = vst [vmem:[#allocation126_spill] sm:$0xff] %v9880_v31 }
 0x893   : > { %11503 = vst [vmem:[#allocation125_spill] sm:$0xff] %v9878_v18 }
 0x894   : > { %11498 = vst [vmem:[#allocation120_spill] sm:$0xff] %v9853_v40  ;;  %11499 = vst [vmem:[#allocation121_spill] sm:$0xff] %v9856_v45  ;;  %3292 = vperm.xlu1 %7258, %v9833_v25   ;;  %3287 = vperm.xlu0 %7257, %v9856_v45   ;;  %v11511_v25 = vld [vmem:[#allocation106_spill] sm:$0xff] }
 0x895   : > { %3743 = vst.msk [vmem:[#allocation3 + $0x148] sm:$0xff] %vm1778_vm5, %v9853_v40  ;;  %3744 = vst.msk [vmem:[#allocation3 + $0x150] sm:$0xff] %vm1778_vm5, %v9856_v45  ;;  %v3170_v46 = vpop.xlane.xlu1 %3169  ;;  %v3156_v62 = vpop.xlane.xlu0 %3155 }
 0x896   : > { %v9873_v9 = vmax.f32 %v9858_v5, %v3170_v46  ;;  %v9876_v16 = vmax.f32 %v9860_v56, %v3156_v62  ;;  %v9898_v5 = vld [vmem:[#allocation3 + $0x160] sm:$0xff] }
 0x897   : > { %11507 = vst [vmem:[#allocation129_spill] sm:$0xff] %v9898_v5 }
 0x898   : > { %11501 = vst [vmem:[#allocation123_spill] sm:$0xff] %v9873_v9  ;;  %11502 = vst [vmem:[#allocation124_spill] sm:$0xff] %v9876_v16  ;;  %3282 = vperm.xlu1 %7258, %v9853_v40   ;;  %3277 = vperm.xlu0 %7257, %v9876_v16   ;;  %v11512_v40 = vld [vmem:[#allocation107_spill] sm:$0xff] }
 0x899   : > { %3749 = vst.msk [vmem:[#allocation3 + $0x178] sm:$0xff] %vm1778_vm5, %v9873_v9  ;;  %3742 = vst.msk [vmem:[#allocation3 + $0x140] sm:$0xff] %vm1778_vm5, %v9876_v16  ;;  %v3166_v46 = vpop.xlane.xlu1 %3165  ;;  %v3168_v62 = vpop.xlane.xlu0 %3167 }
 0x89a   : > { %v9893_v45 = vmax.f32 %v9878_v18, %v3166_v46  ;;  %v9896_v61 = vmax.f32 %v9880_v31, %v3168_v62 }
 0x89c   : > { %11505 = vst [vmem:[#allocation127_spill] sm:$0xff] %v9893_v45  ;;  %11506 = vst [vmem:[#allocation128_spill] sm:$0xff] %v9896_v61  ;;  %3806 = vrot.lane.b32.xlu0 %v8656_v2, %s7861_s17  ;;  %3307 = vperm.xlu1 %7258, %v9896_v61   ;;  %v11509_v2 = vld [vmem:[#allocation22_spill] sm:$0xff] }
 0x89d   : > { %3747 = vst.msk [vmem:[#allocation3 + $0x168] sm:$0xff] %vm1778_vm5, %v9893_v45  ;;  %3748 = vst.msk [vmem:[#allocation3 + $0x170] sm:$0xff] %vm1778_vm5, %v9896_v61  ;;  %v3164_v46 = vpop.xlane.xlu0 %3163 }
 0x89e   : > { %v9912_v62 = vmax.f32 %v9898_v5, %v3164_v46  ;;  %v11510_v46 = vld [vmem:[#allocation23_spill] sm:$0xff] }
 0x8a0   : > { %11508 = vst [vmem:[#allocation130_spill] sm:$0xff] %v9912_v62  ;;  %3746 = vst.msk [vmem:[#allocation3 + $0x160] sm:$0xff] %vm1778_vm5, %v9912_v62  ;;  %3302 = vperm.xlu0 %7257, %v9893_v45   ;;  %3297 = vperm.xlu1 %7258, %v9912_v62   ;;  %v11513_v45 = vld [vmem:[#allocation108_spill] sm:$0xff] }
 0x8a4   : > { %3312 = vperm.xlu0 %7257, %v9873_v9   ;;  %3804 = vrot.lane.b32.xlu1 %v8665_v6, %s7861_s17  ;;  %v11514_v6 = vld [vmem:[#allocation109_spill] sm:$0xff] }
 0x8a8   : > { %3802 = vrot.lane.b32.xlu0 %v8673_v10, %s7861_s17  ;;  %3800 = vrot.lane.b32.xlu1 %v11509_v2, %s7861_s17  ;;  %v11515_v10 = vld [vmem:[#allocation110_spill] sm:$0xff]  ;;  %v11516_v2 = vld [vmem:[#allocation111_spill] sm:$0xff] }
 0x8ac   : > { %3798 = vrot.lane.b32.xlu0 %v11510_v46, %s7861_s17  ;;  %3782 = vrot.lane.b32.xlu1 %v11511_v25, %s7861_s17  ;;  %v11517_v46 = vld [vmem:[#allocation112_spill] sm:$0xff]  ;;  %v11518_v25 = vld [vmem:[#allocation113_spill] sm:$0xff] }
 0x8b0   : > { %3784 = vrot.lane.b32.xlu0 %v11512_v40, %s7861_s17  ;;  %3786 = vrot.lane.b32.xlu1 %v11513_v45, %s7861_s17 }
 0x8b4   : > { %3788 = vrot.lane.b32.xlu0 %v11514_v6, %s7861_s17  ;;  %3790 = vrot.lane.b32.xlu1 %v11515_v10, %s7861_s17 }
 0x8b8   : > { %3792 = vrot.lane.b32.xlu0 %v11516_v2, %s7861_s17  ;;  %3794 = vrot.lane.b32.xlu1 %v11517_v46, %s7861_s17 }
 0x8bc   : > { %3796 = vrot.lane.b32.xlu0 %v11518_v25, %s7861_s17 }
 0x8ca   : > { %v3248_v18 = vpop.permute.xlu1 %3247 }
 0x8cb   : > { %v3317_v61 = vsub.f32 %v9674_v54, %v3248_v18 }
 0x8cd   : > { %v3335_v16 = vmul.f32 1.442695, %v3317_v61 }
 0x8ce   : > { %v3238_v40 = vpop.permute.xlu1 %3237 }
 0x8cf   : > { %v3315_v9 = vsub.f32 %v9678_v60, %v3238_v40 }
 0x8d1   : > { %v3331_v45 = vmul.f32 1.442695, %v3315_v9 }
 0x8d2   : > { %v3592_v62 = vpop.permute.xlu1 %3591  ;;  %v3243_v5 = vpop.permute.xlu0 %3242 }
 0x8d3   : > { %v3316_v6 = vsub.f32 %v9686_v59, %v3243_v5  ;;  %6870 = vmatprep.subr.bf16.mxu1 %v3592_v62  ;;  %7379 = vpow2.f32 %v3331_v45 }
 0x8d4   : > { %6871 = vmatpush3.bf16.msra.mxu1 %v3592_v62 }
 0x8d5   : > { %v3333_v10 = vmul.f32 1.442695, %v3316_v6  ;;  %v11519_v6 = vld [vmem:[#allocation79_spill] sm:$0xff] }
 0x8d6   : > { %v3253_v2 = vpop.permute.xlu0 %3252  ;;  %v3588_v9 = vpop.permute.xlu1 %3587 }
 0x8d7   : > { %7381 = vpow2.f32 %v3333_v10  ;;  %v3318_v46 = vsub.f32 %v9681_v55, %v3253_v2  ;;  %v11520_v10 = vld [vmem:[#allocation81_spill] sm:$0xff] }
 0x8d9   : > { %v3337_v25 = vmul.f32 1.442695, %v3318_v46 }
 0x8da   : > { %v3590_v31 = vpop.permute.xlu0 %3589  ;;  %v3584_v54 = vpop.permute.xlu1 %3583 }
 0x8db   : > { %2553 = vadd.xlane.f32.xlu0 %v9430_v32  ;;  %6872 = vmatprep.subr.bf16.mxu1 %v3590_v31  ;;  %7383 = vpow2.f32 %v3337_v25 }
 0x8dc   : > { %2551 = vadd.xlane.f32.xlu1 %v9427_v13  ;;  %6873 = vmatpush3.bf16.msra.mxu1 %v3590_v31  ;;  %7385 = vpow2.f32 %v3335_v16 }
 0x8dd   : > { %6874 = vmatprep.subr.bf16.mxu1 %v3588_v9 }
 0x8de   : > { %v3586_v59 = vpop.permute.xlu0 %3585 }
 0x8df   : > { %2555 = vadd.xlane.f32.xlu0 %v9440_v21 }
 0x8e0   : > { %2557 = vadd.xlane.f32.xlu1 %v9437_v50  ;;  %6875 = vmatpush3.bf16.msra.mxu1 %v3588_v9  ;;  %v9953_v18 = vpop.eup %7379 }
 0x8e1   : > { %6876 = vmatprep.subr.bf16.mxu1 %v3586_v59 }
 0x8e2   : > { %v3582_v13 = vpop.permute.xlu0 %3581 }
 0x8e3   : > { %2559 = vadd.xlane.f32.xlu0 %v9486_v26  ;;  %v3813_v26 = vpop.permute.xlu1 %3812 }
 0x8e4   : > { %v9956_v32 = vpop.eup %7381  ;;  %2561 = vadd.xlane.f32.xlu1 %v9488_v1  ;;  %6877 = vmatpush3.bf16.msra.mxu1 %v3586_v59  ;;  %v11522_v59 = vld [vmem:[#allocation75_spill] sm:$0xff] }
 0x8e5   : > { %6878 = vmatprep.subr.bf16.mxu1 %v3584_v54  ;;  %v3573_v31 = vpack.c.bf16 %v9956_v32, %v9953_v18 }
 0x8e6   : > { %v3811_v1 = vpop.permute.xlu0 %3810 }
 0x8e7   : > { %2563 = vadd.xlane.f32.xlu0 %v9479_v47  ;;  %6882 = vmatprep.mubr.bf16.mxu1 %v3573_v31 }
 0x8e8   : > { %2565 = vadd.xlane.f32.xlu1 %v9482_v33  ;;  %6879 = vmatpush3.bf16.msra.mxu1 %v3584_v54  ;;  %v9963_v50 = vpop.eup %7383  ;;  %v3860_v33 = vsel %vm1312_vm3, %v3813_v26, 0 }
 0x8e9   : > { %6880 = vmatprep.subr.bf16.mxu1 %v3582_v13  ;;  %v9966_v21 = vpop.eup %7385 }
 0x8ea   : > { %v3574_v47 = vpack.c.bf16 %v9963_v50, %v9966_v21 }
 0x8eb   : > { %2567 = vadd.xlane.f32.xlu0 %v9504_v44  ;;  %v3809_v44 = vpop.permute.xlu1 %3808 }
 0x8ec   : > { %2569 = vadd.xlane.f32.xlu1 %v9502_v52  ;;  %6881 = vmatpush3.bf16.msra.mxu1 %v3582_v13  ;;  %v3857_v52 = vsel %vm1312_vm3, %v3811_v1, 0 }
 0x8ed   : > { %7114 = vmatprep.subr.msk.bf16.mxu1 %vm1312_vm3, %v3813_v26  ;;  %v11525_v26 = vld [vmem:[#allocation74_spill] sm:$0xff] }
 0x8ef   : > { %2571 = vadd.xlane.f32.xlu0 %v9499_v35  ;;  %6883 = vmatmul.mubr.bf16.vlgmr.msra.gmra.mxu1 %v3574_v47  ;;  %v3854_v35 = vsel %vm1312_vm3, %v3809_v44, 0  ;;  %v11526_v47 = vld [vmem:[#allocation76_spill] sm:$0xff] }
 0x8f0   : > { %2573 = vadd.xlane.f32.xlu1 %v9497_v48  ;;  %6899 = vmatpush3.bf16.xpose.msra.mxu1 %v3860_v33 }
 0x8f1   : > { %7115 = vmatprep.subr.msk.bf16.mxu1 %vm1312_vm3, %v3811_v1 }
 0x8f3   : > { %2575 = vadd.xlane.f32.xlu0 %v9512_v63 }
 0x8f4   : > { %2577 = vadd.xlane.f32.xlu1 %v9514_v20 }
 0x8f7   : > { %2579 = vadd.xlane.f32.xlu0 %v9518_v58 }
 0x8f8   : > { %2581 = vadd.xlane.f32.xlu1 %v9521_v30  ;;  %6901 = vmatpush3.bf16.xpose.msra.mxu1 %v3857_v52 }
 0x8f9   : > { %7116 = vmatprep.subr.msk.bf16.mxu1 %vm1312_vm3, %v3809_v44  ;;  %v11531_v44 = vld [vmem:[#allocation83_spill] sm:$0xff] }
 0x900   : > { %6903 = vmatpush3.bf16.xpose.msra.mxu1 %v3854_v35  ;;  %v11532_v35 = vld [vmem:[#allocation85_spill] sm:$0xff] }
 0x907   : > { %v3268_v48 = vpop.permute.xlu1 %3267  ;;  %v3273_v60 = vpop.permute.xlu0 %3272 }
 0x908   : > { %v3321_v55 = vsub.f32 %v9698_v4, %v3268_v48  ;;  %v3322_v63 = vsub.f32 %v9701_v57, %v3273_v60  ;;  %v11533_v48 = vsub.f32 %v11531_v44, %v11532_v35  ;;  %v11552_v35 = vld [vmem:[#allocation91_spill] sm:$0xff] }
 0x909   : > { %1823 = vperm.xlu1 %7258, %v9563_v11  }
 0x90a   : > { %v3343_v20 = vmul.f32 1.442695, %v3321_v55  ;;  %v3345_v58 = vmul.f32 1.442695, %v3322_v63  ;;  %v2370_v60 = vmul.f32 1.442695, %v11533_v48 }
 0x90b   : > { %v3258_v61 = vpop.permute.xlu1 %3257  ;;  %v3263_v16 = vpop.permute.xlu0 %3262  ;;  %v11534_v63 = vld [vmem:[#allocation87_spill] sm:$0xff]  ;;  %v11553_v48 = vld [vmem:[#allocation93_spill] sm:$0xff] }
 0x90c   : > { %v3319_v30 = vsub.f32 %v9694_v43, %v3258_v61  ;;  %v3320_v5 = vsub.f32 %v9709_v19, %v3263_v16  ;;  %7387 = vpow2.f32 %v3343_v20  ;;  %v11521_v43 = vsub.f32 %v11519_v6, %v11520_v10  ;;  %v11535_v20 = vld [vmem:[#allocation89_spill] sm:$0xff] }
 0x90d   : > { %1828 = vperm.xlu0 %7257, %v9569_v7   ;;  %1833 = vperm.xlu1 %7258, %v9576_v42   ;;  %7389 = vpow2.f32 %v3345_v58  ;;  %v11536_v58 = vsub.f32 %v11534_v63, %v11535_v20 }
 0x90e   : > { %v3339_v62 = vmul.f32 1.442695, %v3319_v30  ;;  %v3341_v40 = vmul.f32 1.442695, %v3320_v5  ;;  %v2360_v2 = vmul.f32 1.442695, %v11521_v43 }
 0x90f   : > { %v3293_v4 = vpop.permute.xlu1 %3292  ;;  %v3288_v57 = vpop.permute.xlu0 %3287  ;;  %v2366_v61 = vmul.f32 1.442695, %v11536_v58 }
 0x910   : > { %7391 = vpow2.f32 %v3339_v62  ;;  %v3326_v11 = vsub.f32 %v9704_v36, %v3293_v4  ;;  %v3325_v45 = vsub.f32 %v9714_v23, %v3288_v57  ;;  %v11538_v57 = vld [vmem:[#allocation88_spill] sm:$0xff] }
 0x911   : > { %7393 = vpow2.f32 %v3341_v40  ;;  %1838 = vperm.xlu0 %7257, %v9583_v15   ;;  %1843 = vperm.xlu1 %7258, %v9590_v27   ;;  %v11523_v15 = vld [vmem:[#allocation77_spill] sm:$0xff] }
 0x912   : > { %v3353_v7 = vmul.f32 1.442695, %v3326_v11  ;;  %v3351_v42 = vmul.f32 1.442695, %v3325_v45  ;;  %7395 = vpow2.f32 %v2360_v2  ;;  %v11524_v54 = vsub.f32 %v11522_v59, %v11523_v15 }
 0x913   : > { %v3283_v19 = vpop.permute.xlu1 %3282  ;;  %v3278_v46 = vpop.permute.xlu0 %3277 }
 0x914   : > { %v3324_v25 = vsub.f32 %v9717_v29, %v3283_v19  ;;  %v3323_v9 = vsub.f32 %v9725_v12, %v3278_v46  ;;  %7397 = vpow2.f32 %v3353_v7  ;;  %v2358_v27 = vmul.f32 1.442695, %v11524_v54  ;;  %v11529_v12 = vld [vmem:[#allocation80_spill] sm:$0xff] }
 0x915   : > { %1848 = vperm.xlu0 %7257, %v9597_v24   ;;  %1853 = vperm.xlu1 %7258, %v9601_v53   ;;  %7399 = vpow2.f32 %v3351_v42  ;;  %v11527_v29 = vsub.f32 %v11525_v26, %v11526_v47  ;;  %v11528_v53 = vld [vmem:[#allocation78_spill] sm:$0xff] }
 0x916   : > { %v3349_v23 = vmul.f32 1.442695, %v3324_v25  ;;  %v3347_v36 = vmul.f32 1.442695, %v3323_v9  ;;  %v11530_v1 = vsub.f32 %v11528_v53, %v11529_v12  ;;  %v11540_v42 = vld [vmem:[#allocation34_spill] sm:$0xff]  ;;  %v11550_v53 = vld [vmem:[#allocation96_spill] sm:$0xff] }
 0x917   : > { %v3308_v31 = vpop.permute.xlu1 %3307  ;;  %v3807_v13 = vpop.permute.xlu0 %3806  ;;  %v2362_v33 = vmul.f32 1.442695, %v11527_v29  ;;  %v11541_v25 = vld [vmem:[#allocation38_spill] sm:$0xff]  ;;  %v11548_v29 = vld [vmem:[#allocation40_spill] sm:$0xff] }
 0x918   : > { %7401 = vpow2.f32 %v3349_v23  ;;  %7117 = vmatprep.subr.msk.bf16.mxu1 %vm1312_vm3, %v3807_v13  ;;  %v3851_v24 = vsel %vm1312_vm3, %v3807_v13, 0  ;;  %v2364_v52 = vmul.f32 1.442695, %v11530_v1  ;;  %v3329_v16 = vsub.f32 %v9728_v3, %v3308_v31  ;;  %v11537_v3 = vld [vmem:[#allocation86_spill] sm:$0xff]  ;;  %v11543_v23 = vld [vmem:[#allocation84_spill] sm:$0xff]  ;;  %v11546_v31 = vld [vmem:[#allocation97_spill] sm:$0xff] }
 0x919   : > { %7403 = vpow2.f32 %v3347_v36  ;;  %1858 = vperm.xlu0 %7257, %v9605_v51   ;;  %1863 = vperm.xlu1 %7258, %v9609_v49   ;;  %v10017_v55 = vpop.eup %7387  ;;  %v11539_v11 = vsub.f32 %v11537_v3, %v11538_v57 }
 0x91a   : > { %6905 = vmatpush3.bf16.xpose.msra.mxu1 %v3851_v24  ;;  %7405 = vpow2.f32 %v2358_v27  ;;  %v10023_v62 = vpop.eup %7389  ;;  %v11545_v27 = vld [vmem:[#allocation95_spill] sm:$0xff]  ;;  %v11549_v24 = vld [vmem:[#allocation94_spill] sm:$0xff] }
 0x91b   : > { %v3298_v30 = vpop.permute.xlu1 %3297  ;;  %v3303_v5 = vpop.permute.xlu0 %3302  ;;  %7407 = vpow2.f32 %v2362_v33  ;;  %v2368_v45 = vmul.f32 1.442695, %v11539_v11  ;;  %v11547_v13 = vsub.f32 %v11545_v27, %v11546_v31  ;;  %v11551_v12 = vsub.f32 %v11549_v24, %v11550_v53 }
 0x91c   : > { %v3327_v51 = vsub.f32 %v9738_v39, %v3298_v30  ;;  %v3328_v49 = vsub.f32 %v9733_v41, %v3303_v5  ;;  %7409 = vpow2.f32 %v2364_v52  ;;  %v3359_v39 = vmul.f32 1.442695, %v3329_v16  ;;  %v11555_v5 = vld [vmem:[#allocation90_spill] sm:$0xff] }
 0x91d   : > { %v10027_v40 = vpop.eup %7391  ;;  %1868 = vperm.xlu0 %7257, %v9613_v8   ;;  %1873 = vperm.xlu1 %7258, %v9617_v17   ;;  %7411 = vpow2.f32 %v2370_v60  ;;  %v3576_v17 = vpack.c.bf16 %v10023_v62, %v10017_v55  ;;  %v2374_v26 = vmul.f32 1.442695, %v11547_v13  ;;  %v2376_v1 = vmul.f32 1.442695, %v11551_v12 }
 0x91e   : > { %v10031_v4 = vpop.eup %7393  ;;  %v3355_v6 = vmul.f32 1.442695, %v3327_v51  ;;  %v3357_v10 = vmul.f32 1.442695, %v3328_v49  ;;  %7413 = vpow2.f32 %v2366_v61  ;;  %v11554_v60 = vsub.f32 %v11552_v35, %v11553_v48  ;;  %v11556_v51 = vld [vmem:[#allocation92_spill] sm:$0xff] }
 0x91f   : > { %v3805_v43 = vpop.permute.xlu1 %3804  ;;  %v3313_v41 = vpop.permute.xlu0 %3312  ;;  %v3575_v2 = vpack.c.bf16 %v10031_v4, %v10027_v40  ;;  %v11557_v49 = vsub.f32 %v11555_v5, %v11556_v51 }
 0x920   : > { %7415 = vpow2.f32 %v3355_v6  ;;  %v3330_v8 = vsub.f32 %v9722_v34, %v3313_v41  ;;  %7118 = vmatprep.subr.msk.bf16.mxu1 %vm1312_vm3, %v3805_v43  ;;  %v3848_v7 = vsel %vm1312_vm3, %v3805_v43, 0  ;;  %v10044_v19 = vpop.eup %7395  ;;  %v11542_v34 = vld [vmem:[#allocation82_spill] sm:$0xff]  ;;  %v2378_v63 = vmul.f32 1.442695, %v11554_v60  ;;  %v11559_v6 = vld [vmem:[#allocation105_spill] sm:$0xff] }
 0x921   : > { %7417 = vpow2.f32 %v3357_v10  ;;  %6886 = vmatprep.mubr.bf16.mxu1 %v3575_v2  ;;  %1878 = vperm.xlu0 %7257, %v11540_v42   ;;  %v10047_v9 = vpop.eup %7397  ;;  %v11544_v36 = vsub.f32 %v11542_v34, %v11543_v23  ;;  %v2380_v3 = vmul.f32 1.442695, %v11557_v49  ;;  %v11564_v34 = vld [vmem:[#allocation99_spill] sm:$0xff]  ;;  %v11565_v23 = vld [vmem:[#allocation101_spill] sm:$0xff]  ;;  %v11571_v60 = vsub.f32 %v9746_v28, %v9756_v14 }
 0x922   : > { %7419 = vpow2.f32 %v2368_v45  ;;  %v3361_v46 = vmul.f32 1.442695, %v3330_v8  ;;  %1883 = vperm.xlu1 %7258, %v11541_v25   ;;  %6887 = vmatmul.mubr.bf16.gmra.mxu1 %v3576_v17  ;;  %v10052_v54 = vpop.eup %7399  ;;  %v11558_v45 = vld [vmem:[#allocation103_spill] sm:$0xff]  ;;  %v11561_v8 = vld [vmem:[#allocation102_spill] sm:$0xff]  ;;  %v11562_v17 = vld [vmem:[#allocation104_spill] sm:$0xff] }
 0x923   : > { %v2372_v59 = vmul.f32 1.442695, %v11544_v36  ;;  %7421 = vpow2.f32 %v3359_v39  ;;  %6907 = vmatpush3.bf16.xpose.msra.mxu1 %v3848_v7  ;;  %v3803_v15 = vpop.permute.xlu0 %3802  ;;  %v3578_v20 = vpack.c.bf16 %v10047_v9, %v10052_v54  ;;  %v3801_v57 = vpop.permute.xlu1 %3800  ;;  %v11560_v10 = vsub.f32 %v11558_v45, %v11559_v6 }
 0x924   : > { %7423 = vpow2.f32 %v3361_v46  ;;  %7119 = vmatprep.subr.msk.bf16.mxu1 %vm1312_vm3, %v3803_v15  ;;  %v3845_v16 = vsel %vm1312_vm3, %v3803_v15, 0  ;;  %v11563_v7 = vsub.f32 %v11561_v8, %v11562_v17  ;;  %v11566_v36 = vsub.f32 %v11564_v34, %v11565_v23 }
 0x925   : > { %v10058_v47 = vpop.eup %7401  ;;  %1888 = vperm.xlu0 %7257, %v11548_v29   ;;  %7425 = vpow2.f32 %v2372_v59  ;;  %v2382_v39 = vmul.f32 1.442695, %v11560_v10  ;;  %v3842_v27 = vsel %vm1312_vm3, %v3801_v57, 0  ;;  %v11568_v29 = vld [vmem:[#allocation100_spill] sm:$0xff] }
 0x926   : > { %v10061_v33 = vpop.eup %7403  ;;  %2639 = vperm.xlu1 %7258, %v10044_v19   ;;  %7427 = vpow2.f32 %v2374_v26  ;;  %v2384_v42 = vmul.f32 1.442695, %v11563_v7  ;;  %v2386_v59 = vmul.f32 1.442695, %v11566_v36  ;;  %v11567_v26 = vld [vmem:[#allocation98_spill] sm:$0xff] }
 0x927   : > { %v3577_v52 = vpack.c.bf16 %v10058_v47, %v10061_v33  ;;  %v10069_v44 = vpop.eup %7405  ;;  %7429 = vpow2.f32 %v2376_v1  ;;  %v3783_v13 = vpop.permute.xlu1 %3782  ;;  %v11569_v24 = vsub.f32 %v11567_v26, %v11568_v29 }
 0x928   : > { %v10076_v58 = vpop.eup %7407  ;;  %7431 = vpow2.f32 %v2378_v63  ;;  %v3799_v12 = vpop.permute.xlu0 %3798  ;;  %v3203_v63 = vmul.f32 1.442695, %v11571_v60 }
 0x929   : > { %6890 = vmatprep.mubr.bf16.mxu1 %v3577_v52  ;;  %2634 = vperm.xlu0 %7257, %v10069_v44   ;;  %v10079_v61 = vpop.eup %7409  ;;  %7433 = vpow2.f32 %v2380_v3  ;;  %v2388_v53 = vmul.f32 1.442695, %v11569_v24  ;;  %v11570_v52 = vsub.f32 %v9761_v37, %v9773_v22  ;;  %v3839_v22 = vsel %vm1312_vm3, %v3799_v12, 0 }
 0x92a   : > { %2644 = vperm.xlu1 %7258, %v10076_v58   ;;  %6891 = vmatmul.mubr.bf16.gmra.mxu1 %v3578_v20  ;;  %v10083_v30 = vpop.eup %7411  ;;  %7435 = vpow2.f32 %v2382_v39  ;;  %v11572_v39 = vld [vmem:[#allocation26_spill] sm:$0xff] }
 0x92b   : > { %6909 = vmatpush3.bf16.xpose.msra.mxu1 %v3845_v16  ;;  %v10088_v11 = vpop.eup %7413  ;;  %7437 = vpow2.f32 %v2384_v42  ;;  %v3205_v35 = vmul.f32 1.442695, %v11570_v52  ;;  %v3787_v51 = vpop.permute.xlu1 %3786  ;;  %v2520_v42 = vld [vmem:[#allocation4 + $0x88] sm:$0xff] }
 0x92c   : > { %7120 = vmatprep.subr.msk.bf16.mxu1 %vm1312_vm3, %v3801_v57  ;;  %7439 = vpow2.f32 %v2386_v59  ;;  %v3785_v14 = vpop.permute.xlu0 %3784  ;;  %v2536_v34 = vmul.f32 %v10044_v19, %v2520_v42  ;;  %v2521_v59 = vld [vmem:[#allocation4 + $0x90] sm:$0xff]  ;;  %v2523_v19 = vld [vmem:[#allocation4 + $0xa0] sm:$0xff] }
 0x92d   : > { %v10094_v43 = vpop.eup %7415  ;;  %2649 = vperm.xlu0 %7257, %v10079_v61   ;;  %7441 = vpow2.f32 %v2388_v53  ;;  %v2537_v29 = vmul.f32 %v10076_v58, %v2521_v59  ;;  %v2539_v60 = vmul.f32 %v10088_v11, %v2523_v19  ;;  %v2532_v59 = vld [vmem:[#allocation4 + $0xe8] sm:$0xff]  ;;  %v1797_v19 = vld [vmem:[#allocation5 + $0x10] sm:$0xff] }
 0x92e   : > { %v10097_v41 = vpop.eup %7417  ;;  %2654 = vperm.xlu1 %7258, %v10088_v11   ;;  %7443 = vpow2.f32 %v3205_v35 }
 0x92f   : > { %v10100_v2 = vpop.eup %7419  ;;  %v3579_v46 = vpack.c.bf16 %v10097_v41, %v10094_v43  ;;  %7445 = vpow2.f32 %v3203_v63  ;;  %v3791_v10 = vpop.permute.xlu1 %3790 }
 0x930   : > { %v10107_v25 = vpop.eup %7421  ;;  %v3789_v45 = vpop.permute.xlu0 %3788 }
 0x931   : > { %v10112_v15 = vpop.eup %7423  ;;  %6894 = vmatprep.mubr.bf16.mxu1 %v3579_v46  ;;  %2659 = vperm.xlu0 %7257, %v10100_v2   ;;  %v2519_v46 = vld [vmem:[#allocation4 + $0x80] sm:$0xff] }
 0x932   : > { %2664 = vperm.xlu1 %7258, %v10083_v30   ;;  %v3580_v31 = vpack.c.bf16 %v10112_v15, %v10107_v25  ;;  %v10122_v1 = vpop.eup %7425  ;;  %v2535_v36 = vmul.f32 %v10069_v44, %v2519_v46  ;;  %v2524_v44 = vld [vmem:[#allocation4 + $0xa8] sm:$0xff]  ;;  %v2530_v46 = vld [vmem:[#allocation4 + $0xd8] sm:$0xff] }
 0x933   : > { %6911 = vmatpush3.bf16.xpose.msra.mxu1 %v3842_v27  ;;  %v10128_v48 = vpop.eup %7427  ;;  %v3795_v17 = vpop.permute.xlu1 %3794  ;;  %v2540_v63 = vmul.f32 %v10100_v2, %v2524_v44 }
 0x934   : > { %7121 = vmatprep.subr.msk.bf16.mxu1 %vm1312_vm3, %v3799_v12  ;;  %6895 = vmatmul.mubr.bf16.gmra.mxu1 %v3580_v31  ;;  %v10136_v20 = vpop.eup %7429  ;;  %v3793_v8 = vpop.permute.xlu0 %3792 }
 0x935   : > { %2669 = vperm.xlu0 %7257, %v10122_v1   ;;  %6914 = vmatprep.mubr.msk.bf16.mxu1 %vm1312_vm3, %v3783_v13  ;;  %v10138_v37 = vpop.eup %7431  ;;  %v2522_v13 = vld [vmem:[#allocation4 + $0x98] sm:$0xff] }
 0x936   : > { %2674 = vperm.xlu1 %7258, %v10128_v48   ;;  %v10143_v16 = vpop.eup %7433  ;;  %v2538_v53 = vmul.f32 %v10079_v61, %v2522_v13  ;;  %v2526_v61 = vld [vmem:[#allocation4 + $0xb8] sm:$0xff] }
 0x937   : > { %v10145_v5 = vpop.eup %7435 }
 0x938   : > { %v10149_v28 = vpop.eup %7437  ;;  %v3797_v7 = vpop.permute.xlu0 %3796 }
 0x939   : > { %2679 = vperm.xlu0 %7257, %v10136_v20   ;;  %v10151_v49 = vpop.eup %7439 }
 0x93a   : > { %2684 = vperm.xlu1 %7258, %v10138_v37   ;;  %v10157_v3 = vpop.eup %7441 }
 0x93b   : > { %6913 = vmatpush3.bf16.xpose.msra.mxu1 %v3839_v22  ;;  %v10159_v57 = vpop.eup %7443 }
 0x93c   : > { %v10163_v6 = vpop.eup %7445 }
 0x93d   : > { %2689 = vperm.xlu0 %7257, %v10143_v16  }
 0x93e   : > { %2694 = vperm.xlu1 %7258, %v10145_v5  }
 0x941   : > { %2699 = vperm.xlu0 %7257, %v10149_v28  }
 0x942   : > { %6915 = vmatmul.mubr.msk.bf16.vlgmr.msra.gmra.mxu1 %vm1312_vm3, %v3785_v14  ;;  %2704 = vperm.xlu1 %7258, %v10151_v49  }
 0x943   : > { %6918 = vmatprep.mubr.msk.bf16.mxu1 %vm1312_vm3, %v3787_v51 }
 0x945   : > { %2709 = vperm.xlu0 %7257, %v10157_v3  }
 0x946   : > { %3484 = vperm.xlu1 %7258, %v10159_v57  }
 0x949   : > { %3479 = vperm.xlu0 %7257, %v10163_v6  }
 0x94a   : > { %6919 = vmatmul.mubr.msk.bf16.gmra.mxu1 %vm1312_vm3, %v3789_v45  ;;  %4432 = vrot.lane.b32.xlu1 %v11572_v39, %s7861_s17 }
 0x94b   : > { %6922 = vmatprep.mubr.msk.bf16.mxu1 %vm1312_vm3, %v3791_v10  ;;  %v2527_v10 = vld [vmem:[#allocation4 + $0xc0] sm:$0xff] }
 0x952   : > { %6923 = vmatmul.mubr.msk.bf16.gmra.mxu1 %vm1312_vm3, %v3793_v8  ;;  %v2528_v8 = vld [vmem:[#allocation4 + $0xc8] sm:$0xff] }
 0x953   : > { %6926 = vmatprep.mubr.msk.bf16.mxu1 %vm1312_vm3, %v3795_v17 }
 0x95a   : > { %6927 = vmatmul.mubr.msk.bf16.gmra.mxu1 %vm1312_vm3, %v3797_v7  ;;  %v2529_v7 = vld [vmem:[#allocation4 + $0xd0] sm:$0xff] }
 0x964   : > { %v2554_v23 = vpop.xlane.xlu0 %2553 }
 0x965   : > { %v2584_v27 = vadd.f32 %v2554_v23, %v2536_v34  ;;  %v2552_v31 = vpop.xlane.xlu1 %2551  ;;  %v2531_v23 = vld [vmem:[#allocation4 + $0xe0] sm:$0xff] }
 0x966   : > { %v2583_v26 = vadd.f32 %v2552_v31, %v2535_v36  ;;  %v2533_v31 = vld [vmem:[#allocation4 + $0xf0] sm:$0xff] }
 0x967   : > { %2600 = vst.msk [vmem:[#allocation4 + $0x88] sm:$0xff] %vm1778_vm5, %v2584_v27 }
 0x968   : > { %2599 = vst.msk [vmem:[#allocation4 + $0x80] sm:$0xff] %vm1778_vm5, %v2583_v26  ;;  %3400 = vadd.xlane.f32.xlu0 %v9966_v21  ;;  %v2556_v24 = vpop.xlane.xlu0 %2555  ;;  %v2525_v21 = vld [vmem:[#allocation4 + $0xb0] sm:$0xff]  ;;  %v2534_v26 = vld [vmem:[#allocation4 + $0xf8] sm:$0xff] }
 0x969   : > { %v2585_v12 = vadd.f32 %v2556_v24, %v2537_v29  ;;  %v2558_v52 = vpop.xlane.xlu1 %2557  ;;  %v2541_v45 = vmul.f32 %v10083_v30, %v2525_v21 }
 0x96a   : > { %v2586_v35 = vadd.f32 %v2558_v52, %v2538_v53  ;;  %v11573_v52 = vld [vmem:[#allocation58_spill] sm:$0xff] }
 0x96b   : > { %2601 = vst.msk [vmem:[#allocation4 + $0x90] sm:$0xff] %vm1778_vm5, %v2585_v12  ;;  %v1799_v12 = vld [vmem:[#allocation5 + $0x20] sm:$0xff] }
 0x96c   : > { %2602 = vst.msk [vmem:[#allocation4 + $0x98] sm:$0xff] %vm1778_vm5, %v2586_v35  ;;  %3398 = vadd.xlane.f32.xlu0 %v9956_v32  ;;  %v2560_v58 = vpop.xlane.xlu0 %2559  ;;  %v2542_v32 = vmul.f32 %v10122_v1, %v2526_v61 }
 0x96d   : > { %v2587_v22 = vadd.f32 %v2560_v58, %v2539_v60  ;;  %v2562_v14 = vpop.xlane.xlu1 %2561  ;;  %v1800_v58 = vld [vmem:[#allocation5 + $0x28] sm:$0xff] }
 0x96e   : > { %3396 = vadd.xlane.f32.xlu1 %v9953_v18  ;;  %v2588_v51 = vadd.f32 %v2562_v14, %v2540_v63  ;;  %v2543_v18 = vmul.f32 %v10128_v48, %v2527_v10  ;;  %v11574_v63 = vld [vmem:[#allocation60_spill] sm:$0xff] }
 0x96f   : > { %2603 = vst.msk [vmem:[#allocation4 + $0xa0] sm:$0xff] %vm1778_vm5, %v2587_v22  ;;  %v11575_v22 = vld [vmem:[#allocation63_spill] sm:$0xff] }
 0x970   : > { %2604 = vst.msk [vmem:[#allocation4 + $0xa8] sm:$0xff] %vm1778_vm5, %v2588_v51  ;;  %3408 = vadd.xlane.f32.xlu0 %v10017_v55  ;;  %v2564_v11 = vpop.xlane.xlu0 %2563  ;;  %v2544_v55 = vmul.f32 %v10136_v20, %v2528_v8 }
 0x971   : > { %v2589_v2 = vadd.f32 %v2564_v11, %v2541_v45  ;;  %v2566_v39 = vpop.xlane.xlu1 %2565  ;;  %v1802_v11 = vld [vmem:[#allocation5 + $0x38] sm:$0xff] }
 0x972   : > { %v2590_v17 = vadd.f32 %v2566_v39, %v2542_v32  ;;  %3402 = vadd.xlane.f32.xlu1 %v9963_v50  ;;  %v2545_v50 = vmul.f32 %v10138_v37, %v2529_v7  ;;  %v11576_v32 = vld [vmem:[#allocation65_spill] sm:$0xff]  ;;  %v11577_v39 = vld [vmem:[#allocation62_spill] sm:$0xff]  ;;  %v11578_v7 = vld [vmem:[#allocation64_spill] sm:$0xff] }
 0x973   : > { %2605 = vst.msk [vmem:[#allocation4 + $0xb0] sm:$0xff] %vm1778_vm5, %v2589_v2  ;;  %v1803_v2 = vld [vmem:[#allocation5 + $0x40] sm:$0xff] }
 0x974   : > { %2606 = vst.msk [vmem:[#allocation4 + $0xb8] sm:$0xff] %vm1778_vm5, %v2590_v17  ;;  %3404 = vadd.xlane.f32.xlu0 %v10027_v40  ;;  %v2568_v30 = vpop.xlane.xlu0 %2567  ;;  %v2546_v40 = vmul.f32 %v10143_v16, %v2530_v46  ;;  %v11579_v46 = vld [vmem:[#allocation67_spill] sm:$0xff] }
 0x975   : > { %v2591_v1 = vadd.f32 %v2568_v30, %v2543_v18  ;;  %v2570_v42 = vpop.xlane.xlu1 %2569 }
 0x976   : > { %v2592_v34 = vadd.f32 %v2570_v42, %v2544_v55  ;;  %3410 = vadd.xlane.f32.xlu1 %v10023_v62  ;;  %v2547_v62 = vmul.f32 %v10145_v5, %v2531_v23  ;;  %v1804_v55 = vld [vmem:[#allocation5 + $0x48] sm:$0xff]  ;;  %v1805_v42 = vld [vmem:[#allocation5 + $0x50] sm:$0xff] }
 0x977   : > { %2607 = vst.msk [vmem:[#allocation4 + $0xc0] sm:$0xff] %vm1778_vm5, %v2591_v1 }
 0x978   : > { %2608 = vst.msk [vmem:[#allocation4 + $0xc8] sm:$0xff] %vm1778_vm5, %v2592_v34  ;;  %3416 = vadd.xlane.f32.xlu0 %v10052_v54  ;;  %v2572_v48 = vpop.xlane.xlu0 %2571  ;;  %v2548_v54 = vmul.f32 %v10149_v28, %v2532_v59 }
 0x979   : > { %v2593_v20 = vadd.f32 %v2572_v48, %v2545_v50  ;;  %v2574_v36 = vpop.xlane.xlu1 %2573 }
 0x97a   : > { %v2594_v27 = vadd.f32 %v2574_v36, %v2546_v40  ;;  %3406 = vadd.xlane.f32.xlu1 %v10031_v4  ;;  %v2549_v4 = vmul.f32 %v10151_v49, %v2533_v31  ;;  %v11580_v36 = vld [vmem:[#allocation69_spill] sm:$0xff] }
 0x97b   : > { %2609 = vst.msk [vmem:[#allocation4 + $0xd0] sm:$0xff] %vm1778_vm5, %v2593_v20  ;;  %v1806_v20 = vld [vmem:[#allocation5 + $0x58] sm:$0xff] }
 0x97c   : > { %2610 = vst.msk [vmem:[#allocation4 + $0xd8] sm:$0xff] %vm1778_vm5, %v2594_v27  ;;  %3412 = vadd.xlane.f32.xlu0 %v10061_v33  ;;  %v2576_v37 = vpop.xlane.xlu0 %2575  ;;  %v2550_v33 = vmul.f32 %v10157_v3, %v2534_v26  ;;  %v1807_v27 = vld [vmem:[#allocation5 + $0x60] sm:$0xff]  ;;  %v1808_v26 = vld [vmem:[#allocation5 + $0x68] sm:$0xff] }
 0x97d   : > { %v2595_v16 = vadd.f32 %v2576_v37, %v2547_v62  ;;  %v2578_v13 = vpop.xlane.xlu1 %2577  ;;  %v11581_v62 = vld [vmem:[#allocation66_spill] sm:$0xff] }
 0x97e   : > { %v2596_v29 = vadd.f32 %v2578_v13, %v2548_v54  ;;  %3418 = vadd.xlane.f32.xlu1 %v10047_v9 }
 0x97f   : > { %2611 = vst.msk [vmem:[#allocation4 + $0xe0] sm:$0xff] %vm1778_vm5, %v2595_v16 }
 0x980   : > { %2612 = vst.msk [vmem:[#allocation4 + $0xe8] sm:$0xff] %vm1778_vm5, %v2596_v29  ;;  %3424 = vadd.xlane.f32.xlu0 %v10107_v25  ;;  %v2580_v5 = vpop.xlane.xlu0 %2579  ;;  %v1798_v25 = vld [vmem:[#allocation5 + $0x18] sm:$0xff]  ;;  %v11582_v29 = vld [vmem:[#allocation68_spill] sm:$0xff] }
 0x981   : > { %v2597_v24 = vadd.f32 %v2580_v5, %v2549_v4  ;;  %v2582_v28 = vpop.xlane.xlu1 %2581  ;;  %v1809_v5 = vld [vmem:[#allocation5 + $0x70] sm:$0xff] }
 0x982   : > { %v2598_v53 = vadd.f32 %v2582_v28, %v2550_v33  ;;  %3414 = vadd.xlane.f32.xlu1 %v10058_v47  ;;  %v11583_v33 = vld [vmem:[#allocation71_spill] sm:$0xff] }
 0x983   : > { %2613 = vst.msk [vmem:[#allocation4 + $0xf0] sm:$0xff] %vm1778_vm5, %v2597_v24 }
 0x984   : > { %2614 = vst.msk [vmem:[#allocation4 + $0xf8] sm:$0xff] %vm1778_vm5, %v2598_v53  ;;  %3420 = vadd.xlane.f32.xlu0 %v10094_v43  ;;  %v1801_v43 = vld [vmem:[#allocation5 + $0x30] sm:$0xff] }
 0x985   : > { %v1824_v9 = vpop.permute.xlu1 %1823 }
 0x986   : > { %v1893_v49 = vmul.f32 %v1824_v9, %v1797_v19  ;;  %3426 = vadd.xlane.f32.xlu1 %v10112_v15 }
 0x988   : > { %v2014_v3 = vadd.f32 %v11573_v52, %v1893_v49  ;;  %v1829_v44 = vpop.permute.xlu0 %1828  ;;  %v1810_v49 = vld [vmem:[#allocation5 + $0x78] sm:$0xff]  ;;  %v2617_v52 = vld [vmem:[#allocation5 + $0x88] sm:$0xff] }
 0x989   : > { %v1894_v35 = vmul.f32 %v1829_v44, %v1798_v25  ;;  %v1834_v60 = vpop.permute.xlu1 %1833  ;;  %v11584_v25 = vld [vmem:[#allocation73_spill] sm:$0xff] }
 0x98a   : > { %2030 = vst.msk [vmem:[#allocation5 + $0x10] sm:$0xff] %vm1312_vm3, %v2014_v3  ;;  %v1895_v47 = vmul.f32 %v1834_v60, %v1799_v12  ;;  %3422 = vadd.xlane.f32.xlu1 %v10097_v41  ;;  %v11585_v3 = vld [vmem:[#allocation70_spill] sm:$0xff] }
 0x98b   : > { %v2015_v21 = vadd.f32 %v11574_v63, %v1894_v35  ;;  %v2616_v63 = vld [vmem:[#allocation5 + $0x80] sm:$0xff] }
 0x98c   : > { %v2016_v14 = vadd.f32 %v11575_v22, %v1895_v47  ;;  %v1839_v61 = vpop.permute.xlu0 %1838  ;;  %v2618_v22 = vld [vmem:[#allocation5 + $0x90] sm:$0xff] }
 0x98d   : > { %2031 = vst.msk [vmem:[#allocation5 + $0x18] sm:$0xff] %vm1312_vm3, %v2015_v21  ;;  %v1896_v15 = vmul.f32 %v1839_v61, %v1800_v58  ;;  %v1844_v51 = vpop.permute.xlu1 %1843  ;;  %v11586_v21 = vld [vmem:[#allocation72_spill] sm:$0xff] }
 0x98e   : > { %2032 = vst.msk [vmem:[#allocation5 + $0x20] sm:$0xff] %vm1312_vm3, %v2016_v14  ;;  %v1897_v45 = vmul.f32 %v1844_v51, %v1801_v43  ;;  %v11587_v14 = vld [vmem:[#allocation36_spill] sm:$0xff] }
 0x98f   : > { %v2017_v10 = vadd.f32 %v11576_v32, %v1896_v15  ;;  %v2619_v32 = vld [vmem:[#allocation5 + $0x98] sm:$0xff] }
 0x990   : > { %v2018_v41 = vadd.f32 %v11577_v39, %v1897_v45  ;;  %v1849_v8 = vpop.permute.xlu0 %1848  ;;  %v2620_v39 = vld [vmem:[#allocation5 + $0xa0] sm:$0xff] }
 0x991   : > { %2033 = vst.msk [vmem:[#allocation5 + $0x28] sm:$0xff] %vm1312_vm3, %v2017_v10  ;;  %v1898_v17 = vmul.f32 %v1849_v8, %v1802_v11  ;;  %v1854_v18 = vpop.permute.xlu1 %1853  ;;  %v11588_v10 = vld [vmem:[#allocation35_spill] sm:$0xff] }
 0x992   : > { %2034 = vst.msk [vmem:[#allocation5 + $0x30] sm:$0xff] %vm1312_vm3, %v2018_v41  ;;  %v1899_v30 = vmul.f32 %v1854_v18, %v1803_v2  ;;  %v11589_v41 = vld [vmem:[#allocation42_spill] sm:$0xff] }
 0x993   : > { %v2019_v1 = vadd.f32 %v11578_v7, %v1898_v17  ;;  %v2621_v7 = vld [vmem:[#allocation5 + $0xa8] sm:$0xff] }
 0x994   : > { %v2020_v34 = vadd.f32 %v11579_v46, %v1899_v30  ;;  %v1859_v50 = vpop.permute.xlu0 %1858  ;;  %v2622_v46 = vld [vmem:[#allocation5 + $0xb0] sm:$0xff] }
 0x995   : > { %2035 = vst.msk [vmem:[#allocation5 + $0x38] sm:$0xff] %vm1312_vm3, %v2019_v1  ;;  %v1900_v48 = vmul.f32 %v1859_v50, %v1804_v55  ;;  %v1864_v40 = vpop.permute.xlu1 %1863  ;;  %v11590_v1 = vld [vmem:[#allocation37_spill] sm:$0xff] }
 0x996   : > { %2036 = vst.msk [vmem:[#allocation5 + $0x40] sm:$0xff] %vm1312_vm3, %v2020_v34  ;;  %v1901_v23 = vmul.f32 %v1864_v40, %v1805_v42  ;;  %v11591_v34 = vld [vmem:[#allocation45_spill] sm:$0xff] }
 0x997   : > { %v2021_v59 = vadd.f32 %v11580_v36, %v1900_v48  ;;  %v2623_v36 = vld [vmem:[#allocation5 + $0xb8] sm:$0xff] }
 0x998   : > { %v2022_v37 = vadd.f32 %v11581_v62, %v1901_v23  ;;  %v1869_v54 = vpop.permute.xlu0 %1868  ;;  %v2624_v62 = vld [vmem:[#allocation5 + $0xc0] sm:$0xff] }
 0x999   : > { %2037 = vst.msk [vmem:[#allocation5 + $0x48] sm:$0xff] %vm1312_vm3, %v2021_v59  ;;  %v1902_v31 = vmul.f32 %v1869_v54, %v1806_v20  ;;  %v1874_v16 = vpop.permute.xlu1 %1873  ;;  %v11592_v59 = vld [vmem:[#allocation47_spill] sm:$0xff] }
 0x99a   : > { %2038 = vst.msk [vmem:[#allocation5 + $0x50] sm:$0xff] %vm1312_vm3, %v2022_v37  ;;  %v1903_v13 = vmul.f32 %v1874_v16, %v1807_v27  ;;  %v11593_v37 = vld [vmem:[#allocation39_spill] sm:$0xff] }
 0x99b   : > { %v2023_v4 = vadd.f32 %v11582_v29, %v1902_v31  ;;  %v2625_v29 = vld [vmem:[#allocation5 + $0xc8] sm:$0xff] }
 0x99c   : > { %v2024_v24 = vadd.f32 %v11583_v33, %v1903_v13  ;;  %v1879_v28 = vpop.permute.xlu0 %1878  ;;  %v2626_v33 = vld [vmem:[#allocation5 + $0xd0] sm:$0xff] }
 0x99d   : > { %2039 = vst.msk [vmem:[#allocation5 + $0x58] sm:$0xff] %vm1312_vm3, %v2023_v4  ;;  %v1904_v53 = vmul.f32 %v1879_v28, %v1808_v26  ;;  %v1884_v19 = vpop.permute.xlu1 %1883  ;;  %v11594_v4 = vld [vmem:[#allocation48_spill] sm:$0xff] }
 0x99e   : > { %2040 = vst.msk [vmem:[#allocation5 + $0x60] sm:$0xff] %vm1312_vm3, %v2024_v24  ;;  %v1905_v9 = vmul.f32 %v1884_v19, %v1809_v5  ;;  %v11595_v24 = vld [vmem:[#allocation41_spill] sm:$0xff] }
 0x99f   : > { %v2025_v12 = vadd.f32 %v11584_v25, %v1904_v53  ;;  %v2627_v25 = vld [vmem:[#allocation5 + $0xd8] sm:$0xff] }
 0x9a0   : > { %v2026_v44 = vadd.f32 %v11585_v3, %v1905_v9  ;;  %v1889_v35 = vpop.permute.xlu0 %1888 }
 0x9a1   : > { %2041 = vst.msk [vmem:[#allocation5 + $0x68] sm:$0xff] %vm1312_vm3, %v2025_v12  ;;  %v1906_v60 = vmul.f32 %v1889_v35, %v1810_v49  ;;  %v2640_v47 = vpop.permute.xlu1 %2639  ;;  %v11597_v35 = vld [vmem:[#allocation50_spill] sm:$0xff] }
 0x9a2   : > { %2042 = vst.msk [vmem:[#allocation5 + $0x70] sm:$0xff] %vm1312_vm3, %v2026_v44  ;;  %v2713_v58 = vmul.f32 %v2640_v47, %v2617_v52  ;;  %v11596_v52 = vld [vmem:[#allocation43_spill] sm:$0xff]  ;;  %v2628_v44 = vld [vmem:[#allocation5 + $0xe0] sm:$0xff] }
 0x9a3   : > { %v2027_v43 = vadd.f32 %v11586_v21, %v1906_v60 }
 0x9a4   : > { %v2866_v61 = vadd.f32 %v11587_v14, %v2713_v58  ;;  %v2635_v15 = vpop.permute.xlu0 %2634  ;;  %v11598_v14 = vld [vmem:[#allocation44_spill] sm:$0xff] }
 0x9a5   : > { %2043 = vst.msk [vmem:[#allocation5 + $0x78] sm:$0xff] %vm1312_vm3, %v2027_v43  ;;  %v2712_v51 = vmul.f32 %v2635_v15, %v2616_v63  ;;  %v2645_v45 = vpop.permute.xlu1 %2644  ;;  %v2629_v43 = vld [vmem:[#allocation5 + $0xe8] sm:$0xff]  ;;  %v2630_v15 = vld [vmem:[#allocation5 + $0xf0] sm:$0xff] }
 0x9a6   : > { %2882 = vst.msk [vmem:[#allocation5 + $0x88] sm:$0xff] %vm1312_vm3, %v2866_v61  ;;  %v2714_v11 = vmul.f32 %v2645_v45, %v2618_v22 }
 0x9a7   : > { %v2865_v2 = vadd.f32 %v11588_v10, %v2712_v51  ;;  %v11599_v51 = vld [vmem:[#allocation53_spill] sm:$0xff] }
 0x9a8   : > { %v2867_v8 = vadd.f32 %v11589_v41, %v2714_v11  ;;  %v2650_v17 = vpop.permute.xlu0 %2649 }
 0x9a9   : > { %2881 = vst.msk [vmem:[#allocation5 + $0x80] sm:$0xff] %vm1312_vm3, %v2865_v2  ;;  %v2715_v18 = vmul.f32 %v2650_v17, %v2619_v32  ;;  %v2655_v30 = vpop.permute.xlu1 %2654 }
 0x9aa   : > { %2883 = vst.msk [vmem:[#allocation5 + $0x90] sm:$0xff] %vm1312_vm3, %v2867_v8  ;;  %v2716_v55 = vmul.f32 %v2655_v30, %v2620_v39  ;;  %v2631_v39 = vld [vmem:[#allocation5 + $0xf8] sm:$0xff]  ;;  %v11600_v8 = vld [vmem:[#allocation55_spill] sm:$0xff]  ;;  %v11601_v30 = vld [vmem:[#allocation46_spill] sm:$0xff] }
 0x9ab   : > { %v2868_v42 = vadd.f32 %v11590_v1, %v2715_v18  ;;  %v3462_v18 = vld [vmem:[#allocation5 + $0x108] sm:$0xff] }
 0x9ac   : > { %v2869_v50 = vadd.f32 %v11591_v34, %v2716_v55  ;;  %v2660_v48 = vpop.permute.xlu0 %2659  ;;  %v3461_v34 = vld [vmem:[#allocation5 + $0x100] sm:$0xff] }
 0x9ad   : > { %2884 = vst.msk [vmem:[#allocation5 + $0x98] sm:$0xff] %vm1312_vm3, %v2868_v42  ;;  %v2717_v40 = vmul.f32 %v2660_v48, %v2621_v7  ;;  %v2665_v23 = vpop.permute.xlu1 %2664  ;;  %v11602_v48 = vld [vmem:[#allocation56_spill] sm:$0xff] }
 0x9ae   : > { %2885 = vst.msk [vmem:[#allocation5 + $0xa0] sm:$0xff] %vm1312_vm3, %v2869_v50  ;;  %v2718_v20 = vmul.f32 %v2665_v23, %v2622_v46 }
 0x9af   : > { %v2870_v27 = vadd.f32 %v11592_v59, %v2717_v40  ;;  %v10267_v12 = vpop.f32.mrf.mxu1 }
 0x9b0   : > { %v2871_v54 = vadd.f32 %v11593_v37, %v2718_v20  ;;  %v2670_v31 = vpop.permute.xlu0 %2669 }
 0x9b1   : > { %2886 = vst.msk [vmem:[#allocation5 + $0xa8] sm:$0xff] %vm1312_vm3, %v2870_v27  ;;  %v2719_v16 = vmul.f32 %v2670_v31, %v2623_v36  ;;  %v2675_v13 = vpop.permute.xlu1 %2674  ;;  %v3639_v22 = vpop.f32.mrf.mxu1 }
 0x9b2   : > { %2887 = vst.msk [vmem:[#allocation5 + $0xb0] sm:$0xff] %vm1312_vm3, %v2871_v54  ;;  %v2720_v26 = vmul.f32 %v2675_v13, %v2624_v62  ;;  %v11603_v62 = vld [vmem:[#allocation57_spill] sm:$0xff]  ;;  %v11607_v13 = vld [vmem:[#allocation114_spill] sm:$0xff] }
 0x9b3   : > { %v2872_v5 = vadd.f32 %v11594_v4, %v2719_v16  ;;  %v10277_v41 = vpop.f32.mrf.mxu1  ;;  %v11604_v37 = vsub.f32 %v9741_v38, %v11603_v62  ;;  %v11606_v16 = vld [vmem:[#allocation59_spill] sm:$0xff] }
 0x9b4   : > { %v2873_v28 = vadd.f32 %v11595_v24, %v2720_v26  ;;  %v2680_v53 = vpop.permute.xlu0 %2679  ;;  %v11608_v26 = vsub.f32 %v11606_v16, %v11607_v13 }
 0x9b5   : > { %2888 = vst.msk [vmem:[#allocation5 + $0xb8] sm:$0xff] %vm1312_vm3, %v2872_v5  ;;  %v2721_v19 = vmul.f32 %v2680_v53, %v2625_v29  ;;  %v2685_v9 = vpop.permute.xlu1 %2684  ;;  %v3642_v50 = vpop.f32.mrf.mxu1  ;;  %v3207_v54 = vmul.f32 1.442695, %v11604_v37  ;;  %v11610_v5 = vld [vmem:[#allocation49_spill] sm:$0xff] }
 0x9b6   : > { %2889 = vst.msk [vmem:[#allocation5 + $0xc0] sm:$0xff] %vm1312_vm3, %v2873_v28  ;;  %v2722_v49 = vmul.f32 %v2685_v9, %v2626_v33  ;;  %v3215_v29 = vmul.f32 1.442695, %v11608_v26  ;;  %v11611_v33 = vld [vmem:[#allocation52_spill] sm:$0xff]  ;;  %v11615_v9 = vld [vmem:[#allocation54_spill] sm:$0xff]  ;;  %v3367_v26 = vld [vmem:[#allocation4 + $0x118] sm:$0xff] }
 0x9b7   : > { %v2874_v3 = vadd.f32 %v11596_v52, %v2721_v19  ;;  %7447 = vpow2.f32 %v3207_v54  ;;  %v11612_v24 = vsub.f32 %v11610_v5, %v11611_v33  ;;  %v11614_v19 = vld [vmem:[#allocation51_spill] sm:$0xff]  ;;  %v11617_v52 = vld [vmem:[#allocation61_spill] sm:$0xff]  ;;  %v11642_v5 = vld [vmem:[#allocation130_spill] sm:$0xff] }
 0x9b8   : > { %v2875_v60 = vadd.f32 %v11597_v35, %v2722_v49  ;;  %v2690_v47 = vpop.permute.xlu0 %2689  ;;  %v11616_v49 = vsub.f32 %v11614_v19, %v11615_v9  ;;  %7449 = vpow2.f32 %v3215_v29  ;;  %v11641_v29 = vld [vmem:[#allocation129_spill] sm:$0xff] }
 0x9b9   : > { %2890 = vst.msk [vmem:[#allocation5 + $0xc8] sm:$0xff] %vm1312_vm3, %v2874_v3  ;;  %v2723_v58 = vmul.f32 %v2690_v47, %v2627_v25  ;;  %v2695_v63 = vpop.permute.xlu1 %2694  ;;  %v3209_v28 = vmul.f32 1.442695, %v11612_v24  ;;  %v11618_v3 = vld [vmem:[#allocation24_spill] sm:$0xff]  ;;  %v11621_v47 = vld [vmem:[#allocation121_spill] sm:$0xff] }
 0x9ba   : > { %2891 = vst.msk [vmem:[#allocation5 + $0xd0] sm:$0xff] %vm1312_vm3, %v2875_v60  ;;  %v2724_v21 = vmul.f32 %v2695_v63, %v2628_v44  ;;  %v3211_v38 = vmul.f32 1.442695, %v11616_v49  ;;  %v11619_v44 = vsub.f32 %v11617_v52, %v11618_v3  ;;  %v11646_v52 = vld [vmem:[#allocation123_spill] sm:$0xff] }
 0x9bb   : > { %v2876_v61 = vadd.f32 %v11598_v14, %v2723_v58  ;;  %7451 = vpow2.f32 %v3209_v28  ;;  %v11622_v58 = vsub.f32 %v9840_v0, %v11621_v47  ;;  %v11624_v14 = vld [vmem:[#allocation116_spill] sm:$0xff] }
 0x9bc   : > { %v2877_v45 = vadd.f32 %v11599_v51, %v2724_v21  ;;  %v2700_v11 = vpop.permute.xlu0 %2699  ;;  %v3217_v35 = vmul.f32 1.442695, %v11619_v44  ;;  %7453 = vpow2.f32 %v3211_v38  ;;  %v11645_v38 = vld [vmem:[#allocation122_spill] sm:$0xff] }
 0x9bd   : > { %2892 = vst.msk [vmem:[#allocation5 + $0xd8] sm:$0xff] %vm1312_vm3, %v2876_v61  ;;  %v2725_v32 = vmul.f32 %v2700_v11, %v2629_v43  ;;  %v2705_v10 = vpop.permute.xlu1 %2704  ;;  %v3223_v63 = vmul.f32 1.442695, %v11622_v58  ;;  %v11625_v61 = vld [vmem:[#allocation118_spill] sm:$0xff]  ;;  %v11628_v11 = vld [vmem:[#allocation124_spill] sm:$0xff]  ;;  %v11647_v3 = vsub.f32 %v11645_v38, %v11646_v52 }
 0x9be   : > { %2893 = vst.msk [vmem:[#allocation5 + $0xe0] sm:$0xff] %vm1312_vm3, %v2877_v45  ;;  %v2726_v2 = vmul.f32 %v2705_v10, %v2630_v15  ;;  %7455 = vpow2.f32 %v3217_v35  ;;  %v11626_v15 = vsub.f32 %v11624_v14, %v11625_v61 }
 0x9bf   : > { %v2878_v17 = vadd.f32 %v11600_v8, %v2725_v32  ;;  %7457 = vpow2.f32 %v3223_v63  ;;  %v11629_v32 = vsub.f32 %v9860_v56, %v11628_v11  ;;  %v11630_v8 = vld [vmem:[#allocation115_spill] sm:$0xff]  ;;  %v3233_v44 = vmul.f32 1.442695, %v11647_v3 }
 0x9c0   : > { %v2879_v55 = vadd.f32 %v11601_v30, %v2726_v2  ;;  %v2710_v7 = vpop.permute.xlu0 %2709  ;;  %v3213_v51 = vmul.f32 1.442695, %v11626_v15 }
 0x9c1   : > { %2894 = vst.msk [vmem:[#allocation5 + $0xe8] sm:$0xff] %vm1312_vm3, %v2878_v17  ;;  %v2727_v1 = vmul.f32 %v2710_v7, %v2631_v39  ;;  %v3485_v42 = vpop.permute.xlu1 %3484  ;;  %v3219_v10 = vmul.f32 1.442695, %v11629_v32  ;;  %v3365_v39 = vld [vmem:[#allocation4 + $0x108] sm:$0xff]  ;;  %v11631_v17 = vld [vmem:[#allocation117_spill] sm:$0xff]  ;;  %v3374_v32 = vld [vmem:[#allocation4 + $0x150] sm:$0xff] }
 0x9c2   : > { %2895 = vst.msk [vmem:[#allocation5 + $0xf0] sm:$0xff] %vm1312_vm3, %v2879_v55  ;;  %v3558_v46 = vmul.f32 %v3485_v42, %v3462_v18  ;;  %v11632_v18 = vsub.f32 %v11630_v8, %v11631_v17  ;;  %7459 = vpow2.f32 %v3213_v51  ;;  %v11634_v42 = vld [vmem:[#allocation126_spill] sm:$0xff] }
 0x9c3   : > { %v2880_v40 = vadd.f32 %v11602_v48, %v2727_v1  ;;  %v3364_v1 = vld [vmem:[#allocation4 + $0x100] sm:$0xff]  ;;  %7461 = vpow2.f32 %v3219_v10  ;;  %v3381_v48 = vmul.f32 %v10159_v57, %v3365_v39  ;;  %v11643_v57 = vsub.f32 %v11641_v29, %v11642_v5  ;;  %v11649_v10 = vld [vmem:[#allocation125_spill] sm:$0xff] }
 0x9c4   : > { %v3703_v23 = vadd.f32 %v3642_v50, %v3558_v46  ;;  %v3480_v20 = vpop.permute.xlu0 %3479  ;;  %v10317_v43 = vpop.eup %7447  ;;  %v3225_v30 = vmul.f32 1.442695, %v11632_v18  ;;  %v11635_v46 = vld [vmem:[#allocation128_spill] sm:$0xff]  ;;  %v3380_v54 = vmul.f32 %v10163_v6, %v3364_v1  ;;  %v3368_v6 = vld [vmem:[#allocation4 + $0x120] sm:$0xff] }
 0x9c5   : > { %2896 = vst.msk [vmem:[#allocation5 + $0xf8] sm:$0xff] %vm1312_vm3, %v2880_v40  ;;  %v3557_v36 = vmul.f32 %v3480_v20, %v3461_v34  ;;  %v4433_v59 = vpop.permute.xlu1 %4432  ;;  %v11636_v34 = vsub.f32 %v11634_v42, %v11635_v46  ;;  %v10340_v40 = vpop.eup %7449  ;;  %v3370_v20 = vld [vmem:[#allocation4 + $0x130] sm:$0xff]  ;;  %v3227_v33 = vmul.f32 1.442695, %v11643_v57 }
 0x9c6   : > { %3719 = vst.msk [vmem:[#allocation5 + $0x108] sm:$0xff] %vm1312_vm3, %v3703_v23  ;;  %6930 = vmatprep.subr.bf16.mxu0 %v4433_v59  ;;  %7463 = vpow2.f32 %v3225_v30  ;;  %v3386_v19 = vmul.f32 %v10340_v40, %v3370_v20 }
 0x9c7   : > { %v3702_v27 = vadd.f32 %v3639_v22, %v3557_v36  ;;  %6931 = vmatpush3.bf16.msra.mxu0 %v4433_v59  ;;  %v3366_v22 = vld [vmem:[#allocation4 + $0x110] sm:$0xff]  ;;  %v3231_v50 = vmul.f32 1.442695, %v11636_v34  ;;  %v11638_v36 = vld [vmem:[#allocation119_spill] sm:$0xff] }
 0x9c8   : > { %v3382_v0 = vmul.f32 %v10317_v43, %v3366_v22  ;;  %v11639_v59 = vld [vmem:[#allocation120_spill] sm:$0xff]  ;;  %v10346_v16 = vpop.eup %7451  ;;  %v3371_v22 = vld [vmem:[#allocation4 + $0x138] sm:$0xff] }
 0x9c9   : > { %3718 = vst.msk [vmem:[#allocation5 + $0x100] sm:$0xff] %vm1312_vm3, %v3702_v27  ;;  %v11640_v27 = vsub.f32 %v11638_v36, %v11639_v59  ;;  %7465 = vpow2.f32 %v3231_v50  ;;  %v10355_v9 = vpop.eup %7453  ;;  %v3383_v47 = vmul.f32 %v10346_v16, %v3367_v26 }
 0x9ca   : > { %v3384_v15 = vmul.f32 %v10355_v9, %v3368_v6 }
 0x9cb   : > { %v3221_v62 = vmul.f32 1.442695, %v11640_v27  ;;  %v10362_v58 = vpop.eup %7455  ;;  %v11653_v27 = vld [vmem:[#allocation25_spill] sm:$0xff] }
 0x9cc   : > { %v10368_v51 = vpop.eup %7457  ;;  %v3387_v17 = vmul.f32 %v10362_v58, %v3371_v22 }
 0x9cd   : > { %7467 = vpow2.f32 %v3221_v62  ;;  %v3390_v46 = vmul.f32 %v10368_v51, %v3374_v32 }
 0x9ce   : > { %7469 = vpow2.f32 %v3227_v33  ;;  %v3378_v33 = vld [vmem:[#allocation4 + $0x170] sm:$0xff] }
 0x9cf   : > { %7471 = vpow2.f32 %v3233_v44  ;;  %v10375_v18 = vpop.eup %7459  ;;  %v3373_v44 = vld [vmem:[#allocation4 + $0x148] sm:$0xff] }
 0x9d0   : > { %v10381_v34 = vpop.eup %7461 }
 0x9d3   : > { %v10385_v59 = vpop.eup %7463 }
 0x9d6   : > { %v10392_v5 = vpop.eup %7465 }
 0x9da   : > { %v10397_v6 = vpop.eup %7467 }
 0x9db   : > { %v10407_v22 = vpop.eup %7469 }
 0x9e2   : > { %v10290_v31 = vpop.f32.mrf.mxu1 }
 0x9e3   : > { %11605 = vst [vmem:[#allocation22_spill] sm:$0xff] %v10290_v31  ;;  %v3969_v31 = vld [vmem:[#allocation3 + $0x1c8] sm:$0xff] }
 0x9e4   : > { %v10295_v4 = vpop.f32.mrf.mxu1 }
 0x9e5   : > { %11609 = vst [vmem:[#allocation23_spill] sm:$0xff] %v10295_v4  ;;  %v10578_v4 = vld [vmem:[#allocation3 + $0x1f0] sm:$0xff] }
 0x9e6   : > { %v10300_v53 = vpop.f32.mrf.mxu1  ;;  %11661 = vst [vmem:[#allocation77_spill] sm:$0xff] %v10578_v4 }
 0x9e7   : > { %11613 = vst [vmem:[#allocation106_spill] sm:$0xff] %v10300_v53 }
 0x9e8   : > { %v10305_v25 = vpop.f32.mrf.mxu1 }
 0x9ea   : > { %v10310_v60 = vpop.f32.mrf.mxu1 }
 0x9eb   : > { %11620 = vst [vmem:[#allocation107_spill] sm:$0xff] %v10310_v60 }
 0x9ec   : > { %v10315_v21 = vpop.f32.mrf.mxu1 }
 0x9ed   : > { %11623 = vst [vmem:[#allocation108_spill] sm:$0xff] %v10315_v21 }
 0x9ee   : > { %v10322_v45 = vpop.f32.mrf.mxu1 }
 0x9ef   : > { %11627 = vst [vmem:[#allocation109_spill] sm:$0xff] %v10322_v45 }
 0x9f0   : > { %v10331_v55 = vpop.f32.mrf.mxu1 }
 0x9f1   : > { %v3401_v2 = vpop.xlane.xlu0 %3400  ;;  %11633 = vst [vmem:[#allocation110_spill] sm:$0xff] %v10331_v55 }
 0x9f2   : > { %v3430_v7 = vadd.f32 %v3401_v2, %v3382_v0  ;;  %v11650_v0 = vld [vmem:[#allocation127_spill] sm:$0xff] }
 0x9f3   : > { %v11651_v2 = vsub.f32 %v11649_v10, %v11650_v0  ;;  %v3389_v10 = vmul.f32 %v10397_v6, %v3373_v44  ;;  %v10413_v0 = vpop.eup %7471 }
 0x9f4   : > { %3446 = vst.msk [vmem:[#allocation4 + $0x110] sm:$0xff] %vm1778_vm5, %v3430_v7  ;;  %v10337_v56 = vpop.f32.mrf.mxu1  ;;  %v3369_v7 = vld [vmem:[#allocation4 + $0x128] sm:$0xff] }
 0x9f5   : > { %11637 = vst [vmem:[#allocation111_spill] sm:$0xff] %v10337_v56  ;;  %v3399_v23 = vpop.xlane.xlu0 %3398  ;;  %v3229_v39 = vmul.f32 1.442695, %v11651_v2  ;;  %v3385_v36 = vmul.f32 %v10375_v18, %v3369_v7  ;;  %v10562_v56 = vld [vmem:[#allocation3 + $0x1d8] sm:$0xff] }
 0x9f6   : > { %v3429_v37 = vadd.f32 %v3399_v23, %v3381_v48  ;;  %v10352_v28 = vpop.f32.mrf.mxu1  ;;  %v3372_v48 = vld [vmem:[#allocation4 + $0x140] sm:$0xff] }
 0x9f7   : > { %v3397_v13 = vpop.xlane.xlu1 %3396  ;;  %11644 = vst [vmem:[#allocation112_spill] sm:$0xff] %v10352_v28  ;;  %7473 = vpow2.f32 %v3229_v39  ;;  %v3388_v29 = vmul.f32 %v10381_v34, %v3372_v48  ;;  %v10564_v28 = vld [vmem:[#allocation3 + $0x1c0] sm:$0xff] }
 0x9f8   : > { %3445 = vst.msk [vmem:[#allocation4 + $0x108] sm:$0xff] %vm1778_vm5, %v3429_v37  ;;  %v3428_v24 = vadd.f32 %v3397_v13, %v3380_v54  ;;  %v10364_v14 = vpop.f32.mrf.mxu1  ;;  %v3375_v54 = vld [vmem:[#allocation4 + $0x158] sm:$0xff] }
 0x9f9   : > { %v3409_v49 = vpop.xlane.xlu0 %3408  ;;  %11648 = vst [vmem:[#allocation113_spill] sm:$0xff] %v10364_v14  ;;  %v10589_v14 = vld [vmem:[#allocation3 + $0x1e0] sm:$0xff] }
 0x9fa   : > { %3444 = vst.msk [vmem:[#allocation4 + $0x100] sm:$0xff] %vm1778_vm5, %v3428_v24  ;;  %v3434_v35 = vadd.f32 %v3409_v49, %v3386_v19  ;;  %v10377_v1 = vpop.f32.mrf.mxu1  ;;  %v3391_v49 = vmul.f32 %v10385_v59, %v3375_v54 }
 0x9fb   : > { %v3403_v63 = vpop.xlane.xlu1 %3402  ;;  %11652 = vst [vmem:[#allocation79_spill] sm:$0xff] %v10377_v1  ;;  %v11663_v1 = vld [vmem:[#allocation33_spill] sm:$0xff] }
 0x9fc   : > { %3450 = vst.msk [vmem:[#allocation4 + $0x130] sm:$0xff] %vm1778_vm5, %v3434_v35  ;;  %v3431_v61 = vadd.f32 %v3403_v63, %v3383_v47  ;;  %v3394_v63 = vmul.f32 %v10392_v5, %v3378_v33 }
 0x9fd   : > { %v3405_v11 = vpop.xlane.xlu0 %3404 }
 0x9fe   : > { %3447 = vst.msk [vmem:[#allocation4 + $0x118] sm:$0xff] %vm1778_vm5, %v3431_v61  ;;  %v3432_v8 = vadd.f32 %v3405_v11, %v3384_v15  ;;  %v3376_v15 = vld [vmem:[#allocation4 + $0x160] sm:$0xff] }
 0x9ff   : > { %v3411_v30 = vpop.xlane.xlu1 %3410 }
 0xa00   : > { %3448 = vst.msk [vmem:[#allocation4 + $0x120] sm:$0xff] %vm1778_vm5, %v3432_v8  ;;  %v3435_v42 = vadd.f32 %v3411_v30, %v3387_v17  ;;  %v3379_v17 = vld [vmem:[#allocation4 + $0x178] sm:$0xff] }
 0xa01   : > { %v3417_v50 = vpop.xlane.xlu0 %3416 }
 0xa02   : > { %3451 = vst.msk [vmem:[#allocation4 + $0x138] sm:$0xff] %vm1778_vm5, %v3435_v42  ;;  %v6916_v23 = vpop.f32.mrf.mxu1  ;;  %v3438_v20 = vadd.f32 %v3417_v50, %v3390_v46  ;;  %v3392_v42 = vmul.f32 %v10407_v22, %v3376_v15 }
 0xa03   : > { %v10388_v62 = vadd.f32 %v6916_v23, %v11653_v27  ;;  %v3407_v37 = vpop.xlane.xlu1 %3406  ;;  %v3395_v23 = vmul.f32 %v10413_v0, %v3379_v17  ;;  %v11654_v17 = vld [vmem:[#allocation27_spill] sm:$0xff] }
 0xa04   : > { %3454 = vst.msk [vmem:[#allocation4 + $0x150] sm:$0xff] %vm1778_vm5, %v3438_v20  ;;  %v3433_v13 = vadd.f32 %v3407_v37, %v3385_v36  ;;  %v3896_v26 = vpop.f32.mrf.mxu1  ;;  %v10427_v20 = vpop.eup %7473 }
 0xa05   : > { %3980 = vmax.xlane.f32.xlu0 %v10388_v62  ;;  %v3413_v57 = vpop.xlane.xlu0 %3412  ;;  %v10400_v38 = vadd.f32 %v3896_v26, %v11653_v27 }
 0xa06   : > { %3449 = vst.msk [vmem:[#allocation4 + $0x128] sm:$0xff] %vm1778_vm5, %v3433_v13  ;;  %v6917_v24 = vpop.f32.mrf.mxu1  ;;  %v3436_v19 = vadd.f32 %v3413_v57, %v3388_v29  ;;  %v3377_v13 = vld [vmem:[#allocation4 + $0x168] sm:$0xff] }
 0xa07   : > { %v10403_v52 = vadd.f32 %v6917_v24, %v11653_v27  ;;  %v3419_v3 = vpop.xlane.xlu1 %3418  ;;  %v3393_v33 = vmul.f32 %v10427_v20, %v3377_v13 }
 0xa08   : > { %3452 = vst.msk [vmem:[#allocation4 + $0x140] sm:$0xff] %vm1778_vm5, %v3436_v19  ;;  %v3439_v35 = vadd.f32 %v3419_v3, %v3391_v49  ;;  %v3899_v47 = vpop.f32.mrf.mxu1 }
 0xa09   : > { %3982 = vmax.xlane.f32.xlu1 %v10403_v52  ;;  %3976 = vmax.xlane.f32.xlu0 %v10400_v38  ;;  %v3425_v61 = vpop.xlane.xlu0 %3424  ;;  %v10416_v2 = vadd.f32 %v3899_v47, %v11653_v27 }
 0xa0a   : > { %3455 = vst.msk [vmem:[#allocation4 + $0x158] sm:$0xff] %vm1778_vm5, %v3439_v35  ;;  %v6920_v11 = vpop.f32.mrf.mxu1  ;;  %v3442_v32 = vadd.f32 %v3425_v61, %v3394_v63 }
 0xa0b   : > { %v10419_v39 = vadd.f32 %v6920_v11, %v11653_v27  ;;  %v3415_v8 = vpop.xlane.xlu1 %3414 }
 0xa0c   : > { %3458 = vst.msk [vmem:[#allocation4 + $0x170] sm:$0xff] %vm1778_vm5, %v3442_v32  ;;  %v3437_v30 = vadd.f32 %v3415_v8, %v3389_v10  ;;  %v3912_v7 = vpop.f32.mrf.mxu1 }
 0xa0d   : > { %3978 = vmax.xlane.f32.xlu1 %v10416_v2  ;;  %3988 = vmax.xlane.f32.xlu0 %v10419_v39  ;;  %v3421_v46 = vpop.xlane.xlu0 %3420  ;;  %v10430_v36 = vadd.f32 %v3912_v7, %v11653_v27  ;;  %v11656_v7 = vld [vmem:[#allocation30_spill] sm:$0xff] }
 0xa0e   : > { %3453 = vst.msk [vmem:[#allocation4 + $0x148] sm:$0xff] %vm1778_vm5, %v3437_v30  ;;  %v6921_v50 = vpop.f32.mrf.mxu1  ;;  %v3440_v48 = vadd.f32 %v3421_v46, %v3392_v42  ;;  %v11655_v30 = vld [vmem:[#allocation28_spill] sm:$0xff] }
 0xa0f   : > { %v10433_v37 = vadd.f32 %v6921_v50, %v11653_v27  ;;  %v3427_v54 = vpop.xlane.xlu1 %3426 }
 0xa10   : > { %3456 = vst.msk [vmem:[#allocation4 + $0x160] sm:$0xff] %vm1778_vm5, %v3440_v48  ;;  %v3443_v26 = vadd.f32 %v3427_v54, %v3395_v23  ;;  %v3915_v29 = vpop.f32.mrf.mxu1  ;;  %v11660_v23 = vld [vmem:[#allocation31_spill] sm:$0xff]  ;;  %v10488_v54 = vld [vmem:[#allocation3 + $0x190] sm:$0xff] }
 0xa11   : > { %3990 = vmax.xlane.f32.xlu1 %v10433_v37  ;;  %3984 = vmax.xlane.f32.xlu0 %v10430_v36  ;;  %v10441_v24 = vadd.f32 %v3915_v29, %v11653_v27  ;;  %v10493_v29 = vld [vmem:[#allocation3 + $0x198] sm:$0xff] }
 0xa12   : > { %3459 = vst.msk [vmem:[#allocation4 + $0x178] sm:$0xff] %vm1778_vm5, %v3443_v26  ;;  %v6924_v57 = vpop.f32.mrf.mxu1 }
 0xa13   : > { %v10444_v19 = vadd.f32 %v6924_v57, %v11653_v27  ;;  %v3423_v49 = vpop.xlane.xlu1 %3422  ;;  %v10495_v57 = vld [vmem:[#allocation3 + $0x180] sm:$0xff] }
 0xa14   : > { %v3441_v3 = vadd.f32 %v3423_v49, %v3393_v33  ;;  %v3928_v44 = vpop.f32.mrf.mxu1 }
 0xa15   : > { %3986 = vmax.xlane.f32.xlu1 %v10441_v24  ;;  %3996 = vmax.xlane.f32.xlu0 %v10444_v19  ;;  %v10450_v47 = vadd.f32 %v3928_v44, %v11653_v27 }
 0xa16   : > { %3457 = vst.msk [vmem:[#allocation4 + $0x168] sm:$0xff] %vm1778_vm5, %v3441_v3  ;;  %v6925_v35 = vpop.f32.mrf.mxu1 }
 0xa17   : > { %v10453_v63 = vadd.f32 %v6925_v35, %v11653_v27  ;;  %v10508_v35 = vld [vmem:[#allocation3 + $0x188] sm:$0xff] }
 0xa18   : > { %v3931_v61 = vpop.f32.mrf.mxu1 }
 0xa19   : > { %3998 = vmax.xlane.f32.xlu1 %v10453_v63  ;;  %3992 = vmax.xlane.f32.xlu0 %v10450_v47  ;;  %v10458_v11 = vadd.f32 %v3931_v61, %v11653_v27  ;;  %v10510_v61 = vld [vmem:[#allocation3 + $0x1b0] sm:$0xff] }
 0xa1a   : > { %v6928_v15 = vpop.f32.mrf.mxu1 }
 0xa1b   : > { %v10461_v32 = vadd.f32 %v6928_v15, %v11653_v27 }
 0xa1c   : > { %v3944_v10 = vpop.f32.mrf.mxu1 }
 0xa1d   : > { %3994 = vmax.xlane.f32.xlu1 %v10458_v11  ;;  %4004 = vmax.xlane.f32.xlu0 %v10461_v32  ;;  %v10466_v8 = vadd.f32 %v3944_v10, %v11653_v27 }
 0xa1e   : > { %v6929_v42 = vpop.f32.mrf.mxu1 }
 0xa1f   : > { %v10477_v46 = vadd.f32 %v6929_v42, %v11653_v27  ;;  %v10526_v42 = vld [vmem:[#allocation3 + $0x1a0] sm:$0xff] }
 0xa20   : > { %v3947_v50 = vpop.f32.mrf.mxu1 }
 0xa21   : > { %4000 = vmax.xlane.f32.xlu0 %v10466_v8  ;;  %11657 = vst [vmem:[#allocation81_spill] sm:$0xff] %v10477_v46  ;;  %v10481_v48 = vadd.f32 %v3947_v50, %v11653_v27 }
 0xa23   : > { %11658 = vst [vmem:[#allocation75_spill] sm:$0xff] %v10481_v48 }
 0xa2e   : > { %4430 = vrot.lane.b32.xlu1 %v11654_v17, %s7861_s17 }
 0xa37   : > { %3489 = vperm.xlu0 %7257, %v10317_v43   ;;  %v11659_v43 = vld [vmem:[#allocation29_spill] sm:$0xff] }
 0xa3b   : > { %4428 = vrot.lane.b32.xlu0 %v11655_v30, %s7861_s17 }
 0xa3f   : > { %4424 = vrot.lane.b32.xlu0 %v11656_v7, %s7861_s17  ;;  %v10524_v7 = vld [vmem:[#allocation3 + $0x1b8] sm:$0xff] }
 0xa52   : > { %4006 = vmax.xlane.f32.xlu1 %v10477_v46 }
 0xa56   : > { %4002 = vmax.xlane.f32.xlu1 %v10481_v48 }
 0xa67   : > { %4426 = vrot.lane.b32.xlu1 %v11659_v43, %s7861_s17  ;;  %v11662_v43 = vld [vmem:[#allocation32_spill] sm:$0xff] }
 0xa6b   : > { %4422 = vrot.lane.b32.xlu1 %v11660_v23, %s7861_s17 }
 0xa8e   : > { %v3981_v13 = vpop.xlane.xlu0 %3980 }
 0xa8f   : > { %v10491_v26 = vmax.f32 %v10488_v54, %v3981_v13 }
 0xa91   : > { %4573 = vst.msk [vmem:[#allocation3 + $0x190] sm:$0xff] %vm1778_vm5, %v10491_v26  ;;  %4084 = vperm.xlu0 %7257, %v10491_v26  }
 0xa92   : > { %v3983_v33 = vpop.xlane.xlu1 %3982  ;;  %v3977_v49 = vpop.xlane.xlu0 %3976 }
 0xa93   : > { %v10503_v3 = vmax.f32 %v10493_v29, %v3983_v33  ;;  %v10506_v44 = vmax.f32 %v10495_v57, %v3977_v49 }
 0xa95   : > { %4574 = vst.msk [vmem:[#allocation3 + $0x198] sm:$0xff] %vm1778_vm5, %v10503_v3  ;;  %4571 = vst.msk [vmem:[#allocation3 + $0x180] sm:$0xff] %vm1778_vm5, %v10506_v44  ;;  %4089 = vperm.xlu1 %7258, %v10503_v3   ;;  %4074 = vperm.xlu0 %7257, %v10506_v44  }
 0xa96   : > { %v3979_v15 = vpop.xlane.xlu1 %3978  ;;  %v3989_v10 = vpop.xlane.xlu0 %3988 }
 0xa97   : > { %v10519_v17 = vmax.f32 %v10508_v35, %v3979_v15  ;;  %v10522_v30 = vmax.f32 %v10510_v61, %v3989_v10  ;;  %v10544_v15 = vld [vmem:[#allocation3 + $0x1a8] sm:$0xff]  ;;  %v10546_v10 = vld [vmem:[#allocation3 + $0x1d0] sm:$0xff] }
 0xa99   : > { %4572 = vst.msk [vmem:[#allocation3 + $0x188] sm:$0xff] %vm1778_vm5, %v10519_v17  ;;  %4577 = vst.msk [vmem:[#allocation3 + $0x1b0] sm:$0xff] %vm1778_vm5, %v10522_v30  ;;  %4079 = vperm.xlu1 %7258, %v10519_v17   ;;  %4104 = vperm.xlu0 %7257, %v10522_v30  }
 0xa9a   : > { %v3991_v23 = vpop.xlane.xlu1 %3990  ;;  %v3985_v13 = vpop.xlane.xlu0 %3984 }
 0xa9b   : > { %v10539_v33 = vmax.f32 %v10524_v7, %v3991_v23  ;;  %v10542_v49 = vmax.f32 %v10526_v42, %v3985_v13 }
 0xa9d   : > { %4578 = vst.msk [vmem:[#allocation3 + $0x1b8] sm:$0xff] %vm1778_vm5, %v10539_v33  ;;  %4575 = vst.msk [vmem:[#allocation3 + $0x1a0] sm:$0xff] %vm1778_vm5, %v10542_v49  ;;  %4109 = vperm.xlu1 %7258, %v10539_v33   ;;  %4094 = vperm.xlu0 %7257, %v10542_v49  }
 0xa9e   : > { %v3987_v23 = vpop.xlane.xlu1 %3986  ;;  %v3997_v13 = vpop.xlane.xlu0 %3996 }
 0xa9f   : > { %v10557_v27 = vmax.f32 %v10544_v15, %v3987_v23  ;;  %v10560_v50 = vmax.f32 %v10546_v10, %v3997_v13 }
 0xaa1   : > { %4576 = vst.msk [vmem:[#allocation3 + $0x1a8] sm:$0xff] %vm1778_vm5, %v10557_v27  ;;  %4581 = vst.msk [vmem:[#allocation3 + $0x1d0] sm:$0xff] %vm1778_vm5, %v10560_v50  ;;  %4099 = vperm.xlu1 %7258, %v10557_v27   ;;  %4124 = vperm.xlu0 %7257, %v10560_v50  }
 0xaa2   : > { %v3999_v23 = vpop.xlane.xlu1 %3998  ;;  %v3993_v13 = vpop.xlane.xlu0 %3992 }
 0xaa3   : > { %v4019_v60 = vmax.f32 %v10562_v56, %v3999_v23  ;;  %v10576_v21 = vmax.f32 %v10564_v28, %v3993_v13 }
 0xaa5   : > { %4582 = vst.msk [vmem:[#allocation3 + $0x1d8] sm:$0xff] %vm1778_vm5, %v4019_v60  ;;  %4579 = vst.msk [vmem:[#allocation3 + $0x1c0] sm:$0xff] %vm1778_vm5, %v10576_v21  ;;  %4129 = vperm.xlu1 %7258, %v4019_v60   ;;  %4114 = vperm.xlu0 %7257, %v10576_v21  }
 0xaa6   : > { %v3995_v46 = vpop.xlane.xlu1 %3994  ;;  %v4005_v48 = vpop.xlane.xlu0 %4004 }
 0xaa7   : > { %v4017_v23 = vmax.f32 %v3969_v31, %v3995_v46  ;;  %v10587_v13 = vmax.f32 %v10578_v4, %v4005_v48  ;;  %v3463_v4 = vld [vmem:[#allocation5 + $0x110] sm:$0xff]  ;;  %v4027_v48 = vsub.f32 %v10493_v29, %v10503_v3  ;;  %v4035_v29 = vsub.f32 %v10562_v56, %v4019_v60  ;;  %v10636_v60 = vld [vmem:[#allocation3 + $0x1f8] sm:$0xff] }
 0xaa9   : > { %4580 = vst.msk [vmem:[#allocation3 + $0x1c8] sm:$0xff] %vm1778_vm5, %v4017_v23  ;;  %4585 = vst.msk [vmem:[#allocation3 + $0x1f0] sm:$0xff] %vm1778_vm5, %v10587_v13  ;;  %4119 = vperm.xlu1 %7258, %v4017_v23   ;;  %4420 = vrot.lane.b32.xlu0 %v11662_v43, %s7861_s17 }
 0xaaa   : > { %v4431_v45 = vpop.permute.xlu1 %4430  ;;  %v4001_v55 = vpop.xlane.xlu0 %4000 }
 0xaab   : > { %v10599_v46 = vmax.f32 %v10589_v14, %v4001_v55  ;;  %6932 = vmatprep.subr.bf16.mxu0 %v4431_v45 }
 0xaac   : > { %6933 = vmatpush3.bf16.msra.mxu0 %v4431_v45 }
 0xaad   : > { %4583 = vst.msk [vmem:[#allocation3 + $0x1e0] sm:$0xff] %vm1778_vm5, %v10599_v46  ;;  %4418 = vrot.lane.b32.xlu1 %v11663_v1, %s7861_s17  ;;  %4134 = vperm.xlu0 %7257, %v10599_v46   ;;  %v4024_v1 = vsub.f32 %v10495_v57, %v10506_v44  ;;  %v4033_v57 = vsub.f32 %v3969_v31, %v4017_v23 }
 0xab1   : > { %4144 = vperm.xlu0 %7257, %v10587_v13  }
 0xab2   : > { %v3490_v43 = vpop.permute.xlu0 %3489 }
 0xab3   : > { %v3559_v53 = vmul.f32 %v3490_v43, %v3463_v4  ;;  %v4040_v4 = vmul.f32 1.442695, %v4024_v1 }
 0xab5   : > { %v3704_v55 = vadd.f32 %v10267_v12, %v3559_v53  ;;  %3494 = vperm.xlu0 %7257, %v10346_v16   ;;  %v4046_v12 = vmul.f32 1.442695, %v4027_v48  ;;  %7475 = vpow2.f32 %v4040_v4  ;;  %v4031_v53 = vsub.f32 %v10524_v7, %v10539_v33 }
 0xab6   : > { %v4429_v45 = vpop.permute.xlu0 %4428 }
 0xab7   : > { %3720 = vst.msk [vmem:[#allocation5 + $0x110] sm:$0xff] %vm1312_vm3, %v3704_v55  ;;  %6934 = vmatprep.subr.bf16.mxu0 %v4429_v45  ;;  %7477 = vpow2.f32 %v4046_v12  ;;  %v4054_v16 = vmul.f32 1.442695, %v4031_v53  ;;  %v11664_v12 = vsub.f32 %v10508_v35, %v10519_v17 }
 0xab8   : > { %6935 = vmatpush3.bf16.msra.mxu0 %v4429_v45 }
 0xab9   : > { %3504 = vperm.xlu0 %7257, %v10375_v18   ;;  %v4029_v18 = vsub.f32 %v10544_v15, %v10557_v27  ;;  %7479 = vpow2.f32 %v4054_v16  ;;  %v3973_v27 = vld [vmem:[#allocation3 + $0x1e8] sm:$0xff]  ;;  %v4042_v53 = vmul.f32 1.442695, %v11664_v12 }
 0xaba   : > { %v4425_v1 = vpop.permute.xlu0 %4424 }
 0xabd   : > { %3514 = vperm.xlu0 %7257, %v10362_v58   ;;  %v4050_v58 = vmul.f32 1.442695, %v4029_v18  ;;  %v11665_v18 = vsub.f32 %v10488_v54, %v10491_v26  ;;  %v11668_v54 = vsub.f32 %v10546_v10, %v10560_v50 }
 0xabf   : > { %7481 = vpow2.f32 %v4050_v58  ;;  %v4044_v58 = vmul.f32 1.442695, %v11665_v18  ;;  %v4060_v26 = vmul.f32 1.442695, %v11668_v54 }
 0xac1   : > { %3524 = vperm.xlu0 %7257, %v10397_v6   ;;  %v4062_v6 = vmul.f32 1.442695, %v4035_v29 }
 0xac2   : > { %v10627_v3 = vpop.eup %7475 }
 0xac3   : > { %7483 = vpow2.f32 %v4062_v6 }
 0xac4   : > { %v10630_v44 = vpop.eup %7477 }
 0xac5   : > { %3534 = vperm.xlu0 %7257, %v10385_v59   ;;  %v4058_v59 = vmul.f32 1.442695, %v4033_v57 }
 0xac7   : > { %7485 = vpow2.f32 %v4058_v59 }
 0xac9   : > { %3544 = vperm.xlu0 %7257, %v10427_v20   ;;  %v10633_v20 = vpop.eup %7479 }
 0xacd   : > { %3554 = vperm.xlu0 %7257, %v10413_v0   ;;  %v10638_v0 = vpop.eup %7481 }
 0xad0   : > { %v10648_v15 = vpop.eup %7483 }
 0xad1   : > { %4316 = vperm.xlu0 %7257, %v10627_v3  }
 0xad4   : > { %v10652_v55 = vpop.eup %7485 }
 0xad5   : > { %4331 = vperm.xlu0 %7257, %v10630_v44  }
 0xad9   : > { %4351 = vperm.xlu0 %7257, %v10633_v20  }
 0xadb   : > { %v4007_v56 = vpop.xlane.xlu1 %4006 }
 0xadc   : > { %v10641_v31 = vmax.f32 %v10636_v60, %v4007_v56 }
 0xadd   : > { %4341 = vperm.xlu0 %7257, %v10638_v0  }
 0xade   : > { %v4039_v7 = vsub.f32 %v10636_v60, %v10641_v31  ;;  %4586 = vst.msk [vmem:[#allocation3 + $0x1f8] sm:$0xff] %vm1778_vm5, %v10641_v31 }
 0xadf   : > { %v4003_v33 = vpop.xlane.xlu1 %4002 }
 0xae0   : > { %v4021_v23 = vmax.f32 %v3973_v27, %v4003_v33 }
 0xae1   : > { %4371 = vperm.xlu0 %7257, %v10648_v15  }
 0xae2   : > { %v4037_v48 = vsub.f32 %v3973_v27, %v4021_v23  ;;  %4584 = vst.msk [vmem:[#allocation3 + $0x1e8] sm:$0xff] %vm1778_vm5, %v4021_v23  ;;  %4139 = vperm.xlu1 %7258, %v4021_v23  }
 0xae3   : > { %v4427_v43 = vpop.permute.xlu1 %4426 }
 0xae4   : > { %v4066_v45 = vmul.f32 1.442695, %v4037_v48  ;;  %6936 = vmatprep.subr.bf16.mxu0 %v4427_v43 }
 0xae5   : > { %4361 = vperm.xlu0 %7257, %v10652_v55   ;;  %6937 = vmatpush3.bf16.msra.mxu0 %v4427_v43 }
 0xae6   : > { %7487 = vpow2.f32 %v4066_v45  ;;  %4149 = vperm.xlu1 %7258, %v10641_v31   ;;  %6938 = vmatprep.subr.bf16.mxu0 %v4425_v1  ;;  %v11676_v31 = vld [vmem:[#allocation75_spill] sm:$0xff] }
 0xae7   : > { %v4423_v4 = vpop.permute.xlu1 %4422  ;;  %7489 = vpow2.f32 %v4042_v53 }
 0xae8   : > { %7491 = vpow2.f32 %v4044_v58 }
 0xae9   : > { %6939 = vmatpush3.bf16.msra.mxu0 %v4425_v1 }
 0xaea   : > { %3499 = vperm.xlu1 %7258, %v10355_v9   ;;  %6940 = vmatprep.subr.bf16.mxu0 %v4423_v4 }
 0xaed   : > { %6941 = vmatpush3.bf16.msra.mxu0 %v4423_v4 }
 0xaee   : > { %3509 = vperm.xlu1 %7258, %v10340_v40   ;;  %v11666_v40 = vsub.f32 %v10526_v42, %v10542_v49 }
 0xaf0   : > { %v4048_v9 = vmul.f32 1.442695, %v11666_v40 }
 0xaf2   : > { %3519 = vperm.xlu1 %7258, %v10381_v34   ;;  %v11667_v34 = vsub.f32 %v10510_v61, %v10522_v30  ;;  %7493 = vpow2.f32 %v4048_v9 }
 0xaf3   : > { %v10662_v16 = vpop.eup %7487 }
 0xaf4   : > { %4381 = vperm.xlu0 %7257, %v10662_v16   ;;  %v4052_v35 = vmul.f32 1.442695, %v11667_v34 }
 0xaf6   : > { %3529 = vperm.xlu1 %7258, %v10368_v51   ;;  %7495 = vpow2.f32 %v4052_v35  ;;  %v10680_v51 = vpop.eup %7489 }
 0xaf7   : > { %7497 = vpow2.f32 %v4060_v26  ;;  %v10686_v42 = vpop.eup %7491 }
 0xafa   : > { %3539 = vperm.xlu1 %7258, %v10407_v22   ;;  %v11669_v22 = vsub.f32 %v10564_v28, %v10576_v21 }
 0xafc   : > { %v4056_v17 = vmul.f32 1.442695, %v11669_v22 }
 0xafe   : > { %3549 = vperm.xlu1 %7258, %v10392_v5   ;;  %7499 = vpow2.f32 %v4056_v17  ;;  %v11670_v5 = vsub.f32 %v10589_v14, %v10599_v46 }
 0xaff   : > { %v10692_v30 = vpop.eup %7493 }
 0xb00   : > { %v4064_v61 = vmul.f32 1.442695, %v11670_v5 }
 0xb02   : > { %4321 = vperm.xlu1 %7258, %v10680_v51   ;;  %7501 = vpow2.f32 %v4064_v61 }
 0xb03   : > { %v10695_v49 = vpop.eup %7495 }
 0xb04   : > { %v10699_v6 = vpop.eup %7497 }
 0xb06   : > { %4326 = vperm.xlu1 %7258, %v10686_v42  }
 0xb0a   : > { %4336 = vperm.xlu1 %7258, %v10692_v30  }
 0xb0b   : > { %v10704_v27 = vpop.eup %7499 }
 0xb0c   : > { %v4085_v50 = vpop.permute.xlu0 %4084 }
 0xb0d   : > { %v4154_v21 = vsub.f32 %v10388_v62, %v4085_v50 }
 0xb0e   : > { %4346 = vperm.xlu1 %7258, %v10695_v49  }
 0xb0f   : > { %v4172_v28 = vmul.f32 1.442695, %v4154_v21  ;;  %v10709_v45 = vpop.eup %7501 }
 0xb10   : > { %v4090_v10 = vpop.permute.xlu1 %4089  ;;  %v4075_v29 = vpop.permute.xlu0 %4074 }
 0xb11   : > { %7503 = vpow2.f32 %v4172_v28  ;;  %v4152_v14 = vsub.f32 %v10400_v38, %v4075_v29  ;;  %v4155_v46 = vsub.f32 %v10403_v52, %v4090_v10 }
 0xb12   : > { %4366 = vperm.xlu1 %7258, %v10699_v6  }
 0xb13   : > { %v4168_v57 = vmul.f32 1.442695, %v4152_v14  ;;  %v4174_v23 = vmul.f32 1.442695, %v4155_v46 }
 0xb14   : > { %v4080_v59 = vpop.permute.xlu1 %4079  ;;  %v4105_v56 = vpop.permute.xlu0 %4104 }
 0xb15   : > { %v4153_v62 = vsub.f32 %v10416_v2, %v4080_v59  ;;  %v4158_v33 = vsub.f32 %v10419_v39, %v4105_v56  ;;  %7505 = vpow2.f32 %v4168_v57  ;;  %v3464_v56 = vld [vmem:[#allocation5 + $0x118] sm:$0xff] }
 0xb16   : > { %4356 = vperm.xlu1 %7258, %v10704_v27  }
 0xb17   : > { %v4170_v48 = vmul.f32 1.442695, %v4153_v62  ;;  %v4180_v52 = vmul.f32 1.442695, %v4158_v33 }
 0xb18   : > { %v4110_v43 = vpop.permute.xlu1 %4109  ;;  %v4095_v38 = vpop.permute.xlu0 %4094 }
 0xb19   : > { %7507 = vpow2.f32 %v4170_v48  ;;  %v4156_v1 = vsub.f32 %v10430_v36, %v4095_v38  ;;  %v4159_v2 = vsub.f32 %v10433_v37, %v4110_v43 }
 0xb1a   : > { %4376 = vperm.xlu1 %7258, %v10709_v45   ;;  %7509 = vpow2.f32 %v4174_v23 }
 0xb1b   : > { %v4176_v4 = vmul.f32 1.442695, %v4156_v1  ;;  %7511 = vpow2.f32 %v4180_v52  ;;  %v4182_v40 = vmul.f32 1.442695, %v4159_v2  ;;  %v3466_v1 = vld [vmem:[#allocation5 + $0x128] sm:$0xff] }
 0xb1c   : > { %v4100_v39 = vpop.permute.xlu1 %4099  ;;  %v4125_v12 = vpop.permute.xlu0 %4124 }
 0xb1d   : > { %v4157_v53 = vsub.f32 %v10441_v24, %v4100_v39  ;;  %v4162_v18 = vsub.f32 %v10444_v19, %v4125_v12  ;;  %7513 = vpow2.f32 %v4176_v4 }
 0xb1e   : > { %v7504_v58 = vpop.eup %7503 }
 0xb1f   : > { %v4178_v9 = vmul.f32 1.442695, %v4157_v53  ;;  %4237 = vadd.xlane.f32.xlu0 %v7504_v58  ;;  %v4188_v35 = vmul.f32 1.442695, %v4162_v18  ;;  %v3468_v53 = vld [vmem:[#allocation5 + $0x138] sm:$0xff] }
 0xb20   : > { %v4130_v34 = vpop.permute.xlu1 %4129  ;;  %v4115_v36 = vpop.permute.xlu0 %4114 }
 0xb21   : > { %7515 = vpow2.f32 %v4178_v9  ;;  %v4160_v54 = vsub.f32 %v10450_v47, %v4115_v36  ;;  %v4163_v37 = vsub.f32 %v10453_v63, %v4130_v34  ;;  %v3470_v34 = vld [vmem:[#allocation5 + $0x148] sm:$0xff]  ;;  %v11671_v36 = vld [vmem:[#allocation106_spill] sm:$0xff] }
 0xb22   : > { %7517 = vpow2.f32 %v4182_v40  ;;  %v10718_v24 = vpop.eup %7505 }
 0xb23   : > { %v4184_v26 = vmul.f32 1.442695, %v4160_v54  ;;  %7519 = vpow2.f32 %v4188_v35  ;;  %v4190_v61 = vmul.f32 1.442695, %v4163_v37 }
 0xb24   : > { %v4120_v22 = vpop.permute.xlu1 %4119  ;;  %v4421_v17 = vpop.permute.xlu0 %4420 }
 0xb25   : > { %v4161_v19 = vsub.f32 %v10458_v11, %v4120_v22  ;;  %6942 = vmatprep.subr.bf16.mxu0 %v4421_v17  ;;  %7521 = vpow2.f32 %v4184_v26 }
 0xb26   : > { %v7508_v5 = vpop.eup %7507  ;;  %6943 = vmatpush3.bf16.msra.mxu0 %v4421_v17  ;;  %v11672_v17 = vld [vmem:[#allocation110_spill] sm:$0xff] }
 0xb27   : > { %v4186_v50 = vmul.f32 1.442695, %v4161_v19  ;;  %4235 = vadd.xlane.f32.xlu0 %v7508_v5  ;;  %v4410_v21 = vpack.c.bf16 %v7508_v5, %v10718_v24  ;;  %v10722_v47 = vpop.eup %7509 }
 0xb28   : > { %v4419_v63 = vpop.permute.xlu1 %4418  ;;  %v4135_v28 = vpop.permute.xlu0 %4134  ;;  %v4411_v11 = vpack.c.bf16 %v10722_v47, %v7504_v58 }
 0xb29   : > { %7523 = vpow2.f32 %v4186_v50  ;;  %6944 = vmatprep.subr.bf16.mxu0 %v4419_v63  ;;  %6946 = vmatprep.mubr.bf16.mxu0 %v4410_v21  ;;  %v7512_v10 = vpop.eup %7511  ;;  %v4164_v46 = vsub.f32 %v10466_v8, %v4135_v28  ;;  %v3474_v21 = vld [vmem:[#allocation5 + $0x168] sm:$0xff] }
 0xb2a   : > { %6945 = vmatpush3.bf16.msra.mxu0 %v4419_v63  ;;  %7525 = vpow2.f32 %v4190_v61  ;;  %v7514_v14 = vpop.eup %7513  ;;  %v11673_v63 = vld [vmem:[#allocation109_spill] sm:$0xff] }
 0xb2b   : > { %4245 = vadd.xlane.f32.xlu0 %v7512_v10  ;;  %v4192_v43 = vmul.f32 1.442695, %v4164_v46 }
 0xb2c   : > { %v4145_v29 = vpop.permute.xlu0 %4144 }
 0xb2d   : > { %v4166_v57 = vsub.f32 %v10461_v32, %v4145_v29  ;;  %6947 = vmatmul.mubr.bf16.vlgmr.msra.gmra.mxu0 %v4411_v11  ;;  %v3476_v11 = vld [vmem:[#allocation5 + $0x178] sm:$0xff]  ;;  %v4070_v29 = vmul.f32 1.442695, %v4039_v7 }
 0xb2e   : > { %v7516_v59 = vpop.eup %7515 }
 0xb2f   : > { %v4196_v62 = vmul.f32 1.442695, %v4166_v57  ;;  %4241 = vadd.xlane.f32.xlu0 %v7514_v14  ;;  %v4412_v33 = vpack.c.bf16 %v7516_v59, %v7514_v14  ;;  %v7518_v23 = vpop.eup %7517  ;;  %v11674_v14 = vld [vmem:[#allocation79_spill] sm:$0xff] }
 0xb30   : > { %v3495_v48 = vpop.permute.xlu0 %3494  ;;  %v7520_v52 = vpop.eup %7519  ;;  %v4413_v8 = vpack.c.bf16 %v7518_v23, %v7512_v10 }
 0xb31   : > { %7527 = vpow2.f32 %v4196_v62  ;;  %v3560_v38 = vmul.f32 %v3495_v48, %v3464_v56  ;;  %6950 = vmatprep.mubr.bf16.mxu0 %v4412_v33  ;;  %v11675_v56 = vld [vmem:[#allocation113_spill] sm:$0xff] }
 0xb32   : > { %v7522_v32 = vpop.eup %7521  ;;  %7529 = vpow2.f32 %v4192_v43  ;;  %v11677_v43 = vld [vmem:[#allocation81_spill] sm:$0xff] }
 0xb33   : > { %v3705_v2 = vadd.f32 %v10277_v41, %v3560_v38  ;;  %4253 = vadd.xlane.f32.xlu0 %v7520_v52  ;;  %7531 = vpow2.f32 %v4070_v29 }
 0xb34   : > { %v3505_v4 = vpop.permute.xlu0 %3504 }
 0xb35   : > { %3721 = vst.msk [vmem:[#allocation5 + $0x118] sm:$0xff] %vm1312_vm3, %v3705_v2  ;;  %v3562_v39 = vmul.f32 %v3505_v4, %v3466_v1  ;;  %6951 = vmatmul.mubr.bf16.gmra.mxu0 %v4413_v8  ;;  %v3467_v8 = vld [vmem:[#allocation5 + $0x130] sm:$0xff]  ;;  %v11678_v4 = vld [vmem:[#allocation23_spill] sm:$0xff] }
 0xb36   : > { %v7524_v12 = vpop.eup %7523 }
 0xb37   : > { %v3707_v18 = vadd.f32 %v10305_v25, %v3562_v39  ;;  %4249 = vadd.xlane.f32.xlu0 %v7522_v32  ;;  %v4414_v58 = vpack.c.bf16 %v7524_v12, %v7522_v32  ;;  %v7526_v40 = vpop.eup %7525  ;;  %v3472_v25 = vld [vmem:[#allocation5 + $0x158] sm:$0xff] }
 0xb38   : > { %v3515_v9 = vpop.permute.xlu0 %3514  ;;  %v4415_v54 = vpack.c.bf16 %v7526_v40, %v7520_v52 }
 0xb39   : > { %3723 = vst.msk [vmem:[#allocation5 + $0x128] sm:$0xff] %vm1312_vm3, %v3707_v18  ;;  %v3564_v41 = vmul.f32 %v3515_v9, %v3468_v53  ;;  %6954 = vmatprep.mubr.bf16.mxu0 %v4414_v58  ;;  %v3469_v53 = vld [vmem:[#allocation5 + $0x140] sm:$0xff] }
 0xb3a   : > { %v11679_v18 = vld [vmem:[#allocation22_spill] sm:$0xff] }
 0xb3b   : > { %v3709_v35 = vadd.f32 %v11671_v36, %v3564_v41  ;;  %v11680_v36 = vld [vmem:[#allocation108_spill] sm:$0xff] }
 0xb3c   : > { %v3525_v37 = vpop.permute.xlu0 %3524 }
 0xb3d   : > { %3725 = vst.msk [vmem:[#allocation5 + $0x138] sm:$0xff] %vm1312_vm3, %v3709_v35  ;;  %v3566_v26 = vmul.f32 %v3525_v37, %v3470_v34  ;;  %6955 = vmatmul.mubr.bf16.gmra.mxu0 %v4415_v54  ;;  %v3471_v34 = vld [vmem:[#allocation5 + $0x150] sm:$0xff] }
 0xb3e   : > { %v10733_v22 = vpop.eup %7527  ;;  %4233 = vadd.xlane.f32.xlu1 %v10718_v24 }
 0xb3f   : > { %v3711_v19 = vadd.f32 %v11672_v17, %v3566_v26  ;;  %4261 = vadd.xlane.f32.xlu0 %v10733_v22  ;;  %v7530_v50 = vpop.eup %7529  ;;  %v3473_v17 = vld [vmem:[#allocation5 + $0x160] sm:$0xff] }
 0xb40   : > { %v3535_v5 = vpop.permute.xlu0 %3534  ;;  %v10749_v33 = vpop.eup %7531 }
 0xb41   : > { %3727 = vst.msk [vmem:[#allocation5 + $0x148] sm:$0xff] %vm1312_vm3, %v3711_v19  ;;  %v3568_v61 = vmul.f32 %v3535_v5, %v3472_v25  ;;  %v11681_v19 = vld [vmem:[#allocation107_spill] sm:$0xff] }
 0xb42   : > { %4239 = vadd.xlane.f32.xlu1 %v10722_v47 }
 0xb43   : > { %v3713_v28 = vadd.f32 %v11673_v63, %v3568_v61  ;;  %4257 = vadd.xlane.f32.xlu0 %v7530_v50 }
 0xb44   : > { %v3545_v10 = vpop.permute.xlu0 %3544 }
 0xb45   : > { %3729 = vst.msk [vmem:[#allocation5 + $0x158] sm:$0xff] %vm1312_vm3, %v3713_v28  ;;  %v3570_v24 = vmul.f32 %v3545_v10, %v3474_v21  ;;  %v11682_v28 = vld [vmem:[#allocation77_spill] sm:$0xff] }
 0xb46   : > { %4247 = vadd.xlane.f32.xlu1 %v7518_v23 }
 0xb47   : > { %v3715_v46 = vadd.f32 %v11674_v14, %v3570_v24  ;;  %v3475_v24 = vld [vmem:[#allocation5 + $0x170] sm:$0xff] }
 0xb48   : > { %v3555_v57 = vpop.permute.xlu0 %3554 }
 0xb49   : > { %3731 = vst.msk [vmem:[#allocation5 + $0x168] sm:$0xff] %vm1312_vm3, %v3715_v46  ;;  %v3572_v47 = vmul.f32 %v3555_v57, %v3476_v11  ;;  %v11684_v11 = vld [vmem:[#allocation112_spill] sm:$0xff]  ;;  %v11685_v57 = vld [vmem:[#allocation111_spill] sm:$0xff] }
 0xb4a   : > { %4243 = vadd.xlane.f32.xlu1 %v7516_v59  ;;  %v3465_v59 = vld [vmem:[#allocation5 + $0x120] sm:$0xff] }
 0xb4b   : > { %v3717_v62 = vadd.f32 %v11675_v56, %v3572_v47 }
 0xb4c   : > { %v10770_v47 = vpop.permute.xlu0 %4316 }
 0xb4d   : > { %3733 = vst.msk [vmem:[#allocation5 + $0x178] sm:$0xff] %vm1312_vm3, %v3717_v62 }
 0xb4e   : > { %4255 = vadd.xlane.f32.xlu1 %v7526_v40 }
 0xb50   : > { %v10772_v62 = vpop.permute.xlu0 %4331 }
 0xb52   : > { %4251 = vadd.xlane.f32.xlu1 %v7524_v12 }
 0xb59   : > { %4391 = vperm.xlu0 %7257, %v10749_v33  }
 0xb5d   : > { %v4140_v60 = vpop.permute.xlu1 %4139 }
 0xb5e   : > { %v4165_v7 = vsub.f32 %v11676_v31, %v4140_v60 }
 0xb60   : > { %v4194_v23 = vmul.f32 1.442695, %v4165_v7 }
 0xb61   : > { %v4150_v48 = vpop.permute.xlu1 %4149 }
 0xb62   : > { %7533 = vpow2.f32 %v4194_v23  ;;  %v4167_v38 = vsub.f32 %v11677_v43, %v4150_v48  ;;  %v4203_v43 = vld [vmem:[#allocation4 + $0x190] sm:$0xff] }
 0xb64   : > { %v4198_v52 = vmul.f32 1.442695, %v4167_v38 }
 0xb65   : > { %v3500_v1 = vpop.permute.xlu1 %3499 }
 0xb66   : > { %7535 = vpow2.f32 %v4198_v52  ;;  %v3561_v2 = vmul.f32 %v3500_v1, %v3465_v59  ;;  %v4219_v59 = vmul.f32 %v10686_v42, %v4203_v43  ;;  %v4205_v42 = vld [vmem:[#allocation4 + $0x1a0] sm:$0xff] }
 0xb68   : > { %v3706_v32 = vadd.f32 %v11678_v4, %v3561_v2 }
 0xb69   : > { %v3510_v39 = vpop.permute.xlu1 %3509 }
 0xb6a   : > { %3722 = vst.msk [vmem:[#allocation5 + $0x120] sm:$0xff] %vm1312_vm3, %v3706_v32  ;;  %v3563_v12 = vmul.f32 %v3510_v39, %v3467_v8  ;;  %v4202_v8 = vld [vmem:[#allocation4 + $0x188] sm:$0xff]  ;;  %v4207_v39 = vld [vmem:[#allocation4 + $0x1b0] sm:$0xff] }
 0xb6b   : > { %v4218_v4 = vmul.f32 %v10680_v51, %v4202_v8  ;;  %v4211_v51 = vld [vmem:[#allocation4 + $0x1d0] sm:$0xff]  ;;  %v4212_v8 = vld [vmem:[#allocation4 + $0x1d8] sm:$0xff] }
 0xb6c   : > { %v3708_v58 = vadd.f32 %v11679_v18, %v3563_v12  ;;  %v4223_v18 = vmul.f32 %v10695_v49, %v4207_v39  ;;  %v4210_v39 = vld [vmem:[#allocation4 + $0x1c8] sm:$0xff] }
 0xb6d   : > { %v3520_v40 = vpop.permute.xlu1 %3519 }
 0xb6e   : > { %3724 = vst.msk [vmem:[#allocation5 + $0x130] sm:$0xff] %vm1312_vm3, %v3708_v58  ;;  %v3565_v9 = vmul.f32 %v3520_v40, %v3469_v53 }
 0xb6f   : > { %v7534_v41 = vpop.eup %7533 }
 0xb70   : > { %v3710_v35 = vadd.f32 %v11680_v36, %v3565_v9  ;;  %v4416_v54 = vpack.c.bf16 %v7534_v41, %v7530_v50  ;;  %v11683_v50 = vsub.f32 %v11682_v28, %v10587_v13  ;;  %v10774_v13 = vpop.permute.xlu0 %4351  ;;  %v4204_v28 = vld [vmem:[#allocation4 + $0x198] sm:$0xff] }
 0xb71   : > { %v3530_v37 = vpop.permute.xlu1 %3529 }
 0xb72   : > { %3726 = vst.msk [vmem:[#allocation5 + $0x140] sm:$0xff] %vm1312_vm3, %v3710_v35  ;;  %v3567_v26 = vmul.f32 %v3530_v37, %v3471_v34  ;;  %6958 = vmatprep.mubr.bf16.mxu0 %v4416_v54  ;;  %v4068_v10 = vmul.f32 1.442695, %v11683_v50  ;;  %v4227_v35 = vmul.f32 %v10699_v6, %v4211_v51  ;;  %v4209_v37 = vld [vmem:[#allocation4 + $0x1c0] sm:$0xff] }
 0xb73   : > { %v7536_v25 = vpop.eup %7535 }
 0xb74   : > { %v3712_v5 = vadd.f32 %v11681_v19, %v3567_v26  ;;  %4263 = vadd.xlane.f32.xlu1 %v7536_v25  ;;  %v4417_v61 = vpack.c.bf16 %v7536_v25, %v10733_v22  ;;  %7537 = vpow2.f32 %v4068_v10  ;;  %v10776_v60 = vpop.permute.xlu0 %4341  ;;  %v4225_v25 = vmul.f32 %v10704_v27, %v4209_v37  ;;  %v4304_v37 = vld [vmem:[#allocation5 + $0x1b0] sm:$0xff] }
 0xb75   : > { %v3540_v21 = vpop.permute.xlu1 %3539  ;;  %v4220_v27 = vmul.f32 %v10630_v44, %v4204_v28 }
 0xb76   : > { %3728 = vst.msk [vmem:[#allocation5 + $0x150] sm:$0xff] %vm1312_vm3, %v3712_v5  ;;  %v3569_v63 = vmul.f32 %v3540_v21, %v3473_v17  ;;  %6959 = vmatmul.mubr.bf16.gmra.mxu0 %v4417_v61  ;;  %v4215_v61 = vld [vmem:[#allocation4 + $0x1f0] sm:$0xff] }
 0xb78   : > { %v3714_v29 = vadd.f32 %v11684_v11, %v3569_v63  ;;  %4259 = vadd.xlane.f32.xlu1 %v7534_v41  ;;  %v10778_v31 = vpop.permute.xlu0 %4371  ;;  %v4221_v41 = vmul.f32 %v10692_v30, %v4205_v42  ;;  %v4201_v30 = vld [vmem:[#allocation4 + $0x180] sm:$0xff]  ;;  %v4300_v42 = vld [vmem:[#allocation5 + $0x190] sm:$0xff] }
 0xb79   : > { %v3550_v14 = vpop.permute.xlu1 %3549  ;;  %v4217_v21 = vmul.f32 %v10627_v3, %v4201_v30 }
 0xb7a   : > { %3730 = vst.msk [vmem:[#allocation5 + $0x160] sm:$0xff] %vm1312_vm3, %v3714_v29  ;;  %v3571_v46 = vmul.f32 %v3550_v14, %v3475_v24  ;;  %v4213_v24 = vld [vmem:[#allocation4 + $0x1e0] sm:$0xff] }
 0xb7b   : > { %v4229_v14 = vmul.f32 %v10709_v45, %v4213_v24 }
 0xb7c   : > { %v3716_v22 = vadd.f32 %v11685_v57, %v3571_v46  ;;  %v10782_v23 = vpop.permute.xlu0 %4361  ;;  %v4208_v46 = vld [vmem:[#allocation4 + $0x1b8] sm:$0xff] }
 0xb7d   : > { %v10780_v7 = vpop.permute.xlu1 %4321 }
 0xb7e   : > { %3732 = vst.msk [vmem:[#allocation5 + $0x170] sm:$0xff] %vm1312_vm3, %v3716_v22 }
 0xb80   : > { %v10784_v48 = vpop.permute.xlu0 %4381 }
 0xb81   : > { %v7538_v56 = vpop.eup %7537  ;;  %v10786_v38 = vpop.permute.xlu1 %4326 }
 0xb82   : > { %v4231_v63 = vmul.f32 %v7538_v56, %v4215_v61  ;;  %v4305_v61 = vld [vmem:[#allocation5 + $0x1b8] sm:$0xff] }
 0xb85   : > { %v10789_v2 = vpop.permute.xlu1 %4336 }
 0xb89   : > { %4386 = vperm.xlu1 %7258, %v7538_v56   ;;  %v10793_v12 = vpop.permute.xlu1 %4346  ;;  %v4224_v56 = vmul.f32 %v10633_v20, %v4208_v46  ;;  %v4226_v20 = vmul.f32 %v10652_v55, %v4210_v39 }
 0xb8a   : > { %v4400_v30 = vmul.f32 %v10793_v12, %v4304_v37  ;;  %v4216_v12 = vld [vmem:[#allocation4 + $0x1f8] sm:$0xff] }
 0xb8d   : > { %v10797_v9 = vpop.permute.xlu1 %4366 }
 0xb91   : > { %v10803_v26 = vpop.permute.xlu1 %4356 }
 0xb95   : > { %v10807_v5 = vpop.permute.xlu1 %4376 }
 0xba8   : > { %v4238_v52 = vpop.xlane.xlu0 %4237 }
 0xba9   : > { %v4267_v1 = vadd.f32 %v4238_v52, %v4219_v59  ;;  %v4206_v59 = vld [vmem:[#allocation4 + $0x1a8] sm:$0xff] }
 0xbaa   : > { %v4222_v44 = vmul.f32 %v10638_v0, %v4206_v59  ;;  %v4298_v0 = vld [vmem:[#allocation5 + $0x180] sm:$0xff] }
 0xbab   : > { %4283 = vst.msk [vmem:[#allocation4 + $0x190] sm:$0xff] %vm1778_vm5, %v4267_v1  ;;  %v4394_v51 = vmul.f32 %v10770_v47, %v4298_v0 }
 0xbb0   : > { %v4236_v32 = vpop.xlane.xlu0 %4235 }
 0xbb1   : > { %v4266_v53 = vadd.f32 %v4236_v32, %v4218_v4  ;;  %v4228_v4 = vmul.f32 %v10648_v15, %v4212_v8 }
 0xbb3   : > { %4282 = vst.msk [vmem:[#allocation4 + $0x188] sm:$0xff] %vm1778_vm5, %v4266_v53 }
 0xbb4   : > { %v4246_v58 = vpop.xlane.xlu0 %4245 }
 0xbb5   : > { %v4271_v40 = vadd.f32 %v4246_v58, %v4223_v18 }
 0xbb7   : > { %4287 = vst.msk [vmem:[#allocation4 + $0x1b0] sm:$0xff] %vm1778_vm5, %v4271_v40  ;;  %v4396_v40 = vmul.f32 %v10786_v38, %v4300_v42  ;;  %v4302_v38 = vld [vmem:[#allocation5 + $0x1a0] sm:$0xff] }
 0xbb8   : > { %v4242_v34 = vpop.xlane.xlu0 %4241 }
 0xbb9   : > { %v4269_v36 = vadd.f32 %v4242_v34, %v4221_v41  ;;  %v4301_v41 = vld [vmem:[#allocation5 + $0x198] sm:$0xff] }
 0xbbb   : > { %4285 = vst.msk [vmem:[#allocation4 + $0x1a0] sm:$0xff] %vm1778_vm5, %v4269_v36  ;;  %v4299_v36 = vld [vmem:[#allocation5 + $0x188] sm:$0xff] }
 0xbbc   : > { %v4254_v54 = vpop.xlane.xlu0 %4253 }
 0xbbd   : > { %v4275_v49 = vadd.f32 %v4254_v54, %v4227_v35  ;;  %v4397_v54 = vmul.f32 %v10772_v62, %v4301_v41  ;;  %v4398_v62 = vmul.f32 %v10789_v2, %v4302_v38  ;;  %v4311_v41 = vld [vmem:[#allocation5 + $0x1e8] sm:$0xff] }
 0xbbf   : > { %4291 = vst.msk [vmem:[#allocation4 + $0x1d0] sm:$0xff] %vm1778_vm5, %v4275_v49 }
 0xbc0   : > { %v4250_v17 = vpop.xlane.xlu0 %4249 }
 0xbc1   : > { %v4273_v19 = vadd.f32 %v4250_v17, %v4225_v25  ;;  %v4395_v25 = vmul.f32 %v10780_v7, %v4299_v36  ;;  %v4401_v7 = vmul.f32 %v10774_v13, %v4305_v61  ;;  %v4232_v13 = vmul.f32 %v10749_v33, %v4216_v12 }
 0xbc3   : > { %4289 = vst.msk [vmem:[#allocation4 + $0x1c0] sm:$0xff] %vm1778_vm5, %v4273_v19 }
 0xbc7   : > { %v4234_v6 = vpop.xlane.xlu1 %4233 }
 0xbc8   : > { %v4265_v50 = vadd.f32 %v4234_v6, %v4217_v21  ;;  %v4262_v10 = vpop.xlane.xlu0 %4261 }
 0xbc9   : > { %v4279_v11 = vadd.f32 %v4262_v10, %v4231_v63  ;;  %v4303_v63 = vld [vmem:[#allocation5 + $0x1a8] sm:$0xff]  ;;  %v4308_v10 = vld [vmem:[#allocation5 + $0x1d0] sm:$0xff] }
 0xbca   : > { %4281 = vst.msk [vmem:[#allocation4 + $0x180] sm:$0xff] %vm1778_vm5, %v4265_v50 }
 0xbcb   : > { %4295 = vst.msk [vmem:[#allocation4 + $0x1f0] sm:$0xff] %vm1778_vm5, %v4279_v11  ;;  %v4240_v29 = vpop.xlane.xlu1 %4239  ;;  %v4399_v11 = vmul.f32 %v10776_v60, %v4303_v63 }
 0xbcc   : > { %v4268_v57 = vadd.f32 %v4240_v29, %v4220_v27  ;;  %v4258_v22 = vpop.xlane.xlu0 %4257  ;;  %v4306_v29 = vld [vmem:[#allocation5 + $0x1c0] sm:$0xff] }
 0xbcd   : > { %v4277_v3 = vadd.f32 %v4258_v22, %v4229_v14  ;;  %v4404_v14 = vmul.f32 %v10797_v9, %v4308_v10 }
 0xbce   : > { %4284 = vst.msk [vmem:[#allocation4 + $0x198] sm:$0xff] %vm1778_vm5, %v4268_v57  ;;  %v4309_v57 = vld [vmem:[#allocation5 + $0x1d8] sm:$0xff] }
 0xbcf   : > { %4293 = vst.msk [vmem:[#allocation4 + $0x1e0] sm:$0xff] %vm1778_vm5, %v4277_v3  ;;  %v4248_v43 = vpop.xlane.xlu1 %4247 }
 0xbd0   : > { %v4272_v52 = vadd.f32 %v4248_v43, %v4224_v56  ;;  %v4214_v56 = vld [vmem:[#allocation4 + $0x1e8] sm:$0xff]  ;;  %v4402_v43 = vmul.f32 %v10803_v26, %v4306_v29 }
 0xbd1   : > { %v4230_v33 = vmul.f32 %v10662_v16, %v4214_v56 }
 0xbd2   : > { %4288 = vst.msk [vmem:[#allocation4 + $0x1b8] sm:$0xff] %vm1778_vm5, %v4272_v52  ;;  %v4307_v52 = vld [vmem:[#allocation5 + $0x1c8] sm:$0xff] }
 0xbd3   : > { %v4244_v1 = vpop.xlane.xlu1 %4243 }
 0xbd4   : > { %v4270_v45 = vadd.f32 %v4244_v1, %v4222_v44  ;;  %v4405_v1 = vmul.f32 %v10778_v31, %v4309_v57  ;;  %v4392_v42 = vpop.permute.xlu0 %4391 }
 0xbd6   : > { %4286 = vst.msk [vmem:[#allocation4 + $0x1a8] sm:$0xff] %vm1778_vm5, %v4270_v45 }
 0xbd7   : > { %v4256_v32 = vpop.xlane.xlu1 %4255 }
 0xbd8   : > { %v4276_v53 = vadd.f32 %v4256_v32, %v4228_v4  ;;  %v4403_v4 = vmul.f32 %v10782_v23, %v4307_v52 }
 0xbda   : > { %4292 = vst.msk [vmem:[#allocation4 + $0x1d8] sm:$0xff] %vm1778_vm5, %v4276_v53  ;;  %v4312_v53 = vld [vmem:[#allocation5 + $0x1f0] sm:$0xff] }
 0xbdb   : > { %v4252_v18 = vpop.xlane.xlu1 %4251 }
 0xbdc   : > { %v4274_v58 = vadd.f32 %v4252_v18, %v4226_v20  ;;  %v4310_v18 = vld [vmem:[#allocation5 + $0x1e0] sm:$0xff] }
 0xbdd   : > { %v4406_v23 = vmul.f32 %v10807_v5, %v4310_v18 }
 0xbde   : > { %4290 = vst.msk [vmem:[#allocation4 + $0x1c8] sm:$0xff] %vm1778_vm5, %v4274_v58  ;;  %v4313_v58 = vld [vmem:[#allocation5 + $0x1f8] sm:$0xff] }
 0xbed   : > { %v6948_v34 = vpop.f32.mrf.mxu0 }
 0xbee   : > { %v4541_v15 = vadd.f32 %v6948_v34, %v4396_v40 }
 0xbef   : > { %v4476_v35 = vpop.f32.mrf.mxu0 }
 0xbf0   : > { %4557 = vst.msk [vmem:[#allocation5 + $0x190] sm:$0xff] %vm1312_vm3, %v4541_v15  ;;  %v4539_v55 = vadd.f32 %v4476_v35, %v4394_v51  ;;  %v4409_v51 = vmul.f32 %v4392_v42, %v4313_v58  ;;  %v4407_v35 = vmul.f32 %v10784_v48, %v4311_v41 }
 0xbf1   : > { %v6949_v49 = vpop.f32.mrf.mxu0 }
 0xbf2   : > { %4555 = vst.msk [vmem:[#allocation5 + $0x180] sm:$0xff] %vm1312_vm3, %v4539_v55  ;;  %v4542_v17 = vadd.f32 %v6949_v49, %v4397_v54 }
 0xbf3   : > { %v4479_v19 = vpop.f32.mrf.mxu0 }
 0xbf4   : > { %4558 = vst.msk [vmem:[#allocation5 + $0x198] sm:$0xff] %vm1312_vm3, %v4542_v17  ;;  %v4540_v47 = vadd.f32 %v4479_v19, %v4395_v25 }
 0xbf5   : > { %v6952_v21 = vpop.f32.mrf.mxu0 }
 0xbf6   : > { %4556 = vst.msk [vmem:[#allocation5 + $0x188] sm:$0xff] %vm1312_vm3, %v4540_v47  ;;  %v4545_v6 = vadd.f32 %v6952_v21, %v4400_v30 }
 0xbf7   : > { %v4492_v28 = vpop.f32.mrf.mxu0 }
 0xbf8   : > { %4561 = vst.msk [vmem:[#allocation5 + $0x1b0] sm:$0xff] %vm1312_vm3, %v4545_v6  ;;  %v4543_v50 = vadd.f32 %v4492_v28, %v4398_v62 }
 0xbf9   : > { %v6953_v24 = vpop.f32.mrf.mxu0 }
 0xbfa   : > { %4559 = vst.msk [vmem:[#allocation5 + $0x1a0] sm:$0xff] %vm1312_vm3, %v4543_v50  ;;  %v4546_v27 = vadd.f32 %v6953_v24, %v4401_v7 }
 0xbfb   : > { %v4495_v2 = vpop.f32.mrf.mxu0 }
 0xbfc   : > { %4562 = vst.msk [vmem:[#allocation5 + $0x1b8] sm:$0xff] %vm1312_vm3, %v4546_v27  ;;  %v4544_v46 = vadd.f32 %v4495_v2, %v4399_v11 }
 0xbfd   : > { %v4264_v22 = vpop.xlane.xlu1 %4263  ;;  %v6956_v3 = vpop.f32.mrf.mxu0 }
 0xbfe   : > { %4560 = vst.msk [vmem:[#allocation5 + $0x1a8] sm:$0xff] %vm1312_vm3, %v4544_v46  ;;  %v4280_v60 = vadd.f32 %v4264_v22, %v4232_v13  ;;  %v4549_v59 = vadd.f32 %v6956_v3, %v4404_v14 }
 0xbff   : > { %v4508_v44 = vpop.f32.mrf.mxu0 }
 0xc00   : > { %4296 = vst.msk [vmem:[#allocation4 + $0x1f8] sm:$0xff] %vm1778_vm5, %v4280_v60  ;;  %v4547_v9 = vadd.f32 %v4508_v44, %v4402_v43 }
 0xc01   : > { %4565 = vst.msk [vmem:[#allocation5 + $0x1d0] sm:$0xff] %vm1312_vm3, %v4549_v59  ;;  %v4260_v8 = vpop.xlane.xlu1 %4259  ;;  %v6957_v45 = vpop.f32.mrf.mxu0 }
 0xc02   : > { %4563 = vst.msk [vmem:[#allocation5 + $0x1c0] sm:$0xff] %vm1312_vm3, %v4547_v9  ;;  %v4278_v26 = vadd.f32 %v4260_v8, %v4230_v33  ;;  %v4550_v32 = vadd.f32 %v6957_v45, %v4405_v1 }
 0xc03   : > { %v4511_v39 = vpop.f32.mrf.mxu0 }
 0xc04   : > { %4294 = vst.msk [vmem:[#allocation4 + $0x1e8] sm:$0xff] %vm1778_vm5, %v4278_v26  ;;  %v4548_v31 = vadd.f32 %v4511_v39, %v4403_v4 }
 0xc05   : > { %4566 = vst.msk [vmem:[#allocation5 + $0x1d8] sm:$0xff] %vm1312_vm3, %v4550_v32  ;;  %v4387_v20 = vpop.permute.xlu1 %4386 }
 0xc06   : > { %4564 = vst.msk [vmem:[#allocation5 + $0x1c8] sm:$0xff] %vm1312_vm3, %v4548_v31  ;;  %v4408_v16 = vmul.f32 %v4387_v20, %v4312_v53 }
 0xc36   : > { %v6960_v0 = vpop.f32.mrf.mxu0 }
 0xc37   : > { %v4553_v40 = vadd.f32 %v6960_v0, %v4408_v16 }
 0xc38   : > { %v4524_v34 = vpop.f32.mrf.mxu0 }
 0xc39   : > { %4569 = vst.msk [vmem:[#allocation5 + $0x1f0] sm:$0xff] %vm1312_vm3, %v4553_v40  ;;  %v4551_v15 = vadd.f32 %v4524_v34, %v4406_v23 }
 0xc3a   : > { %v6961_v36 = vpop.f32.mrf.mxu0 }
 0xc3b   : > { %4567 = vst.msk [vmem:[#allocation5 + $0x1e0] sm:$0xff] %vm1312_vm3, %v4551_v15  ;;  %v4554_v54 = vadd.f32 %v6961_v36, %v4409_v51  ;;  %4590 = sbr.rel (%p6289_p1) target bundleno = 3606 (0xe16), region = 80 }
 0xc3c   : > { %v4527_v55 = vpop.f32.mrf.mxu0 }
 0xc3d   : > { %4570 = vst.msk [vmem:[#allocation5 + $0x1f8] sm:$0xff] %vm1312_vm3, %v4554_v54  ;;  %v4552_v37 = vadd.f32 %v4527_v55, %v4407_v35 }
 0xc3f   : > { %4568 = vst.msk [vmem:[#allocation5 + $0x1e8] sm:$0xff] %vm1312_vm3, %v4552_v37 }
 0xc40   : > { %v4737_v5 = vld [vmem:[#allocation4 + $0x80] sm:$0xff]  ;;  %v4738_v25 = vld [vmem:[#allocation4 + $0x88] sm:$0xff]  ;;  %v7862_v17 = vmov 0   ;;  %v4739_v38 = vld [vmem:[#allocation4 + $0x90] sm:$0xff] }
 0xc41   : > { %v4591_v49 = vld [vmem:[#allocation4] sm:$0xff]  ;;  %7540 = vset.pattern.permute.xlu1 %v7862_v17  ;;  %7539 = vset.pattern.permute.xlu0 %v7862_v17  ;;  %7541 = vrcp.f32 %v4737_v5  ;;  %v4592_v48 = vld [vmem:[#allocation4 + $0x8] sm:$0xff]  ;;  %v4740_v19 = vld [vmem:[#allocation4 + $0x98] sm:$0xff] }
 0xc42   : > { %7543 = vrcp.f32 %v4591_v49  ;;  %v4593_v30 = vld [vmem:[#allocation4 + $0x10] sm:$0xff]  ;;  %v4594_v47 = vld [vmem:[#allocation4 + $0x18] sm:$0xff]  ;;  %v4741_v61 = vld [vmem:[#allocation4 + $0xa0] sm:$0xff] }
 0xc43   : > { %7545 = vrcp.f32 %v4738_v25  ;;  %v4742_v21 = vld [vmem:[#allocation4 + $0xa8] sm:$0xff]  ;;  %v4595_v28 = vld [vmem:[#allocation4 + $0x20] sm:$0xff]  ;;  %v4743_v24 = vld [vmem:[#allocation4 + $0xb0] sm:$0xff] }
 0xc44   : > { %7547 = vrcp.f32 %v4592_v48  ;;  %v4596_v50 = vld [vmem:[#allocation4 + $0x28] sm:$0xff]  ;;  %v4744_v11 = vld [vmem:[#allocation4 + $0xb8] sm:$0xff]  ;;  %v4881_v2 = vld [vmem:[#allocation10 + $0x10] sm:$0xff] }
 0xc45   : > { %7549 = vrcp.f32 %v4739_v38  ;;  %v4882_v27 = vld [vmem:[#allocation10 + $0x18] sm:$0xff]  ;;  %v4736_v29 = vld [vmem:[#allocation10 + $0x8] sm:$0xff]  ;;  %v4735_v14 = vld [vmem:[#allocation10] sm:$0xff] }
 0xc46   : > { %7551 = vrcp.f32 %v4740_v19  ;;  %6962 = vmatprep.subr.mxu0 %v4882_v27  ;;  %6990 = vmatprep.subr.mxu1 %v4736_v29  ;;  %v4597_v13 = vld [vmem:[#allocation4 + $0x30] sm:$0xff]  ;;  %v4598_v22 = vld [vmem:[#allocation4 + $0x38] sm:$0xff]  ;;  %v4745_v56 = vld [vmem:[#allocation4 + $0xc0] sm:$0xff] }
 0xc47   : > { %7553 = vrcp.f32 %v4593_v30  ;;  %6963 = vmatpush3.msra.mxu0 %v4882_v27  ;;  %6991 = vmatpush3.msra.mxu1 %v4736_v29  ;;  %v4746_v60 = vld [vmem:[#allocation4 + $0xc8] sm:$0xff]  ;;  %v4599_v52 = vld [vmem:[#allocation4 + $0x40] sm:$0xff]  ;;  %v4747_v33 = vld [vmem:[#allocation4 + $0xd0] sm:$0xff] }
 0xc48   : > { %7555 = vrcp.f32 %v4594_v47  ;;  %6964 = vmatprep.subr.mxu0 %v4881_v2  ;;  %6992 = vmatprep.subr.mxu1 %v4735_v14  ;;  %v4600_v1 = vld [vmem:[#allocation4 + $0x48] sm:$0xff]  ;;  %v4748_v45 = vld [vmem:[#allocation4 + $0xd8] sm:$0xff]  ;;  %v4601_v26 = vld [vmem:[#allocation4 + $0x50] sm:$0xff] }
 0xc49   : > { %7557 = vrcp.f32 %v4741_v61  ;;  %6965 = vmatpush3.msra.mxu0 %v4881_v2  ;;  %6993 = vmatpush3.msra.mxu1 %v4735_v14  ;;  %v4602_v39 = vld [vmem:[#allocation4 + $0x58] sm:$0xff]  ;;  %v4749_v53 = vld [vmem:[#allocation4 + $0xe0] sm:$0xff]  ;;  %v4750_v18 = vld [vmem:[#allocation4 + $0xe8] sm:$0xff] }
 0xc4a   : > { %7559 = vrcp.f32 %v4742_v21  ;;  %v4603_v58 = vld [vmem:[#allocation4 + $0x60] sm:$0xff]  ;;  %v4604_v0 = vld [vmem:[#allocation4 + $0x68] sm:$0xff]  ;;  %v4751_v40 = vld [vmem:[#allocation4 + $0xf0] sm:$0xff] }
 0xc4b   : > { %7561 = vrcp.f32 %v4595_v28  ;;  %v4752_v34 = vld [vmem:[#allocation4 + $0xf8] sm:$0xff]  ;;  %v4605_v15 = vld [vmem:[#allocation4 + $0x70] sm:$0xff]  ;;  %v5269_v55 = vld [vmem:[#allocation4 + $0x100] sm:$0xff] }
 0xc4c   : > { %7563 = vrcp.f32 %v4596_v50  ;;  %v4606_v35 = vld [vmem:[#allocation4 + $0x78] sm:$0xff]  ;;  %v5270_v5 = vld [vmem:[#allocation4 + $0x108] sm:$0xff]  ;;  %v5624_v25 = vld [vmem:[#allocation4 + $0x180] sm:$0xff] }
 0xc4d   : > { %7565 = vrcp.f32 %v4743_v24  ;;  %v5625_v48 = vld [vmem:[#allocation4 + $0x188] sm:$0xff]  ;;  %v5271_v19 = vld [vmem:[#allocation4 + $0x110] sm:$0xff]  ;;  %v5272_v47 = vld [vmem:[#allocation4 + $0x118] sm:$0xff] }
 0xc4e   : > { %v7542_v62 = vpop.eup %7541  ;;  %7567 = vrcp.f32 %v4744_v11  ;;  %v5626_v21 = vld [vmem:[#allocation4 + $0x190] sm:$0xff]  ;;  %v10863_v24 = vld [vmem:[#allocation10 + $0x38] sm:$0xff]  ;;  %v5628_v11 = vld [vmem:[#allocation4 + $0x1a0] sm:$0xff] }
 0xc4f   : > { %v7544_v6 = vpop.eup %7543  ;;  %4787 = vperm.xlu0 %7539, %v7542_v62   ;;  %7569 = vrcp.f32 %v4597_v13  ;;  %7046 = vmatprep.subr.mxu1 %v10863_v24  ;;  %v5629_v29 = vld [vmem:[#allocation4 + $0x1a8] sm:$0xff]  ;;  %v5275_v14 = vld [vmem:[#allocation4 + $0x130] sm:$0xff]  ;;  %v5276_v13 = vld [vmem:[#allocation4 + $0x138] sm:$0xff] }
 0xc50   : > { %v7546_v63 = vpop.eup %7545  ;;  %4641 = vperm.xlu1 %7540, %v7544_v6   ;;  %7571 = vrcp.f32 %v4598_v22  ;;  %v5627_v6 = vld [vmem:[#allocation4 + $0x198] sm:$0xff]  ;;  %v5630_v22 = vld [vmem:[#allocation4 + $0x1b0] sm:$0xff] }
 0xc51   : > { %v7548_v7 = vpop.eup %7547  ;;  %7573 = vrcp.f32 %v4745_v56  ;;  %v5631_v56 = vld [vmem:[#allocation4 + $0x1b8] sm:$0xff] }
 0xc52   : > { %v7550_v10 = vpop.eup %7549  ;;  %7575 = vrcp.f32 %v4746_v60  ;;  %v5277_v60 = vld [vmem:[#allocation4 + $0x140] sm:$0xff] }
 0xc53   : > { %4792 = vperm.xlu0 %7539, %v7546_v63   ;;  %v7552_v12 = vpop.eup %7551  ;;  %7577 = vrcp.f32 %v4599_v52  ;;  %v10860_v63 = vld [vmem:[#allocation10 + $0x28] sm:$0xff] }
 0xc54   : > { %4646 = vperm.xlu1 %7540, %v7548_v7   ;;  %v7554_v46 = vpop.eup %7553  ;;  %7579 = vrcp.f32 %v4600_v1  ;;  %7018 = vmatprep.subr.mxu0 %v10860_v63  ;;  %v5273_v7 = vld [vmem:[#allocation4 + $0x120] sm:$0xff]  ;;  %v5278_v52 = vld [vmem:[#allocation4 + $0x148] sm:$0xff] }
 0xc55   : > { %v7556_v57 = vpop.eup %7555  ;;  %7581 = vrcp.f32 %v4747_v33  ;;  %v5632_v1 = vld [vmem:[#allocation4 + $0x1c0] sm:$0xff]  ;;  %v5633_v33 = vld [vmem:[#allocation4 + $0x1c8] sm:$0xff] }
 0xc56   : > { %v7558_v3 = vpop.eup %7557  ;;  %7583 = vrcp.f32 %v4748_v45  ;;  %v5279_v45 = vld [vmem:[#allocation4 + $0x150] sm:$0xff] }
 0xc57   : > { %4797 = vperm.xlu0 %7539, %v7550_v10   ;;  %v7560_v43 = vpop.eup %7559  ;;  %7585 = vrcp.f32 %v4601_v26  ;;  %v5274_v10 = vld [vmem:[#allocation4 + $0x128] sm:$0xff]  ;;  %v5280_v26 = vld [vmem:[#allocation4 + $0x158] sm:$0xff] }
 0xc58   : > { %4802 = vperm.xlu1 %7540, %v7552_v12   ;;  %v7562_v59 = vpop.eup %7561  ;;  %7587 = vrcp.f32 %v4602_v39  ;;  %v5634_v39 = vld [vmem:[#allocation4 + $0x1d0] sm:$0xff] }
 0xc59   : > { %v7564_v44 = vpop.eup %7563  ;;  %7589 = vrcp.f32 %v4749_v53  ;;  %v5635_v53 = vld [vmem:[#allocation4 + $0x1d8] sm:$0xff] }
 0xc5a   : > { %v7566_v9 = vpop.eup %7565  ;;  %7591 = vrcp.f32 %v4750_v18  ;;  %v5281_v18 = vld [vmem:[#allocation4 + $0x160] sm:$0xff] }
 0xc5b   : > { %4651 = vperm.xlu0 %7539, %v7554_v46   ;;  %v7568_v8 = vpop.eup %7567  ;;  %7593 = vrcp.f32 %v4603_v58  ;;  %v5282_v58 = vld [vmem:[#allocation4 + $0x168] sm:$0xff] }
 0xc5c   : > { %4656 = vperm.xlu1 %7540, %v7556_v57   ;;  %v7570_v4 = vpop.eup %7569  ;;  %7595 = vrcp.f32 %v4604_v0  ;;  %v5636_v0 = vld [vmem:[#allocation4 + $0x1e0] sm:$0xff] }
 0xc5d   : > { %v7572_v32 = vpop.eup %7571  ;;  %7597 = vrcp.f32 %v4751_v40  ;;  %v5637_v40 = vld [vmem:[#allocation4 + $0x1e8] sm:$0xff] }
 0xc5e   : > { %v7574_v31 = vpop.eup %7573  ;;  %7599 = vrcp.f32 %v4752_v34  ;;  %v5283_v34 = vld [vmem:[#allocation4 + $0x170] sm:$0xff] }
 0xc5f   : > { %4807 = vperm.xlu0 %7539, %v7558_v3   ;;  %v7576_v20 = vpop.eup %7575  ;;  %7601 = vrcp.f32 %v4605_v15  ;;  %v5284_v15 = vld [vmem:[#allocation4 + $0x178] sm:$0xff] }
 0xc60   : > { %4812 = vperm.xlu1 %7540, %v7560_v43   ;;  %v7578_v16 = vpop.eup %7577  ;;  %7603 = vrcp.f32 %v4606_v35  ;;  %v5638_v35 = vld [vmem:[#allocation4 + $0x1f0] sm:$0xff] }
 0xc61   : > { %v7580_v42 = vpop.eup %7579  ;;  %7605 = vrcp.f32 %v5269_v55  ;;  %v5639_v55 = vld [vmem:[#allocation4 + $0x1f8] sm:$0xff] }
 0xc62   : > { %v7582_v23 = vpop.eup %7581  ;;  %7607 = vrcp.f32 %v5270_v5 }
 0xc63   : > { %4661 = vperm.xlu0 %7539, %v7562_v59   ;;  %v7584_v41 = vpop.eup %7583  ;;  %7609 = vrcp.f32 %v5624_v25 }
 0xc64   : > { %4666 = vperm.xlu1 %7540, %v7564_v44   ;;  %v7586_v51 = vpop.eup %7585  ;;  %7611 = vrcp.f32 %v5625_v48 }
 0xc65   : > { %v7588_v36 = vpop.eup %7587  ;;  %7613 = vrcp.f32 %v5271_v19  ;;  %v4769_v19 = vld [vmem:[#allocation5 + $0x80] sm:$0xff] }
 0xc66   : > { %v7590_v54 = vpop.eup %7589  ;;  %7615 = vrcp.f32 %v5272_v47  ;;  %v4623_v47 = vld [vmem:[#allocation5] sm:$0xff] }
 0xc67   : > { %4817 = vperm.xlu0 %7539, %v7566_v9   ;;  %v7592_v37 = vpop.eup %7591  ;;  %7617 = vrcp.f32 %v5626_v21 }
 0xc68   : > { %4822 = vperm.xlu1 %7540, %v7568_v8   ;;  %v7594_v49 = vpop.eup %7593  ;;  %7619 = vrcp.f32 %v5627_v6  ;;  %v4770_v6 = vld [vmem:[#allocation5 + $0x88] sm:$0xff] }
 0xc69   : > { %v7596_v17 = vpop.eup %7595  ;;  %7621 = vrcp.f32 %v5273_v7  ;;  %v4624_v7 = vld [vmem:[#allocation5 + $0x8] sm:$0xff] }
 0xc6a   : > { %v7598_v38 = vpop.eup %7597  ;;  %7623 = vrcp.f32 %v5274_v10 }
 0xc6b   : > { %4671 = vperm.xlu0 %7539, %v7570_v4   ;;  %v7600_v30 = vpop.eup %7599  ;;  %7625 = vrcp.f32 %v5628_v11 }
 0xc6c   : > { %4676 = vperm.xlu1 %7540, %v7572_v32   ;;  %v7602_v61 = vpop.eup %7601  ;;  %7627 = vrcp.f32 %v5629_v29  ;;  %v5413_v29 = vld [vmem:[#allocation10 + $0x20] sm:$0xff] }
 0xc6d   : > { %v7604_v62 = vpop.eup %7603  ;;  %7629 = vrcp.f32 %v5275_v14  ;;  %v5768_v14 = vld [vmem:[#allocation10 + $0x30] sm:$0xff] }
 0xc6e   : > { %v7606_v28 = vpop.eup %7605  ;;  %7631 = vrcp.f32 %v5276_v13 }
 0xc6f   : > { %4827 = vperm.xlu0 %7539, %v7574_v31   ;;  %v7608_v50 = vpop.eup %7607  ;;  %7633 = vrcp.f32 %v5630_v22 }
 0xc70   : > { %4832 = vperm.xlu1 %7540, %v7576_v20   ;;  %v7610_v12 = vpop.eup %7609  ;;  %7635 = vrcp.f32 %v5631_v56  ;;  %v4626_v56 = vld [vmem:[#allocation5 + $0x18] sm:$0xff] }
 0xc71   : > { %v7612_v27 = vpop.eup %7611  ;;  %7637 = vrcp.f32 %v5277_v60 }
 0xc72   : > { %v7614_v2 = vpop.eup %7613  ;;  %7639 = vrcp.f32 %v5278_v52 }
 0xc73   : > { %4681 = vperm.xlu0 %7539, %v7578_v16   ;;  %v7616_v46 = vpop.eup %7615  ;;  %7641 = vrcp.f32 %v5632_v1 }
 0xc74   : > { %4686 = vperm.xlu1 %7540, %v7580_v42   ;;  %v7618_v57 = vpop.eup %7617  ;;  %7643 = vrcp.f32 %v5633_v33 }
 0xc75   : > { %v7620_v3 = vpop.eup %7619  ;;  %7645 = vrcp.f32 %v5279_v45  ;;  %v4628_v45 = vld [vmem:[#allocation5 + $0x28] sm:$0xff] }
 0xc76   : > { %v7622_v43 = vpop.eup %7621  ;;  %7647 = vrcp.f32 %v5280_v26 }
 0xc77   : > { %4837 = vperm.xlu0 %7539, %v7582_v23   ;;  %v7624_v59 = vpop.eup %7623  ;;  %7649 = vrcp.f32 %v5634_v39 }
 0xc78   : > { %4842 = vperm.xlu1 %7540, %v7584_v41   ;;  %v7626_v44 = vpop.eup %7625  ;;  %7651 = vrcp.f32 %v5635_v53  ;;  %v4776_v53 = vld [vmem:[#allocation5 + $0xb8] sm:$0xff] }
 0xc79   : > { %v7628_v9 = vpop.eup %7627  ;;  %7653 = vrcp.f32 %v5281_v18 }
 0xc7a   : > { %v7630_v8 = vpop.eup %7629  ;;  %7655 = vrcp.f32 %v5282_v58 }
 0xc7b   : > { %4691 = vperm.xlu0 %7539, %v7586_v51   ;;  %v7632_v4 = vpop.eup %7631  ;;  %7657 = vrcp.f32 %v5636_v0  ;;  %v4630_v0 = vld [vmem:[#allocation5 + $0x38] sm:$0xff] }
 0xc7c   : > { %4696 = vperm.xlu1 %7540, %v7588_v36   ;;  %v7634_v32 = vpop.eup %7633  ;;  %7659 = vrcp.f32 %v5637_v40 }
 0xc7d   : > { %v7636_v31 = vpop.eup %7635  ;;  %7661 = vrcp.f32 %v5283_v34 }
 0xc7e   : > { %v7638_v20 = vpop.eup %7637  ;;  %7663 = vrcp.f32 %v5284_v15  ;;  %v4778_v15 = vld [vmem:[#allocation5 + $0xc8] sm:$0xff] }
 0xc7f   : > { %4847 = vperm.xlu0 %7539, %v7590_v54   ;;  %v7640_v16 = vpop.eup %7639  ;;  %7665 = vrcp.f32 %v5638_v35 }
 0xc80   : > { %4852 = vperm.xlu1 %7540, %v7592_v37   ;;  %v7642_v42 = vpop.eup %7641  ;;  %7667 = vrcp.f32 %v5639_v55 }
 0xc81   : > { %v7644_v23 = vpop.eup %7643 }
 0xc82   : > { %v7646_v41 = vpop.eup %7645 }
 0xc83   : > { %4701 = vperm.xlu0 %7539, %v7594_v49   ;;  %v7648_v51 = vpop.eup %7647 }
 0xc84   : > { %4706 = vperm.xlu1 %7540, %v7596_v17   ;;  %v7650_v36 = vpop.eup %7649 }
 0xc85   : > { %v7652_v54 = vpop.eup %7651 }
 0xc86   : > { %v7654_v37 = vpop.eup %7653 }
 0xc87   : > { %4857 = vperm.xlu0 %7539, %v7598_v38   ;;  %v7656_v5 = vpop.eup %7655 }
 0xc88   : > { %4862 = vperm.xlu1 %7540, %v7600_v30   ;;  %v7658_v49 = vpop.eup %7657 }
 0xc89   : > { %v7660_v25 = vpop.eup %7659 }
 0xc8a   : > { %v7662_v17 = vpop.eup %7661 }
 0xc8b   : > { %4711 = vperm.xlu0 %7539, %v7602_v61   ;;  %v7664_v48 = vpop.eup %7663 }
 0xc8c   : > { %4716 = vperm.xlu1 %7540, %v7604_v62   ;;  %v7666_v38 = vpop.eup %7665 }
 0xc8d   : > { %v7668_v30 = vpop.eup %7667 }
 0xc8f   : > { %5319 = vperm.xlu0 %7539, %v7606_v28  }
 0xc90   : > { %5324 = vperm.xlu1 %7540, %v7608_v50  }
 0xc93   : > { %5674 = vperm.xlu0 %7539, %v7610_v12  }
 0xc94   : > { %5679 = vperm.xlu1 %7540, %v7612_v27   ;;  %v4771_v27 = vld [vmem:[#allocation5 + $0x90] sm:$0xff] }
 0xc97   : > { %5329 = vperm.xlu0 %7539, %v7614_v2   ;;  %v4772_v2 = vld [vmem:[#allocation5 + $0x98] sm:$0xff] }
 0xc98   : > { %5334 = vperm.xlu1 %7540, %v7616_v46  }
 0xc9b   : > { %5684 = vperm.xlu0 %7539, %v7618_v57  }
 0xc9c   : > { %5689 = vperm.xlu1 %7540, %v7620_v3   ;;  %v4625_v3 = vld [vmem:[#allocation5 + $0x10] sm:$0xff] }
 0xc9f   : > { %5339 = vperm.xlu0 %7539, %v7622_v43  }
 0xca0   : > { %5344 = vperm.xlu1 %7540, %v7624_v59  }
 0xca3   : > { %5694 = vperm.xlu0 %7539, %v7626_v44   ;;  %v4774_v44 = vld [vmem:[#allocation5 + $0xa8] sm:$0xff] }
 0xca4   : > { %5699 = vperm.xlu1 %7540, %v7628_v9  }
 0xca7   : > { %5349 = vperm.xlu0 %7539, %v7630_v8   ;;  %v4627_v8 = vld [vmem:[#allocation5 + $0x20] sm:$0xff] }
 0xca8   : > { %5354 = vperm.xlu1 %7540, %v7632_v4  }
 0xcab   : > { %5704 = vperm.xlu0 %7539, %v7634_v32  }
 0xcac   : > { %5709 = vperm.xlu1 %7540, %v7636_v31   ;;  %v4775_v31 = vld [vmem:[#allocation5 + $0xb0] sm:$0xff] }
 0xcaf   : > { %5359 = vperm.xlu0 %7539, %v7638_v20  }
 0xcb0   : > { %5364 = vperm.xlu1 %7540, %v7640_v16  }
 0xcb3   : > { %5714 = vperm.xlu0 %7539, %v7642_v42   ;;  %v4629_v42 = vld [vmem:[#allocation5 + $0x30] sm:$0xff] }
 0xcb4   : > { %5719 = vperm.xlu1 %7540, %v7644_v23  }
 0xcb7   : > { %5369 = vperm.xlu0 %7539, %v7646_v41  }
 0xcb8   : > { %5374 = vperm.xlu1 %7540, %v7648_v51   ;;  %v4777_v51 = vld [vmem:[#allocation5 + $0xc0] sm:$0xff] }
 0xcbb   : > { %5724 = vperm.xlu0 %7539, %v7650_v36  }
 0xcbc   : > { %5729 = vperm.xlu1 %7540, %v7652_v54  }
 0xcbf   : > { %5379 = vperm.xlu0 %7539, %v7654_v37   ;;  %v4631_v37 = vld [vmem:[#allocation5 + $0x40] sm:$0xff] }
 0xcc0   : > { %5384 = vperm.xlu1 %7540, %v7656_v5   ;;  %v4632_v5 = vld [vmem:[#allocation5 + $0x48] sm:$0xff] }
 0xcc3   : > { %5734 = vperm.xlu0 %7539, %v7658_v49  }
 0xcc4   : > { %5739 = vperm.xlu1 %7540, %v7660_v25  }
 0xcc7   : > { %5389 = vperm.xlu0 %7539, %v7662_v17  }
 0xcc8   : > { %5394 = vperm.xlu1 %7540, %v7664_v48  }
 0xcca   : > { %v4788_v61 = vpop.permute.xlu0 %4787 }
 0xccb   : > { %v4642_v21 = vpop.permute.xlu1 %4641  ;;  %5744 = vperm.xlu0 %7539, %v7666_v38   ;;  %v4865_v62 = vmul.f32 %v4788_v61, %v4769_v19  ;;  %v4779_v38 = vld [vmem:[#allocation5 + $0xd0] sm:$0xff]  ;;  %v4780_v19 = vld [vmem:[#allocation5 + $0xd8] sm:$0xff] }
 0xccc   : > { %5749 = vperm.xlu1 %7540, %v7668_v30   ;;  %v4719_v28 = vmul.f32 %v4642_v21, %v4623_v47 }
 0xccd   : > { %6966 = vmatprep.mubr.msk.f32.mxu0 %vm1312_vm3, %v4865_v62  ;;  %v4633_v62 = vld [vmem:[#allocation5 + $0x50] sm:$0xff] }
 0xcce   : > { %v4793_v50 = vpop.permute.xlu0 %4792  ;;  %6994 = vmatprep.mubr.msk.f32.mxu1 %vm1312_vm3, %v4719_v28 }
 0xccf   : > { %v4866_v10 = vmul.f32 %v4793_v50, %v4770_v6  ;;  %v4647_v12 = vpop.permute.xlu1 %4646  ;;  %v4634_v6 = vld [vmem:[#allocation5 + $0x58] sm:$0xff] }
 0xcd0   : > { %v4720_v11 = vmul.f32 %v4647_v12, %v4624_v7  ;;  %v4781_v12 = vld [vmem:[#allocation5 + $0xe0] sm:$0xff] }
 0xcd1   : > { %6967 = vmatmul.mubr.msk.f32.vlgmr.msra.gmra.mxu0 %vm1312_vm3, %v4866_v10 }
 0xcd2   : > { %6995 = vmatmul.mubr.msk.f32.vlgmr.msra.gmra.mxu1 %vm1312_vm3, %v4720_v11  ;;  %v4798_v46 = vpop.permute.xlu0 %4797  ;;  %7019 = vmatpush3.msra.mxu0 %v10860_v63  ;;  %v4773_v63 = vld [vmem:[#allocation5 + $0xa0] sm:$0xff]  ;;  %v4782_v11 = vld [vmem:[#allocation5 + $0xe8] sm:$0xff] }
 0xcd3   : > { %v4867_v13 = vmul.f32 %v4798_v46, %v4771_v27  ;;  %v4803_v57 = vpop.permute.xlu1 %4802  ;;  %7020 = vmatprep.subr.mxu0 %v5413_v29  ;;  %7047 = vmatpush3.msra.mxu1 %v10863_v24  ;;  %v4635_v46 = vld [vmem:[#allocation5 + $0x60] sm:$0xff] }
 0xcd4   : > { %v4868_v22 = vmul.f32 %v4803_v57, %v4772_v2  ;;  %7021 = vmatpush3.msra.mxu0 %v5413_v29  ;;  %7048 = vmatprep.subr.mxu1 %v5768_v14 }
 0xcd5   : > { %6969 = vmatprep.mubr.msk.f32.mxu0 %vm1312_vm3, %v4867_v13  ;;  %7049 = vmatpush3.msra.mxu1 %v5768_v14  ;;  %v4636_v13 = vld [vmem:[#allocation5 + $0x68] sm:$0xff] }
 0xcd6   : > { %v4652_v43 = vpop.permute.xlu0 %4651  ;;  %6970 = vmatmul.mubr.msk.f32.gmra.mxu0 %vm1312_vm3, %v4868_v22 }
 0xcd7   : > { %v4721_v60 = vmul.f32 %v4652_v43, %v4625_v3  ;;  %v4657_v59 = vpop.permute.xlu1 %4656  ;;  %v4783_v43 = vld [vmem:[#allocation5 + $0xf0] sm:$0xff] }
 0xcd8   : > { %v4722_v52 = vmul.f32 %v4657_v59, %v4626_v56 }
 0xcd9   : > { %6997 = vmatprep.mubr.msk.f32.mxu1 %vm1312_vm3, %v4721_v60  ;;  %v4784_v60 = vld [vmem:[#allocation5 + $0xf8] sm:$0xff] }
 0xcda   : > { %v4808_v1 = vpop.permute.xlu0 %4807  ;;  %6998 = vmatmul.mubr.msk.f32.gmra.mxu1 %vm1312_vm3, %v4722_v52 }
 0xcdb   : > { %v4869_v24 = vmul.f32 %v4808_v1, %v4773_v63  ;;  %v4813_v9 = vpop.permute.xlu1 %4812  ;;  %v4637_v1 = vld [vmem:[#allocation5 + $0x70] sm:$0xff] }
 0xcdc   : > { %v4870_v33 = vmul.f32 %v4813_v9, %v4774_v44 }
 0xcdd   : > { %6972 = vmatprep.mubr.msk.f32.mxu0 %vm1312_vm3, %v4869_v24  ;;  %v4638_v24 = vld [vmem:[#allocation5 + $0x78] sm:$0xff] }
 0xcde   : > { %v4662_v4 = vpop.permute.xlu0 %4661  ;;  %6973 = vmatmul.mubr.msk.f32.gmra.mxu0 %vm1312_vm3, %v4870_v33 }
 0xcdf   : > { %v4723_v26 = vmul.f32 %v4662_v4, %v4627_v8  ;;  %v4667_v32 = vpop.permute.xlu1 %4666  ;;  %v5301_v4 = vld [vmem:[#allocation5 + $0x100] sm:$0xff] }
 0xce0   : > { %v4724_v39 = vmul.f32 %v4667_v32, %v4628_v45 }
 0xce1   : > { %7000 = vmatprep.mubr.msk.f32.mxu1 %vm1312_vm3, %v4723_v26  ;;  %v5302_v26 = vld [vmem:[#allocation5 + $0x108] sm:$0xff] }
 0xce2   : > { %v4818_v20 = vpop.permute.xlu0 %4817  ;;  %7001 = vmatmul.mubr.msk.f32.gmra.mxu1 %vm1312_vm3, %v4724_v39 }
 0xce3   : > { %v4871_v18 = vmul.f32 %v4818_v20, %v4775_v31  ;;  %v4823_v16 = vpop.permute.xlu1 %4822  ;;  %v5656_v20 = vld [vmem:[#allocation5 + $0x180] sm:$0xff] }
 0xce4   : > { %v4872_v58 = vmul.f32 %v4823_v16, %v4776_v53 }
 0xce5   : > { %6975 = vmatprep.mubr.msk.f32.mxu0 %vm1312_vm3, %v4871_v18  ;;  %v5657_v18 = vld [vmem:[#allocation5 + $0x188] sm:$0xff] }
 0xce6   : > { %v4672_v23 = vpop.permute.xlu0 %4671  ;;  %6976 = vmatmul.mubr.msk.f32.gmra.mxu0 %vm1312_vm3, %v4872_v58 }
 0xce7   : > { %v4725_v40 = vmul.f32 %v4672_v23, %v4629_v42  ;;  %v4677_v41 = vpop.permute.xlu1 %4676  ;;  %v5303_v23 = vld [vmem:[#allocation5 + $0x110] sm:$0xff] }
 0xce8   : > { %v4726_v34 = vmul.f32 %v4677_v41, %v4630_v0 }
 0xce9   : > { %7003 = vmatprep.mubr.msk.f32.mxu1 %vm1312_vm3, %v4725_v40  ;;  %v5304_v40 = vld [vmem:[#allocation5 + $0x118] sm:$0xff] }
 0xcea   : > { %v4828_v36 = vpop.permute.xlu0 %4827  ;;  %7004 = vmatmul.mubr.msk.f32.gmra.mxu1 %vm1312_vm3, %v4726_v34 }
 0xceb   : > { %v4873_v35 = vmul.f32 %v4828_v36, %v4777_v51  ;;  %v4833_v54 = vpop.permute.xlu1 %4832  ;;  %v5658_v36 = vld [vmem:[#allocation5 + $0x190] sm:$0xff] }
 0xcec   : > { %v4874_v55 = vmul.f32 %v4833_v54, %v4778_v15 }
 0xced   : > { %6978 = vmatprep.mubr.msk.f32.mxu0 %vm1312_vm3, %v4873_v35  ;;  %v5659_v35 = vld [vmem:[#allocation5 + $0x198] sm:$0xff] }
 0xcee   : > { %v4682_v49 = vpop.permute.xlu0 %4681  ;;  %6979 = vmatmul.mubr.msk.f32.gmra.mxu0 %vm1312_vm3, %v4874_v55 }
 0xcef   : > { %v4727_v25 = vmul.f32 %v4682_v49, %v4631_v37  ;;  %v4687_v17 = vpop.permute.xlu1 %4686  ;;  %v5305_v49 = vld [vmem:[#allocation5 + $0x120] sm:$0xff] }
 0xcf0   : > { %v4728_v48 = vmul.f32 %v4687_v17, %v4632_v5 }
 0xcf1   : > { %7006 = vmatprep.mubr.msk.f32.mxu1 %vm1312_vm3, %v4727_v25  ;;  %v5306_v25 = vld [vmem:[#allocation5 + $0x128] sm:$0xff] }
 0xcf2   : > { %v4838_v30 = vpop.permute.xlu0 %4837  ;;  %7007 = vmatmul.mubr.msk.f32.gmra.mxu1 %vm1312_vm3, %v4728_v48 }
 0xcf3   : > { %v4875_v47 = vmul.f32 %v4838_v30, %v4779_v38  ;;  %v4843_v61 = vpop.permute.xlu1 %4842  ;;  %v5660_v30 = vld [vmem:[#allocation5 + $0x1a0] sm:$0xff] }
 0xcf4   : > { %v4876_v21 = vmul.f32 %v4843_v61, %v4780_v19 }
 0xcf5   : > { %6981 = vmatprep.mubr.msk.f32.mxu0 %vm1312_vm3, %v4875_v47  ;;  %v5661_v47 = vld [vmem:[#allocation5 + $0x1a8] sm:$0xff] }
 0xcf6   : > { %v4692_v28 = vpop.permute.xlu0 %4691  ;;  %6982 = vmatmul.mubr.msk.f32.gmra.mxu0 %vm1312_vm3, %v4876_v21 }
 0xcf7   : > { %v4729_v7 = vmul.f32 %v4692_v28, %v4633_v62  ;;  %v4697_v50 = vpop.permute.xlu1 %4696  ;;  %v5307_v28 = vld [vmem:[#allocation5 + $0x130] sm:$0xff] }
 0xcf8   : > { %v4730_v10 = vmul.f32 %v4697_v50, %v4634_v6 }
 0xcf9   : > { %7009 = vmatprep.mubr.msk.f32.mxu1 %vm1312_vm3, %v4729_v7  ;;  %v5308_v7 = vld [vmem:[#allocation5 + $0x138] sm:$0xff] }
 0xcfa   : > { %v4848_v27 = vpop.permute.xlu0 %4847  ;;  %7010 = vmatmul.mubr.msk.f32.gmra.mxu1 %vm1312_vm3, %v4730_v10 }
 0xcfb   : > { %v4877_v29 = vmul.f32 %v4848_v27, %v4781_v12  ;;  %v4853_v2 = vpop.permute.xlu1 %4852  ;;  %v5662_v27 = vld [vmem:[#allocation5 + $0x1b0] sm:$0xff] }
 0xcfc   : > { %v4878_v14 = vmul.f32 %v4853_v2, %v4782_v11 }
 0xcfd   : > { %6984 = vmatprep.mubr.msk.f32.mxu0 %vm1312_vm3, %v4877_v29  ;;  %v5663_v29 = vld [vmem:[#allocation5 + $0x1b8] sm:$0xff] }
 0xcfe   : > { %v4702_v57 = vpop.permute.xlu0 %4701  ;;  %6985 = vmatmul.mubr.msk.f32.gmra.mxu0 %vm1312_vm3, %v4878_v14 }
 0xcff   : > { %v4731_v22 = vmul.f32 %v4702_v57, %v4635_v46  ;;  %v4707_v3 = vpop.permute.xlu1 %4706  ;;  %v5309_v57 = vld [vmem:[#allocation5 + $0x140] sm:$0xff] }
 0xd00   : > { %v4732_v56 = vmul.f32 %v4707_v3, %v4636_v13 }
 0xd01   : > { %7012 = vmatprep.mubr.msk.f32.mxu1 %vm1312_vm3, %v4731_v22  ;;  %v5310_v22 = vld [vmem:[#allocation5 + $0x148] sm:$0xff] }
 0xd02   : > { %v4858_v59 = vpop.permute.xlu0 %4857  ;;  %7013 = vmatmul.mubr.msk.f32.gmra.mxu1 %vm1312_vm3, %v4732_v56 }
 0xd03   : > { %v4879_v52 = vmul.f32 %v4858_v59, %v4783_v43  ;;  %v4863_v63 = vpop.permute.xlu1 %4862  ;;  %v5664_v59 = vld [vmem:[#allocation5 + $0x1c0] sm:$0xff] }
 0xd04   : > { %v4880_v44 = vmul.f32 %v4863_v63, %v4784_v60 }
 0xd05   : > { %6987 = vmatprep.mubr.msk.f32.mxu0 %vm1312_vm3, %v4879_v52  ;;  %v5665_v52 = vld [vmem:[#allocation5 + $0x1c8] sm:$0xff] }
 0xd06   : > { %v4712_v9 = vpop.permute.xlu0 %4711  ;;  %6988 = vmatmul.mubr.msk.f32.gmra.mxu0 %vm1312_vm3, %v4880_v44 }
 0xd07   : > { %v4733_v33 = vmul.f32 %v4712_v9, %v4637_v1  ;;  %v4717_v8 = vpop.permute.xlu1 %4716  ;;  %v5311_v9 = vld [vmem:[#allocation5 + $0x150] sm:$0xff] }
 0xd08   : > { %v4734_v45 = vmul.f32 %v4717_v8, %v4638_v24 }
 0xd09   : > { %7015 = vmatprep.mubr.msk.f32.mxu1 %vm1312_vm3, %v4733_v33  ;;  %v5312_v33 = vld [vmem:[#allocation5 + $0x158] sm:$0xff] }
 0xd0a   : > { %v5320_v32 = vpop.permute.xlu0 %5319  ;;  %7016 = vmatmul.mubr.msk.f32.gmra.mxu1 %vm1312_vm3, %v4734_v45 }
 0xd0b   : > { %v5397_v39 = vmul.f32 %v5320_v32, %v5301_v4  ;;  %v5325_v31 = vpop.permute.xlu1 %5324  ;;  %v5666_v32 = vld [vmem:[#allocation5 + $0x1d0] sm:$0xff] }
 0xd0c   : > { %v5398_v53 = vmul.f32 %v5325_v31, %v5302_v26 }
 0xd0d   : > { %7022 = vmatprep.mubr.msk.f32.mxu0 %vm1312_vm3, %v5397_v39  ;;  %v5667_v39 = vld [vmem:[#allocation5 + $0x1d8] sm:$0xff] }
 0xd0e   : > { %v5675_v16 = vpop.permute.xlu0 %5674  ;;  %7023 = vmatmul.mubr.msk.f32.vlgmr.msra.gmra.mxu0 %vm1312_vm3, %v5398_v53 }
 0xd0f   : > { %v5752_v58 = vmul.f32 %v5675_v16, %v5656_v20  ;;  %v5680_v42 = vpop.permute.xlu1 %5679  ;;  %v5313_v16 = vld [vmem:[#allocation5 + $0x160] sm:$0xff] }
 0xd10   : > { %v5753_v0 = vmul.f32 %v5680_v42, %v5657_v18 }
 0xd11   : > { %7050 = vmatprep.mubr.msk.f32.mxu1 %vm1312_vm3, %v5752_v58  ;;  %v5314_v58 = vld [vmem:[#allocation5 + $0x168] sm:$0xff] }
 0xd12   : > { %v5330_v41 = vpop.permute.xlu0 %5329  ;;  %7051 = vmatmul.mubr.msk.f32.vlgmr.msra.gmra.mxu1 %vm1312_vm3, %v5753_v0 }
 0xd13   : > { %v5399_v34 = vmul.f32 %v5330_v41, %v5303_v23  ;;  %v5335_v51 = vpop.permute.xlu1 %5334  ;;  %v5668_v41 = vld [vmem:[#allocation5 + $0x1e0] sm:$0xff] }
 0xd14   : > { %v5400_v15 = vmul.f32 %v5335_v51, %v5304_v40 }
 0xd15   : > { %7025 = vmatprep.mubr.msk.f32.mxu0 %vm1312_vm3, %v5399_v34  ;;  %v5669_v34 = vld [vmem:[#allocation5 + $0x1e8] sm:$0xff] }
 0xd16   : > { %v5685_v54 = vpop.permute.xlu0 %5684  ;;  %7026 = vmatmul.mubr.msk.f32.gmra.mxu0 %vm1312_vm3, %v5400_v15 }
 0xd17   : > { %v5754_v55 = vmul.f32 %v5685_v54, %v5658_v36  ;;  %v5690_v37 = vpop.permute.xlu1 %5689  ;;  %v5315_v54 = vld [vmem:[#allocation5 + $0x170] sm:$0xff] }
 0xd18   : > { %v5755_v5 = vmul.f32 %v5690_v37, %v5659_v35 }
 0xd19   : > { %7053 = vmatprep.mubr.msk.f32.mxu1 %vm1312_vm3, %v5754_v55  ;;  %v5316_v55 = vld [vmem:[#allocation5 + $0x178] sm:$0xff] }
 0xd1a   : > { %v5340_v17 = vpop.permute.xlu0 %5339  ;;  %7054 = vmatmul.mubr.msk.f32.gmra.mxu1 %vm1312_vm3, %v5755_v5 }
 0xd1b   : > { %v5401_v48 = vmul.f32 %v5340_v17, %v5305_v49  ;;  %v5345_v38 = vpop.permute.xlu1 %5344  ;;  %v5670_v17 = vld [vmem:[#allocation5 + $0x1f0] sm:$0xff] }
 0xd1c   : > { %v5402_v19 = vmul.f32 %v5345_v38, %v5306_v25 }
 0xd1d   : > { %7028 = vmatprep.mubr.msk.f32.mxu0 %vm1312_vm3, %v5401_v48  ;;  %v5671_v48 = vld [vmem:[#allocation5 + $0x1f8] sm:$0xff] }
 0xd1e   : > { %v5695_v61 = vpop.permute.xlu0 %5694  ;;  %7029 = vmatmul.mubr.msk.f32.gmra.mxu0 %vm1312_vm3, %v5402_v19 }
 0xd1f   : > { %v5756_v21 = vmul.f32 %v5695_v61, %v5660_v30  ;;  %v5700_v62 = vpop.permute.xlu1 %5699 }
 0xd20   : > { %v5757_v6 = vmul.f32 %v5700_v62, %v5661_v47 }
 0xd21   : > { %7056 = vmatprep.mubr.msk.f32.mxu1 %vm1312_vm3, %v5756_v21 }
 0xd22   : > { %v5350_v50 = vpop.permute.xlu0 %5349  ;;  %7057 = vmatmul.mubr.msk.f32.gmra.mxu1 %vm1312_vm3, %v5757_v6 }
 0xd23   : > { %v5403_v10 = vmul.f32 %v5350_v50, %v5307_v28  ;;  %v5355_v12 = vpop.permute.xlu1 %5354 }
 0xd24   : > { %v5404_v11 = vmul.f32 %v5355_v12, %v5308_v7 }
 0xd25   : > { %7031 = vmatprep.mubr.msk.f32.mxu0 %vm1312_vm3, %v5403_v10 }
 0xd26   : > { %v5705_v2 = vpop.permute.xlu0 %5704  ;;  %7032 = vmatmul.mubr.msk.f32.gmra.mxu0 %vm1312_vm3, %v5404_v11 }
 0xd27   : > { %v5758_v14 = vmul.f32 %v5705_v2, %v5662_v27  ;;  %v5710_v46 = vpop.permute.xlu1 %5709 }
 0xd28   : > { %v5759_v13 = vmul.f32 %v5710_v46, %v5663_v29 }
 0xd29   : > { %7059 = vmatprep.mubr.msk.f32.mxu1 %vm1312_vm3, %v5758_v14 }
 0xd2a   : > { %v5360_v3 = vpop.permute.xlu0 %5359  ;;  %7060 = vmatmul.mubr.msk.f32.gmra.mxu1 %vm1312_vm3, %v5759_v13 }
 0xd2b   : > { %v5405_v56 = vmul.f32 %v5360_v3, %v5309_v57  ;;  %v5365_v43 = vpop.permute.xlu1 %5364 }
 0xd2c   : > { %v5406_v60 = vmul.f32 %v5365_v43, %v5310_v22 }
 0xd2d   : > { %7034 = vmatprep.mubr.msk.f32.mxu0 %vm1312_vm3, %v5405_v56 }
 0xd2e   : > { %v5715_v63 = vpop.permute.xlu0 %5714  ;;  %7035 = vmatmul.mubr.msk.f32.gmra.mxu0 %vm1312_vm3, %v5406_v60 }
 0xd2f   : > { %v5760_v44 = vmul.f32 %v5715_v63, %v5664_v59  ;;  %v5720_v1 = vpop.permute.xlu1 %5719 }
 0xd30   : > { %v5761_v24 = vmul.f32 %v5720_v1, %v5665_v52 }
 0xd31   : > { %7062 = vmatprep.mubr.msk.f32.mxu1 %vm1312_vm3, %v5760_v44 }
 0xd32   : > { %v5370_v8 = vpop.permute.xlu0 %5369  ;;  %7063 = vmatmul.mubr.msk.f32.gmra.mxu1 %vm1312_vm3, %v5761_v24 }
 0xd33   : > { %v5407_v45 = vmul.f32 %v5370_v8, %v5311_v9  ;;  %v5375_v4 = vpop.permute.xlu1 %5374 }
 0xd34   : > { %v5408_v26 = vmul.f32 %v5375_v4, %v5312_v33 }
 0xd35   : > { %7037 = vmatprep.mubr.msk.f32.mxu0 %vm1312_vm3, %v5407_v45 }
 0xd36   : > { %v5725_v31 = vpop.permute.xlu0 %5724  ;;  %7038 = vmatmul.mubr.msk.f32.gmra.mxu0 %vm1312_vm3, %v5408_v26 }
 0xd37   : > { %v5762_v53 = vmul.f32 %v5725_v31, %v5666_v32  ;;  %v5730_v20 = vpop.permute.xlu1 %5729 }
 0xd38   : > { %v5763_v18 = vmul.f32 %v5730_v20, %v5667_v39  ;;  %v10983_v20 = vld [vmem:[%s11686_s7] ss:$0 sm:$0xff] }
 0xd39   : > { %7065 = vmatprep.mubr.msk.f32.mxu1 %vm1312_vm3, %v5762_v53 }
 0xd3a   : > { %v5380_v42 = vpop.permute.xlu0 %5379  ;;  %7066 = vmatmul.mubr.msk.f32.gmra.mxu1 %vm1312_vm3, %v5763_v18  ;;  %v6021_v18 = vld [vmem:[%s8084_s14 + $0x8] sm:$0xff] }
 0xd3b   : > { %v5409_v0 = vmul.f32 %v5380_v42, %v5313_v16  ;;  %v5385_v23 = vpop.permute.xlu1 %5384  ;;  %v10986_v16 = vstv %s6036_s12 }
 0xd3c   : > { %v5410_v40 = vmul.f32 %v5385_v23, %v5314_v58 }
 0xd3d   : > { %7040 = vmatprep.mubr.msk.f32.mxu0 %vm1312_vm3, %v5409_v0  ;;  %v10988_v0 = vstv %s5979_s25 }
 0xd3e   : > { %v5735_v51 = vpop.permute.xlu0 %5734  ;;  %7041 = vmatmul.mubr.msk.f32.gmra.mxu0 %vm1312_vm3, %v5410_v40  ;;  %v6020_v40 = vld [vmem:[%s8084_s14] sm:$0xff] }
 0xd3f   : > { %v5764_v15 = vmul.f32 %v5735_v51, %v5668_v41  ;;  %v5740_v36 = vpop.permute.xlu1 %5739 }
 0xd40   : > { %v5765_v35 = vmul.f32 %v5740_v36, %v5669_v34  ;;  %v6039_v34 = vmul.f32 %v10986_v16, %v6021_v18 }
 0xd41   : > { %7068 = vmatprep.mubr.msk.f32.mxu1 %vm1312_vm3, %v5764_v15 }
 0xd42   : > { %v5390_v37 = vpop.permute.xlu0 %5389  ;;  %7069 = vmatmul.mubr.msk.f32.gmra.mxu1 %vm1312_vm3, %v5765_v35 }
 0xd43   : > { %v5411_v5 = vmul.f32 %v5390_v37, %v5315_v54  ;;  %v5395_v49 = vpop.permute.xlu1 %5394 }
 0xd44   : > { %v5412_v25 = vmul.f32 %v5395_v49, %v5316_v55  ;;  %v6038_v55 = vmul.f32 %v10986_v16, %v6020_v40 }
 0xd45   : > { %7043 = vmatprep.mubr.msk.f32.mxu0 %vm1312_vm3, %v5411_v5 }
 0xd46   : > { %v5745_v38 = vpop.permute.xlu0 %5744  ;;  %7044 = vmatmul.mubr.msk.f32.gmra.mxu0 %vm1312_vm3, %v5412_v25 }
 0xd47   : > { %v5766_v19 = vmul.f32 %v5745_v38, %v5670_v17  ;;  %v5750_v30 = vpop.permute.xlu1 %5749  ;;  %v6023_v38 = vld [vmem:[%s8084_s14 + $0x18] sm:$0xff] }
 0xd48   : > { %v5767_v47 = vmul.f32 %v5750_v30, %v5671_v48 }
 0xd49   : > { %7071 = vmatprep.mubr.msk.f32.mxu1 %vm1312_vm3, %v5766_v19 }
 0xd4a   : > { %7072 = vmatmul.mubr.msk.f32.gmra.mxu1 %vm1312_vm3, %v5767_v47 }
 0xd91   : > { %v6968_v61 = vpop.f32.mrf.mxu0 }
 0xd92   : > { %v6996_v62 = vpop.f32.mrf.mxu1 }
 0xd93   : > { %v4997_v21 = vpop.f32.mrf.mxu0  ;;  %v5196_v4 = vadd.f32 %v6996_v62, %v6968_v61 }
 0xd94   : > { %v5190_v28 = vpop.f32.mrf.mxu1 }
 0xd95   : > { %v5191_v39 = vadd.f32 %v5190_v28, %v4997_v21  ;;  %v6022_v21 = vld [vmem:[%s8084_s14 + $0x10] sm:$0xff] }
 0xd96   : > { %v6971_v6 = vpop.f32.mrf.mxu0 }
 0xd98   : > { %v5007_v7 = vpop.f32.mrf.mxu0 }
 0xd9a   : > { %v6999_v50 = vpop.f32.mrf.mxu1 }
 0xd9b   : > { %v5206_v36 = vadd.f32 %v6999_v50, %v6971_v6  ;;  %v6041_v6 = vmul.f32 %v10986_v16, %v6023_v38 }
 0xd9c   : > { %v5200_v12 = vpop.f32.mrf.mxu1 }
 0xd9d   : > { %v5201_v5 = vadd.f32 %v5200_v12, %v5007_v7 }
 0xd9e   : > { %v10932_v10 = vpop.f32.mrf.mxu0 }
 0xda0   : > { %v10934_v11 = vpop.f32.mrf.mxu0 }
 0xda2   : > { %v10936_v27 = vpop.f32.mrf.mxu1 }
 0xda3   : > { %v5216_v50 = vadd.f32 %v10936_v27, %v10932_v10 }
 0xda4   : > { %v10940_v2 = vpop.f32.mrf.mxu1 }
 0xda6   : > { %v10938_v29 = vpop.f32.mrf.mxu0 }
 0xda8   : > { %v10942_v14 = vpop.f32.mrf.mxu0 }
 0xdaa   : > { %v10944_v46 = vpop.f32.mrf.mxu1 }
 0xdac   : > { %v10948_v57 = vpop.f32.mrf.mxu1 }
 0xdae   : > { %v10946_v13 = vpop.f32.mrf.mxu0 }
 0xdb0   : > { %v10950_v22 = vpop.f32.mrf.mxu0 }
 0xdb2   : > { %v10952_v3 = vpop.f32.mrf.mxu1 }
 0xdb4   : > { %v10956_v43 = vpop.f32.mrf.mxu1 }
 0xdb6   : > { %v10954_v56 = vpop.f32.mrf.mxu0 }
 0xdb8   : > { %v10958_v60 = vpop.f32.mrf.mxu0 }
 0xdba   : > { %v10960_v59 = vpop.f32.mrf.mxu1 }
 0xdbc   : > { %v10964_v63 = vpop.f32.mrf.mxu1 }
 0xdbe   : > { %v10962_v52 = vpop.f32.mrf.mxu0 }
 0xdc0   : > { %v10966_v44 = vpop.f32.mrf.mxu0 }
 0xdc2   : > { %v10968_v1 = vpop.f32.mrf.mxu1 }
 0xdc4   : > { %v10972_v9 = vpop.f32.mrf.mxu1 }
 0xdc6   : > { %v10970_v24 = vpop.f32.mrf.mxu0 }
 0xdc8   : > { %v10974_v33 = vpop.f32.mrf.mxu0 }
 0xdca   : > { %v10976_v8 = vpop.f32.mrf.mxu1 }
 0xdcc   : > { %v10978_v26 = vpop.f32.mrf.mxu1 }
 0xdce   : > { %v7024_v45 = vpop.f32.mrf.mxu0 }
 0xdcf   : > { %v5609_v31 = vadd.f32 %v7024_v45, %v5196_v4  ;;  %v6040_v4 = vmul.f32 %v10986_v16, %v6022_v21  ;;  %v5236_v21 = vadd.f32 %v10952_v3, %v10946_v13 }
 0xdd0   : > { %v5529_v32 = vpop.f32.mrf.mxu0 }
 0xdd1   : > { %v5608_v58 = vadd.f32 %v5529_v32, %v5191_v39  ;;  %v5211_v39 = vadd.f32 %v10940_v2, %v10934_v11 }
 0xdd2   : > { %v7052_v53 = vpop.f32.mrf.mxu1 }
 0xdd3   : > { %v5964_v42 = vadd.f32 %v7052_v53, %v5609_v31 }
 0xdd4   : > { %v5884_v23 = vpop.f32.mrf.mxu1 }
 0xdd5   : > { %v5988_v41 = vadd.f32 %v10983_v20, %v5964_v42  ;;  %v5963_v51 = vadd.f32 %v5884_v23, %v5608_v58  ;;  %v6025_v42 = vld [vmem:[%s8084_s14 + $0x28] sm:$0xff] }
 0xdd6   : > { %v7027_v15 = vpop.f32.mrf.mxu0 }
 0xdd7   : > { %v6005_v35 = vmul.f32 %v10988_v0, %v5988_v41  ;;  %v5987_v54 = vadd.f32 %v10983_v20, %v5963_v51  ;;  %v5611_v17 = vadd.f32 %v7027_v15, %v5206_v36  ;;  %v6024_v41 = vld [vmem:[%s8084_s14 + $0x20] sm:$0xff]  ;;  %v6043_v51 = vmul.f32 %v10986_v16, %v6025_v42 }
 0xdd8   : > { %v5539_v37 = vpop.f32.mrf.mxu0  ;;  %v5226_v15 = vadd.f32 %v10944_v46, %v10938_v29 }
 0xdd9   : > { %v6055_v49 = vadd.f32 %v6039_v34, %v6005_v35  ;;  %v6004_v25 = vmul.f32 %v10988_v0, %v5987_v54  ;;  %v5610_v30 = vadd.f32 %v5539_v37, %v5201_v5  ;;  %v6042_v54 = vmul.f32 %v10986_v16, %v6024_v41 }
 0xdda   : > { %v7055_v48 = vpop.f32.mrf.mxu1  ;;  %v5221_v37 = vadd.f32 %v10948_v57, %v10942_v14 }
 0xddb   : > { %6071 = vst [vmem:[%s8086_s22 + $0x8] sm:$0xff] %v6055_v49  ;;  %v6054_v19 = vadd.f32 %v6038_v55, %v6004_v25  ;;  %v5966_v47 = vadd.f32 %v7055_v48, %v5611_v17  ;;  %v6027_v48 = vld [vmem:[%s8084_s14 + $0x38] sm:$0xff] }
 0xddc   : > { %v5894_v61 = vpop.f32.mrf.mxu1 }
 0xddd   : > { %6070 = vst [vmem:[%s8086_s22] sm:$0xff] %v6054_v19  ;;  %v5990_v62 = vadd.f32 %v10983_v20, %v5966_v47  ;;  %v5965_v28 = vadd.f32 %v5894_v61, %v5610_v30  ;;  %v6026_v30 = vld [vmem:[%s8084_s14 + $0x30] sm:$0xff]  ;;  %v6045_v61 = vmul.f32 %v10986_v16, %v6027_v48 }
 0xdde   : > { %v7030_v7 = vpop.f32.mrf.mxu0 }
 0xddf   : > { %v6007_v12 = vmul.f32 %v10988_v0, %v5990_v62  ;;  %v5989_v45 = vadd.f32 %v10983_v20, %v5965_v28  ;;  %v5613_v18 = vadd.f32 %v7030_v7, %v5216_v50  ;;  %v6044_v28 = vmul.f32 %v10986_v16, %v6026_v30 }
 0xde0   : > { %v5549_v32 = vpop.f32.mrf.mxu0  ;;  %v5231_v50 = vadd.f32 %v10956_v43, %v10950_v22 }
 0xde1   : > { %v6057_v31 = vadd.f32 %v6041_v6, %v6007_v12  ;;  %v6006_v53 = vmul.f32 %v10988_v0, %v5989_v45  ;;  %v5612_v27 = vadd.f32 %v5549_v32, %v5211_v39  ;;  %v6029_v39 = vld [vmem:[%s8084_s14 + $0x48] sm:$0xff] }
 0xde2   : > { %v7058_v58 = vpop.f32.mrf.mxu1  ;;  %v6047_v42 = vmul.f32 %v10986_v16, %v6029_v39 }
 0xde3   : > { %6073 = vst [vmem:[%s8086_s22 + $0x18] sm:$0xff] %v6057_v31  ;;  %v6056_v10 = vadd.f32 %v6040_v4, %v6006_v53  ;;  %v5968_v23 = vadd.f32 %v7058_v58, %v5613_v18  ;;  %v6028_v18 = vld [vmem:[%s8084_s14 + $0x40] sm:$0xff] }
 0xde4   : > { %v5904_v40 = vpop.f32.mrf.mxu1 }
 0xde5   : > { %6072 = vst [vmem:[%s8086_s22 + $0x10] sm:$0xff] %v6056_v10  ;;  %v5992_v34 = vadd.f32 %v10983_v20, %v5968_v23  ;;  %v5967_v11 = vadd.f32 %v5904_v40, %v5612_v27  ;;  %v5246_v10 = vadd.f32 %v10960_v59, %v10954_v56  ;;  %v6046_v40 = vmul.f32 %v10986_v16, %v6028_v18 }
 0xde6   : > { %v7033_v2 = vpop.f32.mrf.mxu0 }
 0xde7   : > { %v6009_v36 = vmul.f32 %v10988_v0, %v5992_v34  ;;  %v5991_v35 = vadd.f32 %v10983_v20, %v5967_v11  ;;  %v5615_v25 = vadd.f32 %v7033_v2, %v5226_v15  ;;  %v5241_v34 = vadd.f32 %v10964_v63, %v10958_v60 }
 0xde8   : > { %v5559_v55 = vpop.f32.mrf.mxu0 }
 0xde9   : > { %v6059_v5 = vadd.f32 %v6043_v51, %v6009_v36  ;;  %v6008_v49 = vmul.f32 %v10988_v0, %v5991_v35  ;;  %v5614_v46 = vadd.f32 %v5559_v55, %v5221_v37  ;;  %v6031_v36 = vld [vmem:[%s8084_s14 + $0x58] sm:$0xff]  ;;  %v6030_v55 = vld [vmem:[%s8084_s14 + $0x50] sm:$0xff] }
 0xdea   : > { %v7061_v17 = vpop.f32.mrf.mxu1  ;;  %v6048_v48 = vmul.f32 %v10986_v16, %v6030_v55 }
 0xdeb   : > { %6075 = vst [vmem:[%s8086_s22 + $0x28] sm:$0xff] %v6059_v5  ;;  %v6058_v29 = vadd.f32 %v6042_v54, %v6008_v49  ;;  %v5970_v38 = vadd.f32 %v7061_v17, %v5615_v25  ;;  %v6049_v5 = vmul.f32 %v10986_v16, %v6031_v36  ;;  %v5256_v49 = vadd.f32 %v10968_v1, %v10962_v52 }
 0xdec   : > { %v5914_v19 = vpop.f32.mrf.mxu1 }
 0xded   : > { %6074 = vst [vmem:[%s8086_s22 + $0x20] sm:$0xff] %v6058_v29  ;;  %v5994_v47 = vadd.f32 %v10983_v20, %v5970_v38  ;;  %v5969_v14 = vadd.f32 %v5914_v19, %v5614_v46  ;;  %v5251_v46 = vadd.f32 %v10972_v9, %v10966_v44 }
 0xdee   : > { %v7036_v57 = vpop.f32.mrf.mxu0 }
 0xdef   : > { %v6011_v62 = vmul.f32 %v10988_v0, %v5994_v47  ;;  %v5993_v6 = vadd.f32 %v10983_v20, %v5969_v14  ;;  %v5617_v4 = vadd.f32 %v7036_v57, %v5236_v21  ;;  %v6032_v21 = vld [vmem:[%s8084_s14 + $0x60] sm:$0xff] }
 0xdf0   : > { %v5569_v7 = vpop.f32.mrf.mxu0 }
 0xdf1   : > { %v6061_v12 = vadd.f32 %v6045_v61, %v6011_v62  ;;  %v6010_v45 = vmul.f32 %v10988_v0, %v5993_v6  ;;  %v5616_v3 = vadd.f32 %v5569_v7, %v5231_v50  ;;  %v6033_v61 = vld [vmem:[%s8084_s14 + $0x68] sm:$0xff] }
 0xdf2   : > { %v7064_v32 = vpop.f32.mrf.mxu1  ;;  %v6051_v6 = vmul.f32 %v10986_v16, %v6033_v61 }
 0xdf3   : > { %6077 = vst [vmem:[%s8086_s22 + $0x38] sm:$0xff] %v6061_v12  ;;  %v6060_v13 = vadd.f32 %v6044_v28, %v6010_v45  ;;  %v5972_v31 = vadd.f32 %v7064_v32, %v5617_v4  ;;  %v5266_v28 = vadd.f32 %v10976_v8, %v10970_v24  ;;  %v6050_v12 = vmul.f32 %v10986_v16, %v6032_v21 }
 0xdf4   : > { %v5924_v53 = vpop.f32.mrf.mxu1  ;;  %v5261_v4 = vadd.f32 %v10978_v26, %v10974_v33 }
 0xdf5   : > { %6076 = vst [vmem:[%s8086_s22 + $0x30] sm:$0xff] %v6060_v13  ;;  %v5996_v58 = vadd.f32 %v10983_v20, %v5972_v31  ;;  %v5971_v22 = vadd.f32 %v5924_v53, %v5616_v3  ;;  %v6035_v31 = vld [vmem:[%s8084_s14 + $0x78] sm:$0xff] }
 0xdf6   : > { %v7039_v43 = vpop.f32.mrf.mxu0 }
 0xdf7   : > { %v6013_v27 = vmul.f32 %v10988_v0, %v5996_v58  ;;  %v5995_v23 = vadd.f32 %v10983_v20, %v5971_v22  ;;  %v5619_v2 = vadd.f32 %v7039_v43, %v5246_v10  ;;  %v6034_v58 = vld [vmem:[%s8084_s14 + $0x70] sm:$0xff]  ;;  %v6053_v22 = vmul.f32 %v10986_v16, %v6035_v31 }
 0xdf8   : > { %v5579_v41 = vpop.f32.mrf.mxu0  ;;  %v6052_v10 = vmul.f32 %v10986_v16, %v6034_v58 }
 0xdf9   : > { %v6063_v51 = vadd.f32 %v6047_v42, %v6013_v27  ;;  %v6012_v11 = vmul.f32 %v10988_v0, %v5995_v23  ;;  %v5618_v59 = vadd.f32 %v5579_v41, %v5241_v34 }
 0xdfa   : > { %v7067_v15 = vpop.f32.mrf.mxu1 }
 0xdfb   : > { %6079 = vst [vmem:[%s8086_s22 + $0x48] sm:$0xff] %v6063_v51  ;;  %v6062_v56 = vadd.f32 %v6046_v40, %v6012_v11  ;;  %v5974_v35 = vadd.f32 %v7067_v15, %v5619_v2 }
 0xdfc   : > { %v5934_v54 = vpop.f32.mrf.mxu1 }
 0xdfd   : > { %6078 = vst [vmem:[%s8086_s22 + $0x40] sm:$0xff] %v6062_v56  ;;  %v5998_v37 = vadd.f32 %v10983_v20, %v5974_v35  ;;  %v5973_v60 = vadd.f32 %v5934_v54, %v5618_v59 }
 0xdfe   : > { %v7042_v63 = vpop.f32.mrf.mxu0 }
 0xdff   : > { %v6015_v25 = vmul.f32 %v10988_v0, %v5998_v37  ;;  %v5997_v17 = vadd.f32 %v10983_v20, %v5973_v60  ;;  %v5621_v30 = vadd.f32 %v7042_v63, %v5256_v49 }
 0xe00   : > { %v5589_v29 = vpop.f32.mrf.mxu0 }
 0xe01   : > { %v6065_v38 = vadd.f32 %v6049_v5, %v6015_v25  ;;  %v6014_v19 = vmul.f32 %v10988_v0, %v5997_v17  ;;  %v5620_v1 = vadd.f32 %v5589_v29, %v5251_v46 }
 0xe02   : > { %v7070_v47 = vpop.f32.mrf.mxu1 }
 0xe03   : > { %6081 = vst [vmem:[%s8086_s22 + $0x58] sm:$0xff] %v6065_v38  ;;  %v6064_v52 = vadd.f32 %v6048_v48, %v6014_v19  ;;  %v5976_v14 = vadd.f32 %v7070_v47, %v5621_v30 }
 0xe04   : > { %v5944_v57 = vpop.f32.mrf.mxu1 }
 0xe05   : > { %6080 = vst [vmem:[%s8086_s22 + $0x50] sm:$0xff] %v6064_v52  ;;  %v6000_v62 = vadd.f32 %v10983_v20, %v5976_v14  ;;  %v5975_v44 = vadd.f32 %v5944_v57, %v5620_v1 }
 0xe06   : > { %v7045_v9 = vpop.f32.mrf.mxu0 }
 0xe07   : > { %v6017_v7 = vmul.f32 %v10988_v0, %v6000_v62  ;;  %v5999_v50 = vadd.f32 %v10983_v20, %v5975_v44  ;;  %v5623_v13 = vadd.f32 %v7045_v9, %v5266_v28 }
 0xe08   : > { %v5599_v45 = vpop.f32.mrf.mxu0 }
 0xe09   : > { %v6067_v32 = vadd.f32 %v6051_v6, %v6017_v7  ;;  %v6016_v39 = vmul.f32 %v10988_v0, %v5999_v50  ;;  %v5622_v8 = vadd.f32 %v5599_v45, %v5261_v4 }
 0xe0a   : > { %v7073_v3 = vpop.f32.mrf.mxu1 }
 0xe0b   : > { %6083 = vst [vmem:[%s8086_s22 + $0x68] sm:$0xff] %v6067_v32  ;;  %v6066_v24 = vadd.f32 %v6050_v12, %v6016_v39  ;;  %v5978_v53 = vadd.f32 %v7073_v3, %v5623_v13 }
 0xe0c   : > { %v5954_v18 = vpop.f32.mrf.mxu1 }
 0xe0d   : > { %6082 = vst [vmem:[%s8086_s22 + $0x60] sm:$0xff] %v6066_v24  ;;  %v6002_v42 = vadd.f32 %v10983_v20, %v5978_v53  ;;  %v5977_v33 = vadd.f32 %v5954_v18, %v5622_v8 }
 0xe0f   : > { %v6019_v26 = vmul.f32 %v10988_v0, %v6002_v42  ;;  %v6001_v43 = vadd.f32 %v10983_v20, %v5977_v33 }
 0xe11   : > { %v6069_v27 = vadd.f32 %v6053_v22, %v6019_v26  ;;  %v6018_v23 = vmul.f32 %v10988_v0, %v6001_v43 }
 0xe13   : > { %6085 = vst [vmem:[%s8086_s22 + $0x78] sm:$0xff] %v6069_v27  ;;  %v6068_v40 = vadd.f32 %v6052_v10, %v6018_v23 }
 0xe15   : > { %6084 = vst [vmem:[%s8086_s22 + $0x70] sm:$0xff] %v6068_v40 }
 0xe16 PF: > { %s11687_s14 = sld [smem:[#allocation18_spill]]  ;;  %s6361_s6 = sshll.u32 %s7835_s10, 11 }
 0xe17   : > { %s11688_s30 = sld [smem:[#allocation137_spill]]  ;;  %s6100_s19 = sshll.u32 %s8086_s22, 4  ;;  %s11100_s19 = int_to_ptr.vmem [resolvable:$true] %s6100_s19 }
 0xe18   : > { %s11104_s28 = scalar_lea.sflag [#allocation9], %s446_s2  ;;  %s7723_s17 = scalar_lea.vmem %s11100_s19, 2048 }
 0xe19   : > { %p7724_p13 = scmp.ne.s32.totalorder %s11100_s19, %s7723_s17  ;;  %s7863_s10 = smov [#allocation12]  }
 0xe1a   : > { %s7727_s25 = sshll.u32 %s7863_s10, 4  ;;  %s7728_s25 = int_to_ptr.vmem [resolvable:$false] %s7727_s25 }
 0xe1b   : > { %s7729_s12 = scalar_lea.vmem %s7728_s25, 4096  ;;  %p7730_p8 = scmp.lt.s32.totalorder %s11100_s19, %s7728_s25 }
 0xe1c   : > { %p11689_p4 = scmp.ne.s32.totalorder %s11687_s14, 0  ;;  %p7731_p7 = scmp.lt.s32.totalorder %s7729_s12, %s7723_s17 }
 0xe1d   : > { %s11097_s3 = scalar_lea.hbm %s11688_s30, %s6361_s6 }
 0xe1e   : > { %p7725_p5 = pnand %p7724_p13, %p11689_p4  ;;  %p7732_p9 = por %p7731_p7, %p7730_p8 }
 0xe20   : > { %p7726_p6 = pneg %p7725_p5 }
 0xe22   : > { %p7733_p10 = pnand %p7732_p9, %p7726_p6 }
 0xe24   : > { %7736 = shalt.err (!%p7733_p10)
}
 0xe25   : > { %s7737_s2 = scalar_lea.hbm %s11097_s3, 2048  ;;  %s7741_s15 = scalar_lea.hbm %s11688_s30, 4096 }
 0xe26   : > { %p7738_p12 = scmp.ne.s32.totalorder %s11097_s3, %s7737_s2  ;;  %p7742_p11 = scmp.lt.s32.totalorder %s11097_s3, %s11688_s30 }
 0xe27   : > { %p7743_p3 = scmp.lt.s32.totalorder %s7741_s15, %s7737_s2 }
 0xe28   : > { %p7739_p0 = pnand %p7738_p12, %p11689_p4 }
 0xe29   : > { %p7744_p1 = por %p7743_p3, %p7742_p11 }
 0xe2a   : > { %p7740_p2 = pneg %p7739_p0 }
 0xe2c   : > { %p7745_p13 = pnand %p7744_p1, %p7740_p2 }
 0xe2e   : > { %7748 = shalt.err (!%p7745_p13)
}
 0xe2f   : > { %s7864_s8 = smov 128   ;;  %s7865_s13 = smov 8  }
 0xe30   : > { %7128 = dma.vmem_to_hbm [thread:$0]  (%p11689_p4), %s11100_s19, 2048, %s11097_s3, %s11104_s28, %s7864_s8, %s7864_s8, %s7865_s13  }
 0xe31 PF: > { %s11690_s17 = sld [smem:[#allocation17_spill]] }
 0xe32   : > { %s11691_s10 = sld [smem:[#allocation16_spill]] }
 0xe33   : > { %s11692_s25 = sld [smem:[#allocation19_spill]] }
 0xe37   : > { %p7145_p5 = scmp.ge.s32.totalorder %s11690_s17, 2 }
 0xe38   : > { %s6115_s12 = sand.u32 1, %s11691_s10  }
 0xe39   : > { %p11693_p6 = scmp.ne.s32.totalorder %s11692_s25, 0  ;;  %s6116_s2 = scalar_lea.sflag [#allocation9], %s6115_s12 }
 0xe3b   : > { %p7139_p8 = pnand %p7145_p5, %p11693_p6 }
 0xe3d   : > { %p7140_p7 = pneg %p7139_p8 }
 0xe3f   : > { %7802 = dma.done.wait (%p7140_p7), %s6116_s2, 2048  }
 0xe40   : > { %7804 = vsyncadd (%p7140_p7), %s6116_s2, 4294965248  ;;  %s29_s28 = sadd.s32 1, %s11690_s17   ;;  %s11694_s14 = sld [smem:[#allocation20_spill]] }
 0xe41   : > { %p26_p9 = scmp.ge.s32.totalorder %s29_s28, 8   ;;  %s11695_s3 = sld [smem:[#allocation21_spill]] }
 0xe42   : > { %s11696_s19 = smov %s7811_s20  ;;  %s11697_s20 = smov %s7815_s21 }
 0xe43   : > { %s11698_s21 = smov %s8049_s9  ;;  %s11699_s22 = smov %s7823_s23 }
 0xe44   : > { %s11700_s23 = smov %s7827_s24  ;;  %s11701_s24 = smov %s8040_s16 }
 0xe45   : > { %s11702_s25 = smov %s7839_s26  ;;  %s11703_s10 = smov %s7843_s27 }
 0xe46   : > { %s11704_s26 = smov %s11694_s14  ;;  %28 = sbr.rel (!%p26_p9) target bundleno = 19 (0x13), region = 133 }
 0xe47   : > { %s11705_s27 = smov %s11695_s3 }
 0xe4b   :  { %6121 = vsyncpa [#allocation8], 1 }
 0xe4c   :  { %6123 = vsyncpa [#allocation8 + $0x1], 1 }
 0xe4d   :  { %6124 = vsyncpa [#allocation11], 1 }
 0xe4e   :  { %6125 = vsyncpa [#allocation9], 1 }
 0xe4f   :  { %6127 = vsyncpa [#allocation9 + $0x1], 1 }

</bundles_post_ra>
